<compile_context>
chip_gen: v7x
topology: tpu7x:2x2x1
jax: 0.10.0
libtpu: 0.0.40
codegen_flags: <defaults>
</compile_context>

<pallas_src>
import functools
import math

import jax
import jax.numpy as jnp
from jax.experimental import pallas as pl
from jax.experimental.pallas import tpu as pltpu


# ---------------------------------------------------------------------------
# Pallas kernel: out = relu(x @ w + b),  bf16 operands, f32 accumulation.
# ---------------------------------------------------------------------------
def _matmul_bias_relu_kernel(x_ref, w_ref, b_ref, o_ref):
    y = jnp.dot(x_ref[...], w_ref[...], preferred_element_type=jnp.float32)
    y = jnp.maximum(y + b_ref[...], 0.0)
    o_ref[...] = y.astype(o_ref.dtype)


def matmul_bias_relu(x, w, b2d, out_dtype=jnp.bfloat16):
    """x: (M, K) bf16, w: (K, N) bf16, b2d: (1, N) f32  ->  (M, N) out_dtype.

    Exactly 2 grid steps when M divides cleanly: low per-step overhead on
    v5e/v6e while both v7x TensorCores still get one tile each.
    """
    M, K = x.shape
    K2, N = w.shape
    assert K == K2, (K, K2)

    if M % 16 == 0:
        TM = M // 2
        Mp = M
    else:                                  # fallback (not hit in this config)
        TM = -(-M // 8) * 8
        Mp = TM
        x = jnp.pad(x, ((0, Mp - M), (0, 0)))

    out = pl.pallas_call(
        _matmul_bias_relu_kernel,
        out_shape=jax.ShapeDtypeStruct((Mp, N), out_dtype),
        grid=(Mp // TM,),
        in_specs=[
            pl.BlockSpec((TM, K), lambda i: (i, 0)),
            pl.BlockSpec((K, N), lambda i: (0, 0)),
            pl.BlockSpec((1, N), lambda i: (0, 0)),
        ],
        out_specs=pl.BlockSpec((TM, N), lambda i: (i, 0)),
        compiler_params=pltpu.CompilerParams(
            dimension_semantics=("parallel",)),
    )(x, w, b2d)
    return out[:M] if Mp != M else out


# ---------------------------------------------------------------------------
# Fused head kernel: action one-hot embedding + tanh, state projection + tanh,
# fc1+ReLU, fc2+ReLU, fc3 (VPU reduce) + tanh/sigmoid.  The state/action
# concat is folded away by splitting fc1's weight into two halves.
# ---------------------------------------------------------------------------
def _head_kernel(x_ref, a_ref, emb_ref, lw_ref, lb_ref, w1s_ref, w1a_ref,
                 b1_ref, w2_ref, b2_ref, w3_ref, b3_ref, o_ref, *, final_act):
    f32 = jnp.float32
    bf16 = jnp.bfloat16

    # state projection: Linear(3136, n_embd) + Tanh  (bf16 operands, f32 acc)
    s = jnp.tanh(jnp.dot(x_ref[...], lw_ref[...], preferred_element_type=f32)
                 + lb_ref[...])                                   # (M, n) f32

    # action Embedding + Tanh as an exact one-hot matmul (folds the gather)
    a = a_ref[...]                                                # (M, 1) i32
    classes = jax.lax.broadcasted_iota(jnp.int32, (1, emb_ref.shape[0]), 1)
    onehot = (a == classes).astype(f32)                           # (M, A_pad)
    ae = jnp.tanh(jnp.dot(onehot, emb_ref[...],
                          preferred_element_type=f32))            # (M, n) f32

    # fc1 + ReLU (concat folded into split weights)
    h = (jnp.dot(s.astype(bf16), w1s_ref[...], preferred_element_type=f32)
         + jnp.dot(ae.astype(bf16), w1a_ref[...], preferred_element_type=f32)
         + b1_ref[...])
    h = jnp.maximum(h, 0.0)                                       # (M, 4n)

    # fc2 + ReLU
    h = jnp.maximum(
        jnp.dot(h.astype(bf16), w2_ref[...], preferred_element_type=f32)
        + b2_ref[...], 0.0)                                       # (M, 16n)

    # fc3: single output column -> VPU multiply + lane reduction (no MXU)
    y = jnp.sum(h * w3_ref[...], axis=-1, keepdims=True) + b3_ref[...]
    if final_act == "tanh":
        y = jnp.tanh(y)
    else:
        y = jax.nn.sigmoid(y)
    o_ref[...] = y                                                # (M, 1) f32


def fused_head(x_flat, actions_i32, p, final_act):
    M = x_flat.shape[0]
    Mp = -(-M // 8) * 8
    if Mp != M:
        x_flat = jnp.pad(x_flat, ((0, Mp - M), (0, 0)))
        actions_i32 = jnp.pad(actions_i32, ((0, Mp - M), (0, 0)))
    out = pl.pallas_call(
        functools.partial(_head_kernel, final_act=final_act),
        out_shape=jax.ShapeDtypeStruct((Mp, 1), jnp.float32),
    )(x_flat, actions_i32,
      p["emb_w"], p["lin_w"], p["lin_b"],
      p["fc1_w_s"], p["fc1_w_a"], p["fc1_b"],
      p["fc2_w"], p["fc2_b"],
      p["fc3_w_row"], p["fc3_b"])
    return out[:M] if Mp != M else out


# ---------------------------------------------------------------------------
# im2col glue (plain JAX, NHWC): feature ordering (kh, kw, c) so the matmul
# output is already NHWC -> no post-conv transpose.
# TODO(synk): still materialized by XLA in HBM (see header note).
# ---------------------------------------------------------------------------
def im2col_nhwc(x, kh, kw, stride):
    n, h, w, c = x.shape
    oh = (h - kh) // stride + 1
    ow = (w - kw) // stride + 1
    cols = []
    for i in range(kh):
        for j in range(kw):
            cols.append(
                x[:, i:i + stride * oh:stride, j:j + stride * ow:stride, :])
    p = jnp.stack(cols, axis=3)                    # (n, oh, ow, kh*kw, c)
    p = p.reshape(n * oh * ow, kh * kw * c)
    return p, oh, ow


def conv2d_relu(x_nhwc, w2d, b2d, kh, kw, stride):
    """Conv2d (VALID) + ReLU via im2col + Pallas matmul, NHWC bf16 in/out."""
    n = x_nhwc.shape[0]
    patches, oh, ow = im2col_nhwc(x_nhwc, kh, kw, stride)
    y = matmul_bias_relu(patches, w2d, b2d, out_dtype=jnp.bfloat16)
    return y.reshape(n, oh, ow, w2d.shape[1])


# ---------------------------------------------------------------------------
# Parameter construction (PyTorch layouts) + one-time kernel-layout prep
# ---------------------------------------------------------------------------
def init_params(key, n_embd, action_dim):
    keys = jax.random.split(key, 16)

    def xavier_uniform(k, shape, gain):
        cout, cin, kh, kw = shape
        fan_in = cin * kh * kw
        fan_out = cout * kh * kw
        bound = gain * math.sqrt(6.0 / (fan_in + fan_out))
        return jax.random.uniform(k, shape, jnp.float32, -bound, bound)

    def normal02(k, shape):
        return 0.02 * jax.random.normal(k, shape, jnp.float32)

    gain = math.sqrt(2.0)
    p = {}
    # state encoder convs (PyTorch Conv2d weight layout: (out, in, kh, kw))
    p["c1_w"] = xavier_uniform(keys[0], (32, 4, 8, 8), gain)
    p["c1_b"] = jnp.zeros((32,), jnp.float32)
    p["c2_w"] = xavier_uniform(keys[1], (64, 32, 4, 4), gain)
    p["c2_b"] = jnp.zeros((64,), jnp.float32)
    p["c3_w"] = xavier_uniform(keys[2], (64, 64, 3, 3), gain)
    p["c3_b"] = jnp.zeros((64,), jnp.float32)
    # Linear(3136, n_embd)  (PyTorch Linear weight layout: (out, in))
    p["lin_w"] = normal02(keys[3], (n_embd, 3136))
    p["lin_b"] = jnp.zeros((n_embd,), jnp.float32)
    # Embedding(action_dim, n_embd)
    p["emb_w"] = normal02(keys[4], (action_dim, n_embd))
    # fc1 / fc2 / fc3
    p["fc1_w"] = normal02(keys[5], (4 * n_embd, 2 * n_embd))
    p["fc1_b"] = jnp.zeros((4 * n_embd,), jnp.float32)
    p["fc2_w"] = normal02(keys[6], (16 * n_embd, 4 * n_embd))
    p["fc2_b"] = jnp.zeros((16 * n_embd,), jnp.float32)
    p["fc3_w"] = normal02(keys[7], (1, 16 * n_embd))
    p["fc3_b"] = jnp.zeros((1,), jnp.float32)
    return p


def prepare_params(p, n_embd, action_dim):
    """One-time conversion from PyTorch layouts to kernel layouts:
       * conv weights -> (kh*kw*cin, cout) bf16 (NHWC im2col feature order)
       * lin_w rows permuted from NCHW-flatten to NHWC-flatten order, bf16
       * Linear weights pre-transposed to (K, N) bf16; fc1 split state/action
       * fc3 kept as a (1, 16n) f32 row (VPU reduce path), biases f32 (1, N)
       * embedding table zero-padded to a multiple of 8 rows (one-hot matmul)
    """
    def conv_w(w):
        cout, cin, kh, kw = w.shape
        return (w.transpose(2, 3, 1, 0)
                 .reshape(kh * kw * cin, cout).astype(jnp.bfloat16))

    q = {}
    q["c1_w"] = conv_w(p["c1_w"]); q["c1_b"] = p["c1_b"].reshape(1, -1)
    q["c2_w"] = conv_w(p["c2_w"]); q["c2_b"] = p["c2_b"].reshape(1, -1)
    q["c3_w"] = conv_w(p["c3_w"]); q["c3_b"] = p["c3_b"].reshape(1, -1)

    # PyTorch Flatten is over (c=64, h=7, w=7); our activations flatten as
    # (h, w, c).  Permute lin_w's input rows accordingly (exact equivalence).
    q["lin_w"] = (p["lin_w"].reshape(n_embd, 64, 7, 7)
                  .transpose(2, 3, 1, 0).reshape(3136, n_embd)
                  .astype(jnp.bfloat16))
    q["lin_b"] = p["lin_b"].reshape(1, -1)

    a_pad = max(8, -(-action_dim // 8) * 8)
    emb = jnp.zeros((a_pad, n_embd), jnp.float32)
    q["emb_w"] = emb.at[:action_dim].set(p["emb_w"])

    w1 = p["fc1_w"].T                                  # (2n, 4n)
    q["fc1_w_s"] = w1[:n_embd].astype(jnp.bfloat16)    # state half
    q["fc1_w_a"] = w1[n_embd:].astype(jnp.bfloat16)    # action half
    q["fc1_b"] = p["fc1_b"].reshape(1, -1)
    q["fc2_w"] = p["fc2_w"].T.astype(jnp.bfloat16)     # (4n, 16n)
    q["fc2_b"] = p["fc2_b"].reshape(1, -1)
    q["fc3_w_row"] = p["fc3_w"].astype(jnp.float32)    # (1, 16n) row vector
    q["fc3_b"] = p["fc3_b"].reshape(1, 1)
    return q


# ---------------------------------------------------------------------------
# Forward pass (mirrors ContinuousRedistributeNetwork.forward)
# ---------------------------------------------------------------------------
def forward(params, states, actions, n_embd, redistribute_activate_func="tanh"):
    B, T = states.shape[0], states.shape[1]
    # cast to bf16 BEFORE the layout change (halves the transpose HBM traffic)
    x = states.reshape(-1, 4, 84, 84).astype(jnp.bfloat16)
    x = jnp.transpose(x, (0, 2, 3, 1))                            # NHWC bf16

    # state_encoder conv stack (Pallas matmuls, bf16 operands, f32 accumulate)
    x = conv2d_relu(x, params["c1_w"], params["c1_b"], 8, 8, 4)   # (N,20,20,32)
    x = conv2d_relu(x, params["c2_w"], params["c2_b"], 4, 4, 2)   # (N, 9, 9,64)
    x = conv2d_relu(x, params["c3_w"], params["c3_b"], 3, 3, 1)   # (N, 7, 7,64)
    x = x.reshape(x.shape[0], -1)                                 # (N, 3136)

    a = actions.astype(jnp.int32).reshape(B * T, 1)
    final_act = "tanh" if redistribute_activate_func == "tanh" else "sigmoid"
    out = fused_head(x, a, params, final_act)                     # (B*T, 1)
    return out.reshape(B, T, 1)


if __name__ == "__main__":
    # Small config consistent with the module: n_embd=32, action_dim=6,
    # batch=2, seq=8; spatial is fixed at 84x84 by the conv stack (3136=64*7*7).
    n_embd = 32
    action_dim = 6
    B, T = 2, 8

    key = jax.random.PRNGKey(0)
    k_param, k_s, k_a = jax.random.split(key, 3)

    params = prepare_params(init_params(k_param, n_embd, action_dim),
                            n_embd, action_dim)
    states = jax.random.normal(k_s, (B, T, 4, 84, 84), jnp.float32)
    actions = jax.random.randint(k_a, (B, T, 1), 0, action_dim, jnp.int32)

    fwd = jax.jit(functools.partial(forward, n_embd=n_embd,
                                    redistribute_activate_func="tanh"))
    out = fwd(params, states, actions)
    out = jax.block_until_ready(out)

    assert out.shape == (B, T, 1), out.shape
    assert bool(jnp.all(jnp.isfinite(out)))
    assert bool(jnp.all(jnp.abs(out) <= 1.0))  # tanh range
    print("KERNEL_OK")
</pallas_src>

<mosaic_0001>
module attributes {stable_mosaic.version = 11 : i64} {
  func.func @_matmul_bias_relu_kernel(%arg0: i32, %arg1: memref<3200x256xbf16, #tpu.memory_space<vmem>>, %arg2: memref<256x32xbf16, #tpu.memory_space<vmem>>, %arg3: memref<1x32xf32, #tpu.memory_space<vmem>>, %arg4: memref<3200x32xbf16, #tpu.memory_space<vmem>>) attributes {dimension_semantics = [#tpu.dimension_semantics<parallel>], iteration_bounds = array<i64: 2>, scalar_prefetch = 0 : i64, scratch_operands = 0 : i64, tpu.core_type = #tpu.core_type<tc>, window_params = [{transform_indices = @transform_0, window_bounds = array<i64: 3200, 256>}, {pipeline_mode = #tpu.pipeline_mode<synchronous>, transform_indices = @transform_1, window_bounds = array<i64: 256, 32>}, {pipeline_mode = #tpu.pipeline_mode<synchronous>, transform_indices = @transform_2, window_bounds = array<i64: 1, 32>}, {transform_indices = @transform_3, window_bounds = array<i64: 3200, 32>}]} {
    %c0 = arith.constant 0 : index
    %c0_0 = arith.constant 0 : index
    %0 = vector.load %arg1[%c0, %c0_0] : memref<3200x256xbf16, #tpu.memory_space<vmem>>, vector<3200x256xbf16>
    %c0_1 = arith.constant 0 : index
    %c0_2 = arith.constant 0 : index
    %1 = vector.load %arg2[%c0_1, %c0_2] : memref<256x32xbf16, #tpu.memory_space<vmem>>, vector<256x32xbf16>
    %cst = arith.constant dense<0.000000e+00> : vector<3200x32xf32>
    %2 = tpu.matmul %0, %1, %cst {dimension_numbers = #tpu.dot_dimension_numbers<[1], [0], [0], [1], [0, 0, 1, 1], [], []>} : vector<3200x256xbf16>, vector<256x32xbf16>, vector<3200x32xf32> -> vector<3200x32xf32>
    %c0_3 = arith.constant 0 : index
    %c0_4 = arith.constant 0 : index
    %3 = vector.load %arg3[%c0_3, %c0_4] : memref<1x32xf32, #tpu.memory_space<vmem>>, vector<1x32xf32>
    %4 = vector.broadcast %3 : vector<1x32xf32> to vector<3200x32xf32>
    %5 = arith.addf %2, %4 : vector<3200x32xf32>
    %cst_5 = arith.constant 0.000000e+00 : f32
    %6 = vector.broadcast %cst_5 : f32 to vector<3200x32xf32>
    %7 = arith.maximumf %5, %6 : vector<3200x32xf32>
    %8 = arith.truncf %7 : vector<3200x32xf32> to vector<3200x32xbf16>
    %c0_6 = arith.constant 0 : index
    %c0_7 = arith.constant 0 : index
    %9 = vector.load %arg4[%c0_6, %c0_7] : memref<3200x32xbf16, #tpu.memory_space<vmem>>, vector<3200x32xbf16>
    tpu.vector_store %arg4[%c0_6, %c0_7], %8 {strides = array<i32>} : memref<3200x32xbf16, #tpu.memory_space<vmem>>, vector<3200x32xbf16>,
    return
  }
  func.func @transform_0(%arg0: i32) -> (i32, i32) {
    %c0_i32 = arith.constant 0 : i32
    %c0_i32_0 = arith.constant 0 : i32
    return %arg0, %c0_i32 : i32, i32
  }
  func.func @transform_1(%arg0: i32) -> (i32, i32) {
    %c0_i32 = arith.constant 0 : i32
    %c0_i32_0 = arith.constant 0 : i32
    %c0_i32_1 = arith.constant 0 : i32
    return %c0_i32, %c0_i32_0 : i32, i32
  }
  func.func @transform_2(%arg0: i32) -> (i32, i32) {
    %c0_i32 = arith.constant 0 : i32
    %c0_i32_0 = arith.constant 0 : i32
    %c0_i32_1 = arith.constant 0 : i32
    return %c0_i32, %c0_i32_0 : i32, i32
  }
  func.func @transform_3(%arg0: i32) -> (i32, i32) {
    %c0_i32 = arith.constant 0 : i32
    %c0_i32_0 = arith.constant 0 : i32
    return %arg0, %c0_i32 : i32, i32
  }
}

module attributes {stable_mosaic.version = 11 : i64} {
  func.func @_matmul_bias_relu_kernel(%arg0: i32, %arg1: memref<648x512xbf16, #tpu.memory_space<vmem>>, %arg2: memref<512x64xbf16, #tpu.memory_space<vmem>>, %arg3: memref<1x64xf32, #tpu.memory_space<vmem>>, %arg4: memref<648x64xbf16, #tpu.memory_space<vmem>>) attributes {dimension_semantics = [#tpu.dimension_semantics<parallel>], iteration_bounds = array<i64: 2>, scalar_prefetch = 0 : i64, scratch_operands = 0 : i64, tpu.core_type = #tpu.core_type<tc>, window_params = [{transform_indices = @transform_0, window_bounds = array<i64: 648, 512>}, {pipeline_mode = #tpu.pipeline_mode<synchronous>, transform_indices = @transform_1, window_bounds = array<i64: 512, 64>}, {pipeline_mode = #tpu.pipeline_mode<synchronous>, transform_indices = @transform_2, window_bounds = array<i64: 1, 64>}, {transform_indices = @transform_3, window_bounds = array<i64: 648, 64>}]} {
    %c0 = arith.constant 0 : index
    %c0_0 = arith.constant 0 : index
    %0 = vector.load %arg1[%c0, %c0_0] : memref<648x512xbf16, #tpu.memory_space<vmem>>, vector<648x512xbf16>
    %c0_1 = arith.constant 0 : index
    %c0_2 = arith.constant 0 : index
    %1 = vector.load %arg2[%c0_1, %c0_2] : memref<512x64xbf16, #tpu.memory_space<vmem>>, vector<512x64xbf16>
    %cst = arith.constant dense<0.000000e+00> : vector<648x64xf32>
    %2 = tpu.matmul %0, %1, %cst {dimension_numbers = #tpu.dot_dimension_numbers<[1], [0], [0], [1], [0, 0, 1, 1], [], []>} : vector<648x512xbf16>, vector<512x64xbf16>, vector<648x64xf32> -> vector<648x64xf32>
    %c0_3 = arith.constant 0 : index
    %c0_4 = arith.constant 0 : index
    %3 = vector.load %arg3[%c0_3, %c0_4] : memref<1x64xf32, #tpu.memory_space<vmem>>, vector<1x64xf32>
    %4 = vector.broadcast %3 : vector<1x64xf32> to vector<648x64xf32>
    %5 = arith.addf %2, %4 : vector<648x64xf32>
    %cst_5 = arith.constant 0.000000e+00 : f32
    %6 = vector.broadcast %cst_5 : f32 to vector<648x64xf32>
    %7 = arith.maximumf %5, %6 : vector<648x64xf32>
    %8 = arith.truncf %7 : vector<648x64xf32> to vector<648x64xbf16>
    %c0_6 = arith.constant 0 : index
    %c0_7 = arith.constant 0 : index
    %9 = vector.load %arg4[%c0_6, %c0_7] : memref<648x64xbf16, #tpu.memory_space<vmem>>, vector<648x64xbf16>
    tpu.vector_store %arg4[%c0_6, %c0_7], %8 {strides = array<i32>} : memref<648x64xbf16, #tpu.memory_space<vmem>>, vector<648x64xbf16>,
    return
  }
  func.func @transform_0(%arg0: i32) -> (i32, i32) {
    %c0_i32 = arith.constant 0 : i32
    %c0_i32_0 = arith.constant 0 : i32
    return %arg0, %c0_i32 : i32, i32
  }
  func.func @transform_1(%arg0: i32) -> (i32, i32) {
    %c0_i32 = arith.constant 0 : i32
    %c0_i32_0 = arith.constant 0 : i32
    %c0_i32_1 = arith.constant 0 : i32
    return %c0_i32, %c0_i32_0 : i32, i32
  }
  func.func @transform_2(%arg0: i32) -> (i32, i32) {
    %c0_i32 = arith.constant 0 : i32
    %c0_i32_0 = arith.constant 0 : i32
    %c0_i32_1 = arith.constant 0 : i32
    return %c0_i32, %c0_i32_0 : i32, i32
  }
  func.func @transform_3(%arg0: i32) -> (i32, i32) {
    %c0_i32 = arith.constant 0 : i32
    %c0_i32_0 = arith.constant 0 : i32
    return %arg0, %c0_i32 : i32, i32
  }
}

module attributes {stable_mosaic.version = 11 : i64} {
  func.func @_matmul_bias_relu_kernel(%arg0: i32, %arg1: memref<392x576xbf16, #tpu.memory_space<vmem>>, %arg2: memref<576x64xbf16, #tpu.memory_space<vmem>>, %arg3: memref<1x64xf32, #tpu.memory_space<vmem>>, %arg4: memref<392x64xbf16, #tpu.memory_space<vmem>>) attributes {dimension_semantics = [#tpu.dimension_semantics<parallel>], iteration_bounds = array<i64: 2>, scalar_prefetch = 0 : i64, scratch_operands = 0 : i64, tpu.core_type = #tpu.core_type<tc>, window_params = [{transform_indices = @transform_0, window_bounds = array<i64: 392, 576>}, {pipeline_mode = #tpu.pipeline_mode<synchronous>, transform_indices = @transform_1, window_bounds = array<i64: 576, 64>}, {pipeline_mode = #tpu.pipeline_mode<synchronous>, transform_indices = @transform_2, window_bounds = array<i64: 1, 64>}, {transform_indices = @transform_3, window_bounds = array<i64: 392, 64>}]} {
    %c0 = arith.constant 0 : index
    %c0_0 = arith.constant 0 : index
    %0 = vector.load %arg1[%c0, %c0_0] : memref<392x576xbf16, #tpu.memory_space<vmem>>, vector<392x576xbf16>
    %c0_1 = arith.constant 0 : index
    %c0_2 = arith.constant 0 : index
    %1 = vector.load %arg2[%c0_1, %c0_2] : memref<576x64xbf16, #tpu.memory_space<vmem>>, vector<576x64xbf16>
    %cst = arith.constant dense<0.000000e+00> : vector<392x64xf32>
    %2 = tpu.matmul %0, %1, %cst {dimension_numbers = #tpu.dot_dimension_numbers<[1], [0], [0], [1], [0, 0, 1, 1], [], []>} : vector<392x576xbf16>, vector<576x64xbf16>, vector<392x64xf32> -> vector<392x64xf32>
    %c0_3 = arith.constant 0 : index
    %c0_4 = arith.constant 0 : index
    %3 = vector.load %arg3[%c0_3, %c0_4] : memref<1x64xf32, #tpu.memory_space<vmem>>, vector<1x64xf32>
    %4 = vector.broadcast %3 : vector<1x64xf32> to vector<392x64xf32>
    %5 = arith.addf %2, %4 : vector<392x64xf32>
    %cst_5 = arith.constant 0.000000e+00 : f32
    %6 = vector.broadcast %cst_5 : f32 to vector<392x64xf32>
    %7 = arith.maximumf %5, %6 : vector<392x64xf32>
    %8 = arith.truncf %7 : vector<392x64xf32> to vector<392x64xbf16>
    %c0_6 = arith.constant 0 : index
    %c0_7 = arith.constant 0 : index
    %9 = vector.load %arg4[%c0_6, %c0_7] : memref<392x64xbf16, #tpu.memory_space<vmem>>, vector<392x64xbf16>
    tpu.vector_store %arg4[%c0_6, %c0_7], %8 {strides = array<i32>} : memref<392x64xbf16, #tpu.memory_space<vmem>>, vector<392x64xbf16>,
    return
  }
  func.func @transform_0(%arg0: i32) -> (i32, i32) {
    %c0_i32 = arith.constant 0 : i32
    %c0_i32_0 = arith.constant 0 : i32
    return %arg0, %c0_i32 : i32, i32
  }
  func.func @transform_1(%arg0: i32) -> (i32, i32) {
    %c0_i32 = arith.constant 0 : i32
    %c0_i32_0 = arith.constant 0 : i32
    %c0_i32_1 = arith.constant 0 : i32
    return %c0_i32, %c0_i32_0 : i32, i32
  }
  func.func @transform_2(%arg0: i32) -> (i32, i32) {
    %c0_i32 = arith.constant 0 : i32
    %c0_i32_0 = arith.constant 0 : i32
    %c0_i32_1 = arith.constant 0 : i32
    return %c0_i32, %c0_i32_0 : i32, i32
  }
  func.func @transform_3(%arg0: i32) -> (i32, i32) {
    %c0_i32 = arith.constant 0 : i32
    %c0_i32_0 = arith.constant 0 : i32
    return %arg0, %c0_i32 : i32, i32
  }
}

module attributes {stable_mosaic.version = 11 : i64} {
  func.func @_head_kernel(%arg0: memref<16x3136xbf16, #tpu.memory_space<vmem>>, %arg1: memref<16x1xi32, #tpu.memory_space<vmem>>, %arg2: memref<8x32xf32, #tpu.memory_space<vmem>>, %arg3: memref<3136x32xbf16, #tpu.memory_space<vmem>>, %arg4: memref<1x32xf32, #tpu.memory_space<vmem>>, %arg5: memref<32x128xbf16, #tpu.memory_space<vmem>>, %arg6: memref<32x128xbf16, #tpu.memory_space<vmem>>, %arg7: memref<1x128xf32, #tpu.memory_space<vmem>>, %arg8: memref<128x512xbf16, #tpu.memory_space<vmem>>, %arg9: memref<1x512xf32, #tpu.memory_space<vmem>>, %arg10: memref<1x512xf32, #tpu.memory_space<vmem>>, %arg11: memref<1x1xf32, #tpu.memory_space<vmem>>, %arg12: memref<16x1xf32, #tpu.memory_space<vmem>>) attributes {dimension_semantics = [], scalar_prefetch = 0 : i64, scratch_operands = 0 : i64, tpu.core_type = #tpu.core_type<tc>} {
    %c0 = arith.constant 0 : index
    %c0_0 = arith.constant 0 : index
    %0 = vector.load %arg0[%c0, %c0_0] : memref<16x3136xbf16, #tpu.memory_space<vmem>>, vector<16x3136xbf16>
    %c0_1 = arith.constant 0 : index
    %c0_2 = arith.constant 0 : index
    %1 = vector.load %arg3[%c0_1, %c0_2] : memref<3136x32xbf16, #tpu.memory_space<vmem>>, vector<3136x32xbf16>
    %cst = arith.constant dense<0.000000e+00> : vector<16x32xf32>
    %2 = tpu.matmul %0, %1, %cst {dimension_numbers = #tpu.dot_dimension_numbers<[1], [0], [0], [1], [0, 0, 1, 1], [], []>} : vector<16x3136xbf16>, vector<3136x32xbf16>, vector<16x32xf32> -> vector<16x32xf32>
    %c0_3 = arith.constant 0 : index
    %c0_4 = arith.constant 0 : index
    %3 = vector.load %arg4[%c0_3, %c0_4] : memref<1x32xf32, #tpu.memory_space<vmem>>, vector<1x32xf32>
    %4 = vector.broadcast %3 : vector<1x32xf32> to vector<16x32xf32>
    %5 = arith.addf %2, %4 : vector<16x32xf32>
    %6 = math.tanh %5 : vector<16x32xf32>
    %c0_5 = arith.constant 0 : index
    %c0_6 = arith.constant 0 : index
    %7 = vector.load %arg1[%c0_5, %c0_6] : memref<16x1xi32, #tpu.memory_space<vmem>>, vector<16x1xi32>
    %8 = tpu.iota {dimensions = array<i32: 1>} : vector<1x8xi32>
    %9 = vector.broadcast %7 : vector<16x1xi32> to vector<16x8xi32>
    %10 = vector.broadcast %8 : vector<1x8xi32> to vector<16x8xi32>
    %11 = arith.cmpi eq, %9, %10 : vector<16x8xi32>
    %12 = arith.extui %11 : vector<16x8xi1> to vector<16x8xi32>
    %13 = arith.sitofp %12 : vector<16x8xi32> to vector<16x8xf32>
    %c0_7 = arith.constant 0 : index
    %c0_8 = arith.constant 0 : index
    %14 = vector.load %arg2[%c0_7, %c0_8] : memref<8x32xf32, #tpu.memory_space<vmem>>, vector<8x32xf32>
    %cst_9 = arith.constant dense<0.000000e+00> : vector<16x32xf32>
    %15 = tpu.matmul %13, %14, %cst_9 {dimension_numbers = #tpu.dot_dimension_numbers<[1], [0], [0], [1], [0, 0, 1, 1], [], []>} : vector<16x8xf32>, vector<8x32xf32>, vector<16x32xf32> -> vector<16x32xf32>
    %16 = math.tanh %15 : vector<16x32xf32>
    %17 = arith.truncf %6 : vector<16x32xf32> to vector<16x32xbf16>
    %c0_10 = arith.constant 0 : index
    %c0_11 = arith.constant 0 : index
    %18 = vector.load %arg5[%c0_10, %c0_11] : memref<32x128xbf16, #tpu.memory_space<vmem>>, vector<32x128xbf16>
    %cst_12 = arith.constant dense<0.000000e+00> : vector<16x128xf32>
    %19 = tpu.matmul %17, %18, %cst_12 {dimension_numbers = #tpu.dot_dimension_numbers<[1], [0], [0], [1], [0, 0, 1, 1], [], []>} : vector<16x32xbf16>, vector<32x128xbf16>, vector<16x128xf32> -> vector<16x128xf32>
    %20 = arith.truncf %16 : vector<16x32xf32> to vector<16x32xbf16>
    %c0_13 = arith.constant 0 : index
    %c0_14 = arith.constant 0 : index
    %21 = vector.load %arg6[%c0_13, %c0_14] : memref<32x128xbf16, #tpu.memory_space<vmem>>, vector<32x128xbf16>
    %cst_15 = arith.constant dense<0.000000e+00> : vector<16x128xf32>
    %22 = tpu.matmul %20, %21, %cst_15 {dimension_numbers = #tpu.dot_dimension_numbers<[1], [0], [0], [1], [0, 0, 1, 1], [], []>} : vector<16x32xbf16>, vector<32x128xbf16>, vector<16x128xf32> -> vector<16x128xf32>
    %23 = arith.addf %19, %22 : vector<16x128xf32>
    %c0_16 = arith.constant 0 : index
    %c0_17 = arith.constant 0 : index
    %24 = vector.load %arg7[%c0_16, %c0_17] : memref<1x128xf32, #tpu.memory_space<vmem>>, vector<1x128xf32>
    %25 = vector.broadcast %24 : vector<1x128xf32> to vector<16x128xf32>
    %26 = arith.addf %23, %25 : vector<16x128xf32>
    %cst_18 = arith.constant 0.000000e+00 : f32
    %27 = vector.broadcast %cst_18 : f32 to vector<16x128xf32>
    %28 = arith.maximumf %26, %27 : vector<16x128xf32>
    %29 = arith.truncf %28 : vector<16x128xf32> to vector<16x128xbf16>
    %c0_19 = arith.constant 0 : index
    %c0_20 = arith.constant 0 : index
    %30 = vector.load %arg8[%c0_19, %c0_20] : memref<128x512xbf16, #tpu.memory_space<vmem>>, vector<128x512xbf16>
    %cst_21 = arith.constant dense<0.000000e+00> : vector<16x512xf32>
    %31 = tpu.matmul %29, %30, %cst_21 {dimension_numbers = #tpu.dot_dimension_numbers<[1], [0], [0], [1], [0, 0, 1, 1], [], []>} : vector<16x128xbf16>, vector<128x512xbf16>, vector<16x512xf32> -> vector<16x512xf32>
    %c0_22 = arith.constant 0 : index
    %c0_23 = arith.constant 0 : index
    %32 = vector.load %arg9[%c0_22, %c0_23] : memref<1x512xf32, #tpu.memory_space<vmem>>, vector<1x512xf32>
    %33 = vector.broadcast %32 : vector<1x512xf32> to vector<16x512xf32>
    %34 = arith.addf %31, %33 : vector<16x512xf32>
    %cst_24 = arith.constant 0.000000e+00 : f32
    %35 = vector.broadcast %cst_24 : f32 to vector<16x512xf32>
    %36 = arith.maximumf %34, %35 : vector<16x512xf32>
    %c0_25 = arith.constant 0 : index
    %c0_26 = arith.constant 0 : index
    %37 = vector.load %arg10[%c0_25, %c0_26] : memref<1x512xf32, #tpu.memory_space<vmem>>, vector<1x512xf32>
    %38 = vector.broadcast %37 : vector<1x512xf32> to vector<16x512xf32>
    %39 = arith.mulf %36, %38 : vector<16x512xf32>
    %cst_27 = arith.constant dense<0.000000e+00> : vector<16xf32>
    %40 = vector.multi_reduction <add>, %39, %cst_27 [1] : vector<16x512xf32> to vector<16xf32>
    %41 = vector.shape_cast %40 : vector<16xf32> to vector<16x1xf32>
    %c0_28 = arith.constant 0 : index
    %c0_29 = arith.constant 0 : index
    %42 = vector.load %arg11[%c0_28, %c0_29] : memref<1x1xf32, #tpu.memory_space<vmem>>, vector<1x1xf32>
    %43 = vector.broadcast %42 : vector<1x1xf32> to vector<16x1xf32>
    %44 = arith.addf %41, %43 : vector<16x1xf32>
    %45 = math.tanh %44 : vector<16x1xf32>
    %c0_30 = arith.constant 0 : index
    %c0_31 = arith.constant 0 : index
    %46 = vector.load %arg12[%c0_30, %c0_31] : memref<16x1xf32, #tpu.memory_space<vmem>>, vector<16x1xf32>
    tpu.vector_store %arg12[%c0_30, %c0_31], %45 {strides = array<i32>} : memref<16x1xf32, #tpu.memory_space<vmem>>, vector<16x1xf32>,
    return
  }
}

</mosaic_0001>

<bundles_post_ra>
// kernel: forward.4
= control target key start
LH: loop header
LB: loop body
LE: loop exit
PB: predicated region body
PF: predicated region fallthrough
CT: control target
= control target key end

     0   :  { %s8722_s12 = smov 0   ;;  %s10457_s0 = inlined_call_operand.vmem [shape: bf16[6400,256], index: 0, kind: input, shape index: {}]   ;;  %s10458_s1 = inlined_call_operand.vmem [shape: bf16[256,32], index: 1, kind: input, shape index: {}]   ;;  %s10459_s2 = inlined_call_operand.vmem [shape: f32[1,32], index: 2, kind: input, shape index: {}]   ;;  %s10460_s3 = inlined_call_operand.vmem [shape: bf16[6400,32], index: 3, kind: output, shape index: {}]  }
   0x1 LB: > { %s6803_s13 = sadd.s32 4294967295, %s8699_s12   ;;  %p6807_p0 = scmp.ge.s32.totalorder %s8699_s12, 1  ;;  %s8699_s12 = sphi %s8722_s12, %s13_s12  }
   0x2   : > { %p139_p1 = scmp.lt.s32.totalorder %s8699_s12, 3 }
   0x4   : > { %p140_p2 = pnand %p6807_p0, %p139_p1 }
   0x5   : > { %v8072_v0 = vld [vmem:[%s10458_s1] sm:$0xff] (!%p140_p2)   ;;  %v8701_v1 = vmov (!%p140_p2), 0   ;;  %s164_s16 = smul.u32 (!%p140_p2), 400, %s6803_s13  ;;  %v8073_v2 = vld [vmem:[%s10458_s1 + $0x8] sm:$0xff] (!%p140_p2)   ;;  %v8074_v3 = vld [vmem:[%s10458_s1 + $0x10] sm:$0xff] (!%p140_p2)   ;;  %vm6346_vm0 = vcmask (!%p140_p2), 257024  }
   0x6   : > { %143 = sbr.rel (%p140_p2) target bundleno = 1083 (0x43b), region = 32  ;;  %2713 = vmatprep.subr.bf16.mxu0 (!%p140_p2), %v8701_v1  ;;  %8031 = vmatprep.subr.bf16.mxu1 (!%p140_p2), %v8701_v1  ;;  %v8075_v4 = vld [vmem:[%s10458_s1 + $0x18] sm:$0xff] (!%p140_p2)   ;;  %v8076_v5 = vld [vmem:[%s10458_s1 + $0x20] sm:$0xff] (!%p140_p2)   ;;  %v8077_v7 = vld [vmem:[%s10458_s1 + $0x28] sm:$0xff] (!%p140_p2)  }
   0x7   : > { %2714 = vmatpush1.bf16.msra.mxu0 (!%p140_p2), %v8072_v0  ;;  %8047 = vmatpush1.bf16.msra.mxu1 (!%p140_p2), %v8072_v0  ;;  %p165_p3 = scmp.lt.s32.totalorder (!%p140_p2), %s164_s16, 799  ;;  %v8078_v9 = vld [vmem:[%s10458_s1 + $0x30] sm:$0xff] (!%p140_p2)   ;;  %v8079_v10 = vld [vmem:[%s10458_s1 + $0x38] sm:$0xff] (!%p140_p2)   ;;  %v8080_v11 = vld [vmem:[%s10458_s1 + $0x40] sm:$0xff] (!%p140_p2)  }
   0x8   : > { %2715 = vmatprep.subr.bf16.mxu0 (!%p140_p2), %v8701_v1  ;;  %8032 = vmatprep.subr.bf16.mxu1 (!%p140_p2), %v8701_v1  ;;  %v8081_v12 = vld [vmem:[%s10458_s1 + $0x48] sm:$0xff] (!%p140_p2)   ;;  %v8082_v13 = vld [vmem:[%s10458_s1 + $0x50] sm:$0xff] (!%p140_p2)   ;;  %v8083_v14 = vld [vmem:[%s10458_s1 + $0x58] sm:$0xff] (!%p140_p2)  }
   0x9   : > { %v8084_v15 = vld [vmem:[%s10458_s1 + $0x60] sm:$0xff] (!%p140_p2)   ;;  %v8085_v16 = vld [vmem:[%s10458_s1 + $0x68] sm:$0xff] (!%p140_p2)   ;;  %v8086_v17 = vld [vmem:[%s10458_s1 + $0x70] sm:$0xff] (!%p140_p2)  }
   0xa   : > { %v8087_v18 = vld [vmem:[%s10458_s1 + $0x78] sm:$0xff] (!%p140_p2)  }
   0xb   : > { %2716 = vmatpush1.bf16.msra.mxu0 (!%p140_p2), %v8073_v2  ;;  %8048 = vmatpush1.bf16.msra.mxu1 (!%p140_p2), %v8073_v2 }
   0xc   : > { %2717 = vmatprep.subr.bf16.mxu0 (!%p140_p2), %v8701_v1  ;;  %8033 = vmatprep.subr.bf16.mxu1 (!%p140_p2), %v8701_v1 }
   0xd   : > { %s10462_s16 = smov (!%p165_p3, %s164_s16), 799 }
   0xe   : > { %s7630_s23 = sshll.u32 %s10462_s16, 3  ;;  %s6810_s29 = sshll.u32 %s10462_s16, 2 }
   0xf   : > { %2718 = vmatpush1.bf16.msra.mxu0 %v8074_v3  ;;  %8049 = vmatpush1.bf16.msra.mxu1 %v8074_v3  ;;  %s8759_s28 = scalar_lea.vmem %s10457_s0, %s7630_s23  ;;  %s8945_s4 = scalar_lea.vmem %s10460_s3, %s6810_s29 }
  0x10   : > { %2719 = vmatprep.subr.bf16.mxu0 %v8701_v1  ;;  %8034 = vmatprep.subr.bf16.mxu1 %v8701_v1  ;;  %v8090_v6 = vld [vmem:[%s8759_s28 + $0x4] ss:$8 sps:$4 sm:$0xff]   ;;  %v8088_v19 = vld [vmem:[%s8759_s28] ss:$8 sps:$4 sm:$0xff]   ;;  %v8094_v21 = vld [vmem:[%s8759_s28 + $0x14] ss:$8 sps:$4 sm:$0xff]  }
  0x11   : > { %v8093_v8 = vld [vmem:[%s8759_s28 + $0x644] ss:$8 sps:$4 sm:$0xff]   ;;  %2745 = vmatprep.mubr.bf16.mxu0 %v8090_v6  ;;  %v8091_v20 = vld [vmem:[%s8759_s28 + $0x640] ss:$8 sps:$4 sm:$0xff]   ;;  %v8096_v22 = vld [vmem:[%s8759_s28 + $0x654] ss:$8 sps:$4 sm:$0xff]  }
  0x12   : > { %3545 = vmatprep.mubr.bf16.mxu1 %v8093_v8  ;;  %v8098_v23 = vld [vmem:[%s8759_s28 + $0x10] ss:$8 sps:$4 sm:$0xff]   ;;  %v8100_v25 = vld [vmem:[%s8759_s28 + $0x24] ss:$8 sps:$4 sm:$0xff]   ;;  %v8104_v27 = vld [vmem:[%s8759_s28 + $0x20] ss:$8 sps:$4 sm:$0xff]  }
  0x13   : > { %2720 = vmatpush1.bf16.msra.mxu0 %v8075_v4  ;;  %8050 = vmatpush1.bf16.msra.mxu1 %v8075_v4  ;;  %v8099_v24 = vld [vmem:[%s8759_s28 + $0x650] ss:$8 sps:$4 sm:$0xff]   ;;  %v8102_v26 = vld [vmem:[%s8759_s28 + $0x664] ss:$8 sps:$4 sm:$0xff]   ;;  %v8105_v28 = vld [vmem:[%s8759_s28 + $0x660] ss:$8 sps:$4 sm:$0xff]  }
  0x14   : > { %2721 = vmatprep.subr.bf16.mxu0 %v8701_v1  ;;  %8035 = vmatprep.subr.bf16.mxu1 %v8701_v1  ;;  %v8106_v29 = vld [vmem:[%s8759_s28 + $0x34] ss:$8 sps:$4 sm:$0xff]   ;;  %v8110_v31 = vld [vmem:[%s8759_s28 + $0x30] ss:$8 sps:$4 sm:$0xff]   ;;  %v8112_v33 = vld [vmem:[%s8759_s28 + $0x44] ss:$8 sps:$4 sm:$0xff]  }
  0x15   : > { %v8108_v30 = vld [vmem:[%s8759_s28 + $0x674] ss:$8 sps:$4 sm:$0xff]   ;;  %v8111_v32 = vld [vmem:[%s8759_s28 + $0x670] ss:$8 sps:$4 sm:$0xff]   ;;  %v8114_v34 = vld [vmem:[%s8759_s28 + $0x684] ss:$8 sps:$4 sm:$0xff]  }
  0x16   : > { %v8116_v35 = vld [vmem:[%s8759_s28 + $0x40] ss:$8 sps:$4 sm:$0xff]   ;;  %v8118_v37 = vld [vmem:[%s8759_s28 + $0x54] ss:$8 sps:$4 sm:$0xff]   ;;  %v8122_v39 = vld [vmem:[%s8759_s28 + $0x50] ss:$8 sps:$4 sm:$0xff]  }
  0x17   : > { %2722 = vmatpush1.bf16.msra.mxu0 %v8076_v5  ;;  %8051 = vmatpush1.bf16.msra.mxu1 %v8076_v5  ;;  %v8117_v36 = vld [vmem:[%s8759_s28 + $0x680] ss:$8 sps:$4 sm:$0xff]   ;;  %v8120_v38 = vld [vmem:[%s8759_s28 + $0x694] ss:$8 sps:$4 sm:$0xff]   ;;  %v8123_v40 = vld [vmem:[%s8759_s28 + $0x690] ss:$8 sps:$4 sm:$0xff]  }
  0x18   : > { %2723 = vmatprep.subr.bf16.mxu0 %v8701_v1  ;;  %8036 = vmatprep.subr.bf16.mxu1 %v8701_v1  ;;  %v8124_v41 = vld [vmem:[%s8759_s28 + $0x64] ss:$8 sps:$4 sm:$0xff]   ;;  %v8128_v43 = vld [vmem:[%s8759_s28 + $0x60] ss:$8 sps:$4 sm:$0xff]   ;;  %v8130_v45 = vld [vmem:[%s8759_s28 + $0x74] ss:$8 sps:$4 sm:$0xff]  }
  0x19   : > { %v8126_v42 = vld [vmem:[%s8759_s28 + $0x6a4] ss:$8 sps:$4 sm:$0xff]   ;;  %v8129_v44 = vld [vmem:[%s8759_s28 + $0x6a0] ss:$8 sps:$4 sm:$0xff]   ;;  %v8132_v46 = vld [vmem:[%s8759_s28 + $0x6b4] ss:$8 sps:$4 sm:$0xff]  }
  0x1a   : > { %v8134_v47 = vld [vmem:[%s8759_s28 + $0x70] ss:$8 sps:$4 sm:$0xff]   ;;  %v8136_v49 = vld [vmem:[%s8759_s28 + $0x84] ss:$8 sps:$4 sm:$0xff]   ;;  %v8140_v51 = vld [vmem:[%s8759_s28 + $0x80] ss:$8 sps:$4 sm:$0xff]  }
  0x1b   : > { %2724 = vmatpush1.bf16.msra.mxu0 %v8077_v7  ;;  %8052 = vmatpush1.bf16.msra.mxu1 %v8077_v7  ;;  %v8135_v48 = vld [vmem:[%s8759_s28 + $0x6b0] ss:$8 sps:$4 sm:$0xff]   ;;  %v8138_v50 = vld [vmem:[%s8759_s28 + $0x6c4] ss:$8 sps:$4 sm:$0xff]   ;;  %v8141_v52 = vld [vmem:[%s8759_s28 + $0x6c0] ss:$8 sps:$4 sm:$0xff]  }
  0x1c   : > { %2725 = vmatprep.subr.bf16.mxu0 %v8701_v1  ;;  %8037 = vmatprep.subr.bf16.mxu1 %v8701_v1  ;;  %v8142_v53 = vld [vmem:[%s8759_s28 + $0x94] ss:$8 sps:$4 sm:$0xff]   ;;  %v8146_v55 = vld [vmem:[%s8759_s28 + $0x90] ss:$8 sps:$4 sm:$0xff]   ;;  %v8148_v57 = vld [vmem:[%s8759_s28 + $0xa4] ss:$8 sps:$4 sm:$0xff]  }
  0x1d   : > { %v8144_v54 = vld [vmem:[%s8759_s28 + $0x6d4] ss:$8 sps:$4 sm:$0xff]   ;;  %v8147_v56 = vld [vmem:[%s8759_s28 + $0x6d0] ss:$8 sps:$4 sm:$0xff]   ;;  %v8150_v58 = vld [vmem:[%s8759_s28 + $0x6e4] ss:$8 sps:$4 sm:$0xff]  }
  0x1e   : > { %v8152_v59 = vld [vmem:[%s8759_s28 + $0xa0] ss:$8 sps:$4 sm:$0xff]   ;;  %v8154_v61 = vld [vmem:[%s8759_s28 + $0xb4] ss:$8 sps:$4 sm:$0xff]   ;;  %v8158_v63 = vld [vmem:[%s8759_s28 + $0xb0] ss:$8 sps:$4 sm:$0xff]  }
  0x1f   : > { %2726 = vmatpush1.bf16.msra.mxu0 %v8078_v9  ;;  %8053 = vmatpush1.bf16.msra.mxu1 %v8078_v9  ;;  %v8153_v60 = vld [vmem:[%s8759_s28 + $0x6e0] ss:$8 sps:$4 sm:$0xff]   ;;  %v8156_v62 = vld [vmem:[%s8759_s28 + $0x6f4] ss:$8 sps:$4 sm:$0xff]   ;;  %v8159_v0 = vld [vmem:[%s8759_s28 + $0x6f0] ss:$8 sps:$4 sm:$0xff]  }
  0x20   : > { %2727 = vmatprep.subr.bf16.mxu0 %v8701_v1  ;;  %8038 = vmatprep.subr.bf16.mxu1 %v8701_v1  ;;  %v8162_v2 = vld [vmem:[%s8759_s28 + $0x704] ss:$8 sps:$4 sm:$0xff]   ;;  %v8164_v3 = vld [vmem:[%s8759_s28 + $0xc0] ss:$8 sps:$4 sm:$0xff]   ;;  %v8166_v5 = vld [vmem:[%s8759_s28 + $0xd4] ss:$8 sps:$4 sm:$0xff]  }
  0x21   : > { %v8165_v4 = vld [vmem:[%s8759_s28 + $0x700] ss:$8 sps:$4 sm:$0xff]   ;;  %v8168_v6 = vld [vmem:[%s8759_s28 + $0x714] ss:$8 sps:$4 sm:$0xff]   ;;  %v8170_v7 = vld [vmem:[%s8759_s28 + $0xd0] ss:$8 sps:$4 sm:$0xff]  }
  0x22   : > { %v8171_v8 = vld [vmem:[%s8759_s28 + $0x710] ss:$8 sps:$4 sm:$0xff]   ;;  %v8172_v9 = vld [vmem:[%s8759_s28 + $0xe4] ss:$8 sps:$4 sm:$0xff]  }
  0x23   : > { %2728 = vmatpush1.bf16.msra.mxu0 %v8079_v10  ;;  %8054 = vmatpush1.bf16.msra.mxu1 %v8079_v10  ;;  %v8174_v10 = vld [vmem:[%s8759_s28 + $0x724] ss:$8 sps:$4 sm:$0xff]  }
  0x24   : > { %2729 = vmatprep.subr.bf16.mxu0 %v8701_v1  ;;  %8039 = vmatprep.subr.bf16.mxu1 %v8701_v1 }
  0x27   : > { %2730 = vmatpush1.bf16.msra.mxu0 %v8080_v11  ;;  %8055 = vmatpush1.bf16.msra.mxu1 %v8080_v11  ;;  %v8176_v11 = vld [vmem:[%s8759_s28 + $0xe0] ss:$8 sps:$4 sm:$0xff]  }
  0x28   : > { %2731 = vmatprep.subr.bf16.mxu0 %v8701_v1  ;;  %8040 = vmatprep.subr.bf16.mxu1 %v8701_v1 }
  0x2b   : > { %2732 = vmatpush1.bf16.msra.mxu0 %v8081_v12  ;;  %8056 = vmatpush1.bf16.msra.mxu1 %v8081_v12  ;;  %v8177_v12 = vld [vmem:[%s8759_s28 + $0x720] ss:$8 sps:$4 sm:$0xff]  }
  0x2c   : > { %2733 = vmatprep.subr.bf16.mxu0 %v8701_v1  ;;  %8041 = vmatprep.subr.bf16.mxu1 %v8701_v1 }
  0x2f   : > { %2734 = vmatpush1.bf16.msra.mxu0 %v8082_v13  ;;  %8057 = vmatpush1.bf16.msra.mxu1 %v8082_v13  ;;  %v8178_v13 = vld [vmem:[%s8759_s28 + $0xf4] ss:$8 sps:$4 sm:$0xff]  }
  0x30   : > { %2735 = vmatprep.subr.bf16.mxu0 %v8701_v1  ;;  %8042 = vmatprep.subr.bf16.mxu1 %v8701_v1 }
  0x33   : > { %2736 = vmatpush1.bf16.msra.mxu0 %v8083_v14  ;;  %8058 = vmatpush1.bf16.msra.mxu1 %v8083_v14  ;;  %v8180_v14 = vld [vmem:[%s8759_s28 + $0x734] ss:$8 sps:$4 sm:$0xff]  }
  0x34   : > { %2737 = vmatprep.subr.bf16.mxu0 %v8701_v1  ;;  %8043 = vmatprep.subr.bf16.mxu1 %v8701_v1 }
  0x37   : > { %2738 = vmatpush1.bf16.msra.mxu0 %v8084_v15  ;;  %8059 = vmatpush1.bf16.msra.mxu1 %v8084_v15  ;;  %v8182_v15 = vld [vmem:[%s8759_s28 + $0xf0] ss:$8 sps:$4 sm:$0xff]  }
  0x38   : > { %2739 = vmatprep.subr.bf16.mxu0 %v8701_v1  ;;  %8044 = vmatprep.subr.bf16.mxu1 %v8701_v1 }
  0x3b   : > { %2740 = vmatpush1.bf16.msra.mxu0 %v8085_v16  ;;  %8060 = vmatpush1.bf16.msra.mxu1 %v8085_v16  ;;  %v8183_v16 = vld [vmem:[%s8759_s28 + $0x730] ss:$8 sps:$4 sm:$0xff]  }
  0x3c   : > { %2741 = vmatprep.subr.bf16.mxu0 %v8701_v1  ;;  %8045 = vmatprep.subr.bf16.mxu1 %v8701_v1 }
  0x3f   : > { %2742 = vmatpush1.bf16.msra.mxu0 %v8086_v17  ;;  %8061 = vmatpush1.bf16.msra.mxu1 %v8086_v17  ;;  %v8184_v17 = vld [vmem:[%s8759_s28 + $0x104] ss:$8 sps:$4 sm:$0xff]  }
  0x40   : > { %2743 = vmatprep.subr.bf16.mxu0 %v8701_v1  ;;  %8046 = vmatprep.subr.bf16.mxu1 %v8701_v1  ;;  %v8160_v1 = vld [vmem:[%s8759_s28 + $0xc4] ss:$8 sps:$4 sm:$0xff]  }
  0x43   : > { %2744 = vmatpush1.bf16.msra.mxu0 %v8087_v18  ;;  %8062 = vmatpush1.bf16.msra.mxu1 %v8087_v18  ;;  %v8186_v18 = vld [vmem:[%s8759_s28 + $0x744] ss:$8 sps:$4 sm:$0xff]  }
  0x46   : > { %2746 = vmatmul.mubr.bf16.vlgmr.msra.gmra.mrb[0].mxu0 %v8088_v19  ;;  %3546 = vmatmul.mubr.bf16.vlgmr.msra.gmra.mrb[0].mxu1 %v8091_v20  ;;  %v8188_v19 = vld [vmem:[%s8759_s28 + $0x100] ss:$8 sps:$4 sm:$0xff]  }
  0x47   : > { %2753 = vmatprep.mubr.bf16.mxu0 %v8094_v21  ;;  %3553 = vmatprep.mubr.bf16.mxu1 %v8096_v22  ;;  %v8189_v20 = vld [vmem:[%s8759_s28 + $0x740] ss:$8 sps:$4 sm:$0xff]   ;;  %v8190_v21 = vld [vmem:[%s8759_s28 + $0x114] ss:$8 sps:$4 sm:$0xff]  }
  0x48   : > { %v8192_v22 = vld [vmem:[%s8759_s28 + $0x754] ss:$8 sps:$4 sm:$0xff]  }
  0x4e   : > { %2754 = vmatmul.mubr.bf16.gmra.mrb[4].mxu0 %v8098_v23  ;;  %3554 = vmatmul.mubr.bf16.gmra.mrb[4].mxu1 %v8099_v24  ;;  %v8194_v23 = vld [vmem:[%s8759_s28 + $0x110] ss:$8 sps:$4 sm:$0xff]  }
  0x4f   : > { %2761 = vmatprep.mubr.bf16.mxu0 %v8100_v25  ;;  %3561 = vmatprep.mubr.bf16.mxu1 %v8102_v26  ;;  %v8195_v24 = vld [vmem:[%s8759_s28 + $0x750] ss:$8 sps:$4 sm:$0xff]   ;;  %v8196_v25 = vld [vmem:[%s8759_s28 + $0x124] ss:$8 sps:$4 sm:$0xff]  }
  0x50   : > { %v8198_v26 = vld [vmem:[%s8759_s28 + $0x764] ss:$8 sps:$4 sm:$0xff]  }
  0x56   : > { %2762 = vmatmul.mubr.bf16.gmra.mrb[8].mxu0 %v8104_v27  ;;  %3562 = vmatmul.mubr.bf16.gmra.mrb[8].mxu1 %v8105_v28  ;;  %v8200_v27 = vld [vmem:[%s8759_s28 + $0x120] ss:$8 sps:$4 sm:$0xff]  }
  0x57   : > { %2769 = vmatprep.mubr.bf16.mxu0 %v8106_v29  ;;  %3569 = vmatprep.mubr.bf16.mxu1 %v8108_v30  ;;  %v8201_v28 = vld [vmem:[%s8759_s28 + $0x760] ss:$8 sps:$4 sm:$0xff]   ;;  %v8202_v29 = vld [vmem:[%s8759_s28 + $0x134] ss:$8 sps:$4 sm:$0xff]  }
  0x58   : > { %v8204_v30 = vld [vmem:[%s8759_s28 + $0x774] ss:$8 sps:$4 sm:$0xff]  }
  0x5e   : > { %2770 = vmatmul.mubr.bf16.gmra.mrb[12].mxu0 %v8110_v31  ;;  %3570 = vmatmul.mubr.bf16.gmra.mrb[12].mxu1 %v8111_v32  ;;  %v8206_v31 = vld [vmem:[%s8759_s28 + $0x130] ss:$8 sps:$4 sm:$0xff]  }
  0x5f   : > { %2777 = vmatprep.mubr.bf16.mxu0 %v8112_v33  ;;  %3577 = vmatprep.mubr.bf16.mxu1 %v8114_v34  ;;  %v8207_v32 = vld [vmem:[%s8759_s28 + $0x770] ss:$8 sps:$4 sm:$0xff]   ;;  %v8208_v33 = vld [vmem:[%s8759_s28 + $0x144] ss:$8 sps:$4 sm:$0xff]  }
  0x60   : > { %v8210_v34 = vld [vmem:[%s8759_s28 + $0x784] ss:$8 sps:$4 sm:$0xff]  }
  0x66   : > { %2778 = vmatmul.mubr.bf16.gmra.mrb[16].mxu0 %v8116_v35  ;;  %3578 = vmatmul.mubr.bf16.gmra.mrb[16].mxu1 %v8117_v36  ;;  %v8212_v35 = vld [vmem:[%s8759_s28 + $0x140] ss:$8 sps:$4 sm:$0xff]  }
  0x67   : > { %2785 = vmatprep.mubr.bf16.mxu0 %v8118_v37  ;;  %3585 = vmatprep.mubr.bf16.mxu1 %v8120_v38  ;;  %v8213_v36 = vld [vmem:[%s8759_s28 + $0x780] ss:$8 sps:$4 sm:$0xff]   ;;  %v8214_v37 = vld [vmem:[%s8759_s28 + $0x154] ss:$8 sps:$4 sm:$0xff]  }
  0x68   : > { %v8216_v38 = vld [vmem:[%s8759_s28 + $0x794] ss:$8 sps:$4 sm:$0xff]  }
  0x6e   : > { %2786 = vmatmul.mubr.bf16.gmra.mrb[20].mxu0 %v8122_v39  ;;  %3586 = vmatmul.mubr.bf16.gmra.mrb[20].mxu1 %v8123_v40  ;;  %v8218_v39 = vld [vmem:[%s8759_s28 + $0x150] ss:$8 sps:$4 sm:$0xff]  }
  0x6f   : > { %2793 = vmatprep.mubr.bf16.mxu0 %v8124_v41  ;;  %3593 = vmatprep.mubr.bf16.mxu1 %v8126_v42  ;;  %v8219_v40 = vld [vmem:[%s8759_s28 + $0x790] ss:$8 sps:$4 sm:$0xff]   ;;  %v8220_v41 = vld [vmem:[%s8759_s28 + $0x164] ss:$8 sps:$4 sm:$0xff]  }
  0x70   : > { %v8222_v42 = vld [vmem:[%s8759_s28 + $0x7a4] ss:$8 sps:$4 sm:$0xff]  }
  0x76   : > { %2794 = vmatmul.mubr.bf16.gmra.mrb[24].mxu0 %v8128_v43  ;;  %3594 = vmatmul.mubr.bf16.gmra.mrb[24].mxu1 %v8129_v44  ;;  %v8224_v43 = vld [vmem:[%s8759_s28 + $0x160] ss:$8 sps:$4 sm:$0xff]  }
  0x77   : > { %2801 = vmatprep.mubr.bf16.mxu0 %v8130_v45  ;;  %3601 = vmatprep.mubr.bf16.mxu1 %v8132_v46  ;;  %v8225_v44 = vld [vmem:[%s8759_s28 + $0x7a0] ss:$8 sps:$4 sm:$0xff]   ;;  %v8226_v45 = vld [vmem:[%s8759_s28 + $0x174] ss:$8 sps:$4 sm:$0xff]  }
  0x78   : > { %v8228_v46 = vld [vmem:[%s8759_s28 + $0x7b4] ss:$8 sps:$4 sm:$0xff]  }
  0x7e   : > { %2802 = vmatmul.mubr.bf16.gmra.mrb[28].mxu0 %v8134_v47  ;;  %3602 = vmatmul.mubr.bf16.gmra.mrb[28].mxu1 %v8135_v48  ;;  %v8230_v47 = vld [vmem:[%s8759_s28 + $0x170] ss:$8 sps:$4 sm:$0xff]  }
  0x7f   : > { %2809 = vmatprep.mubr.bf16.mxu0 %v8136_v49  ;;  %3609 = vmatprep.mubr.bf16.mxu1 %v8138_v50  ;;  %v8231_v48 = vld [vmem:[%s8759_s28 + $0x7b0] ss:$8 sps:$4 sm:$0xff]   ;;  %v8232_v49 = vld [vmem:[%s8759_s28 + $0x184] ss:$8 sps:$4 sm:$0xff]  }
  0x80   : > { %v8234_v50 = vld [vmem:[%s8759_s28 + $0x7c4] ss:$8 sps:$4 sm:$0xff]  }
  0x86   : > { %2810 = vmatmul.mubr.bf16.gmra.mrb[32].mxu0 %v8140_v51  ;;  %3610 = vmatmul.mubr.bf16.gmra.mrb[32].mxu1 %v8141_v52  ;;  %v8236_v51 = vld [vmem:[%s8759_s28 + $0x180] ss:$8 sps:$4 sm:$0xff]  }
  0x87   : > { %2817 = vmatprep.mubr.bf16.mxu0 %v8142_v53  ;;  %3617 = vmatprep.mubr.bf16.mxu1 %v8144_v54  ;;  %v8237_v52 = vld [vmem:[%s8759_s28 + $0x7c0] ss:$8 sps:$4 sm:$0xff]   ;;  %v8238_v53 = vld [vmem:[%s8759_s28 + $0x194] ss:$8 sps:$4 sm:$0xff]  }
  0x88   : > { %v8240_v54 = vld [vmem:[%s8759_s28 + $0x7d4] ss:$8 sps:$4 sm:$0xff]  }
  0x8e   : > { %2818 = vmatmul.mubr.bf16.gmra.mrb[36].mxu0 %v8146_v55  ;;  %3618 = vmatmul.mubr.bf16.gmra.mrb[36].mxu1 %v8147_v56  ;;  %v8242_v55 = vld [vmem:[%s8759_s28 + $0x190] ss:$8 sps:$4 sm:$0xff]  }
  0x8f   : > { %2825 = vmatprep.mubr.bf16.mxu0 %v8148_v57  ;;  %3625 = vmatprep.mubr.bf16.mxu1 %v8150_v58  ;;  %v8243_v56 = vld [vmem:[%s8759_s28 + $0x7d0] ss:$8 sps:$4 sm:$0xff]   ;;  %v8244_v57 = vld [vmem:[%s8759_s28 + $0x1a4] ss:$8 sps:$4 sm:$0xff]  }
  0x90   : > { %v8246_v58 = vld [vmem:[%s8759_s28 + $0x7e4] ss:$8 sps:$4 sm:$0xff]  }
  0x96   : > { %2826 = vmatmul.mubr.bf16.gmra.mrb[40].mxu0 %v8152_v59  ;;  %3626 = vmatmul.mubr.bf16.gmra.mrb[40].mxu1 %v8153_v60  ;;  %v8248_v59 = vld [vmem:[%s8759_s28 + $0x1a0] ss:$8 sps:$4 sm:$0xff]  }
  0x97   : > { %2833 = vmatprep.mubr.bf16.mxu0 %v8154_v61  ;;  %3633 = vmatprep.mubr.bf16.mxu1 %v8156_v62  ;;  %v8249_v60 = vld [vmem:[%s8759_s28 + $0x7e0] ss:$8 sps:$4 sm:$0xff]   ;;  %v8250_v61 = vld [vmem:[%s8759_s28 + $0x1b4] ss:$8 sps:$4 sm:$0xff]  }
  0x98   : > { %v8252_v62 = vld [vmem:[%s8759_s28 + $0x7f4] ss:$8 sps:$4 sm:$0xff]  }
  0x9e   : > { %2834 = vmatmul.mubr.bf16.gmra.mrb[44].mxu0 %v8158_v63  ;;  %3634 = vmatmul.mubr.bf16.gmra.mrb[44].mxu1 %v8159_v0  ;;  %v8931_v63 = vld [vmem:[%s10459_s2] ss:$0 sm:$0xff] }
  0x9f   : > { %2841 = vmatprep.mubr.bf16.mxu0 %v8160_v1  ;;  %3641 = vmatprep.mubr.bf16.mxu1 %v8162_v2 }
  0xa6   : > { %2842 = vmatmul.mubr.bf16.gmra.mrb[48].mxu0 %v8164_v3  ;;  %3642 = vmatmul.mubr.bf16.gmra.mrb[48].mxu1 %v8165_v4 }
  0xa7   : > { %2849 = vmatprep.mubr.bf16.mxu0 %v8166_v5  ;;  %3649 = vmatprep.mubr.bf16.mxu1 %v8168_v6  ;;  %v8254_v6 = vld [vmem:[%s8759_s28 + $0x1b0] ss:$8 sps:$4 sm:$0xff]  }
  0xae   : > { %2850 = vmatmul.mubr.bf16.gmra.mrb[52].mxu0 %v8170_v7  ;;  %3650 = vmatmul.mubr.bf16.gmra.mrb[52].mxu1 %v8171_v8  ;;  %v8255_v7 = vld [vmem:[%s8759_s28 + $0x7f0] ss:$8 sps:$4 sm:$0xff]  }
  0xaf   : > { %2857 = vmatprep.mubr.bf16.mxu0 %v8172_v9  ;;  %3657 = vmatprep.mubr.bf16.mxu1 %v8174_v10  ;;  %v8256_v10 = vld [vmem:[%s8759_s28 + $0x1c4] ss:$8 sps:$4 sm:$0xff]  }
  0xb6   : > { %2858 = vmatmul.mubr.bf16.gmra.mrb[56].mxu0 %v8176_v11  ;;  %3658 = vmatmul.mubr.bf16.gmra.mrb[56].mxu1 %v8177_v12  ;;  %v8258_v11 = vld [vmem:[%s8759_s28 + $0x804] ss:$8 sps:$4 sm:$0xff]  }
  0xb7   : > { %2865 = vmatprep.mubr.bf16.mxu0 %v8178_v13  ;;  %3665 = vmatprep.mubr.bf16.mxu1 %v8180_v14 }
  0xbe   : > { %2866 = vmatmul.mubr.bf16.gmra.mrb[60].mxu0 %v8182_v15  ;;  %3666 = vmatmul.mubr.bf16.gmra.mrb[60].mxu1 %v8183_v16 }
  0xbf   : > { %2873 = vmatprep.mubr.bf16.mxu0 %v8184_v17  ;;  %3673 = vmatprep.mubr.bf16.mxu1 %v8186_v18 }
  0xc6   : > { %2874 = vmatmul.mubr.bf16.gmra.mrb[64].mxu0 %v8188_v19  ;;  %3674 = vmatmul.mubr.bf16.gmra.mrb[64].mxu1 %v8189_v20 }
  0xc7   : > { %2881 = vmatprep.mubr.bf16.mxu0 %v8190_v21  ;;  %3681 = vmatprep.mubr.bf16.mxu1 %v8192_v22 }
  0xce   : > { %2882 = vmatmul.mubr.bf16.gmra.mrb[68].mxu0 %v8194_v23  ;;  %3682 = vmatmul.mubr.bf16.gmra.mrb[68].mxu1 %v8195_v24 }
  0xcf   : > { %2889 = vmatprep.mubr.bf16.mxu0 %v8196_v25  ;;  %3689 = vmatprep.mubr.bf16.mxu1 %v8198_v26 }
  0xd6   : > { %2890 = vmatmul.mubr.bf16.gmra.mrb[72].mxu0 %v8200_v27  ;;  %3690 = vmatmul.mubr.bf16.gmra.mrb[72].mxu1 %v8201_v28 }
  0xd7   : > { %2897 = vmatprep.mubr.bf16.mxu0 %v8202_v29  ;;  %3697 = vmatprep.mubr.bf16.mxu1 %v8204_v30  ;;  %v8260_v30 = vld [vmem:[%s8759_s28 + $0x1c0] ss:$8 sps:$4 sm:$0xff]  }
  0xde   : > { %2898 = vmatmul.mubr.bf16.gmra.mrb[76].mxu0 %v8206_v31  ;;  %3698 = vmatmul.mubr.bf16.gmra.mrb[76].mxu1 %v8207_v32  ;;  %v8261_v31 = vld [vmem:[%s8759_s28 + $0x800] ss:$8 sps:$4 sm:$0xff]  }
  0xdf   : > { %2905 = vmatprep.mubr.bf16.mxu0 %v8208_v33  ;;  %3705 = vmatprep.mubr.bf16.mxu1 %v8210_v34  ;;  %v8262_v34 = vld [vmem:[%s8759_s28 + $0x1d4] ss:$8 sps:$4 sm:$0xff]  }
  0xe6   : > { %2906 = vmatmul.mubr.bf16.gmra.mrb[80].mxu0 %v8212_v35  ;;  %3706 = vmatmul.mubr.bf16.gmra.mrb[80].mxu1 %v8213_v36  ;;  %v8264_v35 = vld [vmem:[%s8759_s28 + $0x814] ss:$8 sps:$4 sm:$0xff]  }
  0xe7   : > { %2913 = vmatprep.mubr.bf16.mxu0 %v8214_v37  ;;  %3713 = vmatprep.mubr.bf16.mxu1 %v8216_v38 }
  0xee   : > { %2914 = vmatmul.mubr.bf16.gmra.mrb[84].mxu0 %v8218_v39  ;;  %3714 = vmatmul.mubr.bf16.gmra.mrb[84].mxu1 %v8219_v40 }
  0xef   : > { %2921 = vmatprep.mubr.bf16.mxu0 %v8220_v41  ;;  %3721 = vmatprep.mubr.bf16.mxu1 %v8222_v42 }
  0xf6   : > { %2922 = vmatmul.mubr.bf16.gmra.mrb[88].mxu0 %v8224_v43  ;;  %3722 = vmatmul.mubr.bf16.gmra.mrb[88].mxu1 %v8225_v44 }
  0xf7   : > { %2929 = vmatprep.mubr.bf16.mxu0 %v8226_v45  ;;  %3729 = vmatprep.mubr.bf16.mxu1 %v8228_v46 }
  0xfe   : > { %2930 = vmatmul.mubr.bf16.gmra.mrb[92].mxu0 %v8230_v47  ;;  %3730 = vmatmul.mubr.bf16.gmra.mrb[92].mxu1 %v8231_v48 }
  0xff   : > { %2937 = vmatprep.mubr.bf16.mxu0 %v8232_v49  ;;  %3737 = vmatprep.mubr.bf16.mxu1 %v8234_v50 }
 0x106   : > { %2938 = vmatmul.mubr.bf16.gmra.mrb[96].mxu0 %v8236_v51  ;;  %3738 = vmatmul.mubr.bf16.gmra.mrb[96].mxu1 %v8237_v52 }
 0x107   : > { %2945 = vmatprep.mubr.bf16.mxu0 %v8238_v53  ;;  %3745 = vmatprep.mubr.bf16.mxu1 %v8240_v54  ;;  %v8266_v54 = vld [vmem:[%s8759_s28 + $0x1d0] ss:$8 sps:$4 sm:$0xff]  }
 0x10e   : > { %2946 = vmatmul.mubr.bf16.gmra.mrb[100].mxu0 %v8242_v55  ;;  %3746 = vmatmul.mubr.bf16.gmra.mrb[100].mxu1 %v8243_v56  ;;  %v8267_v55 = vld [vmem:[%s8759_s28 + $0x810] ss:$8 sps:$4 sm:$0xff]  }
 0x10f   : > { %2953 = vmatprep.mubr.bf16.mxu0 %v8244_v57  ;;  %3753 = vmatprep.mubr.bf16.mxu1 %v8246_v58  ;;  %v8268_v58 = vld [vmem:[%s8759_s28 + $0x1e4] ss:$8 sps:$4 sm:$0xff]  }
 0x116   : > { %2954 = vmatmul.mubr.bf16.gmra.mrb[104].mxu0 %v8248_v59  ;;  %3754 = vmatmul.mubr.bf16.gmra.mrb[104].mxu1 %v8249_v60  ;;  %v8270_v59 = vld [vmem:[%s8759_s28 + $0x824] ss:$8 sps:$4 sm:$0xff]  }
 0x117   : > { %2961 = vmatprep.mubr.bf16.mxu0 %v8250_v61  ;;  %3761 = vmatprep.mubr.bf16.mxu1 %v8252_v62 }
 0x119   : > { %v2747_v0 = vpop.f32.mrb[0].mxu0  ;;  %v3547_v1 = vpop.f32.mrb[0].mxu1 }
 0x11a   : > { %v2748_v2 = vadd.f32 %v8931_v63, %v2747_v0  ;;  %v3548_v3 = vadd.f32 %v8931_v63, %v3547_v1  ;;  %v2749_v4 = vpop.f32.mrb[1].mxu0  ;;  %v3549_v5 = vpop.f32.mrb[1].mxu1 }
 0x11b   : > { %v2750_v8 = vpop.f32.mrb[2].mxu0  ;;  %v3550_v9 = vpop.f32.mrb[2].mxu1 }
 0x11c   : > { %v4346_v12 = vmax.f32 %v2748_v2, 0.0  ;;  %v4546_v13 = vmax.f32 %v3548_v3, 0.0  ;;  %v2751_v14 = vadd.f32 %v8931_v63, %v2750_v8  ;;  %v3551_v15 = vadd.f32 %v8931_v63, %v3550_v9  ;;  %v2752_v16 = vpop.f32.mrb[3].mxu0  ;;  %v3552_v17 = vpop.f32.mrb[3].mxu1 }
 0x11d   : > { %v8273_v16 = vld [vmem:[%s8759_s28 + $0x820] ss:$8 sps:$4 sm:$0xff]  }
 0x11e   : > { %v7631_v18 = vpack.c.bf16 %v4346_v12, %v4346_v12  ;;  %v7831_v19 = vpack.c.bf16 %v4546_v13, %v4546_v13  ;;  %v4347_v20 = vmax.f32 %v2751_v14, 0.0  ;;  %v4547_v21 = vmax.f32 %v3551_v15, 0.0  ;;  %2962 = vmatmul.mubr.bf16.gmra.mrb[108].mxu0 %v8254_v6  ;;  %3762 = vmatmul.mubr.bf16.gmra.mrb[108].mxu1 %v8255_v7  ;;  %v8272_v15 = vld [vmem:[%s8759_s28 + $0x1e0] ss:$8 sps:$4 sm:$0xff]  }
 0x11f   : > { %2969 = vmatprep.mubr.bf16.mxu0 %v8256_v10  ;;  %3769 = vmatprep.mubr.bf16.mxu1 %v8258_v11 }
 0x120   : > { %6347 = vst.msk [vmem:[%s8945_s4] sm:$0xf] %vm6346_vm0, %v7631_v18  ;;  %6547 = vst.msk [vmem:[%s8945_s4 + $0x320] sm:$0xf] %vm6346_vm0, %v7831_v19  ;;  %v7632_v22 = vpack.c.bf16 %v4347_v20, %v4347_v20  ;;  %v7832_v23 = vpack.c.bf16 %v4547_v21, %v4547_v21  ;;  %v8274_v19 = vld [vmem:[%s8759_s28 + $0x1f4] ss:$8 sps:$4 sm:$0xff]  }
 0x121   : > { %v2755_v24 = vpop.f32.mrb[4].mxu0  ;;  %v3555_v25 = vpop.f32.mrb[4].mxu1  ;;  %v8276_v20 = vld [vmem:[%s8759_s28 + $0x834] ss:$8 sps:$4 sm:$0xff]  }
 0x122   : > { %6348 = vst.msk [vmem:[%s8945_s4 + $0x4] sm:$0xf] %vm6346_vm0, %v7632_v22  ;;  %6548 = vst.msk [vmem:[%s8945_s4 + $0x324] sm:$0xf] %vm6346_vm0, %v7832_v23  ;;  %v2756_v26 = vadd.f32 %v8931_v63, %v2755_v24  ;;  %v3556_v27 = vadd.f32 %v8931_v63, %v3555_v25  ;;  %v2757_v28 = vpop.f32.mrb[5].mxu0  ;;  %v3557_v29 = vpop.f32.mrb[5].mxu1 }
 0x123   : > { %v2758_v32 = vpop.f32.mrb[6].mxu0  ;;  %v3558_v33 = vpop.f32.mrb[6].mxu1 }
 0x124   : > { %v4348_v36 = vmax.f32 %v2756_v26, 0.0  ;;  %v4548_v37 = vmax.f32 %v3556_v27, 0.0  ;;  %v2759_v38 = vadd.f32 %v8931_v63, %v2758_v32  ;;  %v3559_v39 = vadd.f32 %v8931_v63, %v3558_v33  ;;  %v2760_v40 = vpop.f32.mrb[7].mxu0  ;;  %v3560_v41 = vpop.f32.mrb[7].mxu1 }
 0x125   : > { %v8279_v40 = vld [vmem:[%s8759_s28 + $0x830] ss:$8 sps:$4 sm:$0xff]  }
 0x126   : > { %v7633_v42 = vpack.c.bf16 %v4348_v36, %v4348_v36  ;;  %v7833_v43 = vpack.c.bf16 %v4548_v37, %v4548_v37  ;;  %v4349_v44 = vmax.f32 %v2759_v38, 0.0  ;;  %v4549_v45 = vmax.f32 %v3559_v39, 0.0  ;;  %2970 = vmatmul.mubr.bf16.gmra.mrb[112].mxu0 %v8260_v30  ;;  %3770 = vmatmul.mubr.bf16.gmra.mrb[112].mxu1 %v8261_v31  ;;  %v8278_v39 = vld [vmem:[%s8759_s28 + $0x1f0] ss:$8 sps:$4 sm:$0xff]  }
 0x127   : > { %2977 = vmatprep.mubr.bf16.mxu0 %v8262_v34  ;;  %3777 = vmatprep.mubr.bf16.mxu1 %v8264_v35 }
 0x128   : > { %6349 = vst.msk [vmem:[%s8945_s4 + $0x8] sm:$0xf] %vm6346_vm0, %v7633_v42  ;;  %6549 = vst.msk [vmem:[%s8945_s4 + $0x328] sm:$0xf] %vm6346_vm0, %v7833_v43  ;;  %v7634_v46 = vpack.c.bf16 %v4349_v44, %v4349_v44  ;;  %v7834_v47 = vpack.c.bf16 %v4549_v45, %v4549_v45  ;;  %v8280_v43 = vld [vmem:[%s8759_s28 + $0x204] ss:$8 sps:$4 sm:$0xff]  }
 0x129   : > { %v2763_v48 = vpop.f32.mrb[8].mxu0  ;;  %v3563_v49 = vpop.f32.mrb[8].mxu1  ;;  %v8282_v44 = vld [vmem:[%s8759_s28 + $0x844] ss:$8 sps:$4 sm:$0xff]  }
 0x12a   : > { %6350 = vst.msk [vmem:[%s8945_s4 + $0xc] sm:$0xf] %vm6346_vm0, %v7634_v46  ;;  %6550 = vst.msk [vmem:[%s8945_s4 + $0x32c] sm:$0xf] %vm6346_vm0, %v7834_v47  ;;  %v2764_v50 = vadd.f32 %v8931_v63, %v2763_v48  ;;  %v3564_v51 = vadd.f32 %v8931_v63, %v3563_v49  ;;  %v2765_v52 = vpop.f32.mrb[9].mxu0  ;;  %v3565_v53 = vpop.f32.mrb[9].mxu1 }
 0x12b   : > { %v2766_v56 = vpop.f32.mrb[10].mxu0  ;;  %v3566_v57 = vpop.f32.mrb[10].mxu1 }
 0x12c   : > { %v4350_v60 = vmax.f32 %v2764_v50, 0.0  ;;  %v4550_v61 = vmax.f32 %v3564_v51, 0.0  ;;  %v2767_v62 = vadd.f32 %v8931_v63, %v2766_v56  ;;  %v3567_v0 = vadd.f32 %v8931_v63, %v3566_v57  ;;  %v2768_v1 = vpop.f32.mrb[11].mxu0  ;;  %v3568_v2 = vpop.f32.mrb[11].mxu1 }
 0x12d   : > { %v8285_v1 = vld [vmem:[%s8759_s28 + $0x840] ss:$8 sps:$4 sm:$0xff]  }
 0x12e   : > { %v7635_v3 = vpack.c.bf16 %v4350_v60, %v4350_v60  ;;  %v7835_v4 = vpack.c.bf16 %v4550_v61, %v4550_v61  ;;  %v4351_v5 = vmax.f32 %v2767_v62, 0.0  ;;  %v4551_v6 = vmax.f32 %v3567_v0, 0.0  ;;  %2978 = vmatmul.mubr.bf16.gmra.mrb[116].mxu0 %v8266_v54  ;;  %3778 = vmatmul.mubr.bf16.gmra.mrb[116].mxu1 %v8267_v55  ;;  %v8284_v0 = vld [vmem:[%s8759_s28 + $0x200] ss:$8 sps:$4 sm:$0xff]  }
 0x12f   : > { %2985 = vmatprep.mubr.bf16.mxu0 %v8268_v58  ;;  %3785 = vmatprep.mubr.bf16.mxu1 %v8270_v59 }
 0x130   : > { %6351 = vst.msk [vmem:[%s8945_s4 + $0x10] sm:$0xf] %vm6346_vm0, %v7635_v3  ;;  %6551 = vst.msk [vmem:[%s8945_s4 + $0x330] sm:$0xf] %vm6346_vm0, %v7835_v4  ;;  %v7636_v7 = vpack.c.bf16 %v4351_v5, %v4351_v5  ;;  %v7836_v8 = vpack.c.bf16 %v4551_v6, %v4551_v6  ;;  %v8286_v4 = vld [vmem:[%s8759_s28 + $0x214] ss:$8 sps:$4 sm:$0xff]  }
 0x131   : > { %v2771_v9 = vpop.f32.mrb[12].mxu0  ;;  %v3571_v10 = vpop.f32.mrb[12].mxu1  ;;  %v8288_v5 = vld [vmem:[%s8759_s28 + $0x854] ss:$8 sps:$4 sm:$0xff]  }
 0x132   : > { %6352 = vst.msk [vmem:[%s8945_s4 + $0x14] sm:$0xf] %vm6346_vm0, %v7636_v7  ;;  %6552 = vst.msk [vmem:[%s8945_s4 + $0x334] sm:$0xf] %vm6346_vm0, %v7836_v8  ;;  %v2772_v11 = vadd.f32 %v8931_v63, %v2771_v9  ;;  %v3572_v12 = vadd.f32 %v8931_v63, %v3571_v10  ;;  %v2773_v13 = vpop.f32.mrb[13].mxu0  ;;  %v3573_v14 = vpop.f32.mrb[13].mxu1 }
 0x133   : > { %v2774_v17 = vpop.f32.mrb[14].mxu0  ;;  %v3574_v18 = vpop.f32.mrb[14].mxu1 }
 0x134   : > { %v4352_v21 = vmax.f32 %v2772_v11, 0.0  ;;  %v4552_v22 = vmax.f32 %v3572_v12, 0.0  ;;  %v2775_v23 = vadd.f32 %v8931_v63, %v2774_v17  ;;  %v3575_v24 = vadd.f32 %v8931_v63, %v3574_v18  ;;  %v2776_v25 = vpop.f32.mrb[15].mxu0  ;;  %v3576_v26 = vpop.f32.mrb[15].mxu1 }
 0x135   : > { %v8291_v25 = vld [vmem:[%s8759_s28 + $0x850] ss:$8 sps:$4 sm:$0xff]  }
 0x136   : > { %v7637_v27 = vpack.c.bf16 %v4352_v21, %v4352_v21  ;;  %v7837_v28 = vpack.c.bf16 %v4552_v22, %v4552_v22  ;;  %v4353_v29 = vmax.f32 %v2775_v23, 0.0  ;;  %v4553_v30 = vmax.f32 %v3575_v24, 0.0  ;;  %2986 = vmatmul.mubr.bf16.gmra.mrb[120].mxu0 %v8272_v15  ;;  %3786 = vmatmul.mubr.bf16.gmra.mrb[120].mxu1 %v8273_v16  ;;  %v8290_v24 = vld [vmem:[%s8759_s28 + $0x210] ss:$8 sps:$4 sm:$0xff]  }
 0x137   : > { %2993 = vmatprep.mubr.bf16.mxu0 %v8274_v19  ;;  %3793 = vmatprep.mubr.bf16.mxu1 %v8276_v20 }
 0x138   : > { %6353 = vst.msk [vmem:[%s8945_s4 + $0x18] sm:$0xf] %vm6346_vm0, %v7637_v27  ;;  %6553 = vst.msk [vmem:[%s8945_s4 + $0x338] sm:$0xf] %vm6346_vm0, %v7837_v28  ;;  %v7638_v31 = vpack.c.bf16 %v4353_v29, %v4353_v29  ;;  %v7838_v32 = vpack.c.bf16 %v4553_v30, %v4553_v30  ;;  %v8292_v28 = vld [vmem:[%s8759_s28 + $0x224] ss:$8 sps:$4 sm:$0xff]  }
 0x139   : > { %v2779_v33 = vpop.f32.mrb[16].mxu0  ;;  %v3579_v34 = vpop.f32.mrb[16].mxu1  ;;  %v8294_v29 = vld [vmem:[%s8759_s28 + $0x864] ss:$8 sps:$4 sm:$0xff]  }
 0x13a   : > { %6354 = vst.msk [vmem:[%s8945_s4 + $0x1c] sm:$0xf] %vm6346_vm0, %v7638_v31  ;;  %6554 = vst.msk [vmem:[%s8945_s4 + $0x33c] sm:$0xf] %vm6346_vm0, %v7838_v32  ;;  %v2780_v35 = vadd.f32 %v8931_v63, %v2779_v33  ;;  %v3580_v36 = vadd.f32 %v8931_v63, %v3579_v34  ;;  %v2781_v37 = vpop.f32.mrb[17].mxu0  ;;  %v3581_v38 = vpop.f32.mrb[17].mxu1 }
 0x13b   : > { %v2782_v41 = vpop.f32.mrb[18].mxu0  ;;  %v3582_v42 = vpop.f32.mrb[18].mxu1 }
 0x13c   : > { %v4354_v45 = vmax.f32 %v2780_v35, 0.0  ;;  %v4554_v46 = vmax.f32 %v3580_v36, 0.0  ;;  %v2783_v47 = vadd.f32 %v8931_v63, %v2782_v41  ;;  %v3583_v48 = vadd.f32 %v8931_v63, %v3582_v42  ;;  %v2784_v49 = vpop.f32.mrb[19].mxu0  ;;  %v3584_v50 = vpop.f32.mrb[19].mxu1 }
 0x13d   : > { %v8297_v49 = vld [vmem:[%s8759_s28 + $0x860] ss:$8 sps:$4 sm:$0xff]  }
 0x13e   : > { %v7639_v51 = vpack.c.bf16 %v4354_v45, %v4354_v45  ;;  %v7839_v52 = vpack.c.bf16 %v4554_v46, %v4554_v46  ;;  %v4355_v53 = vmax.f32 %v2783_v47, 0.0  ;;  %v4555_v54 = vmax.f32 %v3583_v48, 0.0  ;;  %2994 = vmatmul.mubr.bf16.gmra.mrb[124].mxu0 %v8278_v39  ;;  %3794 = vmatmul.mubr.bf16.gmra.mrb[124].mxu1 %v8279_v40  ;;  %v8296_v48 = vld [vmem:[%s8759_s28 + $0x220] ss:$8 sps:$4 sm:$0xff]  }
 0x13f   : > { %3001 = vmatprep.mubr.bf16.mxu0 %v8280_v43  ;;  %3801 = vmatprep.mubr.bf16.mxu1 %v8282_v44 }
 0x140   : > { %6355 = vst.msk [vmem:[%s8945_s4 + $0x20] sm:$0xf] %vm6346_vm0, %v7639_v51  ;;  %6555 = vst.msk [vmem:[%s8945_s4 + $0x340] sm:$0xf] %vm6346_vm0, %v7839_v52  ;;  %v7640_v55 = vpack.c.bf16 %v4355_v53, %v4355_v53  ;;  %v7840_v56 = vpack.c.bf16 %v4555_v54, %v4555_v54  ;;  %v8298_v52 = vld [vmem:[%s8759_s28 + $0x234] ss:$8 sps:$4 sm:$0xff]  }
 0x141   : > { %v2787_v57 = vpop.f32.mrb[20].mxu0  ;;  %v3587_v58 = vpop.f32.mrb[20].mxu1  ;;  %v8300_v53 = vld [vmem:[%s8759_s28 + $0x874] ss:$8 sps:$4 sm:$0xff]  }
 0x142   : > { %6356 = vst.msk [vmem:[%s8945_s4 + $0x24] sm:$0xf] %vm6346_vm0, %v7640_v55  ;;  %6556 = vst.msk [vmem:[%s8945_s4 + $0x344] sm:$0xf] %vm6346_vm0, %v7840_v56  ;;  %v2788_v59 = vadd.f32 %v8931_v63, %v2787_v57  ;;  %v3588_v60 = vadd.f32 %v8931_v63, %v3587_v58  ;;  %v2789_v61 = vpop.f32.mrb[21].mxu0  ;;  %v3589_v62 = vpop.f32.mrb[21].mxu1 }
 0x143   : > { %v2790_v2 = vpop.f32.mrb[22].mxu0  ;;  %v3590_v3 = vpop.f32.mrb[22].mxu1 }
 0x144   : > { %v4356_v6 = vmax.f32 %v2788_v59, 0.0  ;;  %v4556_v7 = vmax.f32 %v3588_v60, 0.0  ;;  %v2791_v8 = vadd.f32 %v8931_v63, %v2790_v2  ;;  %v3591_v9 = vadd.f32 %v8931_v63, %v3590_v3  ;;  %v2792_v10 = vpop.f32.mrb[23].mxu0  ;;  %v3592_v11 = vpop.f32.mrb[23].mxu1 }
 0x145   : > { %v8303_v10 = vld [vmem:[%s8759_s28 + $0x870] ss:$8 sps:$4 sm:$0xff]  }
 0x146   : > { %v7641_v12 = vpack.c.bf16 %v4356_v6, %v4356_v6  ;;  %v7841_v13 = vpack.c.bf16 %v4556_v7, %v4556_v7  ;;  %v4357_v14 = vmax.f32 %v2791_v8, 0.0  ;;  %v4557_v15 = vmax.f32 %v3591_v9, 0.0  ;;  %3002 = vmatmul.mubr.bf16.gmra.mrb[128].mxu0 %v8284_v0  ;;  %3802 = vmatmul.mubr.bf16.gmra.mrb[128].mxu1 %v8285_v1  ;;  %v8302_v9 = vld [vmem:[%s8759_s28 + $0x230] ss:$8 sps:$4 sm:$0xff]  }
 0x147   : > { %3009 = vmatprep.mubr.bf16.mxu0 %v8286_v4  ;;  %3809 = vmatprep.mubr.bf16.mxu1 %v8288_v5 }
 0x148   : > { %6357 = vst.msk [vmem:[%s8945_s4 + $0x28] sm:$0xf] %vm6346_vm0, %v7641_v12  ;;  %6557 = vst.msk [vmem:[%s8945_s4 + $0x348] sm:$0xf] %vm6346_vm0, %v7841_v13  ;;  %v7642_v16 = vpack.c.bf16 %v4357_v14, %v4357_v14  ;;  %v7842_v17 = vpack.c.bf16 %v4557_v15, %v4557_v15  ;;  %v8304_v13 = vld [vmem:[%s8759_s28 + $0x244] ss:$8 sps:$4 sm:$0xff]  }
 0x149   : > { %v2795_v18 = vpop.f32.mrb[24].mxu0  ;;  %v3595_v19 = vpop.f32.mrb[24].mxu1  ;;  %v8306_v14 = vld [vmem:[%s8759_s28 + $0x884] ss:$8 sps:$4 sm:$0xff]  }
 0x14a   : > { %6358 = vst.msk [vmem:[%s8945_s4 + $0x2c] sm:$0xf] %vm6346_vm0, %v7642_v16  ;;  %6558 = vst.msk [vmem:[%s8945_s4 + $0x34c] sm:$0xf] %vm6346_vm0, %v7842_v17  ;;  %v2796_v20 = vadd.f32 %v8931_v63, %v2795_v18  ;;  %v3596_v21 = vadd.f32 %v8931_v63, %v3595_v19  ;;  %v2797_v22 = vpop.f32.mrb[25].mxu0  ;;  %v3597_v23 = vpop.f32.mrb[25].mxu1 }
 0x14b   : > { %v2798_v26 = vpop.f32.mrb[26].mxu0  ;;  %v3598_v27 = vpop.f32.mrb[26].mxu1 }
 0x14c   : > { %v4358_v30 = vmax.f32 %v2796_v20, 0.0  ;;  %v4558_v31 = vmax.f32 %v3596_v21, 0.0  ;;  %v2799_v32 = vadd.f32 %v8931_v63, %v2798_v26  ;;  %v3599_v33 = vadd.f32 %v8931_v63, %v3598_v27  ;;  %v2800_v34 = vpop.f32.mrb[27].mxu0  ;;  %v3600_v35 = vpop.f32.mrb[27].mxu1 }
 0x14d   : > { %v8309_v34 = vld [vmem:[%s8759_s28 + $0x880] ss:$8 sps:$4 sm:$0xff]  }
 0x14e   : > { %v7643_v36 = vpack.c.bf16 %v4358_v30, %v4358_v30  ;;  %v7843_v37 = vpack.c.bf16 %v4558_v31, %v4558_v31  ;;  %v4359_v38 = vmax.f32 %v2799_v32, 0.0  ;;  %v4559_v39 = vmax.f32 %v3599_v33, 0.0  ;;  %3010 = vmatmul.mubr.bf16.gmra.mrb[132].mxu0 %v8290_v24  ;;  %3810 = vmatmul.mubr.bf16.gmra.mrb[132].mxu1 %v8291_v25  ;;  %v8308_v33 = vld [vmem:[%s8759_s28 + $0x240] ss:$8 sps:$4 sm:$0xff]  }
 0x14f   : > { %3017 = vmatprep.mubr.bf16.mxu0 %v8292_v28  ;;  %3817 = vmatprep.mubr.bf16.mxu1 %v8294_v29 }
 0x150   : > { %6359 = vst.msk [vmem:[%s8945_s4 + $0x30] sm:$0xf] %vm6346_vm0, %v7643_v36  ;;  %6559 = vst.msk [vmem:[%s8945_s4 + $0x350] sm:$0xf] %vm6346_vm0, %v7843_v37  ;;  %v7644_v40 = vpack.c.bf16 %v4359_v38, %v4359_v38  ;;  %v7844_v41 = vpack.c.bf16 %v4559_v39, %v4559_v39  ;;  %v8310_v37 = vld [vmem:[%s8759_s28 + $0x254] ss:$8 sps:$4 sm:$0xff]  }
 0x151   : > { %v2803_v42 = vpop.f32.mrb[28].mxu0  ;;  %v3603_v43 = vpop.f32.mrb[28].mxu1  ;;  %v8312_v38 = vld [vmem:[%s8759_s28 + $0x894] ss:$8 sps:$4 sm:$0xff]  }
 0x152   : > { %6360 = vst.msk [vmem:[%s8945_s4 + $0x34] sm:$0xf] %vm6346_vm0, %v7644_v40  ;;  %6560 = vst.msk [vmem:[%s8945_s4 + $0x354] sm:$0xf] %vm6346_vm0, %v7844_v41  ;;  %v2804_v44 = vadd.f32 %v8931_v63, %v2803_v42  ;;  %v3604_v45 = vadd.f32 %v8931_v63, %v3603_v43  ;;  %v2805_v46 = vpop.f32.mrb[29].mxu0  ;;  %v3605_v47 = vpop.f32.mrb[29].mxu1 }
 0x153   : > { %v2806_v50 = vpop.f32.mrb[30].mxu0  ;;  %v3606_v51 = vpop.f32.mrb[30].mxu1 }
 0x154   : > { %v4360_v54 = vmax.f32 %v2804_v44, 0.0  ;;  %v4560_v55 = vmax.f32 %v3604_v45, 0.0  ;;  %v2807_v56 = vadd.f32 %v8931_v63, %v2806_v50  ;;  %v3607_v57 = vadd.f32 %v8931_v63, %v3606_v51  ;;  %v2808_v58 = vpop.f32.mrb[31].mxu0  ;;  %v3608_v59 = vpop.f32.mrb[31].mxu1 }
 0x155   : > { %v8315_v58 = vld [vmem:[%s8759_s28 + $0x890] ss:$8 sps:$4 sm:$0xff]  }
 0x156   : > { %v7645_v60 = vpack.c.bf16 %v4360_v54, %v4360_v54  ;;  %v7845_v61 = vpack.c.bf16 %v4560_v55, %v4560_v55  ;;  %v4361_v62 = vmax.f32 %v2807_v56, 0.0  ;;  %v4561_v0 = vmax.f32 %v3607_v57, 0.0  ;;  %3018 = vmatmul.mubr.bf16.gmra.mrb[136].mxu0 %v8296_v48  ;;  %3818 = vmatmul.mubr.bf16.gmra.mrb[136].mxu1 %v8297_v49  ;;  %v8314_v57 = vld [vmem:[%s8759_s28 + $0x250] ss:$8 sps:$4 sm:$0xff]  }
 0x157   : > { %3025 = vmatprep.mubr.bf16.mxu0 %v8298_v52  ;;  %3825 = vmatprep.mubr.bf16.mxu1 %v8300_v53 }
 0x158   : > { %6361 = vst.msk [vmem:[%s8945_s4 + $0x38] sm:$0xf] %vm6346_vm0, %v7645_v60  ;;  %6561 = vst.msk [vmem:[%s8945_s4 + $0x358] sm:$0xf] %vm6346_vm0, %v7845_v61  ;;  %v7646_v1 = vpack.c.bf16 %v4361_v62, %v4361_v62  ;;  %v7846_v2 = vpack.c.bf16 %v4561_v0, %v4561_v0  ;;  %v8316_v61 = vld [vmem:[%s8759_s28 + $0x264] ss:$8 sps:$4 sm:$0xff]  }
 0x159   : > { %v2811_v3 = vpop.f32.mrb[32].mxu0  ;;  %v3611_v4 = vpop.f32.mrb[32].mxu1  ;;  %v8318_v62 = vld [vmem:[%s8759_s28 + $0x8a4] ss:$8 sps:$4 sm:$0xff]  }
 0x15a   : > { %6362 = vst.msk [vmem:[%s8945_s4 + $0x3c] sm:$0xf] %vm6346_vm0, %v7646_v1  ;;  %6562 = vst.msk [vmem:[%s8945_s4 + $0x35c] sm:$0xf] %vm6346_vm0, %v7846_v2  ;;  %v2812_v5 = vadd.f32 %v8931_v63, %v2811_v3  ;;  %v3612_v6 = vadd.f32 %v8931_v63, %v3611_v4  ;;  %v2813_v7 = vpop.f32.mrb[33].mxu0  ;;  %v3613_v8 = vpop.f32.mrb[33].mxu1 }
 0x15b   : > { %v2814_v11 = vpop.f32.mrb[34].mxu0  ;;  %v3614_v12 = vpop.f32.mrb[34].mxu1 }
 0x15c   : > { %v4362_v15 = vmax.f32 %v2812_v5, 0.0  ;;  %v4562_v16 = vmax.f32 %v3612_v6, 0.0  ;;  %v2815_v17 = vadd.f32 %v8931_v63, %v2814_v11  ;;  %v3615_v18 = vadd.f32 %v8931_v63, %v3614_v12  ;;  %v2816_v19 = vpop.f32.mrb[35].mxu0  ;;  %v3616_v20 = vpop.f32.mrb[35].mxu1 }
 0x15d   : > { %v8321_v19 = vld [vmem:[%s8759_s28 + $0x8a0] ss:$8 sps:$4 sm:$0xff]  }
 0x15e   : > { %v7647_v21 = vpack.c.bf16 %v4362_v15, %v4362_v15  ;;  %v7847_v22 = vpack.c.bf16 %v4562_v16, %v4562_v16  ;;  %v4363_v23 = vmax.f32 %v2815_v17, 0.0  ;;  %v4563_v24 = vmax.f32 %v3615_v18, 0.0  ;;  %3026 = vmatmul.mubr.bf16.gmra.mrb[140].mxu0 %v8302_v9  ;;  %3826 = vmatmul.mubr.bf16.gmra.mrb[140].mxu1 %v8303_v10  ;;  %v8320_v18 = vld [vmem:[%s8759_s28 + $0x260] ss:$8 sps:$4 sm:$0xff]  }
 0x15f   : > { %3033 = vmatprep.mubr.bf16.mxu0 %v8304_v13  ;;  %3833 = vmatprep.mubr.bf16.mxu1 %v8306_v14 }
 0x160   : > { %6363 = vst.msk [vmem:[%s8945_s4 + $0x40] sm:$0xf] %vm6346_vm0, %v7647_v21  ;;  %6563 = vst.msk [vmem:[%s8945_s4 + $0x360] sm:$0xf] %vm6346_vm0, %v7847_v22  ;;  %v7648_v25 = vpack.c.bf16 %v4363_v23, %v4363_v23  ;;  %v7848_v26 = vpack.c.bf16 %v4563_v24, %v4563_v24  ;;  %v8322_v22 = vld [vmem:[%s8759_s28 + $0x274] ss:$8 sps:$4 sm:$0xff]  }
 0x161   : > { %v2819_v27 = vpop.f32.mrb[36].mxu0  ;;  %v3619_v28 = vpop.f32.mrb[36].mxu1  ;;  %v8324_v23 = vld [vmem:[%s8759_s28 + $0x8b4] ss:$8 sps:$4 sm:$0xff]  }
 0x162   : > { %6364 = vst.msk [vmem:[%s8945_s4 + $0x44] sm:$0xf] %vm6346_vm0, %v7648_v25  ;;  %6564 = vst.msk [vmem:[%s8945_s4 + $0x364] sm:$0xf] %vm6346_vm0, %v7848_v26  ;;  %v2820_v29 = vadd.f32 %v8931_v63, %v2819_v27  ;;  %v3620_v30 = vadd.f32 %v8931_v63, %v3619_v28  ;;  %v2821_v31 = vpop.f32.mrb[37].mxu0  ;;  %v3621_v32 = vpop.f32.mrb[37].mxu1 }
 0x163   : > { %v2822_v35 = vpop.f32.mrb[38].mxu0  ;;  %v3622_v36 = vpop.f32.mrb[38].mxu1 }
 0x164   : > { %v4364_v39 = vmax.f32 %v2820_v29, 0.0  ;;  %v4564_v40 = vmax.f32 %v3620_v30, 0.0  ;;  %v2823_v41 = vadd.f32 %v8931_v63, %v2822_v35  ;;  %v3623_v42 = vadd.f32 %v8931_v63, %v3622_v36  ;;  %v2824_v43 = vpop.f32.mrb[39].mxu0  ;;  %v3624_v44 = vpop.f32.mrb[39].mxu1 }
 0x165   : > { %v8327_v43 = vld [vmem:[%s8759_s28 + $0x8b0] ss:$8 sps:$4 sm:$0xff]  }
 0x166   : > { %v7649_v45 = vpack.c.bf16 %v4364_v39, %v4364_v39  ;;  %v7849_v46 = vpack.c.bf16 %v4564_v40, %v4564_v40  ;;  %v4365_v47 = vmax.f32 %v2823_v41, 0.0  ;;  %v4565_v48 = vmax.f32 %v3623_v42, 0.0  ;;  %3034 = vmatmul.mubr.bf16.gmra.mrb[144].mxu0 %v8308_v33  ;;  %3834 = vmatmul.mubr.bf16.gmra.mrb[144].mxu1 %v8309_v34  ;;  %v8326_v42 = vld [vmem:[%s8759_s28 + $0x270] ss:$8 sps:$4 sm:$0xff]  }
 0x167   : > { %3041 = vmatprep.mubr.bf16.mxu0 %v8310_v37  ;;  %3841 = vmatprep.mubr.bf16.mxu1 %v8312_v38 }
 0x168   : > { %6365 = vst.msk [vmem:[%s8945_s4 + $0x48] sm:$0xf] %vm6346_vm0, %v7649_v45  ;;  %6565 = vst.msk [vmem:[%s8945_s4 + $0x368] sm:$0xf] %vm6346_vm0, %v7849_v46  ;;  %v7650_v49 = vpack.c.bf16 %v4365_v47, %v4365_v47  ;;  %v7850_v50 = vpack.c.bf16 %v4565_v48, %v4565_v48  ;;  %v8328_v46 = vld [vmem:[%s8759_s28 + $0x284] ss:$8 sps:$4 sm:$0xff]  }
 0x169   : > { %v2827_v51 = vpop.f32.mrb[40].mxu0  ;;  %v3627_v52 = vpop.f32.mrb[40].mxu1  ;;  %v8330_v47 = vld [vmem:[%s8759_s28 + $0x8c4] ss:$8 sps:$4 sm:$0xff]  }
 0x16a   : > { %6366 = vst.msk [vmem:[%s8945_s4 + $0x4c] sm:$0xf] %vm6346_vm0, %v7650_v49  ;;  %6566 = vst.msk [vmem:[%s8945_s4 + $0x36c] sm:$0xf] %vm6346_vm0, %v7850_v50  ;;  %v2828_v53 = vadd.f32 %v8931_v63, %v2827_v51  ;;  %v3628_v54 = vadd.f32 %v8931_v63, %v3627_v52  ;;  %v2829_v55 = vpop.f32.mrb[41].mxu0  ;;  %v3629_v56 = vpop.f32.mrb[41].mxu1 }
 0x16b   : > { %v2830_v59 = vpop.f32.mrb[42].mxu0  ;;  %v3630_v60 = vpop.f32.mrb[42].mxu1 }
 0x16c   : > { %v4366_v0 = vmax.f32 %v2828_v53, 0.0  ;;  %v4566_v1 = vmax.f32 %v3628_v54, 0.0  ;;  %v2831_v2 = vadd.f32 %v8931_v63, %v2830_v59  ;;  %v3631_v3 = vadd.f32 %v8931_v63, %v3630_v60  ;;  %v2832_v4 = vpop.f32.mrb[43].mxu0  ;;  %v3632_v5 = vpop.f32.mrb[43].mxu1 }
 0x16d   : > { %v8333_v4 = vld [vmem:[%s8759_s28 + $0x8c0] ss:$8 sps:$4 sm:$0xff]  }
 0x16e   : > { %v7651_v6 = vpack.c.bf16 %v4366_v0, %v4366_v0  ;;  %v7851_v7 = vpack.c.bf16 %v4566_v1, %v4566_v1  ;;  %v4367_v8 = vmax.f32 %v2831_v2, 0.0  ;;  %v4567_v9 = vmax.f32 %v3631_v3, 0.0  ;;  %3042 = vmatmul.mubr.bf16.gmra.mrb[148].mxu0 %v8314_v57  ;;  %3842 = vmatmul.mubr.bf16.gmra.mrb[148].mxu1 %v8315_v58  ;;  %v8332_v3 = vld [vmem:[%s8759_s28 + $0x280] ss:$8 sps:$4 sm:$0xff]  }
 0x16f   : > { %3049 = vmatprep.mubr.bf16.mxu0 %v8316_v61  ;;  %3849 = vmatprep.mubr.bf16.mxu1 %v8318_v62 }
 0x170   : > { %6367 = vst.msk [vmem:[%s8945_s4 + $0x50] sm:$0xf] %vm6346_vm0, %v7651_v6  ;;  %6567 = vst.msk [vmem:[%s8945_s4 + $0x370] sm:$0xf] %vm6346_vm0, %v7851_v7  ;;  %v7652_v10 = vpack.c.bf16 %v4367_v8, %v4367_v8  ;;  %v7852_v11 = vpack.c.bf16 %v4567_v9, %v4567_v9  ;;  %v8334_v7 = vld [vmem:[%s8759_s28 + $0x294] ss:$8 sps:$4 sm:$0xff]  }
 0x171   : > { %v2835_v12 = vpop.f32.mrb[44].mxu0  ;;  %v3635_v13 = vpop.f32.mrb[44].mxu1  ;;  %v8336_v8 = vld [vmem:[%s8759_s28 + $0x8d4] ss:$8 sps:$4 sm:$0xff]  }
 0x172   : > { %6368 = vst.msk [vmem:[%s8945_s4 + $0x54] sm:$0xf] %vm6346_vm0, %v7652_v10  ;;  %6568 = vst.msk [vmem:[%s8945_s4 + $0x374] sm:$0xf] %vm6346_vm0, %v7852_v11  ;;  %v2836_v14 = vadd.f32 %v8931_v63, %v2835_v12  ;;  %v3636_v15 = vadd.f32 %v8931_v63, %v3635_v13  ;;  %v2837_v16 = vpop.f32.mrb[45].mxu0  ;;  %v3637_v17 = vpop.f32.mrb[45].mxu1 }
 0x173   : > { %v2838_v20 = vpop.f32.mrb[46].mxu0  ;;  %v3638_v21 = vpop.f32.mrb[46].mxu1 }
 0x174   : > { %v4368_v24 = vmax.f32 %v2836_v14, 0.0  ;;  %v4568_v25 = vmax.f32 %v3636_v15, 0.0  ;;  %v2839_v26 = vadd.f32 %v8931_v63, %v2838_v20  ;;  %v3639_v27 = vadd.f32 %v8931_v63, %v3638_v21  ;;  %v2840_v28 = vpop.f32.mrb[47].mxu0  ;;  %v3640_v29 = vpop.f32.mrb[47].mxu1 }
 0x175   : > { %v8339_v28 = vld [vmem:[%s8759_s28 + $0x8d0] ss:$8 sps:$4 sm:$0xff]  }
 0x176   : > { %v7653_v30 = vpack.c.bf16 %v4368_v24, %v4368_v24  ;;  %v7853_v31 = vpack.c.bf16 %v4568_v25, %v4568_v25  ;;  %v4369_v32 = vmax.f32 %v2839_v26, 0.0  ;;  %v4569_v33 = vmax.f32 %v3639_v27, 0.0  ;;  %3050 = vmatmul.mubr.bf16.gmra.mrb[152].mxu0 %v8320_v18  ;;  %3850 = vmatmul.mubr.bf16.gmra.mrb[152].mxu1 %v8321_v19  ;;  %v8338_v27 = vld [vmem:[%s8759_s28 + $0x290] ss:$8 sps:$4 sm:$0xff]  }
 0x177   : > { %3057 = vmatprep.mubr.bf16.mxu0 %v8322_v22  ;;  %3857 = vmatprep.mubr.bf16.mxu1 %v8324_v23 }
 0x178   : > { %6369 = vst.msk [vmem:[%s8945_s4 + $0x58] sm:$0xf] %vm6346_vm0, %v7653_v30  ;;  %6569 = vst.msk [vmem:[%s8945_s4 + $0x378] sm:$0xf] %vm6346_vm0, %v7853_v31  ;;  %v7654_v34 = vpack.c.bf16 %v4369_v32, %v4369_v32  ;;  %v7854_v35 = vpack.c.bf16 %v4569_v33, %v4569_v33  ;;  %v8340_v31 = vld [vmem:[%s8759_s28 + $0x2a4] ss:$8 sps:$4 sm:$0xff]  }
 0x179   : > { %v2843_v36 = vpop.f32.mrb[48].mxu0  ;;  %v3643_v37 = vpop.f32.mrb[48].mxu1  ;;  %v8342_v32 = vld [vmem:[%s8759_s28 + $0x8e4] ss:$8 sps:$4 sm:$0xff]  }
 0x17a   : > { %6370 = vst.msk [vmem:[%s8945_s4 + $0x5c] sm:$0xf] %vm6346_vm0, %v7654_v34  ;;  %6570 = vst.msk [vmem:[%s8945_s4 + $0x37c] sm:$0xf] %vm6346_vm0, %v7854_v35  ;;  %v2844_v38 = vadd.f32 %v8931_v63, %v2843_v36  ;;  %v3644_v39 = vadd.f32 %v8931_v63, %v3643_v37  ;;  %v2845_v40 = vpop.f32.mrb[49].mxu0  ;;  %v3645_v41 = vpop.f32.mrb[49].mxu1 }
 0x17b   : > { %v2846_v44 = vpop.f32.mrb[50].mxu0  ;;  %v3646_v45 = vpop.f32.mrb[50].mxu1 }
 0x17c   : > { %v4370_v48 = vmax.f32 %v2844_v38, 0.0  ;;  %v4570_v49 = vmax.f32 %v3644_v39, 0.0  ;;  %v2847_v50 = vadd.f32 %v8931_v63, %v2846_v44  ;;  %v3647_v51 = vadd.f32 %v8931_v63, %v3646_v45  ;;  %v2848_v52 = vpop.f32.mrb[51].mxu0  ;;  %v3648_v53 = vpop.f32.mrb[51].mxu1 }
 0x17d   : > { %v8345_v52 = vld [vmem:[%s8759_s28 + $0x8e0] ss:$8 sps:$4 sm:$0xff]  }
 0x17e   : > { %v7655_v54 = vpack.c.bf16 %v4370_v48, %v4370_v48  ;;  %v7855_v55 = vpack.c.bf16 %v4570_v49, %v4570_v49  ;;  %v4371_v56 = vmax.f32 %v2847_v50, 0.0  ;;  %v4571_v57 = vmax.f32 %v3647_v51, 0.0  ;;  %3058 = vmatmul.mubr.bf16.gmra.mrb[156].mxu0 %v8326_v42  ;;  %3858 = vmatmul.mubr.bf16.gmra.mrb[156].mxu1 %v8327_v43  ;;  %v8344_v51 = vld [vmem:[%s8759_s28 + $0x2a0] ss:$8 sps:$4 sm:$0xff]  }
 0x17f   : > { %3065 = vmatprep.mubr.bf16.mxu0 %v8328_v46  ;;  %3865 = vmatprep.mubr.bf16.mxu1 %v8330_v47 }
 0x180   : > { %6371 = vst.msk [vmem:[%s8945_s4 + $0x60] sm:$0xf] %vm6346_vm0, %v7655_v54  ;;  %6571 = vst.msk [vmem:[%s8945_s4 + $0x380] sm:$0xf] %vm6346_vm0, %v7855_v55  ;;  %v7656_v58 = vpack.c.bf16 %v4371_v56, %v4371_v56  ;;  %v7856_v59 = vpack.c.bf16 %v4571_v57, %v4571_v57  ;;  %v8346_v55 = vld [vmem:[%s8759_s28 + $0x2b4] ss:$8 sps:$4 sm:$0xff]  }
 0x181   : > { %v2851_v60 = vpop.f32.mrb[52].mxu0  ;;  %v3651_v61 = vpop.f32.mrb[52].mxu1  ;;  %v8348_v56 = vld [vmem:[%s8759_s28 + $0x8f4] ss:$8 sps:$4 sm:$0xff]  }
 0x182   : > { %6372 = vst.msk [vmem:[%s8945_s4 + $0x64] sm:$0xf] %vm6346_vm0, %v7656_v58  ;;  %6572 = vst.msk [vmem:[%s8945_s4 + $0x384] sm:$0xf] %vm6346_vm0, %v7856_v59  ;;  %v2852_v62 = vadd.f32 %v8931_v63, %v2851_v60  ;;  %v3652_v0 = vadd.f32 %v8931_v63, %v3651_v61  ;;  %v2853_v1 = vpop.f32.mrb[53].mxu0  ;;  %v3653_v2 = vpop.f32.mrb[53].mxu1 }
 0x183   : > { %v2854_v5 = vpop.f32.mrb[54].mxu0  ;;  %v3654_v6 = vpop.f32.mrb[54].mxu1 }
 0x184   : > { %v4372_v9 = vmax.f32 %v2852_v62, 0.0  ;;  %v4572_v10 = vmax.f32 %v3652_v0, 0.0  ;;  %v2855_v11 = vadd.f32 %v8931_v63, %v2854_v5  ;;  %v3655_v12 = vadd.f32 %v8931_v63, %v3654_v6  ;;  %v2856_v13 = vpop.f32.mrb[55].mxu0  ;;  %v3656_v14 = vpop.f32.mrb[55].mxu1 }
 0x185   : > { %v8351_v13 = vld [vmem:[%s8759_s28 + $0x8f0] ss:$8 sps:$4 sm:$0xff]  }
 0x186   : > { %v7657_v15 = vpack.c.bf16 %v4372_v9, %v4372_v9  ;;  %v7857_v16 = vpack.c.bf16 %v4572_v10, %v4572_v10  ;;  %v4373_v17 = vmax.f32 %v2855_v11, 0.0  ;;  %v4573_v18 = vmax.f32 %v3655_v12, 0.0  ;;  %3066 = vmatmul.mubr.bf16.gmra.mrb[160].mxu0 %v8332_v3  ;;  %3866 = vmatmul.mubr.bf16.gmra.mrb[160].mxu1 %v8333_v4  ;;  %v8350_v12 = vld [vmem:[%s8759_s28 + $0x2b0] ss:$8 sps:$4 sm:$0xff]  }
 0x187   : > { %3073 = vmatprep.mubr.bf16.mxu0 %v8334_v7  ;;  %3873 = vmatprep.mubr.bf16.mxu1 %v8336_v8  ;;  %v9198_v7 = vld [vmem:[%s10459_s2] ss:$0 sm:$0xff] }
 0x188   : > { %6373 = vst.msk [vmem:[%s8945_s4 + $0x68] sm:$0xf] %vm6346_vm0, %v7657_v15  ;;  %6573 = vst.msk [vmem:[%s8945_s4 + $0x388] sm:$0xf] %vm6346_vm0, %v7857_v16  ;;  %v7658_v19 = vpack.c.bf16 %v4373_v17, %v4373_v17  ;;  %v7858_v20 = vpack.c.bf16 %v4573_v18, %v4573_v18  ;;  %v8352_v16 = vld [vmem:[%s8759_s28 + $0x2c4] ss:$8 sps:$4 sm:$0xff]  }
 0x189   : > { %v2859_v21 = vpop.f32.mrb[56].mxu0  ;;  %v3659_v22 = vpop.f32.mrb[56].mxu1  ;;  %v8354_v17 = vld [vmem:[%s8759_s28 + $0x904] ss:$8 sps:$4 sm:$0xff]  }
 0x18a   : > { %6374 = vst.msk [vmem:[%s8945_s4 + $0x6c] sm:$0xf] %vm6346_vm0, %v7658_v19  ;;  %6574 = vst.msk [vmem:[%s8945_s4 + $0x38c] sm:$0xf] %vm6346_vm0, %v7858_v20  ;;  %v2860_v23 = vadd.f32 %v8931_v63, %v2859_v21  ;;  %v3660_v24 = vadd.f32 %v8931_v63, %v3659_v22  ;;  %v2861_v25 = vpop.f32.mrb[57].mxu0  ;;  %v3661_v26 = vpop.f32.mrb[57].mxu1 }
 0x18b   : > { %v2862_v29 = vpop.f32.mrb[58].mxu0  ;;  %v3662_v30 = vpop.f32.mrb[58].mxu1 }
 0x18c   : > { %v4374_v33 = vmax.f32 %v2860_v23, 0.0  ;;  %v4574_v34 = vmax.f32 %v3660_v24, 0.0  ;;  %v2863_v35 = vadd.f32 %v8931_v63, %v2862_v29  ;;  %v3663_v36 = vadd.f32 %v8931_v63, %v3662_v30  ;;  %v2864_v37 = vpop.f32.mrb[59].mxu0  ;;  %v3664_v38 = vpop.f32.mrb[59].mxu1 }
 0x18d   : > { %v8357_v37 = vld [vmem:[%s8759_s28 + $0x900] ss:$8 sps:$4 sm:$0xff]  }
 0x18e   : > { %v7659_v39 = vpack.c.bf16 %v4374_v33, %v4374_v33  ;;  %v7859_v40 = vpack.c.bf16 %v4574_v34, %v4574_v34  ;;  %v4375_v41 = vmax.f32 %v2863_v35, 0.0  ;;  %v4575_v42 = vmax.f32 %v3663_v36, 0.0  ;;  %3074 = vmatmul.mubr.bf16.gmra.mrb[164].mxu0 %v8338_v27  ;;  %3874 = vmatmul.mubr.bf16.gmra.mrb[164].mxu1 %v8339_v28  ;;  %v8356_v36 = vld [vmem:[%s8759_s28 + $0x2c0] ss:$8 sps:$4 sm:$0xff]  }
 0x18f   : > { %3081 = vmatprep.mubr.bf16.mxu0 %v8340_v31  ;;  %3881 = vmatprep.mubr.bf16.mxu1 %v8342_v32 }
 0x190   : > { %6375 = vst.msk [vmem:[%s8945_s4 + $0x70] sm:$0xf] %vm6346_vm0, %v7659_v39  ;;  %6575 = vst.msk [vmem:[%s8945_s4 + $0x390] sm:$0xf] %vm6346_vm0, %v7859_v40  ;;  %v7660_v43 = vpack.c.bf16 %v4375_v41, %v4375_v41  ;;  %v7860_v44 = vpack.c.bf16 %v4575_v42, %v4575_v42  ;;  %v8358_v40 = vld [vmem:[%s8759_s28 + $0x2d4] ss:$8 sps:$4 sm:$0xff]  }
 0x191   : > { %v2867_v45 = vpop.f32.mrb[60].mxu0  ;;  %v3667_v46 = vpop.f32.mrb[60].mxu1  ;;  %v8360_v41 = vld [vmem:[%s8759_s28 + $0x914] ss:$8 sps:$4 sm:$0xff]  }
 0x192   : > { %6376 = vst.msk [vmem:[%s8945_s4 + $0x74] sm:$0xf] %vm6346_vm0, %v7660_v43  ;;  %6576 = vst.msk [vmem:[%s8945_s4 + $0x394] sm:$0xf] %vm6346_vm0, %v7860_v44  ;;  %v2868_v47 = vadd.f32 %v8931_v63, %v2867_v45  ;;  %v3668_v48 = vadd.f32 %v8931_v63, %v3667_v46  ;;  %v2869_v49 = vpop.f32.mrb[61].mxu0  ;;  %v3669_v50 = vpop.f32.mrb[61].mxu1 }
 0x193   : > { %v2870_v53 = vpop.f32.mrb[62].mxu0  ;;  %v3670_v54 = vpop.f32.mrb[62].mxu1 }
 0x194   : > { %v4376_v57 = vmax.f32 %v2868_v47, 0.0  ;;  %v4576_v58 = vmax.f32 %v3668_v48, 0.0  ;;  %v2871_v59 = vadd.f32 %v8931_v63, %v2870_v53  ;;  %v3671_v60 = vadd.f32 %v8931_v63, %v3670_v54  ;;  %v2872_v61 = vpop.f32.mrb[63].mxu0  ;;  %v3672_v62 = vpop.f32.mrb[63].mxu1 }
 0x195   : > { %v8363_v61 = vld [vmem:[%s8759_s28 + $0x910] ss:$8 sps:$4 sm:$0xff]  }
 0x196   : > { %v7661_v0 = vpack.c.bf16 %v4376_v57, %v4376_v57  ;;  %v7861_v1 = vpack.c.bf16 %v4576_v58, %v4576_v58  ;;  %v4377_v2 = vmax.f32 %v2871_v59, 0.0  ;;  %v4577_v3 = vmax.f32 %v3671_v60, 0.0  ;;  %3082 = vmatmul.mubr.bf16.gmra.mrb[168].mxu0 %v8344_v51  ;;  %3882 = vmatmul.mubr.bf16.gmra.mrb[168].mxu1 %v8345_v52  ;;  %v8362_v60 = vld [vmem:[%s8759_s28 + $0x2d0] ss:$8 sps:$4 sm:$0xff]  }
 0x197   : > { %3089 = vmatprep.mubr.bf16.mxu0 %v8346_v55  ;;  %3889 = vmatprep.mubr.bf16.mxu1 %v8348_v56 }
 0x198   : > { %6377 = vst.msk [vmem:[%s8945_s4 + $0x78] sm:$0xf] %vm6346_vm0, %v7661_v0  ;;  %6577 = vst.msk [vmem:[%s8945_s4 + $0x398] sm:$0xf] %vm6346_vm0, %v7861_v1  ;;  %v7662_v63 = vpack.c.bf16 %v4377_v2, %v4377_v2  ;;  %v7862_v4 = vpack.c.bf16 %v4577_v3, %v4577_v3  ;;  %v8364_v1 = vld [vmem:[%s8759_s28 + $0x2e4] ss:$8 sps:$4 sm:$0xff]  }
 0x199   : > { %v2875_v5 = vpop.f32.mrb[64].mxu0  ;;  %v3675_v6 = vpop.f32.mrb[64].mxu1  ;;  %v8366_v2 = vld [vmem:[%s8759_s28 + $0x924] ss:$8 sps:$4 sm:$0xff]  }
 0x19a   : > { %6378 = vst.msk [vmem:[%s8945_s4 + $0x7c] sm:$0xf] %vm6346_vm0, %v7662_v63  ;;  %6578 = vst.msk [vmem:[%s8945_s4 + $0x39c] sm:$0xf] %vm6346_vm0, %v7862_v4  ;;  %v2876_v8 = vadd.f32 %v9198_v7, %v2875_v5  ;;  %v3676_v9 = vadd.f32 %v9198_v7, %v3675_v6  ;;  %v2877_v10 = vpop.f32.mrb[65].mxu0  ;;  %v3677_v11 = vpop.f32.mrb[65].mxu1 }
 0x19b   : > { %v2878_v14 = vpop.f32.mrb[66].mxu0  ;;  %v3678_v15 = vpop.f32.mrb[66].mxu1 }
 0x19c   : > { %v4378_v18 = vmax.f32 %v2876_v8, 0.0  ;;  %v4578_v19 = vmax.f32 %v3676_v9, 0.0  ;;  %v2879_v20 = vadd.f32 %v9198_v7, %v2878_v14  ;;  %v3679_v21 = vadd.f32 %v9198_v7, %v3678_v15  ;;  %v2880_v22 = vpop.f32.mrb[67].mxu0  ;;  %v3680_v23 = vpop.f32.mrb[67].mxu1 }
 0x19d   : > { %v8369_v22 = vld [vmem:[%s8759_s28 + $0x920] ss:$8 sps:$4 sm:$0xff]  }
 0x19e   : > { %v7663_v24 = vpack.c.bf16 %v4378_v18, %v4378_v18  ;;  %v7863_v25 = vpack.c.bf16 %v4578_v19, %v4578_v19  ;;  %v4379_v26 = vmax.f32 %v2879_v20, 0.0  ;;  %v4579_v27 = vmax.f32 %v3679_v21, 0.0  ;;  %3090 = vmatmul.mubr.bf16.gmra.mrb[172].mxu0 %v8350_v12  ;;  %3890 = vmatmul.mubr.bf16.gmra.mrb[172].mxu1 %v8351_v13  ;;  %v8368_v21 = vld [vmem:[%s8759_s28 + $0x2e0] ss:$8 sps:$4 sm:$0xff]  }
 0x19f   : > { %3097 = vmatprep.mubr.bf16.mxu0 %v8352_v16  ;;  %3897 = vmatprep.mubr.bf16.mxu1 %v8354_v17 }
 0x1a0   : > { %6379 = vst.msk [vmem:[%s8945_s4 + $0x80] sm:$0xf] %vm6346_vm0, %v7663_v24  ;;  %6579 = vst.msk [vmem:[%s8945_s4 + $0x3a0] sm:$0xf] %vm6346_vm0, %v7863_v25  ;;  %v7664_v28 = vpack.c.bf16 %v4379_v26, %v4379_v26  ;;  %v7864_v29 = vpack.c.bf16 %v4579_v27, %v4579_v27  ;;  %v8370_v25 = vld [vmem:[%s8759_s28 + $0x2f4] ss:$8 sps:$4 sm:$0xff]  }
 0x1a1   : > { %v2883_v30 = vpop.f32.mrb[68].mxu0  ;;  %v3683_v31 = vpop.f32.mrb[68].mxu1  ;;  %v8372_v26 = vld [vmem:[%s8759_s28 + $0x934] ss:$8 sps:$4 sm:$0xff]  }
 0x1a2   : > { %6380 = vst.msk [vmem:[%s8945_s4 + $0x84] sm:$0xf] %vm6346_vm0, %v7664_v28  ;;  %6580 = vst.msk [vmem:[%s8945_s4 + $0x3a4] sm:$0xf] %vm6346_vm0, %v7864_v29  ;;  %v2884_v32 = vadd.f32 %v9198_v7, %v2883_v30  ;;  %v3684_v33 = vadd.f32 %v9198_v7, %v3683_v31  ;;  %v2885_v34 = vpop.f32.mrb[69].mxu0  ;;  %v3685_v35 = vpop.f32.mrb[69].mxu1 }
 0x1a3   : > { %v2886_v38 = vpop.f32.mrb[70].mxu0  ;;  %v3686_v39 = vpop.f32.mrb[70].mxu1 }
 0x1a4   : > { %v4380_v42 = vmax.f32 %v2884_v32, 0.0  ;;  %v4580_v43 = vmax.f32 %v3684_v33, 0.0  ;;  %v2887_v44 = vadd.f32 %v9198_v7, %v2886_v38  ;;  %v3687_v45 = vadd.f32 %v9198_v7, %v3686_v39  ;;  %v2888_v46 = vpop.f32.mrb[71].mxu0  ;;  %v3688_v47 = vpop.f32.mrb[71].mxu1 }
 0x1a5   : > { %v8375_v46 = vld [vmem:[%s8759_s28 + $0x930] ss:$8 sps:$4 sm:$0xff]  }
 0x1a6   : > { %v7665_v48 = vpack.c.bf16 %v4380_v42, %v4380_v42  ;;  %v7865_v49 = vpack.c.bf16 %v4580_v43, %v4580_v43  ;;  %v4381_v50 = vmax.f32 %v2887_v44, 0.0  ;;  %v4581_v51 = vmax.f32 %v3687_v45, 0.0  ;;  %3098 = vmatmul.mubr.bf16.gmra.mrb[176].mxu0 %v8356_v36  ;;  %3898 = vmatmul.mubr.bf16.gmra.mrb[176].mxu1 %v8357_v37  ;;  %v8374_v45 = vld [vmem:[%s8759_s28 + $0x2f0] ss:$8 sps:$4 sm:$0xff]  }
 0x1a7   : > { %3105 = vmatprep.mubr.bf16.mxu0 %v8358_v40  ;;  %3905 = vmatprep.mubr.bf16.mxu1 %v8360_v41 }
 0x1a8   : > { %6381 = vst.msk [vmem:[%s8945_s4 + $0x88] sm:$0xf] %vm6346_vm0, %v7665_v48  ;;  %6581 = vst.msk [vmem:[%s8945_s4 + $0x3a8] sm:$0xf] %vm6346_vm0, %v7865_v49  ;;  %v7666_v52 = vpack.c.bf16 %v4381_v50, %v4381_v50  ;;  %v7866_v53 = vpack.c.bf16 %v4581_v51, %v4581_v51  ;;  %v8376_v49 = vld [vmem:[%s8759_s28 + $0x304] ss:$8 sps:$4 sm:$0xff]  }
 0x1a9   : > { %v2891_v54 = vpop.f32.mrb[72].mxu0  ;;  %v3691_v55 = vpop.f32.mrb[72].mxu1  ;;  %v8378_v50 = vld [vmem:[%s8759_s28 + $0x944] ss:$8 sps:$4 sm:$0xff]  }
 0x1aa   : > { %6382 = vst.msk [vmem:[%s8945_s4 + $0x8c] sm:$0xf] %vm6346_vm0, %v7666_v52  ;;  %6582 = vst.msk [vmem:[%s8945_s4 + $0x3ac] sm:$0xf] %vm6346_vm0, %v7866_v53  ;;  %v2892_v56 = vadd.f32 %v9198_v7, %v2891_v54  ;;  %v3692_v57 = vadd.f32 %v9198_v7, %v3691_v55  ;;  %v2893_v58 = vpop.f32.mrb[73].mxu0  ;;  %v3693_v59 = vpop.f32.mrb[73].mxu1 }
 0x1ab   : > { %v2894_v62 = vpop.f32.mrb[74].mxu0  ;;  %v3694_v0 = vpop.f32.mrb[74].mxu1 }
 0x1ac   : > { %v4382_v3 = vmax.f32 %v2892_v56, 0.0  ;;  %v4582_v63 = vmax.f32 %v3692_v57, 0.0  ;;  %v2895_v4 = vadd.f32 %v9198_v7, %v2894_v62  ;;  %v3695_v5 = vadd.f32 %v9198_v7, %v3694_v0  ;;  %v2896_v6 = vpop.f32.mrb[75].mxu0  ;;  %v3696_v8 = vpop.f32.mrb[75].mxu1 }
 0x1ad   : > { %v8381_v6 = vld [vmem:[%s8759_s28 + $0x940] ss:$8 sps:$4 sm:$0xff]  }
 0x1ae   : > { %v7667_v9 = vpack.c.bf16 %v4382_v3, %v4382_v3  ;;  %v7867_v10 = vpack.c.bf16 %v4582_v63, %v4582_v63  ;;  %v4383_v11 = vmax.f32 %v2895_v4, 0.0  ;;  %v4583_v12 = vmax.f32 %v3695_v5, 0.0  ;;  %3106 = vmatmul.mubr.bf16.gmra.mrb[180].mxu0 %v8362_v60  ;;  %3906 = vmatmul.mubr.bf16.gmra.mrb[180].mxu1 %v8363_v61  ;;  %v8380_v5 = vld [vmem:[%s8759_s28 + $0x300] ss:$8 sps:$4 sm:$0xff]  }
 0x1af   : > { %3113 = vmatprep.mubr.bf16.mxu0 %v8364_v1  ;;  %3913 = vmatprep.mubr.bf16.mxu1 %v8366_v2 }
 0x1b0   : > { %6383 = vst.msk [vmem:[%s8945_s4 + $0x90] sm:$0xf] %vm6346_vm0, %v7667_v9  ;;  %6583 = vst.msk [vmem:[%s8945_s4 + $0x3b0] sm:$0xf] %vm6346_vm0, %v7867_v10  ;;  %v7668_v13 = vpack.c.bf16 %v4383_v11, %v4383_v11  ;;  %v7868_v14 = vpack.c.bf16 %v4583_v12, %v4583_v12  ;;  %v8382_v10 = vld [vmem:[%s8759_s28 + $0x314] ss:$8 sps:$4 sm:$0xff]  }
 0x1b1   : > { %v2899_v15 = vpop.f32.mrb[76].mxu0  ;;  %v3699_v16 = vpop.f32.mrb[76].mxu1  ;;  %v8384_v11 = vld [vmem:[%s8759_s28 + $0x954] ss:$8 sps:$4 sm:$0xff]  }
 0x1b2   : > { %6384 = vst.msk [vmem:[%s8945_s4 + $0x94] sm:$0xf] %vm6346_vm0, %v7668_v13  ;;  %6584 = vst.msk [vmem:[%s8945_s4 + $0x3b4] sm:$0xf] %vm6346_vm0, %v7868_v14  ;;  %v2900_v17 = vadd.f32 %v9198_v7, %v2899_v15  ;;  %v3700_v18 = vadd.f32 %v9198_v7, %v3699_v16  ;;  %v2901_v19 = vpop.f32.mrb[77].mxu0  ;;  %v3701_v20 = vpop.f32.mrb[77].mxu1 }
 0x1b3   : > { %v2902_v23 = vpop.f32.mrb[78].mxu0  ;;  %v3702_v24 = vpop.f32.mrb[78].mxu1 }
 0x1b4   : > { %v4384_v27 = vmax.f32 %v2900_v17, 0.0  ;;  %v4584_v28 = vmax.f32 %v3700_v18, 0.0  ;;  %v2903_v29 = vadd.f32 %v9198_v7, %v2902_v23  ;;  %v3703_v30 = vadd.f32 %v9198_v7, %v3702_v24  ;;  %v2904_v31 = vpop.f32.mrb[79].mxu0  ;;  %v3704_v32 = vpop.f32.mrb[79].mxu1 }
 0x1b5   : > { %v8387_v31 = vld [vmem:[%s8759_s28 + $0x950] ss:$8 sps:$4 sm:$0xff]  }
 0x1b6   : > { %v7669_v33 = vpack.c.bf16 %v4384_v27, %v4384_v27  ;;  %v7869_v34 = vpack.c.bf16 %v4584_v28, %v4584_v28  ;;  %v4385_v35 = vmax.f32 %v2903_v29, 0.0  ;;  %v4585_v36 = vmax.f32 %v3703_v30, 0.0  ;;  %3114 = vmatmul.mubr.bf16.gmra.mrb[184].mxu0 %v8368_v21  ;;  %3914 = vmatmul.mubr.bf16.gmra.mrb[184].mxu1 %v8369_v22  ;;  %v8386_v30 = vld [vmem:[%s8759_s28 + $0x310] ss:$8 sps:$4 sm:$0xff]  }
 0x1b7   : > { %3121 = vmatprep.mubr.bf16.mxu0 %v8370_v25  ;;  %3921 = vmatprep.mubr.bf16.mxu1 %v8372_v26 }
 0x1b8   : > { %6385 = vst.msk [vmem:[%s8945_s4 + $0x98] sm:$0xf] %vm6346_vm0, %v7669_v33  ;;  %6585 = vst.msk [vmem:[%s8945_s4 + $0x3b8] sm:$0xf] %vm6346_vm0, %v7869_v34  ;;  %v7670_v37 = vpack.c.bf16 %v4385_v35, %v4385_v35  ;;  %v7870_v38 = vpack.c.bf16 %v4585_v36, %v4585_v36  ;;  %v8388_v34 = vld [vmem:[%s8759_s28 + $0x324] ss:$8 sps:$4 sm:$0xff]  }
 0x1b9   : > { %v2907_v39 = vpop.f32.mrb[80].mxu0  ;;  %v3707_v40 = vpop.f32.mrb[80].mxu1  ;;  %v8390_v35 = vld [vmem:[%s8759_s28 + $0x964] ss:$8 sps:$4 sm:$0xff]  }
 0x1ba   : > { %6386 = vst.msk [vmem:[%s8945_s4 + $0x9c] sm:$0xf] %vm6346_vm0, %v7670_v37  ;;  %6586 = vst.msk [vmem:[%s8945_s4 + $0x3bc] sm:$0xf] %vm6346_vm0, %v7870_v38  ;;  %v2908_v41 = vadd.f32 %v9198_v7, %v2907_v39  ;;  %v3708_v42 = vadd.f32 %v9198_v7, %v3707_v40  ;;  %v2909_v43 = vpop.f32.mrb[81].mxu0  ;;  %v3709_v44 = vpop.f32.mrb[81].mxu1 }
 0x1bb   : > { %v2910_v47 = vpop.f32.mrb[82].mxu0  ;;  %v3710_v48 = vpop.f32.mrb[82].mxu1 }
 0x1bc   : > { %v4386_v51 = vmax.f32 %v2908_v41, 0.0  ;;  %v4586_v52 = vmax.f32 %v3708_v42, 0.0  ;;  %v2911_v53 = vadd.f32 %v9198_v7, %v2910_v47  ;;  %v3711_v54 = vadd.f32 %v9198_v7, %v3710_v48  ;;  %v2912_v55 = vpop.f32.mrb[83].mxu0  ;;  %v3712_v56 = vpop.f32.mrb[83].mxu1 }
 0x1bd   : > { %v8393_v55 = vld [vmem:[%s8759_s28 + $0x960] ss:$8 sps:$4 sm:$0xff]  }
 0x1be   : > { %v7671_v57 = vpack.c.bf16 %v4386_v51, %v4386_v51  ;;  %v7871_v58 = vpack.c.bf16 %v4586_v52, %v4586_v52  ;;  %v4387_v59 = vmax.f32 %v2911_v53, 0.0  ;;  %v4587_v60 = vmax.f32 %v3711_v54, 0.0  ;;  %3122 = vmatmul.mubr.bf16.gmra.mrb[188].mxu0 %v8374_v45  ;;  %3922 = vmatmul.mubr.bf16.gmra.mrb[188].mxu1 %v8375_v46  ;;  %v8392_v54 = vld [vmem:[%s8759_s28 + $0x320] ss:$8 sps:$4 sm:$0xff]  }
 0x1bf   : > { %3129 = vmatprep.mubr.bf16.mxu0 %v8376_v49  ;;  %3929 = vmatprep.mubr.bf16.mxu1 %v8378_v50 }
 0x1c0   : > { %6387 = vst.msk [vmem:[%s8945_s4 + $0xa0] sm:$0xf] %vm6346_vm0, %v7671_v57  ;;  %6587 = vst.msk [vmem:[%s8945_s4 + $0x3c0] sm:$0xf] %vm6346_vm0, %v7871_v58  ;;  %v7672_v61 = vpack.c.bf16 %v4387_v59, %v4387_v59  ;;  %v7872_v62 = vpack.c.bf16 %v4587_v60, %v4587_v60  ;;  %v8394_v58 = vld [vmem:[%s8759_s28 + $0x334] ss:$8 sps:$4 sm:$0xff]  }
 0x1c1   : > { %v2915_v0 = vpop.f32.mrb[84].mxu0  ;;  %v3715_v1 = vpop.f32.mrb[84].mxu1  ;;  %v8396_v59 = vld [vmem:[%s8759_s28 + $0x974] ss:$8 sps:$4 sm:$0xff]  }
 0x1c2   : > { %6388 = vst.msk [vmem:[%s8945_s4 + $0xa4] sm:$0xf] %vm6346_vm0, %v7672_v61  ;;  %6588 = vst.msk [vmem:[%s8945_s4 + $0x3c4] sm:$0xf] %vm6346_vm0, %v7872_v62  ;;  %v2916_v2 = vadd.f32 %v9198_v7, %v2915_v0  ;;  %v3716_v3 = vadd.f32 %v9198_v7, %v3715_v1  ;;  %v2917_v63 = vpop.f32.mrb[85].mxu0  ;;  %v3717_v4 = vpop.f32.mrb[85].mxu1 }
 0x1c3   : > { %v2918_v8 = vpop.f32.mrb[86].mxu0  ;;  %v3718_v9 = vpop.f32.mrb[86].mxu1 }
 0x1c4   : > { %v4388_v12 = vmax.f32 %v2916_v2, 0.0  ;;  %v4588_v13 = vmax.f32 %v3716_v3, 0.0  ;;  %v2919_v14 = vadd.f32 %v9198_v7, %v2918_v8  ;;  %v3719_v15 = vadd.f32 %v9198_v7, %v3718_v9  ;;  %v2920_v16 = vpop.f32.mrb[87].mxu0  ;;  %v3720_v17 = vpop.f32.mrb[87].mxu1 }
 0x1c5   : > { %v8399_v16 = vld [vmem:[%s8759_s28 + $0x970] ss:$8 sps:$4 sm:$0xff]  }
 0x1c6   : > { %v7673_v18 = vpack.c.bf16 %v4388_v12, %v4388_v12  ;;  %v7873_v19 = vpack.c.bf16 %v4588_v13, %v4588_v13  ;;  %v4389_v20 = vmax.f32 %v2919_v14, 0.0  ;;  %v4589_v21 = vmax.f32 %v3719_v15, 0.0  ;;  %3130 = vmatmul.mubr.bf16.gmra.mrb[192].mxu0 %v8380_v5  ;;  %3930 = vmatmul.mubr.bf16.gmra.mrb[192].mxu1 %v8381_v6  ;;  %v8398_v15 = vld [vmem:[%s8759_s28 + $0x330] ss:$8 sps:$4 sm:$0xff]  }
 0x1c7   : > { %3137 = vmatprep.mubr.bf16.mxu0 %v8382_v10  ;;  %3937 = vmatprep.mubr.bf16.mxu1 %v8384_v11 }
 0x1c8   : > { %6389 = vst.msk [vmem:[%s8945_s4 + $0xa8] sm:$0xf] %vm6346_vm0, %v7673_v18  ;;  %6589 = vst.msk [vmem:[%s8945_s4 + $0x3c8] sm:$0xf] %vm6346_vm0, %v7873_v19  ;;  %v7674_v22 = vpack.c.bf16 %v4389_v20, %v4389_v20  ;;  %v7874_v23 = vpack.c.bf16 %v4589_v21, %v4589_v21  ;;  %v8400_v19 = vld [vmem:[%s8759_s28 + $0x344] ss:$8 sps:$4 sm:$0xff]  }
 0x1c9   : > { %v2923_v24 = vpop.f32.mrb[88].mxu0  ;;  %v3723_v25 = vpop.f32.mrb[88].mxu1  ;;  %v8402_v20 = vld [vmem:[%s8759_s28 + $0x984] ss:$8 sps:$4 sm:$0xff]  }
 0x1ca   : > { %6390 = vst.msk [vmem:[%s8945_s4 + $0xac] sm:$0xf] %vm6346_vm0, %v7674_v22  ;;  %6590 = vst.msk [vmem:[%s8945_s4 + $0x3cc] sm:$0xf] %vm6346_vm0, %v7874_v23  ;;  %v2924_v26 = vadd.f32 %v9198_v7, %v2923_v24  ;;  %v3724_v27 = vadd.f32 %v9198_v7, %v3723_v25  ;;  %v2925_v28 = vpop.f32.mrb[89].mxu0  ;;  %v3725_v29 = vpop.f32.mrb[89].mxu1 }
 0x1cb   : > { %v2926_v32 = vpop.f32.mrb[90].mxu0  ;;  %v3726_v33 = vpop.f32.mrb[90].mxu1 }
 0x1cc   : > { %v4390_v36 = vmax.f32 %v2924_v26, 0.0  ;;  %v4590_v37 = vmax.f32 %v3724_v27, 0.0  ;;  %v2927_v38 = vadd.f32 %v9198_v7, %v2926_v32  ;;  %v3727_v39 = vadd.f32 %v9198_v7, %v3726_v33  ;;  %v2928_v40 = vpop.f32.mrb[91].mxu0  ;;  %v3728_v41 = vpop.f32.mrb[91].mxu1 }
 0x1cd   : > { %v8405_v40 = vld [vmem:[%s8759_s28 + $0x980] ss:$8 sps:$4 sm:$0xff]  }
 0x1ce   : > { %v7675_v42 = vpack.c.bf16 %v4390_v36, %v4390_v36  ;;  %v7875_v43 = vpack.c.bf16 %v4590_v37, %v4590_v37  ;;  %v4391_v44 = vmax.f32 %v2927_v38, 0.0  ;;  %v4591_v45 = vmax.f32 %v3727_v39, 0.0  ;;  %3138 = vmatmul.mubr.bf16.gmra.mrb[196].mxu0 %v8386_v30  ;;  %3938 = vmatmul.mubr.bf16.gmra.mrb[196].mxu1 %v8387_v31  ;;  %v8404_v39 = vld [vmem:[%s8759_s28 + $0x340] ss:$8 sps:$4 sm:$0xff]  }
 0x1cf   : > { %3145 = vmatprep.mubr.bf16.mxu0 %v8388_v34  ;;  %3945 = vmatprep.mubr.bf16.mxu1 %v8390_v35 }
 0x1d0   : > { %6391 = vst.msk [vmem:[%s8945_s4 + $0xb0] sm:$0xf] %vm6346_vm0, %v7675_v42  ;;  %6591 = vst.msk [vmem:[%s8945_s4 + $0x3d0] sm:$0xf] %vm6346_vm0, %v7875_v43  ;;  %v7676_v46 = vpack.c.bf16 %v4391_v44, %v4391_v44  ;;  %v7876_v47 = vpack.c.bf16 %v4591_v45, %v4591_v45  ;;  %v8406_v43 = vld [vmem:[%s8759_s28 + $0x354] ss:$8 sps:$4 sm:$0xff]  }
 0x1d1   : > { %v2931_v48 = vpop.f32.mrb[92].mxu0  ;;  %v3731_v49 = vpop.f32.mrb[92].mxu1  ;;  %v8408_v44 = vld [vmem:[%s8759_s28 + $0x994] ss:$8 sps:$4 sm:$0xff]  }
 0x1d2   : > { %6392 = vst.msk [vmem:[%s8945_s4 + $0xb4] sm:$0xf] %vm6346_vm0, %v7676_v46  ;;  %6592 = vst.msk [vmem:[%s8945_s4 + $0x3d4] sm:$0xf] %vm6346_vm0, %v7876_v47  ;;  %v2932_v50 = vadd.f32 %v9198_v7, %v2931_v48  ;;  %v3732_v51 = vadd.f32 %v9198_v7, %v3731_v49  ;;  %v2933_v52 = vpop.f32.mrb[93].mxu0  ;;  %v3733_v53 = vpop.f32.mrb[93].mxu1 }
 0x1d3   : > { %v2934_v56 = vpop.f32.mrb[94].mxu0  ;;  %v3734_v57 = vpop.f32.mrb[94].mxu1 }
 0x1d4   : > { %v4392_v60 = vmax.f32 %v2932_v50, 0.0  ;;  %v4592_v61 = vmax.f32 %v3732_v51, 0.0  ;;  %v2935_v62 = vadd.f32 %v9198_v7, %v2934_v56  ;;  %v3735_v0 = vadd.f32 %v9198_v7, %v3734_v57  ;;  %v2936_v1 = vpop.f32.mrb[95].mxu0  ;;  %v3736_v2 = vpop.f32.mrb[95].mxu1 }
 0x1d5   : > { %v8411_v1 = vld [vmem:[%s8759_s28 + $0x990] ss:$8 sps:$4 sm:$0xff]  }
 0x1d6   : > { %v7677_v3 = vpack.c.bf16 %v4392_v60, %v4392_v60  ;;  %v7877_v63 = vpack.c.bf16 %v4592_v61, %v4592_v61  ;;  %v4393_v4 = vmax.f32 %v2935_v62, 0.0  ;;  %v4593_v5 = vmax.f32 %v3735_v0, 0.0  ;;  %3146 = vmatmul.mubr.bf16.gmra.mrb[200].mxu0 %v8392_v54  ;;  %3946 = vmatmul.mubr.bf16.gmra.mrb[200].mxu1 %v8393_v55  ;;  %v8410_v0 = vld [vmem:[%s8759_s28 + $0x350] ss:$8 sps:$4 sm:$0xff]  }
 0x1d7   : > { %3153 = vmatprep.mubr.bf16.mxu0 %v8394_v58  ;;  %3953 = vmatprep.mubr.bf16.mxu1 %v8396_v59 }
 0x1d8   : > { %6393 = vst.msk [vmem:[%s8945_s4 + $0xb8] sm:$0xf] %vm6346_vm0, %v7677_v3  ;;  %6593 = vst.msk [vmem:[%s8945_s4 + $0x3d8] sm:$0xf] %vm6346_vm0, %v7877_v63  ;;  %v7678_v6 = vpack.c.bf16 %v4393_v4, %v4393_v4  ;;  %v7878_v8 = vpack.c.bf16 %v4593_v5, %v4593_v5  ;;  %v8412_v63 = vld [vmem:[%s8759_s28 + $0x364] ss:$8 sps:$4 sm:$0xff]  }
 0x1d9   : > { %v2939_v9 = vpop.f32.mrb[96].mxu0  ;;  %v3739_v10 = vpop.f32.mrb[96].mxu1  ;;  %v8414_v4 = vld [vmem:[%s8759_s28 + $0x9a4] ss:$8 sps:$4 sm:$0xff]  }
 0x1da   : > { %6394 = vst.msk [vmem:[%s8945_s4 + $0xbc] sm:$0xf] %vm6346_vm0, %v7678_v6  ;;  %6594 = vst.msk [vmem:[%s8945_s4 + $0x3dc] sm:$0xf] %vm6346_vm0, %v7878_v8  ;;  %v2940_v11 = vadd.f32 %v9198_v7, %v2939_v9  ;;  %v3740_v12 = vadd.f32 %v9198_v7, %v3739_v10  ;;  %v2941_v13 = vpop.f32.mrb[97].mxu0  ;;  %v3741_v14 = vpop.f32.mrb[97].mxu1 }
 0x1db   : > { %v2942_v17 = vpop.f32.mrb[98].mxu0  ;;  %v3742_v18 = vpop.f32.mrb[98].mxu1 }
 0x1dc   : > { %v4394_v21 = vmax.f32 %v2940_v11, 0.0  ;;  %v4594_v22 = vmax.f32 %v3740_v12, 0.0  ;;  %v2943_v23 = vadd.f32 %v9198_v7, %v2942_v17  ;;  %v3743_v24 = vadd.f32 %v9198_v7, %v3742_v18  ;;  %v2944_v25 = vpop.f32.mrb[99].mxu0  ;;  %v3744_v26 = vpop.f32.mrb[99].mxu1 }
 0x1dd   : > { %v8417_v25 = vld [vmem:[%s8759_s28 + $0x9a0] ss:$8 sps:$4 sm:$0xff]  }
 0x1de   : > { %v7679_v27 = vpack.c.bf16 %v4394_v21, %v4394_v21  ;;  %v7879_v28 = vpack.c.bf16 %v4594_v22, %v4594_v22  ;;  %v4395_v29 = vmax.f32 %v2943_v23, 0.0  ;;  %v4595_v30 = vmax.f32 %v3743_v24, 0.0  ;;  %3154 = vmatmul.mubr.bf16.gmra.mrb[204].mxu0 %v8398_v15  ;;  %3954 = vmatmul.mubr.bf16.gmra.mrb[204].mxu1 %v8399_v16  ;;  %v8416_v24 = vld [vmem:[%s8759_s28 + $0x360] ss:$8 sps:$4 sm:$0xff]  }
 0x1df   : > { %3161 = vmatprep.mubr.bf16.mxu0 %v8400_v19  ;;  %3961 = vmatprep.mubr.bf16.mxu1 %v8402_v20 }
 0x1e0   : > { %6395 = vst.msk [vmem:[%s8945_s4 + $0xc0] sm:$0xf] %vm6346_vm0, %v7679_v27  ;;  %6595 = vst.msk [vmem:[%s8945_s4 + $0x3e0] sm:$0xf] %vm6346_vm0, %v7879_v28  ;;  %v7680_v31 = vpack.c.bf16 %v4395_v29, %v4395_v29  ;;  %v7880_v32 = vpack.c.bf16 %v4595_v30, %v4595_v30  ;;  %v8418_v28 = vld [vmem:[%s8759_s28 + $0x374] ss:$8 sps:$4 sm:$0xff]  }
 0x1e1   : > { %v2947_v33 = vpop.f32.mrb[100].mxu0  ;;  %v3747_v34 = vpop.f32.mrb[100].mxu1  ;;  %v8420_v29 = vld [vmem:[%s8759_s28 + $0x9b4] ss:$8 sps:$4 sm:$0xff]  }
 0x1e2   : > { %6396 = vst.msk [vmem:[%s8945_s4 + $0xc4] sm:$0xf] %vm6346_vm0, %v7680_v31  ;;  %6596 = vst.msk [vmem:[%s8945_s4 + $0x3e4] sm:$0xf] %vm6346_vm0, %v7880_v32  ;;  %v2948_v35 = vadd.f32 %v9198_v7, %v2947_v33  ;;  %v3748_v36 = vadd.f32 %v9198_v7, %v3747_v34  ;;  %v2949_v37 = vpop.f32.mrb[101].mxu0  ;;  %v3749_v38 = vpop.f32.mrb[101].mxu1 }
 0x1e3   : > { %v2950_v41 = vpop.f32.mrb[102].mxu0  ;;  %v3750_v42 = vpop.f32.mrb[102].mxu1 }
 0x1e4   : > { %v4396_v45 = vmax.f32 %v2948_v35, 0.0  ;;  %v4596_v46 = vmax.f32 %v3748_v36, 0.0  ;;  %v2951_v47 = vadd.f32 %v9198_v7, %v2950_v41  ;;  %v3751_v48 = vadd.f32 %v9198_v7, %v3750_v42  ;;  %v2952_v49 = vpop.f32.mrb[103].mxu0  ;;  %v3752_v50 = vpop.f32.mrb[103].mxu1 }
 0x1e5   : > { %v8423_v49 = vld [vmem:[%s8759_s28 + $0x9b0] ss:$8 sps:$4 sm:$0xff]  }
 0x1e6   : > { %v7681_v51 = vpack.c.bf16 %v4396_v45, %v4396_v45  ;;  %v7881_v52 = vpack.c.bf16 %v4596_v46, %v4596_v46  ;;  %v4397_v53 = vmax.f32 %v2951_v47, 0.0  ;;  %v4597_v54 = vmax.f32 %v3751_v48, 0.0  ;;  %3162 = vmatmul.mubr.bf16.gmra.mrb[208].mxu0 %v8404_v39  ;;  %3962 = vmatmul.mubr.bf16.gmra.mrb[208].mxu1 %v8405_v40  ;;  %v8422_v48 = vld [vmem:[%s8759_s28 + $0x370] ss:$8 sps:$4 sm:$0xff]  }
 0x1e7   : > { %3169 = vmatprep.mubr.bf16.mxu0 %v8406_v43  ;;  %3969 = vmatprep.mubr.bf16.mxu1 %v8408_v44 }
 0x1e8   : > { %6397 = vst.msk [vmem:[%s8945_s4 + $0xc8] sm:$0xf] %vm6346_vm0, %v7681_v51  ;;  %6597 = vst.msk [vmem:[%s8945_s4 + $0x3e8] sm:$0xf] %vm6346_vm0, %v7881_v52  ;;  %v7682_v55 = vpack.c.bf16 %v4397_v53, %v4397_v53  ;;  %v7882_v56 = vpack.c.bf16 %v4597_v54, %v4597_v54  ;;  %v8424_v52 = vld [vmem:[%s8759_s28 + $0x384] ss:$8 sps:$4 sm:$0xff]  }
 0x1e9   : > { %v2955_v57 = vpop.f32.mrb[104].mxu0  ;;  %v3755_v58 = vpop.f32.mrb[104].mxu1  ;;  %v8426_v53 = vld [vmem:[%s8759_s28 + $0x9c4] ss:$8 sps:$4 sm:$0xff]  }
 0x1ea   : > { %6398 = vst.msk [vmem:[%s8945_s4 + $0xcc] sm:$0xf] %vm6346_vm0, %v7682_v55  ;;  %6598 = vst.msk [vmem:[%s8945_s4 + $0x3ec] sm:$0xf] %vm6346_vm0, %v7882_v56  ;;  %v2956_v59 = vadd.f32 %v9198_v7, %v2955_v57  ;;  %v3756_v60 = vadd.f32 %v9198_v7, %v3755_v58  ;;  %v2957_v61 = vpop.f32.mrb[105].mxu0  ;;  %v3757_v62 = vpop.f32.mrb[105].mxu1 }
 0x1eb   : > { %v2958_v2 = vpop.f32.mrb[106].mxu0  ;;  %v3758_v3 = vpop.f32.mrb[106].mxu1 }
 0x1ec   : > { %v4398_v5 = vmax.f32 %v2956_v59, 0.0  ;;  %v4598_v6 = vmax.f32 %v3756_v60, 0.0  ;;  %v2959_v8 = vadd.f32 %v9198_v7, %v2958_v2  ;;  %v3759_v9 = vadd.f32 %v9198_v7, %v3758_v3  ;;  %v2960_v10 = vpop.f32.mrb[107].mxu0  ;;  %v3760_v11 = vpop.f32.mrb[107].mxu1 }
 0x1ed   : > { %v8429_v10 = vld [vmem:[%s8759_s28 + $0x9c0] ss:$8 sps:$4 sm:$0xff]  }
 0x1ee   : > { %v7683_v12 = vpack.c.bf16 %v4398_v5, %v4398_v5  ;;  %v7883_v13 = vpack.c.bf16 %v4598_v6, %v4598_v6  ;;  %v4399_v14 = vmax.f32 %v2959_v8, 0.0  ;;  %v4599_v15 = vmax.f32 %v3759_v9, 0.0  ;;  %3170 = vmatmul.mubr.bf16.gmra.mrb[212].mxu0 %v8410_v0  ;;  %3970 = vmatmul.mubr.bf16.gmra.mrb[212].mxu1 %v8411_v1  ;;  %v8428_v9 = vld [vmem:[%s8759_s28 + $0x380] ss:$8 sps:$4 sm:$0xff]  }
 0x1ef   : > { %3177 = vmatprep.mubr.bf16.mxu0 %v8412_v63  ;;  %3977 = vmatprep.mubr.bf16.mxu1 %v8414_v4 }
 0x1f0   : > { %6399 = vst.msk [vmem:[%s8945_s4 + $0xd0] sm:$0xf] %vm6346_vm0, %v7683_v12  ;;  %6599 = vst.msk [vmem:[%s8945_s4 + $0x3f0] sm:$0xf] %vm6346_vm0, %v7883_v13  ;;  %v7684_v16 = vpack.c.bf16 %v4399_v14, %v4399_v14  ;;  %v7884_v17 = vpack.c.bf16 %v4599_v15, %v4599_v15  ;;  %v8430_v13 = vld [vmem:[%s8759_s28 + $0x394] ss:$8 sps:$4 sm:$0xff]  }
 0x1f1   : > { %v2963_v18 = vpop.f32.mrb[108].mxu0  ;;  %v3763_v19 = vpop.f32.mrb[108].mxu1  ;;  %v8432_v14 = vld [vmem:[%s8759_s28 + $0x9d4] ss:$8 sps:$4 sm:$0xff]  }
 0x1f2   : > { %6400 = vst.msk [vmem:[%s8945_s4 + $0xd4] sm:$0xf] %vm6346_vm0, %v7684_v16  ;;  %6600 = vst.msk [vmem:[%s8945_s4 + $0x3f4] sm:$0xf] %vm6346_vm0, %v7884_v17  ;;  %v2964_v20 = vadd.f32 %v9198_v7, %v2963_v18  ;;  %v3764_v21 = vadd.f32 %v9198_v7, %v3763_v19  ;;  %v2965_v22 = vpop.f32.mrb[109].mxu0  ;;  %v3765_v23 = vpop.f32.mrb[109].mxu1 }
 0x1f3   : > { %v2966_v26 = vpop.f32.mrb[110].mxu0  ;;  %v3766_v27 = vpop.f32.mrb[110].mxu1 }
 0x1f4   : > { %v4400_v30 = vmax.f32 %v2964_v20, 0.0  ;;  %v4600_v31 = vmax.f32 %v3764_v21, 0.0  ;;  %v2967_v32 = vadd.f32 %v9198_v7, %v2966_v26  ;;  %v3767_v33 = vadd.f32 %v9198_v7, %v3766_v27  ;;  %v2968_v34 = vpop.f32.mrb[111].mxu0  ;;  %v3768_v35 = vpop.f32.mrb[111].mxu1 }
 0x1f5   : > { %v8435_v34 = vld [vmem:[%s8759_s28 + $0x9d0] ss:$8 sps:$4 sm:$0xff]  }
 0x1f6   : > { %v7685_v36 = vpack.c.bf16 %v4400_v30, %v4400_v30  ;;  %v7885_v37 = vpack.c.bf16 %v4600_v31, %v4600_v31  ;;  %v4401_v38 = vmax.f32 %v2967_v32, 0.0  ;;  %v4601_v39 = vmax.f32 %v3767_v33, 0.0  ;;  %3178 = vmatmul.mubr.bf16.gmra.mrb[216].mxu0 %v8416_v24  ;;  %3978 = vmatmul.mubr.bf16.gmra.mrb[216].mxu1 %v8417_v25  ;;  %v8434_v33 = vld [vmem:[%s8759_s28 + $0x390] ss:$8 sps:$4 sm:$0xff]  }
 0x1f7   : > { %3185 = vmatprep.mubr.bf16.mxu0 %v8418_v28  ;;  %3985 = vmatprep.mubr.bf16.mxu1 %v8420_v29 }
 0x1f8   : > { %6401 = vst.msk [vmem:[%s8945_s4 + $0xd8] sm:$0xf] %vm6346_vm0, %v7685_v36  ;;  %6601 = vst.msk [vmem:[%s8945_s4 + $0x3f8] sm:$0xf] %vm6346_vm0, %v7885_v37  ;;  %v7686_v40 = vpack.c.bf16 %v4401_v38, %v4401_v38  ;;  %v7886_v41 = vpack.c.bf16 %v4601_v39, %v4601_v39  ;;  %v8436_v37 = vld [vmem:[%s8759_s28 + $0x3a4] ss:$8 sps:$4 sm:$0xff]  }
 0x1f9   : > { %v2971_v42 = vpop.f32.mrb[112].mxu0  ;;  %v3771_v43 = vpop.f32.mrb[112].mxu1  ;;  %v8438_v38 = vld [vmem:[%s8759_s28 + $0x9e4] ss:$8 sps:$4 sm:$0xff]  }
 0x1fa   : > { %6402 = vst.msk [vmem:[%s8945_s4 + $0xdc] sm:$0xf] %vm6346_vm0, %v7686_v40  ;;  %6602 = vst.msk [vmem:[%s8945_s4 + $0x3fc] sm:$0xf] %vm6346_vm0, %v7886_v41  ;;  %v2972_v44 = vadd.f32 %v9198_v7, %v2971_v42  ;;  %v3772_v45 = vadd.f32 %v9198_v7, %v3771_v43  ;;  %v2973_v46 = vpop.f32.mrb[113].mxu0  ;;  %v3773_v47 = vpop.f32.mrb[113].mxu1 }
 0x1fb   : > { %v2974_v50 = vpop.f32.mrb[114].mxu0  ;;  %v3774_v51 = vpop.f32.mrb[114].mxu1 }
 0x1fc   : > { %v4402_v54 = vmax.f32 %v2972_v44, 0.0  ;;  %v4602_v55 = vmax.f32 %v3772_v45, 0.0  ;;  %v2975_v56 = vadd.f32 %v9198_v7, %v2974_v50  ;;  %v3775_v57 = vadd.f32 %v9198_v7, %v3774_v51  ;;  %v2976_v58 = vpop.f32.mrb[115].mxu0  ;;  %v3776_v59 = vpop.f32.mrb[115].mxu1 }
 0x1fd   : > { %v8441_v58 = vld [vmem:[%s8759_s28 + $0x9e0] ss:$8 sps:$4 sm:$0xff]  }
 0x1fe   : > { %v7687_v60 = vpack.c.bf16 %v4402_v54, %v4402_v54  ;;  %v7887_v61 = vpack.c.bf16 %v4602_v55, %v4602_v55  ;;  %v4403_v62 = vmax.f32 %v2975_v56, 0.0  ;;  %v4603_v0 = vmax.f32 %v3775_v57, 0.0  ;;  %3186 = vmatmul.mubr.bf16.gmra.mrb[220].mxu0 %v8422_v48  ;;  %3986 = vmatmul.mubr.bf16.gmra.mrb[220].mxu1 %v8423_v49  ;;  %v8440_v57 = vld [vmem:[%s8759_s28 + $0x3a0] ss:$8 sps:$4 sm:$0xff]  }
 0x1ff   : > { %3193 = vmatprep.mubr.bf16.mxu0 %v8424_v52  ;;  %3993 = vmatprep.mubr.bf16.mxu1 %v8426_v53 }
 0x200   : > { %6403 = vst.msk [vmem:[%s8945_s4 + $0xe0] sm:$0xf] %vm6346_vm0, %v7687_v60  ;;  %6603 = vst.msk [vmem:[%s8945_s4 + $0x400] sm:$0xf] %vm6346_vm0, %v7887_v61  ;;  %v7688_v1 = vpack.c.bf16 %v4403_v62, %v4403_v62  ;;  %v7888_v2 = vpack.c.bf16 %v4603_v0, %v4603_v0  ;;  %v8442_v61 = vld [vmem:[%s8759_s28 + $0x3b4] ss:$8 sps:$4 sm:$0xff]  }
 0x201   : > { %v2979_v3 = vpop.f32.mrb[116].mxu0  ;;  %v3779_v63 = vpop.f32.mrb[116].mxu1  ;;  %v8444_v62 = vld [vmem:[%s8759_s28 + $0x9f4] ss:$8 sps:$4 sm:$0xff]  }
 0x202   : > { %6404 = vst.msk [vmem:[%s8945_s4 + $0xe4] sm:$0xf] %vm6346_vm0, %v7688_v1  ;;  %6604 = vst.msk [vmem:[%s8945_s4 + $0x404] sm:$0xf] %vm6346_vm0, %v7888_v2  ;;  %v2980_v4 = vadd.f32 %v9198_v7, %v2979_v3  ;;  %v3780_v5 = vadd.f32 %v9198_v7, %v3779_v63  ;;  %v2981_v6 = vpop.f32.mrb[117].mxu0  ;;  %v3781_v8 = vpop.f32.mrb[117].mxu1 }
 0x203   : > { %v2982_v11 = vpop.f32.mrb[118].mxu0  ;;  %v3782_v12 = vpop.f32.mrb[118].mxu1 }
 0x204   : > { %v4404_v15 = vmax.f32 %v2980_v4, 0.0  ;;  %v4604_v16 = vmax.f32 %v3780_v5, 0.0  ;;  %v2983_v17 = vadd.f32 %v9198_v7, %v2982_v11  ;;  %v3783_v18 = vadd.f32 %v9198_v7, %v3782_v12  ;;  %v2984_v19 = vpop.f32.mrb[119].mxu0  ;;  %v3784_v20 = vpop.f32.mrb[119].mxu1 }
 0x205   : > { %v8447_v19 = vld [vmem:[%s8759_s28 + $0x9f0] ss:$8 sps:$4 sm:$0xff]  }
 0x206   : > { %v7689_v21 = vpack.c.bf16 %v4404_v15, %v4404_v15  ;;  %v7889_v22 = vpack.c.bf16 %v4604_v16, %v4604_v16  ;;  %v4405_v23 = vmax.f32 %v2983_v17, 0.0  ;;  %v4605_v24 = vmax.f32 %v3783_v18, 0.0  ;;  %3194 = vmatmul.mubr.bf16.gmra.mrb[224].mxu0 %v8428_v9  ;;  %3994 = vmatmul.mubr.bf16.gmra.mrb[224].mxu1 %v8429_v10  ;;  %v8446_v18 = vld [vmem:[%s8759_s28 + $0x3b0] ss:$8 sps:$4 sm:$0xff]  }
 0x207   : > { %3201 = vmatprep.mubr.bf16.mxu0 %v8430_v13  ;;  %4001 = vmatprep.mubr.bf16.mxu1 %v8432_v14  ;;  %v9459_v13 = vld [vmem:[%s10459_s2] ss:$0 sm:$0xff] }
 0x208   : > { %6405 = vst.msk [vmem:[%s8945_s4 + $0xe8] sm:$0xf] %vm6346_vm0, %v7689_v21  ;;  %6605 = vst.msk [vmem:[%s8945_s4 + $0x408] sm:$0xf] %vm6346_vm0, %v7889_v22  ;;  %v7690_v25 = vpack.c.bf16 %v4405_v23, %v4405_v23  ;;  %v7890_v26 = vpack.c.bf16 %v4605_v24, %v4605_v24  ;;  %v8448_v22 = vld [vmem:[%s8759_s28 + $0x3c4] ss:$8 sps:$4 sm:$0xff]  }
 0x209   : > { %v2987_v27 = vpop.f32.mrb[120].mxu0  ;;  %v3787_v28 = vpop.f32.mrb[120].mxu1  ;;  %v8450_v23 = vld [vmem:[%s8759_s28 + $0xa04] ss:$8 sps:$4 sm:$0xff]  }
 0x20a   : > { %6406 = vst.msk [vmem:[%s8945_s4 + $0xec] sm:$0xf] %vm6346_vm0, %v7690_v25  ;;  %6606 = vst.msk [vmem:[%s8945_s4 + $0x40c] sm:$0xf] %vm6346_vm0, %v7890_v26  ;;  %v2988_v29 = vadd.f32 %v9198_v7, %v2987_v27  ;;  %v3788_v30 = vadd.f32 %v9198_v7, %v3787_v28  ;;  %v2989_v31 = vpop.f32.mrb[121].mxu0  ;;  %v3789_v32 = vpop.f32.mrb[121].mxu1 }
 0x20b   : > { %v2990_v35 = vpop.f32.mrb[122].mxu0  ;;  %v3790_v36 = vpop.f32.mrb[122].mxu1 }
 0x20c   : > { %v4406_v39 = vmax.f32 %v2988_v29, 0.0  ;;  %v4606_v40 = vmax.f32 %v3788_v30, 0.0  ;;  %v2991_v41 = vadd.f32 %v9198_v7, %v2990_v35  ;;  %v3791_v42 = vadd.f32 %v9198_v7, %v3790_v36  ;;  %v2992_v43 = vpop.f32.mrb[123].mxu0  ;;  %v3792_v44 = vpop.f32.mrb[123].mxu1 }
 0x20d   : > { %v8453_v43 = vld [vmem:[%s8759_s28 + $0xa00] ss:$8 sps:$4 sm:$0xff]  }
 0x20e   : > { %v7691_v45 = vpack.c.bf16 %v4406_v39, %v4406_v39  ;;  %v7891_v46 = vpack.c.bf16 %v4606_v40, %v4606_v40  ;;  %v4407_v47 = vmax.f32 %v2991_v41, 0.0  ;;  %v4607_v48 = vmax.f32 %v3791_v42, 0.0  ;;  %3202 = vmatmul.mubr.bf16.gmra.mrb[228].mxu0 %v8434_v33  ;;  %4002 = vmatmul.mubr.bf16.gmra.mrb[228].mxu1 %v8435_v34  ;;  %v8452_v42 = vld [vmem:[%s8759_s28 + $0x3c0] ss:$8 sps:$4 sm:$0xff]  }
 0x20f   : > { %3209 = vmatprep.mubr.bf16.mxu0 %v8436_v37  ;;  %4009 = vmatprep.mubr.bf16.mxu1 %v8438_v38 }
 0x210   : > { %6407 = vst.msk [vmem:[%s8945_s4 + $0xf0] sm:$0xf] %vm6346_vm0, %v7691_v45  ;;  %6607 = vst.msk [vmem:[%s8945_s4 + $0x410] sm:$0xf] %vm6346_vm0, %v7891_v46  ;;  %v7692_v49 = vpack.c.bf16 %v4407_v47, %v4407_v47  ;;  %v7892_v50 = vpack.c.bf16 %v4607_v48, %v4607_v48  ;;  %v8454_v46 = vld [vmem:[%s8759_s28 + $0x3d4] ss:$8 sps:$4 sm:$0xff]  }
 0x211   : > { %v2995_v51 = vpop.f32.mrb[124].mxu0  ;;  %v3795_v52 = vpop.f32.mrb[124].mxu1  ;;  %v8456_v47 = vld [vmem:[%s8759_s28 + $0xa14] ss:$8 sps:$4 sm:$0xff]  }
 0x212   : > { %6408 = vst.msk [vmem:[%s8945_s4 + $0xf4] sm:$0xf] %vm6346_vm0, %v7692_v49  ;;  %6608 = vst.msk [vmem:[%s8945_s4 + $0x414] sm:$0xf] %vm6346_vm0, %v7892_v50  ;;  %v2996_v53 = vadd.f32 %v9198_v7, %v2995_v51  ;;  %v3796_v54 = vadd.f32 %v9198_v7, %v3795_v52  ;;  %v2997_v55 = vpop.f32.mrb[125].mxu0  ;;  %v3797_v56 = vpop.f32.mrb[125].mxu1 }
 0x213   : > { %v2998_v59 = vpop.f32.mrb[126].mxu0  ;;  %v3798_v60 = vpop.f32.mrb[126].mxu1 }
 0x214   : > { %v4408_v0 = vmax.f32 %v2996_v53, 0.0  ;;  %v4608_v1 = vmax.f32 %v3796_v54, 0.0  ;;  %v2999_v2 = vadd.f32 %v9198_v7, %v2998_v59  ;;  %v3799_v3 = vadd.f32 %v9198_v7, %v3798_v60  ;;  %v3000_v63 = vpop.f32.mrb[127].mxu0  ;;  %v3800_v4 = vpop.f32.mrb[127].mxu1 }
 0x215   : > { %v8459_v63 = vld [vmem:[%s8759_s28 + $0xa10] ss:$8 sps:$4 sm:$0xff]  }
 0x216   : > { %v7693_v5 = vpack.c.bf16 %v4408_v0, %v4408_v0  ;;  %v7893_v6 = vpack.c.bf16 %v4608_v1, %v4608_v1  ;;  %v4409_v8 = vmax.f32 %v2999_v2, 0.0  ;;  %v4609_v9 = vmax.f32 %v3799_v3, 0.0  ;;  %3210 = vmatmul.mubr.bf16.gmra.mrb[232].mxu0 %v8440_v57  ;;  %4010 = vmatmul.mubr.bf16.gmra.mrb[232].mxu1 %v8441_v58  ;;  %v8458_v3 = vld [vmem:[%s8759_s28 + $0x3d0] ss:$8 sps:$4 sm:$0xff]  }
 0x217   : > { %3217 = vmatprep.mubr.bf16.mxu0 %v8442_v61  ;;  %4017 = vmatprep.mubr.bf16.mxu1 %v8444_v62 }
 0x218   : > { %6409 = vst.msk [vmem:[%s8945_s4 + $0xf8] sm:$0xf] %vm6346_vm0, %v7693_v5  ;;  %6609 = vst.msk [vmem:[%s8945_s4 + $0x418] sm:$0xf] %vm6346_vm0, %v7893_v6  ;;  %v7694_v7 = vpack.c.bf16 %v4409_v8, %v4409_v8  ;;  %v7894_v10 = vpack.c.bf16 %v4609_v9, %v4609_v9  ;;  %v8460_v6 = vld [vmem:[%s8759_s28 + $0x3e4] ss:$8 sps:$4 sm:$0xff]  }
 0x219   : > { %v3003_v11 = vpop.f32.mrb[128].mxu0  ;;  %v3803_v12 = vpop.f32.mrb[128].mxu1  ;;  %v8462_v8 = vld [vmem:[%s8759_s28 + $0xa24] ss:$8 sps:$4 sm:$0xff]  }
 0x21a   : > { %6410 = vst.msk [vmem:[%s8945_s4 + $0xfc] sm:$0xf] %vm6346_vm0, %v7694_v7  ;;  %6610 = vst.msk [vmem:[%s8945_s4 + $0x41c] sm:$0xf] %vm6346_vm0, %v7894_v10  ;;  %v3004_v14 = vadd.f32 %v9459_v13, %v3003_v11  ;;  %v3804_v15 = vadd.f32 %v9459_v13, %v3803_v12  ;;  %v3005_v16 = vpop.f32.mrb[129].mxu0  ;;  %v3805_v17 = vpop.f32.mrb[129].mxu1 }
 0x21b   : > { %v3006_v20 = vpop.f32.mrb[130].mxu0  ;;  %v3806_v21 = vpop.f32.mrb[130].mxu1 }
 0x21c   : > { %v4410_v24 = vmax.f32 %v3004_v14, 0.0  ;;  %v4610_v25 = vmax.f32 %v3804_v15, 0.0  ;;  %v3007_v26 = vadd.f32 %v9459_v13, %v3006_v20  ;;  %v3807_v27 = vadd.f32 %v9459_v13, %v3806_v21  ;;  %v3008_v28 = vpop.f32.mrb[131].mxu0  ;;  %v3808_v29 = vpop.f32.mrb[131].mxu1 }
 0x21d   : > { %v8465_v28 = vld [vmem:[%s8759_s28 + $0xa20] ss:$8 sps:$4 sm:$0xff]  }
 0x21e   : > { %v7695_v30 = vpack.c.bf16 %v4410_v24, %v4410_v24  ;;  %v7895_v31 = vpack.c.bf16 %v4610_v25, %v4610_v25  ;;  %v4411_v32 = vmax.f32 %v3007_v26, 0.0  ;;  %v4611_v33 = vmax.f32 %v3807_v27, 0.0  ;;  %3218 = vmatmul.mubr.bf16.gmra.mrb[236].mxu0 %v8446_v18  ;;  %4018 = vmatmul.mubr.bf16.gmra.mrb[236].mxu1 %v8447_v19  ;;  %v8464_v27 = vld [vmem:[%s8759_s28 + $0x3e0] ss:$8 sps:$4 sm:$0xff]  }
 0x21f   : > { %3225 = vmatprep.mubr.bf16.mxu0 %v8448_v22  ;;  %4025 = vmatprep.mubr.bf16.mxu1 %v8450_v23 }
 0x220   : > { %6411 = vst.msk [vmem:[%s8945_s4 + $0x100] sm:$0xf] %vm6346_vm0, %v7695_v30  ;;  %6611 = vst.msk [vmem:[%s8945_s4 + $0x420] sm:$0xf] %vm6346_vm0, %v7895_v31  ;;  %v7696_v34 = vpack.c.bf16 %v4411_v32, %v4411_v32  ;;  %v7896_v35 = vpack.c.bf16 %v4611_v33, %v4611_v33  ;;  %v8466_v31 = vld [vmem:[%s8759_s28 + $0x3f4] ss:$8 sps:$4 sm:$0xff]  }
 0x221   : > { %v3011_v36 = vpop.f32.mrb[132].mxu0  ;;  %v3811_v37 = vpop.f32.mrb[132].mxu1  ;;  %v8468_v32 = vld [vmem:[%s8759_s28 + $0xa34] ss:$8 sps:$4 sm:$0xff]  }
 0x222   : > { %6412 = vst.msk [vmem:[%s8945_s4 + $0x104] sm:$0xf] %vm6346_vm0, %v7696_v34  ;;  %6612 = vst.msk [vmem:[%s8945_s4 + $0x424] sm:$0xf] %vm6346_vm0, %v7896_v35  ;;  %v3012_v38 = vadd.f32 %v9459_v13, %v3011_v36  ;;  %v3812_v39 = vadd.f32 %v9459_v13, %v3811_v37  ;;  %v3013_v40 = vpop.f32.mrb[133].mxu0  ;;  %v3813_v41 = vpop.f32.mrb[133].mxu1 }
 0x223   : > { %v3014_v44 = vpop.f32.mrb[134].mxu0  ;;  %v3814_v45 = vpop.f32.mrb[134].mxu1 }
 0x224   : > { %v4412_v48 = vmax.f32 %v3012_v38, 0.0  ;;  %v4612_v49 = vmax.f32 %v3812_v39, 0.0  ;;  %v3015_v50 = vadd.f32 %v9459_v13, %v3014_v44  ;;  %v3815_v51 = vadd.f32 %v9459_v13, %v3814_v45  ;;  %v3016_v52 = vpop.f32.mrb[135].mxu0  ;;  %v3816_v53 = vpop.f32.mrb[135].mxu1 }
 0x225   : > { %v8471_v52 = vld [vmem:[%s8759_s28 + $0xa30] ss:$8 sps:$4 sm:$0xff]  }
 0x226   : > { %v7697_v54 = vpack.c.bf16 %v4412_v48, %v4412_v48  ;;  %v7897_v55 = vpack.c.bf16 %v4612_v49, %v4612_v49  ;;  %v4413_v56 = vmax.f32 %v3015_v50, 0.0  ;;  %v4613_v57 = vmax.f32 %v3815_v51, 0.0  ;;  %3226 = vmatmul.mubr.bf16.gmra.mrb[240].mxu0 %v8452_v42  ;;  %4026 = vmatmul.mubr.bf16.gmra.mrb[240].mxu1 %v8453_v43  ;;  %v8470_v51 = vld [vmem:[%s8759_s28 + $0x3f0] ss:$8 sps:$4 sm:$0xff]  }
 0x227   : > { %3233 = vmatprep.mubr.bf16.mxu0 %v8454_v46  ;;  %4033 = vmatprep.mubr.bf16.mxu1 %v8456_v47 }
 0x228   : > { %6413 = vst.msk [vmem:[%s8945_s4 + $0x108] sm:$0xf] %vm6346_vm0, %v7697_v54  ;;  %6613 = vst.msk [vmem:[%s8945_s4 + $0x428] sm:$0xf] %vm6346_vm0, %v7897_v55  ;;  %v7698_v58 = vpack.c.bf16 %v4413_v56, %v4413_v56  ;;  %v7898_v59 = vpack.c.bf16 %v4613_v57, %v4613_v57  ;;  %v8474_v55 = vld [vmem:[%s8759_s28 + $0x404] ss:$8 sps:$4 sm:$0xff]  }
 0x229   : > { %v3019_v60 = vpop.f32.mrb[136].mxu0  ;;  %v3819_v61 = vpop.f32.mrb[136].mxu1  ;;  %v8477_v56 = vld [vmem:[%s8759_s28 + $0xa44] ss:$8 sps:$4 sm:$0xff]  }
 0x22a   : > { %6414 = vst.msk [vmem:[%s8945_s4 + $0x10c] sm:$0xf] %vm6346_vm0, %v7698_v58  ;;  %6614 = vst.msk [vmem:[%s8945_s4 + $0x42c] sm:$0xf] %vm6346_vm0, %v7898_v59  ;;  %v3020_v62 = vadd.f32 %v9459_v13, %v3019_v60  ;;  %v3820_v0 = vadd.f32 %v9459_v13, %v3819_v61  ;;  %v3021_v1 = vpop.f32.mrb[137].mxu0  ;;  %v3821_v2 = vpop.f32.mrb[137].mxu1 }
 0x22b   : > { %v3022_v4 = vpop.f32.mrb[138].mxu0  ;;  %v3822_v5 = vpop.f32.mrb[138].mxu1 }
 0x22c   : > { %v4414_v9 = vmax.f32 %v3020_v62, 0.0  ;;  %v4614_v7 = vmax.f32 %v3820_v0, 0.0  ;;  %v3023_v10 = vadd.f32 %v9459_v13, %v3022_v4  ;;  %v3823_v11 = vadd.f32 %v9459_v13, %v3822_v5  ;;  %v3024_v12 = vpop.f32.mrb[139].mxu0  ;;  %v3824_v14 = vpop.f32.mrb[139].mxu1 }
 0x22d   : > { %v8475_v12 = vld [vmem:[%s8759_s28 + $0xa40] ss:$8 sps:$4 sm:$0xff]  }
 0x22e   : > { %v7699_v15 = vpack.c.bf16 %v4414_v9, %v4414_v9  ;;  %v7899_v16 = vpack.c.bf16 %v4614_v7, %v4614_v7  ;;  %v4415_v17 = vmax.f32 %v3023_v10, 0.0  ;;  %v4615_v18 = vmax.f32 %v3823_v11, 0.0  ;;  %3234 = vmatmul.mubr.bf16.gmra.mrb[244].mxu0 %v8458_v3  ;;  %4034 = vmatmul.mubr.bf16.gmra.mrb[244].mxu1 %v8459_v63  ;;  %v8472_v11 = vld [vmem:[%s8759_s28 + $0x400] ss:$8 sps:$4 sm:$0xff]  }
 0x22f   : > { %3241 = vmatprep.mubr.bf16.mxu0 %v8460_v6  ;;  %4041 = vmatprep.mubr.bf16.mxu1 %v8462_v8 }
 0x230   : > { %6415 = vst.msk [vmem:[%s8945_s4 + $0x110] sm:$0xf] %vm6346_vm0, %v7699_v15  ;;  %6615 = vst.msk [vmem:[%s8945_s4 + $0x430] sm:$0xf] %vm6346_vm0, %v7899_v16  ;;  %v7700_v19 = vpack.c.bf16 %v4415_v17, %v4415_v17  ;;  %v7900_v20 = vpack.c.bf16 %v4615_v18, %v4615_v18  ;;  %v8480_v16 = vld [vmem:[%s8759_s28 + $0x414] ss:$8 sps:$4 sm:$0xff]  }
 0x231   : > { %v3027_v21 = vpop.f32.mrb[140].mxu0  ;;  %v3827_v22 = vpop.f32.mrb[140].mxu1  ;;  %v8483_v17 = vld [vmem:[%s8759_s28 + $0xa54] ss:$8 sps:$4 sm:$0xff]  }
 0x232   : > { %6416 = vst.msk [vmem:[%s8945_s4 + $0x114] sm:$0xf] %vm6346_vm0, %v7700_v19  ;;  %6616 = vst.msk [vmem:[%s8945_s4 + $0x434] sm:$0xf] %vm6346_vm0, %v7900_v20  ;;  %v3028_v23 = vadd.f32 %v9459_v13, %v3027_v21  ;;  %v3828_v24 = vadd.f32 %v9459_v13, %v3827_v22  ;;  %v3029_v25 = vpop.f32.mrb[141].mxu0  ;;  %v3829_v26 = vpop.f32.mrb[141].mxu1 }
 0x233   : > { %v3030_v29 = vpop.f32.mrb[142].mxu0  ;;  %v3830_v30 = vpop.f32.mrb[142].mxu1 }
 0x234   : > { %v4416_v33 = vmax.f32 %v3028_v23, 0.0  ;;  %v4616_v34 = vmax.f32 %v3828_v24, 0.0  ;;  %v3031_v35 = vadd.f32 %v9459_v13, %v3030_v29  ;;  %v3831_v36 = vadd.f32 %v9459_v13, %v3830_v30  ;;  %v3032_v37 = vpop.f32.mrb[143].mxu0  ;;  %v3832_v38 = vpop.f32.mrb[143].mxu1 }
 0x235   : > { %v8481_v37 = vld [vmem:[%s8759_s28 + $0xa50] ss:$8 sps:$4 sm:$0xff]  }
 0x236   : > { %v7701_v39 = vpack.c.bf16 %v4416_v33, %v4416_v33  ;;  %v7901_v40 = vpack.c.bf16 %v4616_v34, %v4616_v34  ;;  %v4417_v41 = vmax.f32 %v3031_v35, 0.0  ;;  %v4617_v42 = vmax.f32 %v3831_v36, 0.0  ;;  %3242 = vmatmul.mubr.bf16.gmra.mrb[248].mxu0 %v8464_v27  ;;  %4042 = vmatmul.mubr.bf16.gmra.mrb[248].mxu1 %v8465_v28  ;;  %v8478_v36 = vld [vmem:[%s8759_s28 + $0x410] ss:$8 sps:$4 sm:$0xff]  }
 0x237   : > { %3249 = vmatprep.mubr.bf16.mxu0 %v8466_v31  ;;  %4049 = vmatprep.mubr.bf16.mxu1 %v8468_v32 }
 0x238   : > { %6417 = vst.msk [vmem:[%s8945_s4 + $0x118] sm:$0xf] %vm6346_vm0, %v7701_v39  ;;  %6617 = vst.msk [vmem:[%s8945_s4 + $0x438] sm:$0xf] %vm6346_vm0, %v7901_v40  ;;  %v7702_v43 = vpack.c.bf16 %v4417_v41, %v4417_v41  ;;  %v7902_v44 = vpack.c.bf16 %v4617_v42, %v4617_v42  ;;  %v8486_v40 = vld [vmem:[%s8759_s28 + $0x424] ss:$8 sps:$4 sm:$0xff]  }
 0x239   : > { %v3035_v45 = vpop.f32.mrb[144].mxu0  ;;  %v3835_v46 = vpop.f32.mrb[144].mxu1  ;;  %v8489_v41 = vld [vmem:[%s8759_s28 + $0xa64] ss:$8 sps:$4 sm:$0xff]  }
 0x23a   : > { %6418 = vst.msk [vmem:[%s8945_s4 + $0x11c] sm:$0xf] %vm6346_vm0, %v7702_v43  ;;  %6618 = vst.msk [vmem:[%s8945_s4 + $0x43c] sm:$0xf] %vm6346_vm0, %v7902_v44  ;;  %v3036_v47 = vadd.f32 %v9459_v13, %v3035_v45  ;;  %v3836_v48 = vadd.f32 %v9459_v13, %v3835_v46  ;;  %v3037_v49 = vpop.f32.mrb[145].mxu0  ;;  %v3837_v50 = vpop.f32.mrb[145].mxu1 }
 0x23b   : > { %v3038_v53 = vpop.f32.mrb[146].mxu0  ;;  %v3838_v54 = vpop.f32.mrb[146].mxu1 }
 0x23c   : > { %v4418_v57 = vmax.f32 %v3036_v47, 0.0  ;;  %v4618_v58 = vmax.f32 %v3836_v48, 0.0  ;;  %v3039_v59 = vadd.f32 %v9459_v13, %v3038_v53  ;;  %v3839_v60 = vadd.f32 %v9459_v13, %v3838_v54  ;;  %v3040_v61 = vpop.f32.mrb[147].mxu0  ;;  %v3840_v62 = vpop.f32.mrb[147].mxu1 }
 0x23d   : > { %v8487_v61 = vld [vmem:[%s8759_s28 + $0xa60] ss:$8 sps:$4 sm:$0xff]  }
 0x23e   : > { %v7703_v0 = vpack.c.bf16 %v4418_v57, %v4418_v57  ;;  %v7903_v1 = vpack.c.bf16 %v4618_v58, %v4618_v58  ;;  %v4419_v2 = vmax.f32 %v3039_v59, 0.0  ;;  %v4619_v3 = vmax.f32 %v3839_v60, 0.0  ;;  %3250 = vmatmul.mubr.bf16.gmra.mrb[252].mxu0 %v8470_v51  ;;  %4050 = vmatmul.mubr.bf16.gmra.mrb[252].mxu1 %v8471_v52  ;;  %v8484_v60 = vld [vmem:[%s8759_s28 + $0x420] ss:$8 sps:$4 sm:$0xff]  }
 0x23f   : > { %3257 = vmatprep.mubr.bf16.mxu0 %v8474_v55  ;;  %4057 = vmatprep.mubr.bf16.mxu1 %v8477_v56 }
 0x240   : > { %6419 = vst.msk [vmem:[%s8945_s4 + $0x120] sm:$0xf] %vm6346_vm0, %v7703_v0  ;;  %6619 = vst.msk [vmem:[%s8945_s4 + $0x440] sm:$0xf] %vm6346_vm0, %v7903_v1  ;;  %v7704_v63 = vpack.c.bf16 %v4419_v2, %v4419_v2  ;;  %v7904_v4 = vpack.c.bf16 %v4619_v3, %v4619_v3  ;;  %v8492_v1 = vld [vmem:[%s8759_s28 + $0x434] ss:$8 sps:$4 sm:$0xff]  }
 0x241   : > { %v3043_v5 = vpop.f32.mrb[148].mxu0  ;;  %v3843_v6 = vpop.f32.mrb[148].mxu1  ;;  %v8495_v2 = vld [vmem:[%s8759_s28 + $0xa74] ss:$8 sps:$4 sm:$0xff]  }
 0x242   : > { %6420 = vst.msk [vmem:[%s8945_s4 + $0x124] sm:$0xf] %vm6346_vm0, %v7704_v63  ;;  %6620 = vst.msk [vmem:[%s8945_s4 + $0x444] sm:$0xf] %vm6346_vm0, %v7904_v4  ;;  %v3044_v8 = vadd.f32 %v9459_v13, %v3043_v5  ;;  %v3844_v9 = vadd.f32 %v9459_v13, %v3843_v6  ;;  %v3045_v7 = vpop.f32.mrb[149].mxu0  ;;  %v3845_v10 = vpop.f32.mrb[149].mxu1 }
 0x243   : > { %v3046_v14 = vpop.f32.mrb[150].mxu0  ;;  %v3846_v15 = vpop.f32.mrb[150].mxu1 }
 0x244   : > { %v4420_v18 = vmax.f32 %v3044_v8, 0.0  ;;  %v4620_v19 = vmax.f32 %v3844_v9, 0.0  ;;  %v3047_v20 = vadd.f32 %v9459_v13, %v3046_v14  ;;  %v3847_v21 = vadd.f32 %v9459_v13, %v3846_v15  ;;  %v3048_v22 = vpop.f32.mrb[151].mxu0  ;;  %v3848_v23 = vpop.f32.mrb[151].mxu1 }
 0x245   : > { %v8493_v22 = vld [vmem:[%s8759_s28 + $0xa70] ss:$8 sps:$4 sm:$0xff]  }
 0x246   : > { %v7705_v24 = vpack.c.bf16 %v4420_v18, %v4420_v18  ;;  %v7905_v25 = vpack.c.bf16 %v4620_v19, %v4620_v19  ;;  %v4421_v26 = vmax.f32 %v3047_v20, 0.0  ;;  %v4621_v27 = vmax.f32 %v3847_v21, 0.0  ;;  %3258 = vmatmul.mubr.bf16.gmra.mrb[0].mxu0 %v8472_v11  ;;  %4058 = vmatmul.mubr.bf16.gmra.mrb[0].mxu1 %v8475_v12  ;;  %v8490_v21 = vld [vmem:[%s8759_s28 + $0x430] ss:$8 sps:$4 sm:$0xff]  }
 0x247   : > { %3265 = vmatprep.mubr.bf16.mxu0 %v8480_v16  ;;  %4065 = vmatprep.mubr.bf16.mxu1 %v8483_v17 }
 0x248   : > { %6421 = vst.msk [vmem:[%s8945_s4 + $0x128] sm:$0xf] %vm6346_vm0, %v7705_v24  ;;  %6621 = vst.msk [vmem:[%s8945_s4 + $0x448] sm:$0xf] %vm6346_vm0, %v7905_v25  ;;  %v7706_v28 = vpack.c.bf16 %v4421_v26, %v4421_v26  ;;  %v7906_v29 = vpack.c.bf16 %v4621_v27, %v4621_v27  ;;  %v8498_v25 = vld [vmem:[%s8759_s28 + $0x444] ss:$8 sps:$4 sm:$0xff]  }
 0x249   : > { %v3051_v30 = vpop.f32.mrb[152].mxu0  ;;  %v3851_v31 = vpop.f32.mrb[152].mxu1  ;;  %v8501_v26 = vld [vmem:[%s8759_s28 + $0xa84] ss:$8 sps:$4 sm:$0xff]  }
 0x24a   : > { %6422 = vst.msk [vmem:[%s8945_s4 + $0x12c] sm:$0xf] %vm6346_vm0, %v7706_v28  ;;  %6622 = vst.msk [vmem:[%s8945_s4 + $0x44c] sm:$0xf] %vm6346_vm0, %v7906_v29  ;;  %v3052_v32 = vadd.f32 %v9459_v13, %v3051_v30  ;;  %v3852_v33 = vadd.f32 %v9459_v13, %v3851_v31  ;;  %v3053_v34 = vpop.f32.mrb[153].mxu0  ;;  %v3853_v35 = vpop.f32.mrb[153].mxu1 }
 0x24b   : > { %v3054_v38 = vpop.f32.mrb[154].mxu0  ;;  %v3854_v39 = vpop.f32.mrb[154].mxu1 }
 0x24c   : > { %v4422_v42 = vmax.f32 %v3052_v32, 0.0  ;;  %v4622_v43 = vmax.f32 %v3852_v33, 0.0  ;;  %v3055_v44 = vadd.f32 %v9459_v13, %v3054_v38  ;;  %v3855_v45 = vadd.f32 %v9459_v13, %v3854_v39  ;;  %v3056_v46 = vpop.f32.mrb[155].mxu0  ;;  %v3856_v47 = vpop.f32.mrb[155].mxu1 }
 0x24d   : > { %v8499_v46 = vld [vmem:[%s8759_s28 + $0xa80] ss:$8 sps:$4 sm:$0xff]  }
 0x24e   : > { %v7707_v48 = vpack.c.bf16 %v4422_v42, %v4422_v42  ;;  %v7907_v49 = vpack.c.bf16 %v4622_v43, %v4622_v43  ;;  %v4423_v50 = vmax.f32 %v3055_v44, 0.0  ;;  %v4623_v51 = vmax.f32 %v3855_v45, 0.0  ;;  %3266 = vmatmul.mubr.bf16.gmra.mrb[4].mxu0 %v8478_v36  ;;  %4066 = vmatmul.mubr.bf16.gmra.mrb[4].mxu1 %v8481_v37  ;;  %v8496_v45 = vld [vmem:[%s8759_s28 + $0x440] ss:$8 sps:$4 sm:$0xff]  }
 0x24f   : > { %3273 = vmatprep.mubr.bf16.mxu0 %v8486_v40  ;;  %4073 = vmatprep.mubr.bf16.mxu1 %v8489_v41 }
 0x250   : > { %6423 = vst.msk [vmem:[%s8945_s4 + $0x130] sm:$0xf] %vm6346_vm0, %v7707_v48  ;;  %6623 = vst.msk [vmem:[%s8945_s4 + $0x450] sm:$0xf] %vm6346_vm0, %v7907_v49  ;;  %v7708_v52 = vpack.c.bf16 %v4423_v50, %v4423_v50  ;;  %v7908_v53 = vpack.c.bf16 %v4623_v51, %v4623_v51  ;;  %v8504_v49 = vld [vmem:[%s8759_s28 + $0x454] ss:$8 sps:$4 sm:$0xff]  }
 0x251   : > { %v3059_v54 = vpop.f32.mrb[156].mxu0  ;;  %v3859_v55 = vpop.f32.mrb[156].mxu1  ;;  %v8507_v50 = vld [vmem:[%s8759_s28 + $0xa94] ss:$8 sps:$4 sm:$0xff]  }
 0x252   : > { %6424 = vst.msk [vmem:[%s8945_s4 + $0x134] sm:$0xf] %vm6346_vm0, %v7708_v52  ;;  %6624 = vst.msk [vmem:[%s8945_s4 + $0x454] sm:$0xf] %vm6346_vm0, %v7908_v53  ;;  %v3060_v56 = vadd.f32 %v9459_v13, %v3059_v54  ;;  %v3860_v57 = vadd.f32 %v9459_v13, %v3859_v55  ;;  %v3061_v58 = vpop.f32.mrb[157].mxu0  ;;  %v3861_v59 = vpop.f32.mrb[157].mxu1 }
 0x253   : > { %v3062_v62 = vpop.f32.mrb[158].mxu0  ;;  %v3862_v0 = vpop.f32.mrb[158].mxu1 }
 0x254   : > { %v4424_v3 = vmax.f32 %v3060_v56, 0.0  ;;  %v4624_v63 = vmax.f32 %v3860_v57, 0.0  ;;  %v3063_v4 = vadd.f32 %v9459_v13, %v3062_v62  ;;  %v3863_v5 = vadd.f32 %v9459_v13, %v3862_v0  ;;  %v3064_v6 = vpop.f32.mrb[159].mxu0  ;;  %v3864_v8 = vpop.f32.mrb[159].mxu1 }
 0x255   : > { %v8505_v6 = vld [vmem:[%s8759_s28 + $0xa90] ss:$8 sps:$4 sm:$0xff]  }
 0x256   : > { %v7709_v9 = vpack.c.bf16 %v4424_v3, %v4424_v3  ;;  %v7909_v7 = vpack.c.bf16 %v4624_v63, %v4624_v63  ;;  %v4425_v10 = vmax.f32 %v3063_v4, 0.0  ;;  %v4625_v11 = vmax.f32 %v3863_v5, 0.0  ;;  %3274 = vmatmul.mubr.bf16.gmra.mrb[8].mxu0 %v8484_v60  ;;  %4074 = vmatmul.mubr.bf16.gmra.mrb[8].mxu1 %v8487_v61  ;;  %v8502_v5 = vld [vmem:[%s8759_s28 + $0x450] ss:$8 sps:$4 sm:$0xff]  }
 0x257   : > { %3281 = vmatprep.mubr.bf16.mxu0 %v8492_v1  ;;  %4081 = vmatprep.mubr.bf16.mxu1 %v8495_v2 }
 0x258   : > { %6425 = vst.msk [vmem:[%s8945_s4 + $0x138] sm:$0xf] %vm6346_vm0, %v7709_v9  ;;  %6625 = vst.msk [vmem:[%s8945_s4 + $0x458] sm:$0xf] %vm6346_vm0, %v7909_v7  ;;  %v7710_v12 = vpack.c.bf16 %v4425_v10, %v4425_v10  ;;  %v7910_v14 = vpack.c.bf16 %v4625_v11, %v4625_v11  ;;  %v8510_v7 = vld [vmem:[%s8759_s28 + $0x464] ss:$8 sps:$4 sm:$0xff]  }
 0x259   : > { %v3067_v15 = vpop.f32.mrb[160].mxu0  ;;  %v3867_v16 = vpop.f32.mrb[160].mxu1  ;;  %v8513_v10 = vld [vmem:[%s8759_s28 + $0xaa4] ss:$8 sps:$4 sm:$0xff]  }
 0x25a   : > { %6426 = vst.msk [vmem:[%s8945_s4 + $0x13c] sm:$0xf] %vm6346_vm0, %v7710_v12  ;;  %6626 = vst.msk [vmem:[%s8945_s4 + $0x45c] sm:$0xf] %vm6346_vm0, %v7910_v14  ;;  %v3068_v17 = vadd.f32 %v9459_v13, %v3067_v15  ;;  %v3868_v18 = vadd.f32 %v9459_v13, %v3867_v16  ;;  %v3069_v19 = vpop.f32.mrb[161].mxu0  ;;  %v3869_v20 = vpop.f32.mrb[161].mxu1 }
 0x25b   : > { %v3070_v23 = vpop.f32.mrb[162].mxu0  ;;  %v3870_v24 = vpop.f32.mrb[162].mxu1 }
 0x25c   : > { %v4426_v27 = vmax.f32 %v3068_v17, 0.0  ;;  %v4626_v28 = vmax.f32 %v3868_v18, 0.0  ;;  %v3071_v29 = vadd.f32 %v9459_v13, %v3070_v23  ;;  %v3871_v30 = vadd.f32 %v9459_v13, %v3870_v24  ;;  %v3072_v31 = vpop.f32.mrb[163].mxu0  ;;  %v3872_v32 = vpop.f32.mrb[163].mxu1 }
 0x25d   : > { %v8511_v31 = vld [vmem:[%s8759_s28 + $0xaa0] ss:$8 sps:$4 sm:$0xff]  }
 0x25e   : > { %v7711_v33 = vpack.c.bf16 %v4426_v27, %v4426_v27  ;;  %v7911_v34 = vpack.c.bf16 %v4626_v28, %v4626_v28  ;;  %v4427_v35 = vmax.f32 %v3071_v29, 0.0  ;;  %v4627_v36 = vmax.f32 %v3871_v30, 0.0  ;;  %3282 = vmatmul.mubr.bf16.gmra.mrb[12].mxu0 %v8490_v21  ;;  %4082 = vmatmul.mubr.bf16.gmra.mrb[12].mxu1 %v8493_v22  ;;  %v8508_v30 = vld [vmem:[%s8759_s28 + $0x460] ss:$8 sps:$4 sm:$0xff]  }
 0x25f   : > { %3289 = vmatprep.mubr.bf16.mxu0 %v8498_v25  ;;  %4089 = vmatprep.mubr.bf16.mxu1 %v8501_v26 }
 0x260   : > { %6427 = vst.msk [vmem:[%s8945_s4 + $0x140] sm:$0xf] %vm6346_vm0, %v7711_v33  ;;  %6627 = vst.msk [vmem:[%s8945_s4 + $0x460] sm:$0xf] %vm6346_vm0, %v7911_v34  ;;  %v7712_v37 = vpack.c.bf16 %v4427_v35, %v4427_v35  ;;  %v7912_v38 = vpack.c.bf16 %v4627_v36, %v4627_v36  ;;  %v8516_v34 = vld [vmem:[%s8759_s28 + $0x474] ss:$8 sps:$4 sm:$0xff]  }
 0x261   : > { %v3075_v39 = vpop.f32.mrb[164].mxu0  ;;  %v3875_v40 = vpop.f32.mrb[164].mxu1  ;;  %v8519_v35 = vld [vmem:[%s8759_s28 + $0xab4] ss:$8 sps:$4 sm:$0xff]  }
 0x262   : > { %6428 = vst.msk [vmem:[%s8945_s4 + $0x144] sm:$0xf] %vm6346_vm0, %v7712_v37  ;;  %6628 = vst.msk [vmem:[%s8945_s4 + $0x464] sm:$0xf] %vm6346_vm0, %v7912_v38  ;;  %v3076_v41 = vadd.f32 %v9459_v13, %v3075_v39  ;;  %v3876_v42 = vadd.f32 %v9459_v13, %v3875_v40  ;;  %v3077_v43 = vpop.f32.mrb[165].mxu0  ;;  %v3877_v44 = vpop.f32.mrb[165].mxu1 }
 0x263   : > { %v3078_v47 = vpop.f32.mrb[166].mxu0  ;;  %v3878_v48 = vpop.f32.mrb[166].mxu1 }
 0x264   : > { %v4428_v51 = vmax.f32 %v3076_v41, 0.0  ;;  %v4628_v52 = vmax.f32 %v3876_v42, 0.0  ;;  %v3079_v53 = vadd.f32 %v9459_v13, %v3078_v47  ;;  %v3879_v54 = vadd.f32 %v9459_v13, %v3878_v48  ;;  %v3080_v55 = vpop.f32.mrb[167].mxu0  ;;  %v3880_v56 = vpop.f32.mrb[167].mxu1 }
 0x265   : > { %v8517_v55 = vld [vmem:[%s8759_s28 + $0xab0] ss:$8 sps:$4 sm:$0xff]  }
 0x266   : > { %v7713_v57 = vpack.c.bf16 %v4428_v51, %v4428_v51  ;;  %v7913_v58 = vpack.c.bf16 %v4628_v52, %v4628_v52  ;;  %v4429_v59 = vmax.f32 %v3079_v53, 0.0  ;;  %v4629_v60 = vmax.f32 %v3879_v54, 0.0  ;;  %3290 = vmatmul.mubr.bf16.gmra.mrb[16].mxu0 %v8496_v45  ;;  %4090 = vmatmul.mubr.bf16.gmra.mrb[16].mxu1 %v8499_v46  ;;  %v8514_v54 = vld [vmem:[%s8759_s28 + $0x470] ss:$8 sps:$4 sm:$0xff]  }
 0x267   : > { %3297 = vmatprep.mubr.bf16.mxu0 %v8504_v49  ;;  %4097 = vmatprep.mubr.bf16.mxu1 %v8507_v50 }
 0x268   : > { %6429 = vst.msk [vmem:[%s8945_s4 + $0x148] sm:$0xf] %vm6346_vm0, %v7713_v57  ;;  %6629 = vst.msk [vmem:[%s8945_s4 + $0x468] sm:$0xf] %vm6346_vm0, %v7913_v58  ;;  %v7714_v61 = vpack.c.bf16 %v4429_v59, %v4429_v59  ;;  %v7914_v62 = vpack.c.bf16 %v4629_v60, %v4629_v60  ;;  %v8522_v58 = vld [vmem:[%s8759_s28 + $0x484] ss:$8 sps:$4 sm:$0xff]  }
 0x269   : > { %v3083_v0 = vpop.f32.mrb[168].mxu0  ;;  %v3883_v1 = vpop.f32.mrb[168].mxu1  ;;  %v8525_v59 = vld [vmem:[%s8759_s28 + $0xac4] ss:$8 sps:$4 sm:$0xff]  }
 0x26a   : > { %6430 = vst.msk [vmem:[%s8945_s4 + $0x14c] sm:$0xf] %vm6346_vm0, %v7714_v61  ;;  %6630 = vst.msk [vmem:[%s8945_s4 + $0x46c] sm:$0xf] %vm6346_vm0, %v7914_v62  ;;  %v3084_v2 = vadd.f32 %v9459_v13, %v3083_v0  ;;  %v3884_v3 = vadd.f32 %v9459_v13, %v3883_v1  ;;  %v3085_v63 = vpop.f32.mrb[169].mxu0  ;;  %v3885_v4 = vpop.f32.mrb[169].mxu1 }
 0x26b   : > { %v3086_v8 = vpop.f32.mrb[170].mxu0  ;;  %v3886_v9 = vpop.f32.mrb[170].mxu1 }
 0x26c   : > { %v4430_v11 = vmax.f32 %v3084_v2, 0.0  ;;  %v4630_v12 = vmax.f32 %v3884_v3, 0.0  ;;  %v3087_v14 = vadd.f32 %v9459_v13, %v3086_v8  ;;  %v3887_v15 = vadd.f32 %v9459_v13, %v3886_v9  ;;  %v3088_v16 = vpop.f32.mrb[171].mxu0  ;;  %v3888_v17 = vpop.f32.mrb[171].mxu1 }
 0x26d   : > { %v8523_v16 = vld [vmem:[%s8759_s28 + $0xac0] ss:$8 sps:$4 sm:$0xff]  }
 0x26e   : > { %v7715_v18 = vpack.c.bf16 %v4430_v11, %v4430_v11  ;;  %v7915_v19 = vpack.c.bf16 %v4630_v12, %v4630_v12  ;;  %v4431_v20 = vmax.f32 %v3087_v14, 0.0  ;;  %v4631_v21 = vmax.f32 %v3887_v15, 0.0  ;;  %3298 = vmatmul.mubr.bf16.gmra.mrb[20].mxu0 %v8502_v5  ;;  %4098 = vmatmul.mubr.bf16.gmra.mrb[20].mxu1 %v8505_v6  ;;  %v8520_v15 = vld [vmem:[%s8759_s28 + $0x480] ss:$8 sps:$4 sm:$0xff]  }
 0x26f   : > { %3305 = vmatprep.mubr.bf16.mxu0 %v8510_v7  ;;  %4105 = vmatprep.mubr.bf16.mxu1 %v8513_v10 }
 0x270   : > { %6431 = vst.msk [vmem:[%s8945_s4 + $0x150] sm:$0xf] %vm6346_vm0, %v7715_v18  ;;  %6631 = vst.msk [vmem:[%s8945_s4 + $0x470] sm:$0xf] %vm6346_vm0, %v7915_v19  ;;  %v7716_v22 = vpack.c.bf16 %v4431_v20, %v4431_v20  ;;  %v7916_v23 = vpack.c.bf16 %v4631_v21, %v4631_v21  ;;  %v8528_v19 = vld [vmem:[%s8759_s28 + $0x494] ss:$8 sps:$4 sm:$0xff]  }
 0x271   : > { %v3091_v24 = vpop.f32.mrb[172].mxu0  ;;  %v3891_v25 = vpop.f32.mrb[172].mxu1  ;;  %v8531_v20 = vld [vmem:[%s8759_s28 + $0xad4] ss:$8 sps:$4 sm:$0xff]  }
 0x272   : > { %6432 = vst.msk [vmem:[%s8945_s4 + $0x154] sm:$0xf] %vm6346_vm0, %v7716_v22  ;;  %6632 = vst.msk [vmem:[%s8945_s4 + $0x474] sm:$0xf] %vm6346_vm0, %v7916_v23  ;;  %v3092_v26 = vadd.f32 %v9459_v13, %v3091_v24  ;;  %v3892_v27 = vadd.f32 %v9459_v13, %v3891_v25  ;;  %v3093_v28 = vpop.f32.mrb[173].mxu0  ;;  %v3893_v29 = vpop.f32.mrb[173].mxu1 }
 0x273   : > { %v3094_v32 = vpop.f32.mrb[174].mxu0  ;;  %v3894_v33 = vpop.f32.mrb[174].mxu1 }
 0x274   : > { %v4432_v36 = vmax.f32 %v3092_v26, 0.0  ;;  %v4632_v37 = vmax.f32 %v3892_v27, 0.0  ;;  %v3095_v38 = vadd.f32 %v9459_v13, %v3094_v32  ;;  %v3895_v39 = vadd.f32 %v9459_v13, %v3894_v33  ;;  %v3096_v40 = vpop.f32.mrb[175].mxu0  ;;  %v3896_v41 = vpop.f32.mrb[175].mxu1 }
 0x275   : > { %v8529_v40 = vld [vmem:[%s8759_s28 + $0xad0] ss:$8 sps:$4 sm:$0xff]  }
 0x276   : > { %v7717_v42 = vpack.c.bf16 %v4432_v36, %v4432_v36  ;;  %v7917_v43 = vpack.c.bf16 %v4632_v37, %v4632_v37  ;;  %v4433_v44 = vmax.f32 %v3095_v38, 0.0  ;;  %v4633_v45 = vmax.f32 %v3895_v39, 0.0  ;;  %3306 = vmatmul.mubr.bf16.gmra.mrb[24].mxu0 %v8508_v30  ;;  %4106 = vmatmul.mubr.bf16.gmra.mrb[24].mxu1 %v8511_v31  ;;  %v8526_v39 = vld [vmem:[%s8759_s28 + $0x490] ss:$8 sps:$4 sm:$0xff]  }
 0x277   : > { %3313 = vmatprep.mubr.bf16.mxu0 %v8516_v34  ;;  %4113 = vmatprep.mubr.bf16.mxu1 %v8519_v35 }
 0x278   : > { %6433 = vst.msk [vmem:[%s8945_s4 + $0x158] sm:$0xf] %vm6346_vm0, %v7717_v42  ;;  %6633 = vst.msk [vmem:[%s8945_s4 + $0x478] sm:$0xf] %vm6346_vm0, %v7917_v43  ;;  %v7718_v46 = vpack.c.bf16 %v4433_v44, %v4433_v44  ;;  %v7918_v47 = vpack.c.bf16 %v4633_v45, %v4633_v45  ;;  %v8534_v43 = vld [vmem:[%s8759_s28 + $0x4a4] ss:$8 sps:$4 sm:$0xff]  }
 0x279   : > { %v3099_v48 = vpop.f32.mrb[176].mxu0  ;;  %v3899_v49 = vpop.f32.mrb[176].mxu1  ;;  %v8537_v44 = vld [vmem:[%s8759_s28 + $0xae4] ss:$8 sps:$4 sm:$0xff]  }
 0x27a   : > { %6434 = vst.msk [vmem:[%s8945_s4 + $0x15c] sm:$0xf] %vm6346_vm0, %v7718_v46  ;;  %6634 = vst.msk [vmem:[%s8945_s4 + $0x47c] sm:$0xf] %vm6346_vm0, %v7918_v47  ;;  %v3100_v50 = vadd.f32 %v9459_v13, %v3099_v48  ;;  %v3900_v51 = vadd.f32 %v9459_v13, %v3899_v49  ;;  %v3101_v52 = vpop.f32.mrb[177].mxu0  ;;  %v3901_v53 = vpop.f32.mrb[177].mxu1 }
 0x27b   : > { %v3102_v56 = vpop.f32.mrb[178].mxu0  ;;  %v3902_v57 = vpop.f32.mrb[178].mxu1 }
 0x27c   : > { %v4434_v60 = vmax.f32 %v3100_v50, 0.0  ;;  %v4634_v61 = vmax.f32 %v3900_v51, 0.0  ;;  %v3103_v62 = vadd.f32 %v9459_v13, %v3102_v56  ;;  %v3903_v0 = vadd.f32 %v9459_v13, %v3902_v57  ;;  %v3104_v1 = vpop.f32.mrb[179].mxu0  ;;  %v3904_v2 = vpop.f32.mrb[179].mxu1 }
 0x27d   : > { %v8535_v1 = vld [vmem:[%s8759_s28 + $0xae0] ss:$8 sps:$4 sm:$0xff]  }
 0x27e   : > { %v7719_v3 = vpack.c.bf16 %v4434_v60, %v4434_v60  ;;  %v7919_v63 = vpack.c.bf16 %v4634_v61, %v4634_v61  ;;  %v4435_v4 = vmax.f32 %v3103_v62, 0.0  ;;  %v4635_v5 = vmax.f32 %v3903_v0, 0.0  ;;  %3314 = vmatmul.mubr.bf16.gmra.mrb[28].mxu0 %v8514_v54  ;;  %4114 = vmatmul.mubr.bf16.gmra.mrb[28].mxu1 %v8517_v55  ;;  %v8532_v0 = vld [vmem:[%s8759_s28 + $0x4a0] ss:$8 sps:$4 sm:$0xff]  }
 0x27f   : > { %3321 = vmatprep.mubr.bf16.mxu0 %v8522_v58  ;;  %4121 = vmatprep.mubr.bf16.mxu1 %v8525_v59 }
 0x280   : > { %6435 = vst.msk [vmem:[%s8945_s4 + $0x160] sm:$0xf] %vm6346_vm0, %v7719_v3  ;;  %6635 = vst.msk [vmem:[%s8945_s4 + $0x480] sm:$0xf] %vm6346_vm0, %v7919_v63  ;;  %v7720_v6 = vpack.c.bf16 %v4435_v4, %v4435_v4  ;;  %v7920_v8 = vpack.c.bf16 %v4635_v5, %v4635_v5  ;;  %v8540_v63 = vld [vmem:[%s8759_s28 + $0x4b4] ss:$8 sps:$4 sm:$0xff]  }
 0x281   : > { %v3107_v9 = vpop.f32.mrb[180].mxu0  ;;  %v3907_v7 = vpop.f32.mrb[180].mxu1  ;;  %v8543_v4 = vld [vmem:[%s8759_s28 + $0xaf4] ss:$8 sps:$4 sm:$0xff]  }
 0x282   : > { %6436 = vst.msk [vmem:[%s8945_s4 + $0x164] sm:$0xf] %vm6346_vm0, %v7720_v6  ;;  %6636 = vst.msk [vmem:[%s8945_s4 + $0x484] sm:$0xf] %vm6346_vm0, %v7920_v8  ;;  %v3108_v10 = vadd.f32 %v9459_v13, %v3107_v9  ;;  %v3908_v11 = vadd.f32 %v9459_v13, %v3907_v7  ;;  %v3109_v12 = vpop.f32.mrb[181].mxu0  ;;  %v3909_v14 = vpop.f32.mrb[181].mxu1 }
 0x283   : > { %v3110_v17 = vpop.f32.mrb[182].mxu0  ;;  %v3910_v18 = vpop.f32.mrb[182].mxu1 }
 0x284   : > { %v4436_v21 = vmax.f32 %v3108_v10, 0.0  ;;  %v4636_v22 = vmax.f32 %v3908_v11, 0.0  ;;  %v3111_v23 = vadd.f32 %v9459_v13, %v3110_v17  ;;  %v3911_v24 = vadd.f32 %v9459_v13, %v3910_v18  ;;  %v3112_v25 = vpop.f32.mrb[183].mxu0  ;;  %v3912_v26 = vpop.f32.mrb[183].mxu1 }
 0x285   : > { %v8541_v25 = vld [vmem:[%s8759_s28 + $0xaf0] ss:$8 sps:$4 sm:$0xff]  }
 0x286   : > { %v7721_v27 = vpack.c.bf16 %v4436_v21, %v4436_v21  ;;  %v7921_v28 = vpack.c.bf16 %v4636_v22, %v4636_v22  ;;  %v4437_v29 = vmax.f32 %v3111_v23, 0.0  ;;  %v4637_v30 = vmax.f32 %v3911_v24, 0.0  ;;  %3322 = vmatmul.mubr.bf16.gmra.mrb[32].mxu0 %v8520_v15  ;;  %4122 = vmatmul.mubr.bf16.gmra.mrb[32].mxu1 %v8523_v16  ;;  %v8538_v24 = vld [vmem:[%s8759_s28 + $0x4b0] ss:$8 sps:$4 sm:$0xff]  }
 0x287   : > { %3329 = vmatprep.mubr.bf16.mxu0 %v8528_v19  ;;  %4129 = vmatprep.mubr.bf16.mxu1 %v8531_v20  ;;  %v9720_v19 = vld [vmem:[%s10459_s2] ss:$0 sm:$0xff] }
 0x288   : > { %6437 = vst.msk [vmem:[%s8945_s4 + $0x168] sm:$0xf] %vm6346_vm0, %v7721_v27  ;;  %6637 = vst.msk [vmem:[%s8945_s4 + $0x488] sm:$0xf] %vm6346_vm0, %v7921_v28  ;;  %v7722_v31 = vpack.c.bf16 %v4437_v29, %v4437_v29  ;;  %v7922_v32 = vpack.c.bf16 %v4637_v30, %v4637_v30  ;;  %v8546_v28 = vld [vmem:[%s8759_s28 + $0x4c4] ss:$8 sps:$4 sm:$0xff]  }
 0x289   : > { %v3115_v33 = vpop.f32.mrb[184].mxu0  ;;  %v3915_v34 = vpop.f32.mrb[184].mxu1  ;;  %v8549_v29 = vld [vmem:[%s8759_s28 + $0xb04] ss:$8 sps:$4 sm:$0xff]  }
 0x28a   : > { %6438 = vst.msk [vmem:[%s8945_s4 + $0x16c] sm:$0xf] %vm6346_vm0, %v7722_v31  ;;  %6638 = vst.msk [vmem:[%s8945_s4 + $0x48c] sm:$0xf] %vm6346_vm0, %v7922_v32  ;;  %v3116_v35 = vadd.f32 %v9459_v13, %v3115_v33  ;;  %v3916_v36 = vadd.f32 %v9459_v13, %v3915_v34  ;;  %v3117_v37 = vpop.f32.mrb[185].mxu0  ;;  %v3917_v38 = vpop.f32.mrb[185].mxu1 }
 0x28b   : > { %v3118_v41 = vpop.f32.mrb[186].mxu0  ;;  %v3918_v42 = vpop.f32.mrb[186].mxu1 }
 0x28c   : > { %v4438_v45 = vmax.f32 %v3116_v35, 0.0  ;;  %v4638_v46 = vmax.f32 %v3916_v36, 0.0  ;;  %v3119_v47 = vadd.f32 %v9459_v13, %v3118_v41  ;;  %v3919_v48 = vadd.f32 %v9459_v13, %v3918_v42  ;;  %v3120_v49 = vpop.f32.mrb[187].mxu0  ;;  %v3920_v50 = vpop.f32.mrb[187].mxu1 }
 0x28d   : > { %v8547_v49 = vld [vmem:[%s8759_s28 + $0xb00] ss:$8 sps:$4 sm:$0xff]  }
 0x28e   : > { %v7723_v51 = vpack.c.bf16 %v4438_v45, %v4438_v45  ;;  %v7923_v52 = vpack.c.bf16 %v4638_v46, %v4638_v46  ;;  %v4439_v53 = vmax.f32 %v3119_v47, 0.0  ;;  %v4639_v54 = vmax.f32 %v3919_v48, 0.0  ;;  %3330 = vmatmul.mubr.bf16.gmra.mrb[36].mxu0 %v8526_v39  ;;  %4130 = vmatmul.mubr.bf16.gmra.mrb[36].mxu1 %v8529_v40  ;;  %v8544_v48 = vld [vmem:[%s8759_s28 + $0x4c0] ss:$8 sps:$4 sm:$0xff]  }
 0x28f   : > { %3337 = vmatprep.mubr.bf16.mxu0 %v8534_v43  ;;  %4137 = vmatprep.mubr.bf16.mxu1 %v8537_v44 }
 0x290   : > { %6439 = vst.msk [vmem:[%s8945_s4 + $0x170] sm:$0xf] %vm6346_vm0, %v7723_v51  ;;  %6639 = vst.msk [vmem:[%s8945_s4 + $0x490] sm:$0xf] %vm6346_vm0, %v7923_v52  ;;  %v7724_v55 = vpack.c.bf16 %v4439_v53, %v4439_v53  ;;  %v7924_v56 = vpack.c.bf16 %v4639_v54, %v4639_v54  ;;  %v8552_v52 = vld [vmem:[%s8759_s28 + $0x4d4] ss:$8 sps:$4 sm:$0xff]  }
 0x291   : > { %v3123_v57 = vpop.f32.mrb[188].mxu0  ;;  %v3923_v58 = vpop.f32.mrb[188].mxu1  ;;  %v8555_v53 = vld [vmem:[%s8759_s28 + $0xb14] ss:$8 sps:$4 sm:$0xff]  }
 0x292   : > { %6440 = vst.msk [vmem:[%s8945_s4 + $0x174] sm:$0xf] %vm6346_vm0, %v7724_v55  ;;  %6640 = vst.msk [vmem:[%s8945_s4 + $0x494] sm:$0xf] %vm6346_vm0, %v7924_v56  ;;  %v3124_v59 = vadd.f32 %v9459_v13, %v3123_v57  ;;  %v3924_v60 = vadd.f32 %v9459_v13, %v3923_v58  ;;  %v3125_v61 = vpop.f32.mrb[189].mxu0  ;;  %v3925_v62 = vpop.f32.mrb[189].mxu1 }
 0x293   : > { %v3126_v2 = vpop.f32.mrb[190].mxu0  ;;  %v3926_v3 = vpop.f32.mrb[190].mxu1 }
 0x294   : > { %v4440_v5 = vmax.f32 %v3124_v59, 0.0  ;;  %v4640_v6 = vmax.f32 %v3924_v60, 0.0  ;;  %v3127_v8 = vadd.f32 %v9459_v13, %v3126_v2  ;;  %v3927_v9 = vadd.f32 %v9459_v13, %v3926_v3  ;;  %v3128_v7 = vpop.f32.mrb[191].mxu0  ;;  %v3928_v10 = vpop.f32.mrb[191].mxu1 }
 0x295   : > { %v8553_v7 = vld [vmem:[%s8759_s28 + $0xb10] ss:$8 sps:$4 sm:$0xff]  }
 0x296   : > { %v7725_v11 = vpack.c.bf16 %v4440_v5, %v4440_v5  ;;  %v7925_v12 = vpack.c.bf16 %v4640_v6, %v4640_v6  ;;  %v4441_v14 = vmax.f32 %v3127_v8, 0.0  ;;  %v4641_v15 = vmax.f32 %v3927_v9, 0.0  ;;  %3338 = vmatmul.mubr.bf16.gmra.mrb[40].mxu0 %v8532_v0  ;;  %4138 = vmatmul.mubr.bf16.gmra.mrb[40].mxu1 %v8535_v1  ;;  %v8550_v9 = vld [vmem:[%s8759_s28 + $0x4d0] ss:$8 sps:$4 sm:$0xff]  }
 0x297   : > { %3345 = vmatprep.mubr.bf16.mxu0 %v8540_v63  ;;  %4145 = vmatprep.mubr.bf16.mxu1 %v8543_v4 }
 0x298   : > { %6441 = vst.msk [vmem:[%s8945_s4 + $0x178] sm:$0xf] %vm6346_vm0, %v7725_v11  ;;  %6641 = vst.msk [vmem:[%s8945_s4 + $0x498] sm:$0xf] %vm6346_vm0, %v7925_v12  ;;  %v7726_v13 = vpack.c.bf16 %v4441_v14, %v4441_v14  ;;  %v7926_v16 = vpack.c.bf16 %v4641_v15, %v4641_v15  ;;  %v8558_v12 = vld [vmem:[%s8759_s28 + $0x4e4] ss:$8 sps:$4 sm:$0xff]  }
 0x299   : > { %v3131_v17 = vpop.f32.mrb[192].mxu0  ;;  %v3931_v18 = vpop.f32.mrb[192].mxu1  ;;  %v8561_v14 = vld [vmem:[%s8759_s28 + $0xb24] ss:$8 sps:$4 sm:$0xff]  }
 0x29a   : > { %6442 = vst.msk [vmem:[%s8945_s4 + $0x17c] sm:$0xf] %vm6346_vm0, %v7726_v13  ;;  %6642 = vst.msk [vmem:[%s8945_s4 + $0x49c] sm:$0xf] %vm6346_vm0, %v7926_v16  ;;  %v3132_v20 = vadd.f32 %v9720_v19, %v3131_v17  ;;  %v3932_v21 = vadd.f32 %v9720_v19, %v3931_v18  ;;  %v3133_v22 = vpop.f32.mrb[193].mxu0  ;;  %v3933_v23 = vpop.f32.mrb[193].mxu1 }
 0x29b   : > { %v3134_v26 = vpop.f32.mrb[194].mxu0  ;;  %v3934_v27 = vpop.f32.mrb[194].mxu1 }
 0x29c   : > { %v4442_v30 = vmax.f32 %v3132_v20, 0.0  ;;  %v4642_v31 = vmax.f32 %v3932_v21, 0.0  ;;  %v3135_v32 = vadd.f32 %v9720_v19, %v3134_v26  ;;  %v3935_v33 = vadd.f32 %v9720_v19, %v3934_v27  ;;  %v3136_v34 = vpop.f32.mrb[195].mxu0  ;;  %v3936_v35 = vpop.f32.mrb[195].mxu1 }
 0x29d   : > { %v8559_v34 = vld [vmem:[%s8759_s28 + $0xb20] ss:$8 sps:$4 sm:$0xff]  }
 0x29e   : > { %v7727_v36 = vpack.c.bf16 %v4442_v30, %v4442_v30  ;;  %v7927_v37 = vpack.c.bf16 %v4642_v31, %v4642_v31  ;;  %v4443_v38 = vmax.f32 %v3135_v32, 0.0  ;;  %v4643_v39 = vmax.f32 %v3935_v33, 0.0  ;;  %3346 = vmatmul.mubr.bf16.gmra.mrb[44].mxu0 %v8538_v24  ;;  %4146 = vmatmul.mubr.bf16.gmra.mrb[44].mxu1 %v8541_v25  ;;  %v8556_v33 = vld [vmem:[%s8759_s28 + $0x4e0] ss:$8 sps:$4 sm:$0xff]  }
 0x29f   : > { %3353 = vmatprep.mubr.bf16.mxu0 %v8546_v28  ;;  %4153 = vmatprep.mubr.bf16.mxu1 %v8549_v29 }
 0x2a0   : > { %6443 = vst.msk [vmem:[%s8945_s4 + $0x180] sm:$0xf] %vm6346_vm0, %v7727_v36  ;;  %6643 = vst.msk [vmem:[%s8945_s4 + $0x4a0] sm:$0xf] %vm6346_vm0, %v7927_v37  ;;  %v7728_v40 = vpack.c.bf16 %v4443_v38, %v4443_v38  ;;  %v7928_v41 = vpack.c.bf16 %v4643_v39, %v4643_v39  ;;  %v8564_v37 = vld [vmem:[%s8759_s28 + $0x4f4] ss:$8 sps:$4 sm:$0xff]  }
 0x2a1   : > { %v3139_v42 = vpop.f32.mrb[196].mxu0  ;;  %v3939_v43 = vpop.f32.mrb[196].mxu1  ;;  %v8567_v38 = vld [vmem:[%s8759_s28 + $0xb34] ss:$8 sps:$4 sm:$0xff]  }
 0x2a2   : > { %6444 = vst.msk [vmem:[%s8945_s4 + $0x184] sm:$0xf] %vm6346_vm0, %v7728_v40  ;;  %6644 = vst.msk [vmem:[%s8945_s4 + $0x4a4] sm:$0xf] %vm6346_vm0, %v7928_v41  ;;  %v3140_v44 = vadd.f32 %v9720_v19, %v3139_v42  ;;  %v3940_v45 = vadd.f32 %v9720_v19, %v3939_v43  ;;  %v3141_v46 = vpop.f32.mrb[197].mxu0  ;;  %v3941_v47 = vpop.f32.mrb[197].mxu1 }
 0x2a3   : > { %v3142_v50 = vpop.f32.mrb[198].mxu0  ;;  %v3942_v51 = vpop.f32.mrb[198].mxu1 }
 0x2a4   : > { %v4444_v54 = vmax.f32 %v3140_v44, 0.0  ;;  %v4644_v55 = vmax.f32 %v3940_v45, 0.0  ;;  %v3143_v56 = vadd.f32 %v9720_v19, %v3142_v50  ;;  %v3943_v57 = vadd.f32 %v9720_v19, %v3942_v51  ;;  %v3144_v58 = vpop.f32.mrb[199].mxu0  ;;  %v3944_v59 = vpop.f32.mrb[199].mxu1 }
 0x2a5   : > { %v8565_v58 = vld [vmem:[%s8759_s28 + $0xb30] ss:$8 sps:$4 sm:$0xff]  }
 0x2a6   : > { %v7729_v60 = vpack.c.bf16 %v4444_v54, %v4444_v54  ;;  %v7929_v61 = vpack.c.bf16 %v4644_v55, %v4644_v55  ;;  %v4445_v62 = vmax.f32 %v3143_v56, 0.0  ;;  %v4645_v0 = vmax.f32 %v3943_v57, 0.0  ;;  %3354 = vmatmul.mubr.bf16.gmra.mrb[48].mxu0 %v8544_v48  ;;  %4154 = vmatmul.mubr.bf16.gmra.mrb[48].mxu1 %v8547_v49  ;;  %v8562_v57 = vld [vmem:[%s8759_s28 + $0x4f0] ss:$8 sps:$4 sm:$0xff]  }
 0x2a7   : > { %3361 = vmatprep.mubr.bf16.mxu0 %v8552_v52  ;;  %4161 = vmatprep.mubr.bf16.mxu1 %v8555_v53 }
 0x2a8   : > { %6445 = vst.msk [vmem:[%s8945_s4 + $0x188] sm:$0xf] %vm6346_vm0, %v7729_v60  ;;  %6645 = vst.msk [vmem:[%s8945_s4 + $0x4a8] sm:$0xf] %vm6346_vm0, %v7929_v61  ;;  %v7730_v1 = vpack.c.bf16 %v4445_v62, %v4445_v62  ;;  %v7930_v2 = vpack.c.bf16 %v4645_v0, %v4645_v0  ;;  %v8570_v61 = vld [vmem:[%s8759_s28 + $0x504] ss:$8 sps:$4 sm:$0xff]  }
 0x2a9   : > { %v3147_v3 = vpop.f32.mrb[200].mxu0  ;;  %v3947_v63 = vpop.f32.mrb[200].mxu1  ;;  %v8573_v62 = vld [vmem:[%s8759_s28 + $0xb44] ss:$8 sps:$4 sm:$0xff]  }
 0x2aa   : > { %6446 = vst.msk [vmem:[%s8945_s4 + $0x18c] sm:$0xf] %vm6346_vm0, %v7730_v1  ;;  %6646 = vst.msk [vmem:[%s8945_s4 + $0x4ac] sm:$0xf] %vm6346_vm0, %v7930_v2  ;;  %v3148_v4 = vadd.f32 %v9720_v19, %v3147_v3  ;;  %v3948_v5 = vadd.f32 %v9720_v19, %v3947_v63  ;;  %v3149_v6 = vpop.f32.mrb[201].mxu0  ;;  %v3949_v8 = vpop.f32.mrb[201].mxu1 }
 0x2ab   : > { %v3150_v10 = vpop.f32.mrb[202].mxu0  ;;  %v3950_v11 = vpop.f32.mrb[202].mxu1 }
 0x2ac   : > { %v4446_v15 = vmax.f32 %v3148_v4, 0.0  ;;  %v4646_v13 = vmax.f32 %v3948_v5, 0.0  ;;  %v3151_v16 = vadd.f32 %v9720_v19, %v3150_v10  ;;  %v3951_v17 = vadd.f32 %v9720_v19, %v3950_v11  ;;  %v3152_v18 = vpop.f32.mrb[203].mxu0  ;;  %v3952_v20 = vpop.f32.mrb[203].mxu1 }
 0x2ad   : > { %v8571_v18 = vld [vmem:[%s8759_s28 + $0xb40] ss:$8 sps:$4 sm:$0xff]  }
 0x2ae   : > { %v7731_v21 = vpack.c.bf16 %v4446_v15, %v4446_v15  ;;  %v7931_v22 = vpack.c.bf16 %v4646_v13, %v4646_v13  ;;  %v4447_v23 = vmax.f32 %v3151_v16, 0.0  ;;  %v4647_v24 = vmax.f32 %v3951_v17, 0.0  ;;  %3362 = vmatmul.mubr.bf16.gmra.mrb[52].mxu0 %v8550_v9  ;;  %4162 = vmatmul.mubr.bf16.gmra.mrb[52].mxu1 %v8553_v7  ;;  %v8568_v17 = vld [vmem:[%s8759_s28 + $0x500] ss:$8 sps:$4 sm:$0xff]  }
 0x2af   : > { %3369 = vmatprep.mubr.bf16.mxu0 %v8558_v12  ;;  %4169 = vmatprep.mubr.bf16.mxu1 %v8561_v14 }
 0x2b0   : > { %6447 = vst.msk [vmem:[%s8945_s4 + $0x190] sm:$0xf] %vm6346_vm0, %v7731_v21  ;;  %6647 = vst.msk [vmem:[%s8945_s4 + $0x4b0] sm:$0xf] %vm6346_vm0, %v7931_v22  ;;  %v7732_v25 = vpack.c.bf16 %v4447_v23, %v4447_v23  ;;  %v7932_v26 = vpack.c.bf16 %v4647_v24, %v4647_v24  ;;  %v8576_v22 = vld [vmem:[%s8759_s28 + $0x514] ss:$8 sps:$4 sm:$0xff]  }
 0x2b1   : > { %v3155_v27 = vpop.f32.mrb[204].mxu0  ;;  %v3955_v28 = vpop.f32.mrb[204].mxu1  ;;  %v8579_v23 = vld [vmem:[%s8759_s28 + $0xb54] ss:$8 sps:$4 sm:$0xff]  }
 0x2b2   : > { %6448 = vst.msk [vmem:[%s8945_s4 + $0x194] sm:$0xf] %vm6346_vm0, %v7732_v25  ;;  %6648 = vst.msk [vmem:[%s8945_s4 + $0x4b4] sm:$0xf] %vm6346_vm0, %v7932_v26  ;;  %v3156_v29 = vadd.f32 %v9720_v19, %v3155_v27  ;;  %v3956_v30 = vadd.f32 %v9720_v19, %v3955_v28  ;;  %v3157_v31 = vpop.f32.mrb[205].mxu0  ;;  %v3957_v32 = vpop.f32.mrb[205].mxu1 }
 0x2b3   : > { %v3158_v35 = vpop.f32.mrb[206].mxu0  ;;  %v3958_v36 = vpop.f32.mrb[206].mxu1 }
 0x2b4   : > { %v4448_v39 = vmax.f32 %v3156_v29, 0.0  ;;  %v4648_v40 = vmax.f32 %v3956_v30, 0.0  ;;  %v3159_v41 = vadd.f32 %v9720_v19, %v3158_v35  ;;  %v3959_v42 = vadd.f32 %v9720_v19, %v3958_v36  ;;  %v3160_v43 = vpop.f32.mrb[207].mxu0  ;;  %v3960_v44 = vpop.f32.mrb[207].mxu1 }
 0x2b5   : > { %v8577_v43 = vld [vmem:[%s8759_s28 + $0xb50] ss:$8 sps:$4 sm:$0xff]  }
 0x2b6   : > { %v7733_v45 = vpack.c.bf16 %v4448_v39, %v4448_v39  ;;  %v7933_v46 = vpack.c.bf16 %v4648_v40, %v4648_v40  ;;  %v4449_v47 = vmax.f32 %v3159_v41, 0.0  ;;  %v4649_v48 = vmax.f32 %v3959_v42, 0.0  ;;  %3370 = vmatmul.mubr.bf16.gmra.mrb[56].mxu0 %v8556_v33  ;;  %4170 = vmatmul.mubr.bf16.gmra.mrb[56].mxu1 %v8559_v34  ;;  %v8574_v42 = vld [vmem:[%s8759_s28 + $0x510] ss:$8 sps:$4 sm:$0xff]  }
 0x2b7   : > { %3377 = vmatprep.mubr.bf16.mxu0 %v8564_v37  ;;  %4177 = vmatprep.mubr.bf16.mxu1 %v8567_v38 }
 0x2b8   : > { %6449 = vst.msk [vmem:[%s8945_s4 + $0x198] sm:$0xf] %vm6346_vm0, %v7733_v45  ;;  %6649 = vst.msk [vmem:[%s8945_s4 + $0x4b8] sm:$0xf] %vm6346_vm0, %v7933_v46  ;;  %v7734_v49 = vpack.c.bf16 %v4449_v47, %v4449_v47  ;;  %v7934_v50 = vpack.c.bf16 %v4649_v48, %v4649_v48  ;;  %v8582_v46 = vld [vmem:[%s8759_s28 + $0x524] ss:$8 sps:$4 sm:$0xff]  }
 0x2b9   : > { %v3163_v51 = vpop.f32.mrb[208].mxu0  ;;  %v3963_v52 = vpop.f32.mrb[208].mxu1  ;;  %v8585_v47 = vld [vmem:[%s8759_s28 + $0xb64] ss:$8 sps:$4 sm:$0xff]  }
 0x2ba   : > { %6450 = vst.msk [vmem:[%s8945_s4 + $0x19c] sm:$0xf] %vm6346_vm0, %v7734_v49  ;;  %6650 = vst.msk [vmem:[%s8945_s4 + $0x4bc] sm:$0xf] %vm6346_vm0, %v7934_v50  ;;  %v3164_v53 = vadd.f32 %v9720_v19, %v3163_v51  ;;  %v3964_v54 = vadd.f32 %v9720_v19, %v3963_v52  ;;  %v3165_v55 = vpop.f32.mrb[209].mxu0  ;;  %v3965_v56 = vpop.f32.mrb[209].mxu1 }
 0x2bb   : > { %v3166_v59 = vpop.f32.mrb[210].mxu0  ;;  %v3966_v60 = vpop.f32.mrb[210].mxu1 }
 0x2bc   : > { %v4450_v0 = vmax.f32 %v3164_v53, 0.0  ;;  %v4650_v1 = vmax.f32 %v3964_v54, 0.0  ;;  %v3167_v2 = vadd.f32 %v9720_v19, %v3166_v59  ;;  %v3967_v3 = vadd.f32 %v9720_v19, %v3966_v60  ;;  %v3168_v63 = vpop.f32.mrb[211].mxu0  ;;  %v3968_v4 = vpop.f32.mrb[211].mxu1 }
 0x2bd   : > { %v8583_v63 = vld [vmem:[%s8759_s28 + $0xb60] ss:$8 sps:$4 sm:$0xff]  }
 0x2be   : > { %v7735_v5 = vpack.c.bf16 %v4450_v0, %v4450_v0  ;;  %v7935_v6 = vpack.c.bf16 %v4650_v1, %v4650_v1  ;;  %v4451_v8 = vmax.f32 %v3167_v2, 0.0  ;;  %v4651_v9 = vmax.f32 %v3967_v3, 0.0  ;;  %3378 = vmatmul.mubr.bf16.gmra.mrb[60].mxu0 %v8562_v57  ;;  %4178 = vmatmul.mubr.bf16.gmra.mrb[60].mxu1 %v8565_v58  ;;  %v8580_v3 = vld [vmem:[%s8759_s28 + $0x520] ss:$8 sps:$4 sm:$0xff]  }
 0x2bf   : > { %3385 = vmatprep.mubr.bf16.mxu0 %v8570_v61  ;;  %4185 = vmatprep.mubr.bf16.mxu1 %v8573_v62 }
 0x2c0   : > { %6451 = vst.msk [vmem:[%s8945_s4 + $0x1a0] sm:$0xf] %vm6346_vm0, %v7735_v5  ;;  %6651 = vst.msk [vmem:[%s8945_s4 + $0x4c0] sm:$0xf] %vm6346_vm0, %v7935_v6  ;;  %v7736_v7 = vpack.c.bf16 %v4451_v8, %v4451_v8  ;;  %v7936_v10 = vpack.c.bf16 %v4651_v9, %v4651_v9  ;;  %v8588_v6 = vld [vmem:[%s8759_s28 + $0x534] ss:$8 sps:$4 sm:$0xff]  }
 0x2c1   : > { %v3171_v11 = vpop.f32.mrb[212].mxu0  ;;  %v3971_v12 = vpop.f32.mrb[212].mxu1  ;;  %v8591_v8 = vld [vmem:[%s8759_s28 + $0xb74] ss:$8 sps:$4 sm:$0xff]  }
 0x2c2   : > { %6452 = vst.msk [vmem:[%s8945_s4 + $0x1a4] sm:$0xf] %vm6346_vm0, %v7736_v7  ;;  %6652 = vst.msk [vmem:[%s8945_s4 + $0x4c4] sm:$0xf] %vm6346_vm0, %v7936_v10  ;;  %v3172_v14 = vadd.f32 %v9720_v19, %v3171_v11  ;;  %v3972_v15 = vadd.f32 %v9720_v19, %v3971_v12  ;;  %v3173_v13 = vpop.f32.mrb[213].mxu0  ;;  %v3973_v16 = vpop.f32.mrb[213].mxu1 }
 0x2c3   : > { %v3174_v20 = vpop.f32.mrb[214].mxu0  ;;  %v3974_v21 = vpop.f32.mrb[214].mxu1 }
 0x2c4   : > { %v4452_v24 = vmax.f32 %v3172_v14, 0.0  ;;  %v4652_v25 = vmax.f32 %v3972_v15, 0.0  ;;  %v3175_v26 = vadd.f32 %v9720_v19, %v3174_v20  ;;  %v3975_v27 = vadd.f32 %v9720_v19, %v3974_v21  ;;  %v3176_v28 = vpop.f32.mrb[215].mxu0  ;;  %v3976_v29 = vpop.f32.mrb[215].mxu1 }
 0x2c5   : > { %v8589_v28 = vld [vmem:[%s8759_s28 + $0xb70] ss:$8 sps:$4 sm:$0xff]  }
 0x2c6   : > { %v7737_v30 = vpack.c.bf16 %v4452_v24, %v4452_v24  ;;  %v7937_v31 = vpack.c.bf16 %v4652_v25, %v4652_v25  ;;  %v4453_v32 = vmax.f32 %v3175_v26, 0.0  ;;  %v4653_v33 = vmax.f32 %v3975_v27, 0.0  ;;  %3386 = vmatmul.mubr.bf16.gmra.mrb[64].mxu0 %v8568_v17  ;;  %4186 = vmatmul.mubr.bf16.gmra.mrb[64].mxu1 %v8571_v18  ;;  %v8586_v27 = vld [vmem:[%s8759_s28 + $0x530] ss:$8 sps:$4 sm:$0xff]  }
 0x2c7   : > { %3393 = vmatprep.mubr.bf16.mxu0 %v8576_v22  ;;  %4193 = vmatprep.mubr.bf16.mxu1 %v8579_v23 }
 0x2c8   : > { %6453 = vst.msk [vmem:[%s8945_s4 + $0x1a8] sm:$0xf] %vm6346_vm0, %v7737_v30  ;;  %6653 = vst.msk [vmem:[%s8945_s4 + $0x4c8] sm:$0xf] %vm6346_vm0, %v7937_v31  ;;  %v7738_v34 = vpack.c.bf16 %v4453_v32, %v4453_v32  ;;  %v7938_v35 = vpack.c.bf16 %v4653_v33, %v4653_v33  ;;  %v8594_v31 = vld [vmem:[%s8759_s28 + $0x544] ss:$8 sps:$4 sm:$0xff]  }
 0x2c9   : > { %v3179_v36 = vpop.f32.mrb[216].mxu0  ;;  %v3979_v37 = vpop.f32.mrb[216].mxu1  ;;  %v8597_v32 = vld [vmem:[%s8759_s28 + $0xb84] ss:$8 sps:$4 sm:$0xff]  }
 0x2ca   : > { %6454 = vst.msk [vmem:[%s8945_s4 + $0x1ac] sm:$0xf] %vm6346_vm0, %v7738_v34  ;;  %6654 = vst.msk [vmem:[%s8945_s4 + $0x4cc] sm:$0xf] %vm6346_vm0, %v7938_v35  ;;  %v3180_v38 = vadd.f32 %v9720_v19, %v3179_v36  ;;  %v3980_v39 = vadd.f32 %v9720_v19, %v3979_v37  ;;  %v3181_v40 = vpop.f32.mrb[217].mxu0  ;;  %v3981_v41 = vpop.f32.mrb[217].mxu1 }
 0x2cb   : > { %v3182_v44 = vpop.f32.mrb[218].mxu0  ;;  %v3982_v45 = vpop.f32.mrb[218].mxu1 }
 0x2cc   : > { %v4454_v48 = vmax.f32 %v3180_v38, 0.0  ;;  %v4654_v49 = vmax.f32 %v3980_v39, 0.0  ;;  %v3183_v50 = vadd.f32 %v9720_v19, %v3182_v44  ;;  %v3983_v51 = vadd.f32 %v9720_v19, %v3982_v45  ;;  %v3184_v52 = vpop.f32.mrb[219].mxu0  ;;  %v3984_v53 = vpop.f32.mrb[219].mxu1 }
 0x2cd   : > { %v8595_v52 = vld [vmem:[%s8759_s28 + $0xb80] ss:$8 sps:$4 sm:$0xff]  }
 0x2ce   : > { %v7739_v54 = vpack.c.bf16 %v4454_v48, %v4454_v48  ;;  %v7939_v55 = vpack.c.bf16 %v4654_v49, %v4654_v49  ;;  %v4455_v56 = vmax.f32 %v3183_v50, 0.0  ;;  %v4655_v57 = vmax.f32 %v3983_v51, 0.0  ;;  %3394 = vmatmul.mubr.bf16.gmra.mrb[68].mxu0 %v8574_v42  ;;  %4194 = vmatmul.mubr.bf16.gmra.mrb[68].mxu1 %v8577_v43  ;;  %v8592_v51 = vld [vmem:[%s8759_s28 + $0x540] ss:$8 sps:$4 sm:$0xff]  }
 0x2cf   : > { %3401 = vmatprep.mubr.bf16.mxu0 %v8582_v46  ;;  %4201 = vmatprep.mubr.bf16.mxu1 %v8585_v47 }
 0x2d0   : > { %6455 = vst.msk [vmem:[%s8945_s4 + $0x1b0] sm:$0xf] %vm6346_vm0, %v7739_v54  ;;  %6655 = vst.msk [vmem:[%s8945_s4 + $0x4d0] sm:$0xf] %vm6346_vm0, %v7939_v55  ;;  %v7740_v58 = vpack.c.bf16 %v4455_v56, %v4455_v56  ;;  %v7940_v59 = vpack.c.bf16 %v4655_v57, %v4655_v57  ;;  %v8600_v55 = vld [vmem:[%s8759_s28 + $0x554] ss:$8 sps:$4 sm:$0xff]  }
 0x2d1   : > { %v3187_v60 = vpop.f32.mrb[220].mxu0  ;;  %v3987_v61 = vpop.f32.mrb[220].mxu1  ;;  %v8603_v56 = vld [vmem:[%s8759_s28 + $0xb94] ss:$8 sps:$4 sm:$0xff]  }
 0x2d2   : > { %6456 = vst.msk [vmem:[%s8945_s4 + $0x1b4] sm:$0xf] %vm6346_vm0, %v7740_v58  ;;  %6656 = vst.msk [vmem:[%s8945_s4 + $0x4d4] sm:$0xf] %vm6346_vm0, %v7940_v59  ;;  %v3188_v62 = vadd.f32 %v9720_v19, %v3187_v60  ;;  %v3988_v0 = vadd.f32 %v9720_v19, %v3987_v61  ;;  %v3189_v1 = vpop.f32.mrb[221].mxu0  ;;  %v3989_v2 = vpop.f32.mrb[221].mxu1 }
 0x2d3   : > { %v3190_v4 = vpop.f32.mrb[222].mxu0  ;;  %v3990_v5 = vpop.f32.mrb[222].mxu1 }
 0x2d4   : > { %v4456_v9 = vmax.f32 %v3188_v62, 0.0  ;;  %v4656_v7 = vmax.f32 %v3988_v0, 0.0  ;;  %v3191_v10 = vadd.f32 %v9720_v19, %v3190_v4  ;;  %v3991_v11 = vadd.f32 %v9720_v19, %v3990_v5  ;;  %v3192_v12 = vpop.f32.mrb[223].mxu0  ;;  %v3992_v14 = vpop.f32.mrb[223].mxu1 }
 0x2d5   : > { %v8601_v12 = vld [vmem:[%s8759_s28 + $0xb90] ss:$8 sps:$4 sm:$0xff]  }
 0x2d6   : > { %v7741_v15 = vpack.c.bf16 %v4456_v9, %v4456_v9  ;;  %v7941_v13 = vpack.c.bf16 %v4656_v7, %v4656_v7  ;;  %v4457_v16 = vmax.f32 %v3191_v10, 0.0  ;;  %v4657_v17 = vmax.f32 %v3991_v11, 0.0  ;;  %3402 = vmatmul.mubr.bf16.gmra.mrb[72].mxu0 %v8580_v3  ;;  %4202 = vmatmul.mubr.bf16.gmra.mrb[72].mxu1 %v8583_v63  ;;  %v8598_v11 = vld [vmem:[%s8759_s28 + $0x550] ss:$8 sps:$4 sm:$0xff]  }
 0x2d7   : > { %3409 = vmatprep.mubr.bf16.mxu0 %v8588_v6  ;;  %4209 = vmatprep.mubr.bf16.mxu1 %v8591_v8 }
 0x2d8   : > { %6457 = vst.msk [vmem:[%s8945_s4 + $0x1b8] sm:$0xf] %vm6346_vm0, %v7741_v15  ;;  %6657 = vst.msk [vmem:[%s8945_s4 + $0x4d8] sm:$0xf] %vm6346_vm0, %v7941_v13  ;;  %v7742_v18 = vpack.c.bf16 %v4457_v16, %v4457_v16  ;;  %v7942_v20 = vpack.c.bf16 %v4657_v17, %v4657_v17  ;;  %v8606_v13 = vld [vmem:[%s8759_s28 + $0x564] ss:$8 sps:$4 sm:$0xff]  }
 0x2d9   : > { %v3195_v21 = vpop.f32.mrb[224].mxu0  ;;  %v3995_v22 = vpop.f32.mrb[224].mxu1  ;;  %v8609_v16 = vld [vmem:[%s8759_s28 + $0xba4] ss:$8 sps:$4 sm:$0xff]  }
 0x2da   : > { %6458 = vst.msk [vmem:[%s8945_s4 + $0x1bc] sm:$0xf] %vm6346_vm0, %v7742_v18  ;;  %6658 = vst.msk [vmem:[%s8945_s4 + $0x4dc] sm:$0xf] %vm6346_vm0, %v7942_v20  ;;  %v3196_v23 = vadd.f32 %v9720_v19, %v3195_v21  ;;  %v3996_v24 = vadd.f32 %v9720_v19, %v3995_v22  ;;  %v3197_v25 = vpop.f32.mrb[225].mxu0  ;;  %v3997_v26 = vpop.f32.mrb[225].mxu1 }
 0x2db   : > { %v3198_v29 = vpop.f32.mrb[226].mxu0  ;;  %v3998_v30 = vpop.f32.mrb[226].mxu1 }
 0x2dc   : > { %v4458_v33 = vmax.f32 %v3196_v23, 0.0  ;;  %v4658_v34 = vmax.f32 %v3996_v24, 0.0  ;;  %v3199_v35 = vadd.f32 %v9720_v19, %v3198_v29  ;;  %v3999_v36 = vadd.f32 %v9720_v19, %v3998_v30  ;;  %v3200_v37 = vpop.f32.mrb[227].mxu0  ;;  %v4000_v38 = vpop.f32.mrb[227].mxu1 }
 0x2dd   : > { %v8607_v37 = vld [vmem:[%s8759_s28 + $0xba0] ss:$8 sps:$4 sm:$0xff]  }
 0x2de   : > { %v7743_v39 = vpack.c.bf16 %v4458_v33, %v4458_v33  ;;  %v7943_v40 = vpack.c.bf16 %v4658_v34, %v4658_v34  ;;  %v4459_v41 = vmax.f32 %v3199_v35, 0.0  ;;  %v4659_v42 = vmax.f32 %v3999_v36, 0.0  ;;  %3410 = vmatmul.mubr.bf16.gmra.mrb[76].mxu0 %v8586_v27  ;;  %4210 = vmatmul.mubr.bf16.gmra.mrb[76].mxu1 %v8589_v28  ;;  %v8604_v36 = vld [vmem:[%s8759_s28 + $0x560] ss:$8 sps:$4 sm:$0xff]  }
 0x2df   : > { %3417 = vmatprep.mubr.bf16.mxu0 %v8594_v31  ;;  %4217 = vmatprep.mubr.bf16.mxu1 %v8597_v32 }
 0x2e0   : > { %6459 = vst.msk [vmem:[%s8945_s4 + $0x1c0] sm:$0xf] %vm6346_vm0, %v7743_v39  ;;  %6659 = vst.msk [vmem:[%s8945_s4 + $0x4e0] sm:$0xf] %vm6346_vm0, %v7943_v40  ;;  %v7744_v43 = vpack.c.bf16 %v4459_v41, %v4459_v41  ;;  %v7944_v44 = vpack.c.bf16 %v4659_v42, %v4659_v42  ;;  %v8612_v40 = vld [vmem:[%s8759_s28 + $0x574] ss:$8 sps:$4 sm:$0xff]  }
 0x2e1   : > { %v3203_v45 = vpop.f32.mrb[228].mxu0  ;;  %v4003_v46 = vpop.f32.mrb[228].mxu1  ;;  %v8615_v41 = vld [vmem:[%s8759_s28 + $0xbb4] ss:$8 sps:$4 sm:$0xff]  }
 0x2e2   : > { %6460 = vst.msk [vmem:[%s8945_s4 + $0x1c4] sm:$0xf] %vm6346_vm0, %v7744_v43  ;;  %6660 = vst.msk [vmem:[%s8945_s4 + $0x4e4] sm:$0xf] %vm6346_vm0, %v7944_v44  ;;  %v3204_v47 = vadd.f32 %v9720_v19, %v3203_v45  ;;  %v4004_v48 = vadd.f32 %v9720_v19, %v4003_v46  ;;  %v3205_v49 = vpop.f32.mrb[229].mxu0  ;;  %v4005_v50 = vpop.f32.mrb[229].mxu1 }
 0x2e3   : > { %v3206_v53 = vpop.f32.mrb[230].mxu0  ;;  %v4006_v54 = vpop.f32.mrb[230].mxu1 }
 0x2e4   : > { %v4460_v57 = vmax.f32 %v3204_v47, 0.0  ;;  %v4660_v58 = vmax.f32 %v4004_v48, 0.0  ;;  %v3207_v59 = vadd.f32 %v9720_v19, %v3206_v53  ;;  %v4007_v60 = vadd.f32 %v9720_v19, %v4006_v54  ;;  %v3208_v61 = vpop.f32.mrb[231].mxu0  ;;  %v4008_v62 = vpop.f32.mrb[231].mxu1 }
 0x2e5   : > { %v8613_v61 = vld [vmem:[%s8759_s28 + $0xbb0] ss:$8 sps:$4 sm:$0xff]  }
 0x2e6   : > { %v7745_v0 = vpack.c.bf16 %v4460_v57, %v4460_v57  ;;  %v7945_v1 = vpack.c.bf16 %v4660_v58, %v4660_v58  ;;  %v4461_v2 = vmax.f32 %v3207_v59, 0.0  ;;  %v4661_v3 = vmax.f32 %v4007_v60, 0.0  ;;  %3418 = vmatmul.mubr.bf16.gmra.mrb[80].mxu0 %v8592_v51  ;;  %4218 = vmatmul.mubr.bf16.gmra.mrb[80].mxu1 %v8595_v52  ;;  %v8610_v60 = vld [vmem:[%s8759_s28 + $0x570] ss:$8 sps:$4 sm:$0xff]  }
 0x2e7   : > { %3425 = vmatprep.mubr.bf16.mxu0 %v8600_v55  ;;  %4225 = vmatprep.mubr.bf16.mxu1 %v8603_v56 }
 0x2e8   : > { %6461 = vst.msk [vmem:[%s8945_s4 + $0x1c8] sm:$0xf] %vm6346_vm0, %v7745_v0  ;;  %6661 = vst.msk [vmem:[%s8945_s4 + $0x4e8] sm:$0xf] %vm6346_vm0, %v7945_v1  ;;  %v7746_v63 = vpack.c.bf16 %v4461_v2, %v4461_v2  ;;  %v7946_v4 = vpack.c.bf16 %v4661_v3, %v4661_v3  ;;  %v8618_v1 = vld [vmem:[%s8759_s28 + $0x584] ss:$8 sps:$4 sm:$0xff]  }
 0x2e9   : > { %v3211_v5 = vpop.f32.mrb[232].mxu0  ;;  %v4011_v6 = vpop.f32.mrb[232].mxu1  ;;  %v8621_v2 = vld [vmem:[%s8759_s28 + $0xbc4] ss:$8 sps:$4 sm:$0xff]  }
 0x2ea   : > { %6462 = vst.msk [vmem:[%s8945_s4 + $0x1cc] sm:$0xf] %vm6346_vm0, %v7746_v63  ;;  %6662 = vst.msk [vmem:[%s8945_s4 + $0x4ec] sm:$0xf] %vm6346_vm0, %v7946_v4  ;;  %v3212_v8 = vadd.f32 %v9720_v19, %v3211_v5  ;;  %v4012_v9 = vadd.f32 %v9720_v19, %v4011_v6  ;;  %v3213_v7 = vpop.f32.mrb[233].mxu0  ;;  %v4013_v10 = vpop.f32.mrb[233].mxu1 }
 0x2eb   : > { %v3214_v14 = vpop.f32.mrb[234].mxu0  ;;  %v4014_v15 = vpop.f32.mrb[234].mxu1 }
 0x2ec   : > { %v4462_v17 = vmax.f32 %v3212_v8, 0.0  ;;  %v4662_v18 = vmax.f32 %v4012_v9, 0.0  ;;  %v3215_v20 = vadd.f32 %v9720_v19, %v3214_v14  ;;  %v4015_v21 = vadd.f32 %v9720_v19, %v4014_v15  ;;  %v3216_v22 = vpop.f32.mrb[235].mxu0  ;;  %v4016_v23 = vpop.f32.mrb[235].mxu1 }
 0x2ed   : > { %v8619_v22 = vld [vmem:[%s8759_s28 + $0xbc0] ss:$8 sps:$4 sm:$0xff]  }
 0x2ee   : > { %v7747_v24 = vpack.c.bf16 %v4462_v17, %v4462_v17  ;;  %v7947_v25 = vpack.c.bf16 %v4662_v18, %v4662_v18  ;;  %v4463_v26 = vmax.f32 %v3215_v20, 0.0  ;;  %v4663_v27 = vmax.f32 %v4015_v21, 0.0  ;;  %3426 = vmatmul.mubr.bf16.gmra.mrb[84].mxu0 %v8598_v11  ;;  %4226 = vmatmul.mubr.bf16.gmra.mrb[84].mxu1 %v8601_v12  ;;  %v8616_v21 = vld [vmem:[%s8759_s28 + $0x580] ss:$8 sps:$4 sm:$0xff]  }
 0x2ef   : > { %3433 = vmatprep.mubr.bf16.mxu0 %v8606_v13  ;;  %4233 = vmatprep.mubr.bf16.mxu1 %v8609_v16 }
 0x2f0   : > { %6463 = vst.msk [vmem:[%s8945_s4 + $0x1d0] sm:$0xf] %vm6346_vm0, %v7747_v24  ;;  %6663 = vst.msk [vmem:[%s8945_s4 + $0x4f0] sm:$0xf] %vm6346_vm0, %v7947_v25  ;;  %v7748_v28 = vpack.c.bf16 %v4463_v26, %v4463_v26  ;;  %v7948_v29 = vpack.c.bf16 %v4663_v27, %v4663_v27  ;;  %v8624_v25 = vld [vmem:[%s8759_s28 + $0x594] ss:$8 sps:$4 sm:$0xff]  }
 0x2f1   : > { %v3219_v30 = vpop.f32.mrb[236].mxu0  ;;  %v4019_v31 = vpop.f32.mrb[236].mxu1  ;;  %v8627_v26 = vld [vmem:[%s8759_s28 + $0xbd4] ss:$8 sps:$4 sm:$0xff]  }
 0x2f2   : > { %6464 = vst.msk [vmem:[%s8945_s4 + $0x1d4] sm:$0xf] %vm6346_vm0, %v7748_v28  ;;  %6664 = vst.msk [vmem:[%s8945_s4 + $0x4f4] sm:$0xf] %vm6346_vm0, %v7948_v29  ;;  %v3220_v32 = vadd.f32 %v9720_v19, %v3219_v30  ;;  %v4020_v33 = vadd.f32 %v9720_v19, %v4019_v31  ;;  %v3221_v34 = vpop.f32.mrb[237].mxu0  ;;  %v4021_v35 = vpop.f32.mrb[237].mxu1 }
 0x2f3   : > { %v3222_v38 = vpop.f32.mrb[238].mxu0  ;;  %v4022_v39 = vpop.f32.mrb[238].mxu1 }
 0x2f4   : > { %v4464_v42 = vmax.f32 %v3220_v32, 0.0  ;;  %v4664_v43 = vmax.f32 %v4020_v33, 0.0  ;;  %v3223_v44 = vadd.f32 %v9720_v19, %v3222_v38  ;;  %v4023_v45 = vadd.f32 %v9720_v19, %v4022_v39  ;;  %v3224_v46 = vpop.f32.mrb[239].mxu0  ;;  %v4024_v47 = vpop.f32.mrb[239].mxu1 }
 0x2f5   : > { %v8625_v46 = vld [vmem:[%s8759_s28 + $0xbd0] ss:$8 sps:$4 sm:$0xff]  }
 0x2f6   : > { %v7749_v48 = vpack.c.bf16 %v4464_v42, %v4464_v42  ;;  %v7949_v49 = vpack.c.bf16 %v4664_v43, %v4664_v43  ;;  %v4465_v50 = vmax.f32 %v3223_v44, 0.0  ;;  %v4665_v51 = vmax.f32 %v4023_v45, 0.0  ;;  %3434 = vmatmul.mubr.bf16.gmra.mrb[88].mxu0 %v8604_v36  ;;  %4234 = vmatmul.mubr.bf16.gmra.mrb[88].mxu1 %v8607_v37  ;;  %v8622_v45 = vld [vmem:[%s8759_s28 + $0x590] ss:$8 sps:$4 sm:$0xff]  }
 0x2f7   : > { %3441 = vmatprep.mubr.bf16.mxu0 %v8612_v40  ;;  %4241 = vmatprep.mubr.bf16.mxu1 %v8615_v41 }
 0x2f8   : > { %6465 = vst.msk [vmem:[%s8945_s4 + $0x1d8] sm:$0xf] %vm6346_vm0, %v7749_v48  ;;  %6665 = vst.msk [vmem:[%s8945_s4 + $0x4f8] sm:$0xf] %vm6346_vm0, %v7949_v49  ;;  %v7750_v52 = vpack.c.bf16 %v4465_v50, %v4465_v50  ;;  %v7950_v53 = vpack.c.bf16 %v4665_v51, %v4665_v51  ;;  %v8630_v49 = vld [vmem:[%s8759_s28 + $0x5a4] ss:$8 sps:$4 sm:$0xff]  }
 0x2f9   : > { %v3227_v54 = vpop.f32.mrb[240].mxu0  ;;  %v4027_v55 = vpop.f32.mrb[240].mxu1  ;;  %v8633_v50 = vld [vmem:[%s8759_s28 + $0xbe4] ss:$8 sps:$4 sm:$0xff]  }
 0x2fa   : > { %6466 = vst.msk [vmem:[%s8945_s4 + $0x1dc] sm:$0xf] %vm6346_vm0, %v7750_v52  ;;  %6666 = vst.msk [vmem:[%s8945_s4 + $0x4fc] sm:$0xf] %vm6346_vm0, %v7950_v53  ;;  %v3228_v56 = vadd.f32 %v9720_v19, %v3227_v54  ;;  %v4028_v57 = vadd.f32 %v9720_v19, %v4027_v55  ;;  %v3229_v58 = vpop.f32.mrb[241].mxu0  ;;  %v4029_v59 = vpop.f32.mrb[241].mxu1 }
 0x2fb   : > { %v3230_v62 = vpop.f32.mrb[242].mxu0  ;;  %v4030_v0 = vpop.f32.mrb[242].mxu1 }
 0x2fc   : > { %v4466_v3 = vmax.f32 %v3228_v56, 0.0  ;;  %v4666_v63 = vmax.f32 %v4028_v57, 0.0  ;;  %v3231_v4 = vadd.f32 %v9720_v19, %v3230_v62  ;;  %v4031_v5 = vadd.f32 %v9720_v19, %v4030_v0  ;;  %v3232_v6 = vpop.f32.mrb[243].mxu0  ;;  %v4032_v8 = vpop.f32.mrb[243].mxu1 }
 0x2fd   : > { %v8631_v6 = vld [vmem:[%s8759_s28 + $0xbe0] ss:$8 sps:$4 sm:$0xff]  }
 0x2fe   : > { %v7751_v9 = vpack.c.bf16 %v4466_v3, %v4466_v3  ;;  %v7951_v7 = vpack.c.bf16 %v4666_v63, %v4666_v63  ;;  %v4467_v10 = vmax.f32 %v3231_v4, 0.0  ;;  %v4667_v11 = vmax.f32 %v4031_v5, 0.0  ;;  %3442 = vmatmul.mubr.bf16.gmra.mrb[92].mxu0 %v8610_v60  ;;  %4242 = vmatmul.mubr.bf16.gmra.mrb[92].mxu1 %v8613_v61  ;;  %v8628_v5 = vld [vmem:[%s8759_s28 + $0x5a0] ss:$8 sps:$4 sm:$0xff]  }
 0x2ff   : > { %3449 = vmatprep.mubr.bf16.mxu0 %v8618_v1  ;;  %4249 = vmatprep.mubr.bf16.mxu1 %v8621_v2 }
 0x300   : > { %6467 = vst.msk [vmem:[%s8945_s4 + $0x1e0] sm:$0xf] %vm6346_vm0, %v7751_v9  ;;  %6667 = vst.msk [vmem:[%s8945_s4 + $0x500] sm:$0xf] %vm6346_vm0, %v7951_v7  ;;  %v7752_v12 = vpack.c.bf16 %v4467_v10, %v4467_v10  ;;  %v7952_v14 = vpack.c.bf16 %v4667_v11, %v4667_v11  ;;  %v8636_v7 = vld [vmem:[%s8759_s28 + $0x5b4] ss:$8 sps:$4 sm:$0xff]  }
 0x301   : > { %v3235_v15 = vpop.f32.mrb[244].mxu0  ;;  %v4035_v13 = vpop.f32.mrb[244].mxu1  ;;  %v8639_v10 = vld [vmem:[%s8759_s28 + $0xbf4] ss:$8 sps:$4 sm:$0xff]  }
 0x302   : > { %6468 = vst.msk [vmem:[%s8945_s4 + $0x1e4] sm:$0xf] %vm6346_vm0, %v7752_v12  ;;  %6668 = vst.msk [vmem:[%s8945_s4 + $0x504] sm:$0xf] %vm6346_vm0, %v7952_v14  ;;  %v3236_v16 = vadd.f32 %v9720_v19, %v3235_v15  ;;  %v4036_v17 = vadd.f32 %v9720_v19, %v4035_v13  ;;  %v3237_v18 = vpop.f32.mrb[245].mxu0  ;;  %v4037_v20 = vpop.f32.mrb[245].mxu1 }
 0x303   : > { %v3238_v23 = vpop.f32.mrb[246].mxu0  ;;  %v4038_v24 = vpop.f32.mrb[246].mxu1 }
 0x304   : > { %v4468_v27 = vmax.f32 %v3236_v16, 0.0  ;;  %v4668_v28 = vmax.f32 %v4036_v17, 0.0  ;;  %v3239_v29 = vadd.f32 %v9720_v19, %v3238_v23  ;;  %v4039_v30 = vadd.f32 %v9720_v19, %v4038_v24  ;;  %v3240_v31 = vpop.f32.mrb[247].mxu0  ;;  %v4040_v32 = vpop.f32.mrb[247].mxu1 }
 0x305   : > { %v8637_v31 = vld [vmem:[%s8759_s28 + $0xbf0] ss:$8 sps:$4 sm:$0xff]  }
 0x306   : > { %v7753_v33 = vpack.c.bf16 %v4468_v27, %v4468_v27  ;;  %v7953_v34 = vpack.c.bf16 %v4668_v28, %v4668_v28  ;;  %v4469_v35 = vmax.f32 %v3239_v29, 0.0  ;;  %v4669_v36 = vmax.f32 %v4039_v30, 0.0  ;;  %3450 = vmatmul.mubr.bf16.gmra.mrb[96].mxu0 %v8616_v21  ;;  %4250 = vmatmul.mubr.bf16.gmra.mrb[96].mxu1 %v8619_v22  ;;  %v8634_v30 = vld [vmem:[%s8759_s28 + $0x5b0] ss:$8 sps:$4 sm:$0xff]  }
 0x307   : > { %3457 = vmatprep.mubr.bf16.mxu0 %v8624_v25  ;;  %4257 = vmatprep.mubr.bf16.mxu1 %v8627_v26  ;;  %v9981_v25 = vld [vmem:[%s10459_s2] ss:$0 sm:$0xff] }
 0x308   : > { %6469 = vst.msk [vmem:[%s8945_s4 + $0x1e8] sm:$0xf] %vm6346_vm0, %v7753_v33  ;;  %6669 = vst.msk [vmem:[%s8945_s4 + $0x508] sm:$0xf] %vm6346_vm0, %v7953_v34  ;;  %v7754_v37 = vpack.c.bf16 %v4469_v35, %v4469_v35  ;;  %v7954_v38 = vpack.c.bf16 %v4669_v36, %v4669_v36  ;;  %v8642_v34 = vld [vmem:[%s8759_s28 + $0x5c4] ss:$8 sps:$4 sm:$0xff]  }
 0x309   : > { %v3243_v39 = vpop.f32.mrb[248].mxu0  ;;  %v4043_v40 = vpop.f32.mrb[248].mxu1  ;;  %v8645_v35 = vld [vmem:[%s8759_s28 + $0xc04] ss:$8 sps:$4 sm:$0xff]  }
 0x30a   : > { %6470 = vst.msk [vmem:[%s8945_s4 + $0x1ec] sm:$0xf] %vm6346_vm0, %v7754_v37  ;;  %6670 = vst.msk [vmem:[%s8945_s4 + $0x50c] sm:$0xf] %vm6346_vm0, %v7954_v38  ;;  %v3244_v41 = vadd.f32 %v9720_v19, %v3243_v39  ;;  %v4044_v42 = vadd.f32 %v9720_v19, %v4043_v40  ;;  %v3245_v43 = vpop.f32.mrb[249].mxu0  ;;  %v4045_v44 = vpop.f32.mrb[249].mxu1 }
 0x30b   : > { %v3246_v47 = vpop.f32.mrb[250].mxu0  ;;  %v4046_v48 = vpop.f32.mrb[250].mxu1 }
 0x30c   : > { %v4470_v51 = vmax.f32 %v3244_v41, 0.0  ;;  %v4670_v52 = vmax.f32 %v4044_v42, 0.0  ;;  %v3247_v53 = vadd.f32 %v9720_v19, %v3246_v47  ;;  %v4047_v54 = vadd.f32 %v9720_v19, %v4046_v48  ;;  %v3248_v55 = vpop.f32.mrb[251].mxu0  ;;  %v4048_v56 = vpop.f32.mrb[251].mxu1 }
 0x30d   : > { %v8643_v55 = vld [vmem:[%s8759_s28 + $0xc00] ss:$8 sps:$4 sm:$0xff]  }
 0x30e   : > { %v7755_v57 = vpack.c.bf16 %v4470_v51, %v4470_v51  ;;  %v7955_v58 = vpack.c.bf16 %v4670_v52, %v4670_v52  ;;  %v4471_v59 = vmax.f32 %v3247_v53, 0.0  ;;  %v4671_v60 = vmax.f32 %v4047_v54, 0.0  ;;  %3458 = vmatmul.mubr.bf16.gmra.mrb[100].mxu0 %v8622_v45  ;;  %4258 = vmatmul.mubr.bf16.gmra.mrb[100].mxu1 %v8625_v46  ;;  %v8640_v54 = vld [vmem:[%s8759_s28 + $0x5c0] ss:$8 sps:$4 sm:$0xff]  }
 0x30f   : > { %3465 = vmatprep.mubr.bf16.mxu0 %v8630_v49  ;;  %4265 = vmatprep.mubr.bf16.mxu1 %v8633_v50 }
 0x310   : > { %6471 = vst.msk [vmem:[%s8945_s4 + $0x1f0] sm:$0xf] %vm6346_vm0, %v7755_v57  ;;  %6671 = vst.msk [vmem:[%s8945_s4 + $0x510] sm:$0xf] %vm6346_vm0, %v7955_v58  ;;  %v7756_v61 = vpack.c.bf16 %v4471_v59, %v4471_v59  ;;  %v7956_v62 = vpack.c.bf16 %v4671_v60, %v4671_v60  ;;  %v8648_v58 = vld [vmem:[%s8759_s28 + $0x5d4] ss:$8 sps:$4 sm:$0xff]  }
 0x311   : > { %v3251_v0 = vpop.f32.mrb[252].mxu0  ;;  %v4051_v1 = vpop.f32.mrb[252].mxu1  ;;  %v8651_v59 = vld [vmem:[%s8759_s28 + $0xc14] ss:$8 sps:$4 sm:$0xff]  }
 0x312   : > { %6472 = vst.msk [vmem:[%s8945_s4 + $0x1f4] sm:$0xf] %vm6346_vm0, %v7756_v61  ;;  %6672 = vst.msk [vmem:[%s8945_s4 + $0x514] sm:$0xf] %vm6346_vm0, %v7956_v62  ;;  %v3252_v2 = vadd.f32 %v9720_v19, %v3251_v0  ;;  %v4052_v3 = vadd.f32 %v9720_v19, %v4051_v1  ;;  %v3253_v63 = vpop.f32.mrb[253].mxu0  ;;  %v4053_v4 = vpop.f32.mrb[253].mxu1 }
 0x313   : > { %v3254_v8 = vpop.f32.mrb[254].mxu0  ;;  %v4054_v9 = vpop.f32.mrb[254].mxu1 }
 0x314   : > { %v4472_v11 = vmax.f32 %v3252_v2, 0.0  ;;  %v4672_v12 = vmax.f32 %v4052_v3, 0.0  ;;  %v3255_v14 = vadd.f32 %v9720_v19, %v3254_v8  ;;  %v4055_v15 = vadd.f32 %v9720_v19, %v4054_v9  ;;  %v3256_v13 = vpop.f32.mrb[255].mxu0  ;;  %v4056_v16 = vpop.f32.mrb[255].mxu1 }
 0x315   : > { %v8649_v13 = vld [vmem:[%s8759_s28 + $0xc10] ss:$8 sps:$4 sm:$0xff]  }
 0x316   : > { %v7757_v17 = vpack.c.bf16 %v4472_v11, %v4472_v11  ;;  %v7957_v18 = vpack.c.bf16 %v4672_v12, %v4672_v12  ;;  %v4473_v20 = vmax.f32 %v3255_v14, 0.0  ;;  %v4673_v21 = vmax.f32 %v4055_v15, 0.0  ;;  %3466 = vmatmul.mubr.bf16.gmra.mrb[104].mxu0 %v8628_v5  ;;  %4266 = vmatmul.mubr.bf16.gmra.mrb[104].mxu1 %v8631_v6  ;;  %v8646_v15 = vld [vmem:[%s8759_s28 + $0x5d0] ss:$8 sps:$4 sm:$0xff]  }
 0x317   : > { %3473 = vmatprep.mubr.bf16.mxu0 %v8636_v7  ;;  %4273 = vmatprep.mubr.bf16.mxu1 %v8639_v10 }
 0x318   : > { %6473 = vst.msk [vmem:[%s8945_s4 + $0x1f8] sm:$0xf] %vm6346_vm0, %v7757_v17  ;;  %6673 = vst.msk [vmem:[%s8945_s4 + $0x518] sm:$0xf] %vm6346_vm0, %v7957_v18  ;;  %v7758_v19 = vpack.c.bf16 %v4473_v20, %v4473_v20  ;;  %v7958_v22 = vpack.c.bf16 %v4673_v21, %v4673_v21  ;;  %v8654_v18 = vld [vmem:[%s8759_s28 + $0x5e4] ss:$8 sps:$4 sm:$0xff]  }
 0x319   : > { %v3259_v23 = vpop.f32.mrb[0].mxu0  ;;  %v4059_v24 = vpop.f32.mrb[0].mxu1  ;;  %v8657_v20 = vld [vmem:[%s8759_s28 + $0xc24] ss:$8 sps:$4 sm:$0xff]  }
 0x31a   : > { %6474 = vst.msk [vmem:[%s8945_s4 + $0x1fc] sm:$0xf] %vm6346_vm0, %v7758_v19  ;;  %6674 = vst.msk [vmem:[%s8945_s4 + $0x51c] sm:$0xf] %vm6346_vm0, %v7958_v22  ;;  %v3260_v26 = vadd.f32 %v9981_v25, %v3259_v23  ;;  %v4060_v27 = vadd.f32 %v9981_v25, %v4059_v24  ;;  %v3261_v28 = vpop.f32.mrb[1].mxu0  ;;  %v4061_v29 = vpop.f32.mrb[1].mxu1 }
 0x31b   : > { %v3262_v32 = vpop.f32.mrb[2].mxu0  ;;  %v4062_v33 = vpop.f32.mrb[2].mxu1 }
 0x31c   : > { %v4474_v36 = vmax.f32 %v3260_v26, 0.0  ;;  %v4674_v37 = vmax.f32 %v4060_v27, 0.0  ;;  %v3263_v38 = vadd.f32 %v9981_v25, %v3262_v32  ;;  %v4063_v39 = vadd.f32 %v9981_v25, %v4062_v33  ;;  %v3264_v40 = vpop.f32.mrb[3].mxu0  ;;  %v4064_v41 = vpop.f32.mrb[3].mxu1 }
 0x31d   : > { %v8655_v40 = vld [vmem:[%s8759_s28 + $0xc20] ss:$8 sps:$4 sm:$0xff]  }
 0x31e   : > { %v7759_v42 = vpack.c.bf16 %v4474_v36, %v4474_v36  ;;  %v7959_v43 = vpack.c.bf16 %v4674_v37, %v4674_v37  ;;  %v4475_v44 = vmax.f32 %v3263_v38, 0.0  ;;  %v4675_v45 = vmax.f32 %v4063_v39, 0.0  ;;  %3474 = vmatmul.mubr.bf16.gmra.mrb[108].mxu0 %v8634_v30  ;;  %4274 = vmatmul.mubr.bf16.gmra.mrb[108].mxu1 %v8637_v31  ;;  %v8652_v39 = vld [vmem:[%s8759_s28 + $0x5e0] ss:$8 sps:$4 sm:$0xff]  }
 0x31f   : > { %3481 = vmatprep.mubr.bf16.mxu0 %v8642_v34  ;;  %4281 = vmatprep.mubr.bf16.mxu1 %v8645_v35 }
 0x320   : > { %6475 = vst.msk [vmem:[%s8945_s4 + $0x200] sm:$0xf] %vm6346_vm0, %v7759_v42  ;;  %6675 = vst.msk [vmem:[%s8945_s4 + $0x520] sm:$0xf] %vm6346_vm0, %v7959_v43  ;;  %v7760_v46 = vpack.c.bf16 %v4475_v44, %v4475_v44  ;;  %v7960_v47 = vpack.c.bf16 %v4675_v45, %v4675_v45  ;;  %v8660_v43 = vld [vmem:[%s8759_s28 + $0x5f4] ss:$8 sps:$4 sm:$0xff]  }
 0x321   : > { %v3267_v48 = vpop.f32.mrb[4].mxu0  ;;  %v4067_v49 = vpop.f32.mrb[4].mxu1  ;;  %v8663_v44 = vld [vmem:[%s8759_s28 + $0xc34] ss:$8 sps:$4 sm:$0xff]  }
 0x322   : > { %6476 = vst.msk [vmem:[%s8945_s4 + $0x204] sm:$0xf] %vm6346_vm0, %v7760_v46  ;;  %6676 = vst.msk [vmem:[%s8945_s4 + $0x524] sm:$0xf] %vm6346_vm0, %v7960_v47  ;;  %v3268_v50 = vadd.f32 %v9981_v25, %v3267_v48  ;;  %v4068_v51 = vadd.f32 %v9981_v25, %v4067_v49  ;;  %v3269_v52 = vpop.f32.mrb[5].mxu0  ;;  %v4069_v53 = vpop.f32.mrb[5].mxu1 }
 0x323   : > { %v3270_v56 = vpop.f32.mrb[6].mxu0  ;;  %v4070_v57 = vpop.f32.mrb[6].mxu1 }
 0x324   : > { %v4476_v60 = vmax.f32 %v3268_v50, 0.0  ;;  %v4676_v61 = vmax.f32 %v4068_v51, 0.0  ;;  %v3271_v62 = vadd.f32 %v9981_v25, %v3270_v56  ;;  %v4071_v0 = vadd.f32 %v9981_v25, %v4070_v57  ;;  %v3272_v1 = vpop.f32.mrb[7].mxu0  ;;  %v4072_v2 = vpop.f32.mrb[7].mxu1 }
 0x325   : > { %v8661_v1 = vld [vmem:[%s8759_s28 + $0xc30] ss:$8 sps:$4 sm:$0xff]  }
 0x326   : > { %v7761_v3 = vpack.c.bf16 %v4476_v60, %v4476_v60  ;;  %v7961_v63 = vpack.c.bf16 %v4676_v61, %v4676_v61  ;;  %v4477_v4 = vmax.f32 %v3271_v62, 0.0  ;;  %v4677_v5 = vmax.f32 %v4071_v0, 0.0  ;;  %3482 = vmatmul.mubr.bf16.gmra.mrb[112].mxu0 %v8640_v54  ;;  %4282 = vmatmul.mubr.bf16.gmra.mrb[112].mxu1 %v8643_v55  ;;  %v8658_v0 = vld [vmem:[%s8759_s28 + $0x5f0] ss:$8 sps:$4 sm:$0xff]  }
 0x327   : > { %3489 = vmatprep.mubr.bf16.mxu0 %v8648_v58  ;;  %4289 = vmatprep.mubr.bf16.mxu1 %v8651_v59 }
 0x328   : > { %6477 = vst.msk [vmem:[%s8945_s4 + $0x208] sm:$0xf] %vm6346_vm0, %v7761_v3  ;;  %6677 = vst.msk [vmem:[%s8945_s4 + $0x528] sm:$0xf] %vm6346_vm0, %v7961_v63  ;;  %v7762_v6 = vpack.c.bf16 %v4477_v4, %v4477_v4  ;;  %v7962_v8 = vpack.c.bf16 %v4677_v5, %v4677_v5  ;;  %v8666_v63 = vld [vmem:[%s8759_s28 + $0x604] ss:$8 sps:$4 sm:$0xff]  }
 0x329   : > { %v3275_v9 = vpop.f32.mrb[8].mxu0  ;;  %v4075_v7 = vpop.f32.mrb[8].mxu1  ;;  %v8669_v4 = vld [vmem:[%s8759_s28 + $0xc44] ss:$8 sps:$4 sm:$0xff]  }
 0x32a   : > { %6478 = vst.msk [vmem:[%s8945_s4 + $0x20c] sm:$0xf] %vm6346_vm0, %v7762_v6  ;;  %6678 = vst.msk [vmem:[%s8945_s4 + $0x52c] sm:$0xf] %vm6346_vm0, %v7962_v8  ;;  %v3276_v10 = vadd.f32 %v9981_v25, %v3275_v9  ;;  %v4076_v11 = vadd.f32 %v9981_v25, %v4075_v7  ;;  %v3277_v12 = vpop.f32.mrb[9].mxu0  ;;  %v4077_v14 = vpop.f32.mrb[9].mxu1 }
 0x32b   : > { %v3278_v16 = vpop.f32.mrb[10].mxu0  ;;  %v4078_v17 = vpop.f32.mrb[10].mxu1 }
 0x32c   : > { %v4478_v21 = vmax.f32 %v3276_v10, 0.0  ;;  %v4678_v19 = vmax.f32 %v4076_v11, 0.0  ;;  %v3279_v22 = vadd.f32 %v9981_v25, %v3278_v16  ;;  %v4079_v23 = vadd.f32 %v9981_v25, %v4078_v17  ;;  %v3280_v24 = vpop.f32.mrb[11].mxu0  ;;  %v4080_v26 = vpop.f32.mrb[11].mxu1 }
 0x32d   : > { %v8667_v24 = vld [vmem:[%s8759_s28 + $0xc40] ss:$8 sps:$4 sm:$0xff]  }
 0x32e   : > { %v7763_v27 = vpack.c.bf16 %v4478_v21, %v4478_v21  ;;  %v7963_v28 = vpack.c.bf16 %v4678_v19, %v4678_v19  ;;  %v4479_v29 = vmax.f32 %v3279_v22, 0.0  ;;  %v4679_v30 = vmax.f32 %v4079_v23, 0.0  ;;  %3490 = vmatmul.mubr.bf16.gmra.mrb[116].mxu0 %v8646_v15  ;;  %4290 = vmatmul.mubr.bf16.gmra.mrb[116].mxu1 %v8649_v13  ;;  %v8664_v23 = vld [vmem:[%s8759_s28 + $0x600] ss:$8 sps:$4 sm:$0xff]  }
 0x32f   : > { %3497 = vmatprep.mubr.bf16.mxu0 %v8654_v18  ;;  %4297 = vmatprep.mubr.bf16.mxu1 %v8657_v20 }
 0x330   : > { %6479 = vst.msk [vmem:[%s8945_s4 + $0x210] sm:$0xf] %vm6346_vm0, %v7763_v27  ;;  %6679 = vst.msk [vmem:[%s8945_s4 + $0x530] sm:$0xf] %vm6346_vm0, %v7963_v28  ;;  %v7764_v31 = vpack.c.bf16 %v4479_v29, %v4479_v29  ;;  %v7964_v32 = vpack.c.bf16 %v4679_v30, %v4679_v30  ;;  %v8672_v28 = vld [vmem:[%s8759_s28 + $0x614] ss:$8 sps:$4 sm:$0xff]  }
 0x331   : > { %v3283_v33 = vpop.f32.mrb[12].mxu0  ;;  %v4083_v34 = vpop.f32.mrb[12].mxu1  ;;  %v8675_v29 = vld [vmem:[%s8759_s28 + $0xc54] ss:$8 sps:$4 sm:$0xff]  }
 0x332   : > { %6480 = vst.msk [vmem:[%s8945_s4 + $0x214] sm:$0xf] %vm6346_vm0, %v7764_v31  ;;  %6680 = vst.msk [vmem:[%s8945_s4 + $0x534] sm:$0xf] %vm6346_vm0, %v7964_v32  ;;  %v3284_v35 = vadd.f32 %v9981_v25, %v3283_v33  ;;  %v4084_v36 = vadd.f32 %v9981_v25, %v4083_v34  ;;  %v3285_v37 = vpop.f32.mrb[13].mxu0  ;;  %v4085_v38 = vpop.f32.mrb[13].mxu1 }
 0x333   : > { %v3286_v41 = vpop.f32.mrb[14].mxu0  ;;  %v4086_v42 = vpop.f32.mrb[14].mxu1 }
 0x334   : > { %v4480_v45 = vmax.f32 %v3284_v35, 0.0  ;;  %v4680_v46 = vmax.f32 %v4084_v36, 0.0  ;;  %v3287_v47 = vadd.f32 %v9981_v25, %v3286_v41  ;;  %v4087_v48 = vadd.f32 %v9981_v25, %v4086_v42  ;;  %v3288_v49 = vpop.f32.mrb[15].mxu0  ;;  %v4088_v50 = vpop.f32.mrb[15].mxu1 }
 0x335   : > { %v8673_v49 = vld [vmem:[%s8759_s28 + $0xc50] ss:$8 sps:$4 sm:$0xff]  }
 0x336   : > { %v7765_v51 = vpack.c.bf16 %v4480_v45, %v4480_v45  ;;  %v7965_v52 = vpack.c.bf16 %v4680_v46, %v4680_v46  ;;  %v4481_v53 = vmax.f32 %v3287_v47, 0.0  ;;  %v4681_v54 = vmax.f32 %v4087_v48, 0.0  ;;  %3498 = vmatmul.mubr.bf16.gmra.mrb[120].mxu0 %v8652_v39  ;;  %4298 = vmatmul.mubr.bf16.gmra.mrb[120].mxu1 %v8655_v40  ;;  %v8670_v48 = vld [vmem:[%s8759_s28 + $0x610] ss:$8 sps:$4 sm:$0xff]  }
 0x337   : > { %3505 = vmatprep.mubr.bf16.mxu0 %v8660_v43  ;;  %4305 = vmatprep.mubr.bf16.mxu1 %v8663_v44 }
 0x338   : > { %6481 = vst.msk [vmem:[%s8945_s4 + $0x218] sm:$0xf] %vm6346_vm0, %v7765_v51  ;;  %6681 = vst.msk [vmem:[%s8945_s4 + $0x538] sm:$0xf] %vm6346_vm0, %v7965_v52  ;;  %v7766_v55 = vpack.c.bf16 %v4481_v53, %v4481_v53  ;;  %v7966_v56 = vpack.c.bf16 %v4681_v54, %v4681_v54  ;;  %v8678_v52 = vld [vmem:[%s8759_s28 + $0x624] ss:$8 sps:$4 sm:$0xff]  }
 0x339   : > { %v3291_v57 = vpop.f32.mrb[16].mxu0  ;;  %v4091_v58 = vpop.f32.mrb[16].mxu1  ;;  %v8681_v53 = vld [vmem:[%s8759_s28 + $0xc64] ss:$8 sps:$4 sm:$0xff]  }
 0x33a   : > { %6482 = vst.msk [vmem:[%s8945_s4 + $0x21c] sm:$0xf] %vm6346_vm0, %v7766_v55  ;;  %6682 = vst.msk [vmem:[%s8945_s4 + $0x53c] sm:$0xf] %vm6346_vm0, %v7966_v56  ;;  %v3292_v59 = vadd.f32 %v9981_v25, %v3291_v57  ;;  %v4092_v60 = vadd.f32 %v9981_v25, %v4091_v58  ;;  %v3293_v61 = vpop.f32.mrb[17].mxu0  ;;  %v4093_v62 = vpop.f32.mrb[17].mxu1 }
 0x33b   : > { %v3294_v2 = vpop.f32.mrb[18].mxu0  ;;  %v4094_v3 = vpop.f32.mrb[18].mxu1 }
 0x33c   : > { %v4482_v5 = vmax.f32 %v3292_v59, 0.0  ;;  %v4682_v6 = vmax.f32 %v4092_v60, 0.0  ;;  %v3295_v8 = vadd.f32 %v9981_v25, %v3294_v2  ;;  %v4095_v9 = vadd.f32 %v9981_v25, %v4094_v3  ;;  %v3296_v7 = vpop.f32.mrb[19].mxu0  ;;  %v4096_v10 = vpop.f32.mrb[19].mxu1 }
 0x33d   : > { %v8679_v7 = vld [vmem:[%s8759_s28 + $0xc60] ss:$8 sps:$4 sm:$0xff]  }
 0x33e   : > { %v7767_v11 = vpack.c.bf16 %v4482_v5, %v4482_v5  ;;  %v7967_v12 = vpack.c.bf16 %v4682_v6, %v4682_v6  ;;  %v4483_v14 = vmax.f32 %v3295_v8, 0.0  ;;  %v4683_v15 = vmax.f32 %v4095_v9, 0.0  ;;  %3506 = vmatmul.mubr.bf16.gmra.mrb[124].mxu0 %v8658_v0  ;;  %4306 = vmatmul.mubr.bf16.gmra.mrb[124].mxu1 %v8661_v1  ;;  %v8676_v9 = vld [vmem:[%s8759_s28 + $0x620] ss:$8 sps:$4 sm:$0xff]  }
 0x33f   : > { %3513 = vmatprep.mubr.bf16.mxu0 %v8666_v63  ;;  %4313 = vmatprep.mubr.bf16.mxu1 %v8669_v4 }
 0x340   : > { %6483 = vst.msk [vmem:[%s8945_s4 + $0x220] sm:$0xf] %vm6346_vm0, %v7767_v11  ;;  %6683 = vst.msk [vmem:[%s8945_s4 + $0x540] sm:$0xf] %vm6346_vm0, %v7967_v12  ;;  %v7768_v13 = vpack.c.bf16 %v4483_v14, %v4483_v14  ;;  %v7968_v16 = vpack.c.bf16 %v4683_v15, %v4683_v15  ;;  %v8684_v12 = vld [vmem:[%s8759_s28 + $0x634] ss:$8 sps:$4 sm:$0xff]  }
 0x341   : > { %v3299_v17 = vpop.f32.mrb[20].mxu0  ;;  %v4099_v18 = vpop.f32.mrb[20].mxu1  ;;  %v8687_v14 = vld [vmem:[%s8759_s28 + $0xc74] ss:$8 sps:$4 sm:$0xff]  }
 0x342   : > { %6484 = vst.msk [vmem:[%s8945_s4 + $0x224] sm:$0xf] %vm6346_vm0, %v7768_v13  ;;  %6684 = vst.msk [vmem:[%s8945_s4 + $0x544] sm:$0xf] %vm6346_vm0, %v7968_v16  ;;  %v3300_v20 = vadd.f32 %v9981_v25, %v3299_v17  ;;  %v4100_v21 = vadd.f32 %v9981_v25, %v4099_v18  ;;  %v3301_v19 = vpop.f32.mrb[21].mxu0  ;;  %v4101_v22 = vpop.f32.mrb[21].mxu1 }
 0x343   : > { %v3302_v26 = vpop.f32.mrb[22].mxu0  ;;  %v4102_v27 = vpop.f32.mrb[22].mxu1 }
 0x344   : > { %v4484_v30 = vmax.f32 %v3300_v20, 0.0  ;;  %v4684_v31 = vmax.f32 %v4100_v21, 0.0  ;;  %v3303_v32 = vadd.f32 %v9981_v25, %v3302_v26  ;;  %v4103_v33 = vadd.f32 %v9981_v25, %v4102_v27  ;;  %v3304_v34 = vpop.f32.mrb[23].mxu0  ;;  %v4104_v35 = vpop.f32.mrb[23].mxu1 }
 0x345   : > { %v8685_v34 = vld [vmem:[%s8759_s28 + $0xc70] ss:$8 sps:$4 sm:$0xff]  }
 0x346   : > { %v7769_v36 = vpack.c.bf16 %v4484_v30, %v4484_v30  ;;  %v7969_v37 = vpack.c.bf16 %v4684_v31, %v4684_v31  ;;  %v4485_v38 = vmax.f32 %v3303_v32, 0.0  ;;  %v4685_v39 = vmax.f32 %v4103_v33, 0.0  ;;  %3514 = vmatmul.mubr.bf16.gmra.mrb[128].mxu0 %v8664_v23  ;;  %4314 = vmatmul.mubr.bf16.gmra.mrb[128].mxu1 %v8667_v24  ;;  %v8682_v33 = vld [vmem:[%s8759_s28 + $0x630] ss:$8 sps:$4 sm:$0xff]  }
 0x347   : > { %3521 = vmatprep.mubr.bf16.mxu0 %v8672_v28  ;;  %4321 = vmatprep.mubr.bf16.mxu1 %v8675_v29 }
 0x348   : > { %6485 = vst.msk [vmem:[%s8945_s4 + $0x228] sm:$0xf] %vm6346_vm0, %v7769_v36  ;;  %6685 = vst.msk [vmem:[%s8945_s4 + $0x548] sm:$0xf] %vm6346_vm0, %v7969_v37  ;;  %v7770_v40 = vpack.c.bf16 %v4485_v38, %v4485_v38  ;;  %v7970_v41 = vpack.c.bf16 %v4685_v39, %v4685_v39 }
 0x349   : > { %v3307_v42 = vpop.f32.mrb[24].mxu0  ;;  %v4107_v43 = vpop.f32.mrb[24].mxu1 }
 0x34a   : > { %6486 = vst.msk [vmem:[%s8945_s4 + $0x22c] sm:$0xf] %vm6346_vm0, %v7770_v40  ;;  %6686 = vst.msk [vmem:[%s8945_s4 + $0x54c] sm:$0xf] %vm6346_vm0, %v7970_v41  ;;  %v3308_v44 = vadd.f32 %v9981_v25, %v3307_v42  ;;  %v4108_v45 = vadd.f32 %v9981_v25, %v4107_v43  ;;  %v3309_v46 = vpop.f32.mrb[25].mxu0  ;;  %v4109_v47 = vpop.f32.mrb[25].mxu1 }
 0x34b   : > { %v3310_v50 = vpop.f32.mrb[26].mxu0  ;;  %v4110_v51 = vpop.f32.mrb[26].mxu1 }
 0x34c   : > { %v4486_v54 = vmax.f32 %v3308_v44, 0.0  ;;  %v4686_v55 = vmax.f32 %v4108_v45, 0.0  ;;  %v3311_v56 = vadd.f32 %v9981_v25, %v3310_v50  ;;  %v4111_v57 = vadd.f32 %v9981_v25, %v4110_v51  ;;  %v3312_v58 = vpop.f32.mrb[27].mxu0  ;;  %v4112_v59 = vpop.f32.mrb[27].mxu1 }
 0x34e   : > { %v7771_v60 = vpack.c.bf16 %v4486_v54, %v4486_v54  ;;  %v7971_v61 = vpack.c.bf16 %v4686_v55, %v4686_v55  ;;  %v4487_v62 = vmax.f32 %v3311_v56, 0.0  ;;  %v4687_v0 = vmax.f32 %v4111_v57, 0.0  ;;  %3522 = vmatmul.mubr.bf16.gmra.mrb[132].mxu0 %v8670_v48  ;;  %4322 = vmatmul.mubr.bf16.gmra.mrb[132].mxu1 %v8673_v49 }
 0x34f   : > { %3529 = vmatprep.mubr.bf16.mxu0 %v8678_v52  ;;  %4329 = vmatprep.mubr.bf16.mxu1 %v8681_v53 }
 0x350   : > { %6487 = vst.msk [vmem:[%s8945_s4 + $0x230] sm:$0xf] %vm6346_vm0, %v7771_v60  ;;  %6687 = vst.msk [vmem:[%s8945_s4 + $0x550] sm:$0xf] %vm6346_vm0, %v7971_v61  ;;  %v7772_v1 = vpack.c.bf16 %v4487_v62, %v4487_v62  ;;  %v7972_v2 = vpack.c.bf16 %v4687_v0, %v4687_v0 }
 0x351   : > { %v3315_v3 = vpop.f32.mrb[28].mxu0  ;;  %v4115_v63 = vpop.f32.mrb[28].mxu1 }
 0x352   : > { %6488 = vst.msk [vmem:[%s8945_s4 + $0x234] sm:$0xf] %vm6346_vm0, %v7772_v1  ;;  %6688 = vst.msk [vmem:[%s8945_s4 + $0x554] sm:$0xf] %vm6346_vm0, %v7972_v2  ;;  %v3316_v4 = vadd.f32 %v9981_v25, %v3315_v3  ;;  %v4116_v5 = vadd.f32 %v9981_v25, %v4115_v63  ;;  %v3317_v6 = vpop.f32.mrb[29].mxu0  ;;  %v4117_v8 = vpop.f32.mrb[29].mxu1 }
 0x353   : > { %v3318_v10 = vpop.f32.mrb[30].mxu0  ;;  %v4118_v11 = vpop.f32.mrb[30].mxu1 }
 0x354   : > { %v4488_v15 = vmax.f32 %v3316_v4, 0.0  ;;  %v4688_v13 = vmax.f32 %v4116_v5, 0.0  ;;  %v3319_v16 = vadd.f32 %v9981_v25, %v3318_v10  ;;  %v4119_v17 = vadd.f32 %v9981_v25, %v4118_v11  ;;  %v3320_v18 = vpop.f32.mrb[31].mxu0  ;;  %v4120_v20 = vpop.f32.mrb[31].mxu1 }
 0x356   : > { %v7773_v21 = vpack.c.bf16 %v4488_v15, %v4488_v15  ;;  %v7973_v19 = vpack.c.bf16 %v4688_v13, %v4688_v13  ;;  %v4489_v22 = vmax.f32 %v3319_v16, 0.0  ;;  %v4689_v23 = vmax.f32 %v4119_v17, 0.0  ;;  %3530 = vmatmul.mubr.bf16.gmra.mrb[136].mxu0 %v8676_v9  ;;  %4330 = vmatmul.mubr.bf16.gmra.mrb[136].mxu1 %v8679_v7 }
 0x357   : > { %3537 = vmatprep.mubr.bf16.mxu0 %v8684_v12  ;;  %4337 = vmatprep.mubr.bf16.mxu1 %v8687_v14 }
 0x358   : > { %6489 = vst.msk [vmem:[%s8945_s4 + $0x238] sm:$0xf] %vm6346_vm0, %v7773_v21  ;;  %6689 = vst.msk [vmem:[%s8945_s4 + $0x558] sm:$0xf] %vm6346_vm0, %v7973_v19  ;;  %v7774_v24 = vpack.c.bf16 %v4489_v22, %v4489_v22  ;;  %v7974_v26 = vpack.c.bf16 %v4689_v23, %v4689_v23 }
 0x359   : > { %v3323_v27 = vpop.f32.mrb[32].mxu0  ;;  %v4123_v28 = vpop.f32.mrb[32].mxu1 }
 0x35a   : > { %6490 = vst.msk [vmem:[%s8945_s4 + $0x23c] sm:$0xf] %vm6346_vm0, %v7774_v24  ;;  %6690 = vst.msk [vmem:[%s8945_s4 + $0x55c] sm:$0xf] %vm6346_vm0, %v7974_v26  ;;  %v3324_v29 = vadd.f32 %v9981_v25, %v3323_v27  ;;  %v4124_v30 = vadd.f32 %v9981_v25, %v4123_v28  ;;  %v3325_v31 = vpop.f32.mrb[33].mxu0  ;;  %v4125_v32 = vpop.f32.mrb[33].mxu1 }
 0x35b   : > { %v3326_v35 = vpop.f32.mrb[34].mxu0  ;;  %v4126_v36 = vpop.f32.mrb[34].mxu1 }
 0x35c   : > { %v4490_v37 = vmax.f32 %v3324_v29, 0.0  ;;  %v4690_v38 = vmax.f32 %v4124_v30, 0.0  ;;  %v3327_v39 = vadd.f32 %v9981_v25, %v3326_v35  ;;  %v4127_v40 = vadd.f32 %v9981_v25, %v4126_v36  ;;  %v3328_v41 = vpop.f32.mrb[35].mxu0  ;;  %v4128_v42 = vpop.f32.mrb[35].mxu1 }
 0x35e   : > { %v7775_v43 = vpack.c.bf16 %v4490_v37, %v4490_v37  ;;  %v7975_v44 = vpack.c.bf16 %v4690_v38, %v4690_v38  ;;  %v4491_v45 = vmax.f32 %v3327_v39, 0.0  ;;  %v4691_v46 = vmax.f32 %v4127_v40, 0.0  ;;  %3538 = vmatmul.mubr.bf16.gmra.mrb[140].mxu0 %v8682_v33  ;;  %4338 = vmatmul.mubr.bf16.gmra.mrb[140].mxu1 %v8685_v34 }
 0x360   : > { %6491 = vst.msk [vmem:[%s8945_s4 + $0x240] sm:$0xf] %vm6346_vm0, %v7775_v43  ;;  %6691 = vst.msk [vmem:[%s8945_s4 + $0x560] sm:$0xf] %vm6346_vm0, %v7975_v44  ;;  %v7776_v47 = vpack.c.bf16 %v4491_v45, %v4491_v45  ;;  %v7976_v48 = vpack.c.bf16 %v4691_v46, %v4691_v46 }
 0x361   : > { %v3331_v49 = vpop.f32.mrb[36].mxu0  ;;  %v4131_v50 = vpop.f32.mrb[36].mxu1 }
 0x362   : > { %6492 = vst.msk [vmem:[%s8945_s4 + $0x244] sm:$0xf] %vm6346_vm0, %v7776_v47  ;;  %6692 = vst.msk [vmem:[%s8945_s4 + $0x564] sm:$0xf] %vm6346_vm0, %v7976_v48  ;;  %v3332_v51 = vadd.f32 %v9981_v25, %v3331_v49  ;;  %v4132_v52 = vadd.f32 %v9981_v25, %v4131_v50  ;;  %v3333_v53 = vpop.f32.mrb[37].mxu0  ;;  %v4133_v54 = vpop.f32.mrb[37].mxu1 }
 0x363   : > { %v3334_v55 = vpop.f32.mrb[38].mxu0  ;;  %v4134_v56 = vpop.f32.mrb[38].mxu1 }
 0x364   : > { %v4492_v57 = vmax.f32 %v3332_v51, 0.0  ;;  %v4692_v58 = vmax.f32 %v4132_v52, 0.0  ;;  %v3335_v59 = vadd.f32 %v9981_v25, %v3334_v55  ;;  %v4135_v60 = vadd.f32 %v9981_v25, %v4134_v56  ;;  %v3336_v61 = vpop.f32.mrb[39].mxu0  ;;  %v4136_v62 = vpop.f32.mrb[39].mxu1 }
 0x366   : > { %v7777_v0 = vpack.c.bf16 %v4492_v57, %v4492_v57  ;;  %v7977_v1 = vpack.c.bf16 %v4692_v58, %v4692_v58  ;;  %v4493_v2 = vmax.f32 %v3335_v59, 0.0  ;;  %v4693_v3 = vmax.f32 %v4135_v60, 0.0 }
 0x368   : > { %6493 = vst.msk [vmem:[%s8945_s4 + $0x248] sm:$0xf] %vm6346_vm0, %v7777_v0  ;;  %6693 = vst.msk [vmem:[%s8945_s4 + $0x568] sm:$0xf] %vm6346_vm0, %v7977_v1  ;;  %v7778_v63 = vpack.c.bf16 %v4493_v2, %v4493_v2  ;;  %v7978_v4 = vpack.c.bf16 %v4693_v3, %v4693_v3 }
 0x369   : > { %v3339_v5 = vpop.f32.mrb[40].mxu0  ;;  %v4139_v6 = vpop.f32.mrb[40].mxu1 }
 0x36a   : > { %6494 = vst.msk [vmem:[%s8945_s4 + $0x24c] sm:$0xf] %vm6346_vm0, %v7778_v63  ;;  %6694 = vst.msk [vmem:[%s8945_s4 + $0x56c] sm:$0xf] %vm6346_vm0, %v7978_v4  ;;  %v3340_v8 = vadd.f32 %v9981_v25, %v3339_v5  ;;  %v4140_v9 = vadd.f32 %v9981_v25, %v4139_v6  ;;  %v3341_v7 = vpop.f32.mrb[41].mxu0  ;;  %v4141_v10 = vpop.f32.mrb[41].mxu1 }
 0x36b   : > { %v3342_v11 = vpop.f32.mrb[42].mxu0  ;;  %v4142_v12 = vpop.f32.mrb[42].mxu1 }
 0x36c   : > { %v4494_v14 = vmax.f32 %v3340_v8, 0.0  ;;  %v4694_v15 = vmax.f32 %v4140_v9, 0.0  ;;  %v3343_v13 = vadd.f32 %v9981_v25, %v3342_v11  ;;  %v4143_v16 = vadd.f32 %v9981_v25, %v4142_v12  ;;  %v3344_v17 = vpop.f32.mrb[43].mxu0  ;;  %v4144_v18 = vpop.f32.mrb[43].mxu1 }
 0x36e   : > { %v7779_v20 = vpack.c.bf16 %v4494_v14, %v4494_v14  ;;  %v7979_v21 = vpack.c.bf16 %v4694_v15, %v4694_v15  ;;  %v4495_v19 = vmax.f32 %v3343_v13, 0.0  ;;  %v4695_v22 = vmax.f32 %v4143_v16, 0.0 }
 0x370   : > { %6495 = vst.msk [vmem:[%s8945_s4 + $0x250] sm:$0xf] %vm6346_vm0, %v7779_v20  ;;  %6695 = vst.msk [vmem:[%s8945_s4 + $0x570] sm:$0xf] %vm6346_vm0, %v7979_v21  ;;  %v7780_v23 = vpack.c.bf16 %v4495_v19, %v4495_v19  ;;  %v7980_v24 = vpack.c.bf16 %v4695_v22, %v4695_v22 }
 0x371   : > { %v3347_v26 = vpop.f32.mrb[44].mxu0  ;;  %v4147_v27 = vpop.f32.mrb[44].mxu1 }
 0x372   : > { %6496 = vst.msk [vmem:[%s8945_s4 + $0x254] sm:$0xf] %vm6346_vm0, %v7780_v23  ;;  %6696 = vst.msk [vmem:[%s8945_s4 + $0x574] sm:$0xf] %vm6346_vm0, %v7980_v24  ;;  %v3348_v28 = vadd.f32 %v9981_v25, %v3347_v26  ;;  %v4148_v29 = vadd.f32 %v9981_v25, %v4147_v27  ;;  %v3349_v30 = vpop.f32.mrb[45].mxu0  ;;  %v4149_v31 = vpop.f32.mrb[45].mxu1 }
 0x373   : > { %v3350_v32 = vpop.f32.mrb[46].mxu0  ;;  %v4150_v33 = vpop.f32.mrb[46].mxu1 }
 0x374   : > { %v4496_v34 = vmax.f32 %v3348_v28, 0.0  ;;  %v4696_v35 = vmax.f32 %v4148_v29, 0.0  ;;  %v3351_v36 = vadd.f32 %v9981_v25, %v3350_v32  ;;  %v4151_v37 = vadd.f32 %v9981_v25, %v4150_v33  ;;  %v3352_v38 = vpop.f32.mrb[47].mxu0  ;;  %v4152_v39 = vpop.f32.mrb[47].mxu1 }
 0x376   : > { %v7781_v40 = vpack.c.bf16 %v4496_v34, %v4496_v34  ;;  %v7981_v41 = vpack.c.bf16 %v4696_v35, %v4696_v35  ;;  %v4497_v42 = vmax.f32 %v3351_v36, 0.0  ;;  %v4697_v43 = vmax.f32 %v4151_v37, 0.0 }
 0x378   : > { %6497 = vst.msk [vmem:[%s8945_s4 + $0x258] sm:$0xf] %vm6346_vm0, %v7781_v40  ;;  %6697 = vst.msk [vmem:[%s8945_s4 + $0x578] sm:$0xf] %vm6346_vm0, %v7981_v41  ;;  %v7782_v44 = vpack.c.bf16 %v4497_v42, %v4497_v42  ;;  %v7982_v45 = vpack.c.bf16 %v4697_v43, %v4697_v43 }
 0x379   : > { %v3355_v46 = vpop.f32.mrb[48].mxu0  ;;  %v4155_v47 = vpop.f32.mrb[48].mxu1 }
 0x37a   : > { %6498 = vst.msk [vmem:[%s8945_s4 + $0x25c] sm:$0xf] %vm6346_vm0, %v7782_v44  ;;  %6698 = vst.msk [vmem:[%s8945_s4 + $0x57c] sm:$0xf] %vm6346_vm0, %v7982_v45  ;;  %v3356_v48 = vadd.f32 %v9981_v25, %v3355_v46  ;;  %v4156_v49 = vadd.f32 %v9981_v25, %v4155_v47  ;;  %v3357_v50 = vpop.f32.mrb[49].mxu0  ;;  %v4157_v51 = vpop.f32.mrb[49].mxu1 }
 0x37b   : > { %v3358_v52 = vpop.f32.mrb[50].mxu0  ;;  %v4158_v53 = vpop.f32.mrb[50].mxu1 }
 0x37c   : > { %v4498_v54 = vmax.f32 %v3356_v48, 0.0  ;;  %v4698_v55 = vmax.f32 %v4156_v49, 0.0  ;;  %v3359_v56 = vadd.f32 %v9981_v25, %v3358_v52  ;;  %v4159_v57 = vadd.f32 %v9981_v25, %v4158_v53  ;;  %v3360_v58 = vpop.f32.mrb[51].mxu0  ;;  %v4160_v59 = vpop.f32.mrb[51].mxu1 }
 0x37e   : > { %v7783_v60 = vpack.c.bf16 %v4498_v54, %v4498_v54  ;;  %v7983_v61 = vpack.c.bf16 %v4698_v55, %v4698_v55  ;;  %v4499_v62 = vmax.f32 %v3359_v56, 0.0  ;;  %v4699_v0 = vmax.f32 %v4159_v57, 0.0 }
 0x380   : > { %6499 = vst.msk [vmem:[%s8945_s4 + $0x260] sm:$0xf] %vm6346_vm0, %v7783_v60  ;;  %6699 = vst.msk [vmem:[%s8945_s4 + $0x580] sm:$0xf] %vm6346_vm0, %v7983_v61  ;;  %v7784_v1 = vpack.c.bf16 %v4499_v62, %v4499_v62  ;;  %v7984_v2 = vpack.c.bf16 %v4699_v0, %v4699_v0 }
 0x381   : > { %v3363_v3 = vpop.f32.mrb[52].mxu0  ;;  %v4163_v63 = vpop.f32.mrb[52].mxu1 }
 0x382   : > { %6500 = vst.msk [vmem:[%s8945_s4 + $0x264] sm:$0xf] %vm6346_vm0, %v7784_v1  ;;  %6700 = vst.msk [vmem:[%s8945_s4 + $0x584] sm:$0xf] %vm6346_vm0, %v7984_v2  ;;  %v3364_v4 = vadd.f32 %v9981_v25, %v3363_v3  ;;  %v4164_v5 = vadd.f32 %v9981_v25, %v4163_v63  ;;  %v3365_v6 = vpop.f32.mrb[53].mxu0  ;;  %v4165_v8 = vpop.f32.mrb[53].mxu1 }
 0x383   : > { %v3366_v9 = vpop.f32.mrb[54].mxu0  ;;  %v4166_v7 = vpop.f32.mrb[54].mxu1 }
 0x384   : > { %v4500_v10 = vmax.f32 %v3364_v4, 0.0  ;;  %v4700_v11 = vmax.f32 %v4164_v5, 0.0  ;;  %v3367_v12 = vadd.f32 %v9981_v25, %v3366_v9  ;;  %v4167_v14 = vadd.f32 %v9981_v25, %v4166_v7  ;;  %v3368_v15 = vpop.f32.mrb[55].mxu0  ;;  %v4168_v13 = vpop.f32.mrb[55].mxu1 }
 0x386   : > { %v7785_v16 = vpack.c.bf16 %v4500_v10, %v4500_v10  ;;  %v7985_v17 = vpack.c.bf16 %v4700_v11, %v4700_v11  ;;  %v4501_v18 = vmax.f32 %v3367_v12, 0.0  ;;  %v4701_v20 = vmax.f32 %v4167_v14, 0.0 }
 0x388   : > { %6501 = vst.msk [vmem:[%s8945_s4 + $0x268] sm:$0xf] %vm6346_vm0, %v7785_v16  ;;  %6701 = vst.msk [vmem:[%s8945_s4 + $0x588] sm:$0xf] %vm6346_vm0, %v7985_v17  ;;  %v7786_v21 = vpack.c.bf16 %v4501_v18, %v4501_v18  ;;  %v7986_v19 = vpack.c.bf16 %v4701_v20, %v4701_v20 }
 0x389   : > { %v3371_v22 = vpop.f32.mrb[56].mxu0  ;;  %v4171_v23 = vpop.f32.mrb[56].mxu1 }
 0x38a   : > { %6502 = vst.msk [vmem:[%s8945_s4 + $0x26c] sm:$0xf] %vm6346_vm0, %v7786_v21  ;;  %6702 = vst.msk [vmem:[%s8945_s4 + $0x58c] sm:$0xf] %vm6346_vm0, %v7986_v19  ;;  %v3372_v24 = vadd.f32 %v9981_v25, %v3371_v22  ;;  %v4172_v26 = vadd.f32 %v9981_v25, %v4171_v23  ;;  %v3373_v27 = vpop.f32.mrb[57].mxu0  ;;  %v4173_v28 = vpop.f32.mrb[57].mxu1 }
 0x38b   : > { %v3374_v29 = vpop.f32.mrb[58].mxu0  ;;  %v4174_v30 = vpop.f32.mrb[58].mxu1 }
 0x38c   : > { %v4502_v31 = vmax.f32 %v3372_v24, 0.0  ;;  %v4702_v32 = vmax.f32 %v4172_v26, 0.0  ;;  %v3375_v33 = vadd.f32 %v9981_v25, %v3374_v29  ;;  %v4175_v34 = vadd.f32 %v9981_v25, %v4174_v30  ;;  %v3376_v35 = vpop.f32.mrb[59].mxu0  ;;  %v4176_v36 = vpop.f32.mrb[59].mxu1 }
 0x38e   : > { %v7787_v37 = vpack.c.bf16 %v4502_v31, %v4502_v31  ;;  %v7987_v38 = vpack.c.bf16 %v4702_v32, %v4702_v32  ;;  %v4503_v39 = vmax.f32 %v3375_v33, 0.0  ;;  %v4703_v40 = vmax.f32 %v4175_v34, 0.0 }
 0x390   : > { %6503 = vst.msk [vmem:[%s8945_s4 + $0x270] sm:$0xf] %vm6346_vm0, %v7787_v37  ;;  %6703 = vst.msk [vmem:[%s8945_s4 + $0x590] sm:$0xf] %vm6346_vm0, %v7987_v38  ;;  %v7788_v41 = vpack.c.bf16 %v4503_v39, %v4503_v39  ;;  %v7988_v42 = vpack.c.bf16 %v4703_v40, %v4703_v40 }
 0x391   : > { %v3379_v43 = vpop.f32.mrb[60].mxu0  ;;  %v4179_v44 = vpop.f32.mrb[60].mxu1 }
 0x392   : > { %6504 = vst.msk [vmem:[%s8945_s4 + $0x274] sm:$0xf] %vm6346_vm0, %v7788_v41  ;;  %6704 = vst.msk [vmem:[%s8945_s4 + $0x594] sm:$0xf] %vm6346_vm0, %v7988_v42  ;;  %v3380_v45 = vadd.f32 %v9981_v25, %v3379_v43  ;;  %v4180_v46 = vadd.f32 %v9981_v25, %v4179_v44  ;;  %v3381_v47 = vpop.f32.mrb[61].mxu0  ;;  %v4181_v48 = vpop.f32.mrb[61].mxu1 }
 0x393   : > { %v3382_v49 = vpop.f32.mrb[62].mxu0  ;;  %v4182_v50 = vpop.f32.mrb[62].mxu1 }
 0x394   : > { %v4504_v51 = vmax.f32 %v3380_v45, 0.0  ;;  %v4704_v52 = vmax.f32 %v4180_v46, 0.0  ;;  %v3383_v53 = vadd.f32 %v9981_v25, %v3382_v49  ;;  %v4183_v54 = vadd.f32 %v9981_v25, %v4182_v50  ;;  %v3384_v55 = vpop.f32.mrb[63].mxu0  ;;  %v4184_v56 = vpop.f32.mrb[63].mxu1 }
 0x396   : > { %v7789_v57 = vpack.c.bf16 %v4504_v51, %v4504_v51  ;;  %v7989_v58 = vpack.c.bf16 %v4704_v52, %v4704_v52  ;;  %v4505_v59 = vmax.f32 %v3383_v53, 0.0  ;;  %v4705_v60 = vmax.f32 %v4183_v54, 0.0 }
 0x398   : > { %6505 = vst.msk [vmem:[%s8945_s4 + $0x278] sm:$0xf] %vm6346_vm0, %v7789_v57  ;;  %6705 = vst.msk [vmem:[%s8945_s4 + $0x598] sm:$0xf] %vm6346_vm0, %v7989_v58  ;;  %v7790_v61 = vpack.c.bf16 %v4505_v59, %v4505_v59  ;;  %v7990_v62 = vpack.c.bf16 %v4705_v60, %v4705_v60 }
 0x399   : > { %v3387_v0 = vpop.f32.mrb[64].mxu0  ;;  %v4187_v1 = vpop.f32.mrb[64].mxu1 }
 0x39a   : > { %6506 = vst.msk [vmem:[%s8945_s4 + $0x27c] sm:$0xf] %vm6346_vm0, %v7790_v61  ;;  %6706 = vst.msk [vmem:[%s8945_s4 + $0x59c] sm:$0xf] %vm6346_vm0, %v7990_v62  ;;  %v3388_v2 = vadd.f32 %v9981_v25, %v3387_v0  ;;  %v4188_v3 = vadd.f32 %v9981_v25, %v4187_v1  ;;  %v3389_v63 = vpop.f32.mrb[65].mxu0  ;;  %v4189_v4 = vpop.f32.mrb[65].mxu1 }
 0x39b   : > { %v3390_v5 = vpop.f32.mrb[66].mxu0  ;;  %v4190_v6 = vpop.f32.mrb[66].mxu1 }
 0x39c   : > { %v4506_v8 = vmax.f32 %v3388_v2, 0.0  ;;  %v4706_v9 = vmax.f32 %v4188_v3, 0.0  ;;  %v3391_v7 = vadd.f32 %v9981_v25, %v3390_v5  ;;  %v4191_v10 = vadd.f32 %v9981_v25, %v4190_v6  ;;  %v3392_v11 = vpop.f32.mrb[67].mxu0  ;;  %v4192_v12 = vpop.f32.mrb[67].mxu1 }
 0x39e   : > { %v7791_v14 = vpack.c.bf16 %v4506_v8, %v4506_v8  ;;  %v7991_v15 = vpack.c.bf16 %v4706_v9, %v4706_v9  ;;  %v4507_v13 = vmax.f32 %v3391_v7, 0.0  ;;  %v4707_v16 = vmax.f32 %v4191_v10, 0.0 }
 0x3a0   : > { %6507 = vst.msk [vmem:[%s8945_s4 + $0x280] sm:$0xf] %vm6346_vm0, %v7791_v14  ;;  %6707 = vst.msk [vmem:[%s8945_s4 + $0x5a0] sm:$0xf] %vm6346_vm0, %v7991_v15  ;;  %v7792_v17 = vpack.c.bf16 %v4507_v13, %v4507_v13  ;;  %v7992_v18 = vpack.c.bf16 %v4707_v16, %v4707_v16 }
 0x3a1   : > { %v3395_v20 = vpop.f32.mrb[68].mxu0  ;;  %v4195_v21 = vpop.f32.mrb[68].mxu1 }
 0x3a2   : > { %6508 = vst.msk [vmem:[%s8945_s4 + $0x284] sm:$0xf] %vm6346_vm0, %v7792_v17  ;;  %6708 = vst.msk [vmem:[%s8945_s4 + $0x5a4] sm:$0xf] %vm6346_vm0, %v7992_v18  ;;  %v3396_v19 = vadd.f32 %v9981_v25, %v3395_v20  ;;  %v4196_v22 = vadd.f32 %v9981_v25, %v4195_v21  ;;  %v3397_v23 = vpop.f32.mrb[69].mxu0  ;;  %v4197_v24 = vpop.f32.mrb[69].mxu1 }
 0x3a3   : > { %v3398_v26 = vpop.f32.mrb[70].mxu0  ;;  %v4198_v27 = vpop.f32.mrb[70].mxu1 }
 0x3a4   : > { %v4508_v28 = vmax.f32 %v3396_v19, 0.0  ;;  %v4708_v29 = vmax.f32 %v4196_v22, 0.0  ;;  %v3399_v30 = vadd.f32 %v9981_v25, %v3398_v26  ;;  %v4199_v31 = vadd.f32 %v9981_v25, %v4198_v27  ;;  %v3400_v32 = vpop.f32.mrb[71].mxu0  ;;  %v4200_v33 = vpop.f32.mrb[71].mxu1 }
 0x3a6   : > { %v7793_v34 = vpack.c.bf16 %v4508_v28, %v4508_v28  ;;  %v7993_v35 = vpack.c.bf16 %v4708_v29, %v4708_v29  ;;  %v4509_v36 = vmax.f32 %v3399_v30, 0.0  ;;  %v4709_v37 = vmax.f32 %v4199_v31, 0.0 }
 0x3a8   : > { %6509 = vst.msk [vmem:[%s8945_s4 + $0x288] sm:$0xf] %vm6346_vm0, %v7793_v34  ;;  %6709 = vst.msk [vmem:[%s8945_s4 + $0x5a8] sm:$0xf] %vm6346_vm0, %v7993_v35  ;;  %v7794_v38 = vpack.c.bf16 %v4509_v36, %v4509_v36  ;;  %v7994_v39 = vpack.c.bf16 %v4709_v37, %v4709_v37 }
 0x3a9   : > { %v3403_v40 = vpop.f32.mrb[72].mxu0  ;;  %v4203_v41 = vpop.f32.mrb[72].mxu1 }
 0x3aa   : > { %6510 = vst.msk [vmem:[%s8945_s4 + $0x28c] sm:$0xf] %vm6346_vm0, %v7794_v38  ;;  %6710 = vst.msk [vmem:[%s8945_s4 + $0x5ac] sm:$0xf] %vm6346_vm0, %v7994_v39  ;;  %v3404_v42 = vadd.f32 %v9981_v25, %v3403_v40  ;;  %v4204_v43 = vadd.f32 %v9981_v25, %v4203_v41  ;;  %v3405_v44 = vpop.f32.mrb[73].mxu0  ;;  %v4205_v45 = vpop.f32.mrb[73].mxu1 }
 0x3ab   : > { %v3406_v46 = vpop.f32.mrb[74].mxu0  ;;  %v4206_v47 = vpop.f32.mrb[74].mxu1 }
 0x3ac   : > { %v4510_v48 = vmax.f32 %v3404_v42, 0.0  ;;  %v4710_v49 = vmax.f32 %v4204_v43, 0.0  ;;  %v3407_v50 = vadd.f32 %v9981_v25, %v3406_v46  ;;  %v4207_v51 = vadd.f32 %v9981_v25, %v4206_v47  ;;  %v3408_v52 = vpop.f32.mrb[75].mxu0  ;;  %v4208_v53 = vpop.f32.mrb[75].mxu1  ;;  %v10248_v25 = vld [vmem:[%s10459_s2] ss:$0 sm:$0xff] }
 0x3ae   : > { %v7795_v54 = vpack.c.bf16 %v4510_v48, %v4510_v48  ;;  %v7995_v55 = vpack.c.bf16 %v4710_v49, %v4710_v49  ;;  %v4511_v56 = vmax.f32 %v3407_v50, 0.0  ;;  %v4711_v57 = vmax.f32 %v4207_v51, 0.0 }
 0x3b0   : > { %6511 = vst.msk [vmem:[%s8945_s4 + $0x290] sm:$0xf] %vm6346_vm0, %v7795_v54  ;;  %6711 = vst.msk [vmem:[%s8945_s4 + $0x5b0] sm:$0xf] %vm6346_vm0, %v7995_v55  ;;  %v7796_v58 = vpack.c.bf16 %v4511_v56, %v4511_v56  ;;  %v7996_v59 = vpack.c.bf16 %v4711_v57, %v4711_v57 }
 0x3b1   : > { %v3411_v60 = vpop.f32.mrb[76].mxu0  ;;  %v4211_v61 = vpop.f32.mrb[76].mxu1 }
 0x3b2   : > { %6512 = vst.msk [vmem:[%s8945_s4 + $0x294] sm:$0xf] %vm6346_vm0, %v7796_v58  ;;  %6712 = vst.msk [vmem:[%s8945_s4 + $0x5b4] sm:$0xf] %vm6346_vm0, %v7996_v59  ;;  %v3412_v62 = vadd.f32 %v10248_v25, %v3411_v60  ;;  %v4212_v0 = vadd.f32 %v10248_v25, %v4211_v61  ;;  %v3413_v1 = vpop.f32.mrb[77].mxu0  ;;  %v4213_v2 = vpop.f32.mrb[77].mxu1 }
 0x3b3   : > { %v3414_v3 = vpop.f32.mrb[78].mxu0  ;;  %v4214_v63 = vpop.f32.mrb[78].mxu1 }
 0x3b4   : > { %v4512_v4 = vmax.f32 %v3412_v62, 0.0  ;;  %v4712_v5 = vmax.f32 %v4212_v0, 0.0  ;;  %v3415_v6 = vadd.f32 %v10248_v25, %v3414_v3  ;;  %v4215_v8 = vadd.f32 %v10248_v25, %v4214_v63  ;;  %v3416_v9 = vpop.f32.mrb[79].mxu0  ;;  %v4216_v7 = vpop.f32.mrb[79].mxu1 }
 0x3b6   : > { %v7797_v10 = vpack.c.bf16 %v4512_v4, %v4512_v4  ;;  %v7997_v11 = vpack.c.bf16 %v4712_v5, %v4712_v5  ;;  %v4513_v12 = vmax.f32 %v3415_v6, 0.0  ;;  %v4713_v14 = vmax.f32 %v4215_v8, 0.0 }
 0x3b8   : > { %6513 = vst.msk [vmem:[%s8945_s4 + $0x298] sm:$0xf] %vm6346_vm0, %v7797_v10  ;;  %6713 = vst.msk [vmem:[%s8945_s4 + $0x5b8] sm:$0xf] %vm6346_vm0, %v7997_v11  ;;  %v7798_v15 = vpack.c.bf16 %v4513_v12, %v4513_v12  ;;  %v7998_v13 = vpack.c.bf16 %v4713_v14, %v4713_v14 }
 0x3b9   : > { %v3419_v16 = vpop.f32.mrb[80].mxu0  ;;  %v4219_v17 = vpop.f32.mrb[80].mxu1 }
 0x3ba   : > { %6514 = vst.msk [vmem:[%s8945_s4 + $0x29c] sm:$0xf] %vm6346_vm0, %v7798_v15  ;;  %6714 = vst.msk [vmem:[%s8945_s4 + $0x5bc] sm:$0xf] %vm6346_vm0, %v7998_v13  ;;  %v3420_v18 = vadd.f32 %v10248_v25, %v3419_v16  ;;  %v4220_v20 = vadd.f32 %v10248_v25, %v4219_v17  ;;  %v3421_v21 = vpop.f32.mrb[81].mxu0  ;;  %v4221_v19 = vpop.f32.mrb[81].mxu1 }
 0x3bb   : > { %v3422_v22 = vpop.f32.mrb[82].mxu0  ;;  %v4222_v23 = vpop.f32.mrb[82].mxu1 }
 0x3bc   : > { %v4514_v24 = vmax.f32 %v3420_v18, 0.0  ;;  %v4714_v26 = vmax.f32 %v4220_v20, 0.0  ;;  %v3423_v27 = vadd.f32 %v10248_v25, %v3422_v22  ;;  %v4223_v28 = vadd.f32 %v10248_v25, %v4222_v23  ;;  %v3424_v29 = vpop.f32.mrb[83].mxu0  ;;  %v4224_v30 = vpop.f32.mrb[83].mxu1 }
 0x3be   : > { %v7799_v31 = vpack.c.bf16 %v4514_v24, %v4514_v24  ;;  %v7999_v32 = vpack.c.bf16 %v4714_v26, %v4714_v26  ;;  %v4515_v33 = vmax.f32 %v3423_v27, 0.0  ;;  %v4715_v34 = vmax.f32 %v4223_v28, 0.0 }
 0x3c0   : > { %6515 = vst.msk [vmem:[%s8945_s4 + $0x2a0] sm:$0xf] %vm6346_vm0, %v7799_v31  ;;  %6715 = vst.msk [vmem:[%s8945_s4 + $0x5c0] sm:$0xf] %vm6346_vm0, %v7999_v32  ;;  %v7800_v35 = vpack.c.bf16 %v4515_v33, %v4515_v33  ;;  %v8000_v36 = vpack.c.bf16 %v4715_v34, %v4715_v34 }
 0x3c1   : > { %v3427_v37 = vpop.f32.mrb[84].mxu0  ;;  %v4227_v38 = vpop.f32.mrb[84].mxu1 }
 0x3c2   : > { %6516 = vst.msk [vmem:[%s8945_s4 + $0x2a4] sm:$0xf] %vm6346_vm0, %v7800_v35  ;;  %6716 = vst.msk [vmem:[%s8945_s4 + $0x5c4] sm:$0xf] %vm6346_vm0, %v8000_v36  ;;  %v3428_v39 = vadd.f32 %v10248_v25, %v3427_v37  ;;  %v4228_v40 = vadd.f32 %v10248_v25, %v4227_v38  ;;  %v3429_v41 = vpop.f32.mrb[85].mxu0  ;;  %v4229_v42 = vpop.f32.mrb[85].mxu1 }
 0x3c3   : > { %v3430_v43 = vpop.f32.mrb[86].mxu0  ;;  %v4230_v44 = vpop.f32.mrb[86].mxu1 }
 0x3c4   : > { %v4516_v45 = vmax.f32 %v3428_v39, 0.0  ;;  %v4716_v46 = vmax.f32 %v4228_v40, 0.0  ;;  %v3431_v47 = vadd.f32 %v10248_v25, %v3430_v43  ;;  %v4231_v48 = vadd.f32 %v10248_v25, %v4230_v44  ;;  %v3432_v49 = vpop.f32.mrb[87].mxu0  ;;  %v4232_v50 = vpop.f32.mrb[87].mxu1 }
 0x3c6   : > { %v7801_v51 = vpack.c.bf16 %v4516_v45, %v4516_v45  ;;  %v8001_v52 = vpack.c.bf16 %v4716_v46, %v4716_v46  ;;  %v4517_v53 = vmax.f32 %v3431_v47, 0.0  ;;  %v4717_v54 = vmax.f32 %v4231_v48, 0.0 }
 0x3c8   : > { %6517 = vst.msk [vmem:[%s8945_s4 + $0x2a8] sm:$0xf] %vm6346_vm0, %v7801_v51  ;;  %6717 = vst.msk [vmem:[%s8945_s4 + $0x5c8] sm:$0xf] %vm6346_vm0, %v8001_v52  ;;  %v7802_v55 = vpack.c.bf16 %v4517_v53, %v4517_v53  ;;  %v8002_v56 = vpack.c.bf16 %v4717_v54, %v4717_v54 }
 0x3c9   : > { %v3435_v57 = vpop.f32.mrb[88].mxu0  ;;  %v4235_v58 = vpop.f32.mrb[88].mxu1 }
 0x3ca   : > { %6518 = vst.msk [vmem:[%s8945_s4 + $0x2ac] sm:$0xf] %vm6346_vm0, %v7802_v55  ;;  %6718 = vst.msk [vmem:[%s8945_s4 + $0x5cc] sm:$0xf] %vm6346_vm0, %v8002_v56  ;;  %v3436_v59 = vadd.f32 %v10248_v25, %v3435_v57  ;;  %v4236_v60 = vadd.f32 %v10248_v25, %v4235_v58  ;;  %v3437_v61 = vpop.f32.mrb[89].mxu0  ;;  %v4237_v62 = vpop.f32.mrb[89].mxu1 }
 0x3cb   : > { %v3438_v0 = vpop.f32.mrb[90].mxu0  ;;  %v4238_v1 = vpop.f32.mrb[90].mxu1 }
 0x3cc   : > { %v4518_v2 = vmax.f32 %v3436_v59, 0.0  ;;  %v4718_v3 = vmax.f32 %v4236_v60, 0.0  ;;  %v3439_v63 = vadd.f32 %v10248_v25, %v3438_v0  ;;  %v4239_v4 = vadd.f32 %v10248_v25, %v4238_v1  ;;  %v3440_v5 = vpop.f32.mrb[91].mxu0  ;;  %v4240_v6 = vpop.f32.mrb[91].mxu1 }
 0x3ce   : > { %v7803_v8 = vpack.c.bf16 %v4518_v2, %v4518_v2  ;;  %v8003_v9 = vpack.c.bf16 %v4718_v3, %v4718_v3  ;;  %v4519_v7 = vmax.f32 %v3439_v63, 0.0  ;;  %v4719_v10 = vmax.f32 %v4239_v4, 0.0 }
 0x3d0   : > { %6519 = vst.msk [vmem:[%s8945_s4 + $0x2b0] sm:$0xf] %vm6346_vm0, %v7803_v8  ;;  %6719 = vst.msk [vmem:[%s8945_s4 + $0x5d0] sm:$0xf] %vm6346_vm0, %v8003_v9  ;;  %v7804_v11 = vpack.c.bf16 %v4519_v7, %v4519_v7  ;;  %v8004_v12 = vpack.c.bf16 %v4719_v10, %v4719_v10 }
 0x3d1   : > { %v3443_v14 = vpop.f32.mrb[92].mxu0  ;;  %v4243_v15 = vpop.f32.mrb[92].mxu1 }
 0x3d2   : > { %6520 = vst.msk [vmem:[%s8945_s4 + $0x2b4] sm:$0xf] %vm6346_vm0, %v7804_v11  ;;  %6720 = vst.msk [vmem:[%s8945_s4 + $0x5d4] sm:$0xf] %vm6346_vm0, %v8004_v12  ;;  %v3444_v13 = vadd.f32 %v10248_v25, %v3443_v14  ;;  %v4244_v16 = vadd.f32 %v10248_v25, %v4243_v15  ;;  %v3445_v17 = vpop.f32.mrb[93].mxu0  ;;  %v4245_v18 = vpop.f32.mrb[93].mxu1 }
 0x3d3   : > { %v3446_v20 = vpop.f32.mrb[94].mxu0  ;;  %v4246_v21 = vpop.f32.mrb[94].mxu1 }
 0x3d4   : > { %v4520_v19 = vmax.f32 %v3444_v13, 0.0  ;;  %v4720_v22 = vmax.f32 %v4244_v16, 0.0  ;;  %v3447_v23 = vadd.f32 %v10248_v25, %v3446_v20  ;;  %v4247_v24 = vadd.f32 %v10248_v25, %v4246_v21  ;;  %v3448_v26 = vpop.f32.mrb[95].mxu0  ;;  %v4248_v27 = vpop.f32.mrb[95].mxu1 }
 0x3d6   : > { %v7805_v28 = vpack.c.bf16 %v4520_v19, %v4520_v19  ;;  %v8005_v29 = vpack.c.bf16 %v4720_v22, %v4720_v22  ;;  %v4521_v30 = vmax.f32 %v3447_v23, 0.0  ;;  %v4721_v31 = vmax.f32 %v4247_v24, 0.0 }
 0x3d8   : > { %6521 = vst.msk [vmem:[%s8945_s4 + $0x2b8] sm:$0xf] %vm6346_vm0, %v7805_v28  ;;  %6721 = vst.msk [vmem:[%s8945_s4 + $0x5d8] sm:$0xf] %vm6346_vm0, %v8005_v29  ;;  %v7806_v32 = vpack.c.bf16 %v4521_v30, %v4521_v30  ;;  %v8006_v33 = vpack.c.bf16 %v4721_v31, %v4721_v31 }
 0x3d9   : > { %v3451_v34 = vpop.f32.mrb[96].mxu0  ;;  %v4251_v35 = vpop.f32.mrb[96].mxu1 }
 0x3da   : > { %6522 = vst.msk [vmem:[%s8945_s4 + $0x2bc] sm:$0xf] %vm6346_vm0, %v7806_v32  ;;  %6722 = vst.msk [vmem:[%s8945_s4 + $0x5dc] sm:$0xf] %vm6346_vm0, %v8006_v33  ;;  %v3452_v36 = vadd.f32 %v10248_v25, %v3451_v34  ;;  %v4252_v37 = vadd.f32 %v10248_v25, %v4251_v35  ;;  %v3453_v38 = vpop.f32.mrb[97].mxu0  ;;  %v4253_v39 = vpop.f32.mrb[97].mxu1 }
 0x3db   : > { %v3454_v40 = vpop.f32.mrb[98].mxu0  ;;  %v4254_v41 = vpop.f32.mrb[98].mxu1 }
 0x3dc   : > { %v4522_v42 = vmax.f32 %v3452_v36, 0.0  ;;  %v4722_v43 = vmax.f32 %v4252_v37, 0.0  ;;  %v3455_v44 = vadd.f32 %v10248_v25, %v3454_v40  ;;  %v4255_v45 = vadd.f32 %v10248_v25, %v4254_v41  ;;  %v3456_v46 = vpop.f32.mrb[99].mxu0  ;;  %v4256_v47 = vpop.f32.mrb[99].mxu1 }
 0x3de   : > { %v7807_v48 = vpack.c.bf16 %v4522_v42, %v4522_v42  ;;  %v8007_v49 = vpack.c.bf16 %v4722_v43, %v4722_v43  ;;  %v4523_v50 = vmax.f32 %v3455_v44, 0.0  ;;  %v4723_v51 = vmax.f32 %v4255_v45, 0.0 }
 0x3e0   : > { %6523 = vst.msk [vmem:[%s8945_s4 + $0x2c0] sm:$0xf] %vm6346_vm0, %v7807_v48  ;;  %6723 = vst.msk [vmem:[%s8945_s4 + $0x5e0] sm:$0xf] %vm6346_vm0, %v8007_v49  ;;  %v7808_v52 = vpack.c.bf16 %v4523_v50, %v4523_v50  ;;  %v8008_v53 = vpack.c.bf16 %v4723_v51, %v4723_v51 }
 0x3e1   : > { %v3459_v54 = vpop.f32.mrb[100].mxu0  ;;  %v4259_v55 = vpop.f32.mrb[100].mxu1 }
 0x3e2   : > { %6524 = vst.msk [vmem:[%s8945_s4 + $0x2c4] sm:$0xf] %vm6346_vm0, %v7808_v52  ;;  %6724 = vst.msk [vmem:[%s8945_s4 + $0x5e4] sm:$0xf] %vm6346_vm0, %v8008_v53  ;;  %v3460_v56 = vadd.f32 %v10248_v25, %v3459_v54  ;;  %v4260_v57 = vadd.f32 %v10248_v25, %v4259_v55  ;;  %v3461_v58 = vpop.f32.mrb[101].mxu0  ;;  %v4261_v59 = vpop.f32.mrb[101].mxu1 }
 0x3e3   : > { %v3462_v60 = vpop.f32.mrb[102].mxu0  ;;  %v4262_v61 = vpop.f32.mrb[102].mxu1 }
 0x3e4   : > { %v4524_v62 = vmax.f32 %v3460_v56, 0.0  ;;  %v4724_v0 = vmax.f32 %v4260_v57, 0.0  ;;  %v3463_v1 = vadd.f32 %v10248_v25, %v3462_v60  ;;  %v4263_v2 = vadd.f32 %v10248_v25, %v4262_v61  ;;  %v3464_v3 = vpop.f32.mrb[103].mxu0  ;;  %v4264_v63 = vpop.f32.mrb[103].mxu1 }
 0x3e6   : > { %v7809_v4 = vpack.c.bf16 %v4524_v62, %v4524_v62  ;;  %v8009_v5 = vpack.c.bf16 %v4724_v0, %v4724_v0  ;;  %v4525_v6 = vmax.f32 %v3463_v1, 0.0  ;;  %v4725_v8 = vmax.f32 %v4263_v2, 0.0 }
 0x3e8   : > { %6525 = vst.msk [vmem:[%s8945_s4 + $0x2c8] sm:$0xf] %vm6346_vm0, %v7809_v4  ;;  %6725 = vst.msk [vmem:[%s8945_s4 + $0x5e8] sm:$0xf] %vm6346_vm0, %v8009_v5  ;;  %v7810_v9 = vpack.c.bf16 %v4525_v6, %v4525_v6  ;;  %v8010_v7 = vpack.c.bf16 %v4725_v8, %v4725_v8 }
 0x3e9   : > { %v3467_v10 = vpop.f32.mrb[104].mxu0  ;;  %v4267_v11 = vpop.f32.mrb[104].mxu1 }
 0x3ea   : > { %6526 = vst.msk [vmem:[%s8945_s4 + $0x2cc] sm:$0xf] %vm6346_vm0, %v7810_v9  ;;  %6726 = vst.msk [vmem:[%s8945_s4 + $0x5ec] sm:$0xf] %vm6346_vm0, %v8010_v7  ;;  %v3468_v12 = vadd.f32 %v10248_v25, %v3467_v10  ;;  %v4268_v14 = vadd.f32 %v10248_v25, %v4267_v11  ;;  %v3469_v15 = vpop.f32.mrb[105].mxu0  ;;  %v4269_v13 = vpop.f32.mrb[105].mxu1 }
 0x3eb   : > { %v3470_v16 = vpop.f32.mrb[106].mxu0  ;;  %v4270_v17 = vpop.f32.mrb[106].mxu1 }
 0x3ec   : > { %v4526_v18 = vmax.f32 %v3468_v12, 0.0  ;;  %v4726_v20 = vmax.f32 %v4268_v14, 0.0  ;;  %v3471_v21 = vadd.f32 %v10248_v25, %v3470_v16  ;;  %v4271_v19 = vadd.f32 %v10248_v25, %v4270_v17  ;;  %v3472_v22 = vpop.f32.mrb[107].mxu0  ;;  %v4272_v23 = vpop.f32.mrb[107].mxu1 }
 0x3ee   : > { %v7811_v24 = vpack.c.bf16 %v4526_v18, %v4526_v18  ;;  %v8011_v26 = vpack.c.bf16 %v4726_v20, %v4726_v20  ;;  %v4527_v27 = vmax.f32 %v3471_v21, 0.0  ;;  %v4727_v28 = vmax.f32 %v4271_v19, 0.0 }
 0x3f0   : > { %6527 = vst.msk [vmem:[%s8945_s4 + $0x2d0] sm:$0xf] %vm6346_vm0, %v7811_v24  ;;  %6727 = vst.msk [vmem:[%s8945_s4 + $0x5f0] sm:$0xf] %vm6346_vm0, %v8011_v26  ;;  %v7812_v29 = vpack.c.bf16 %v4527_v27, %v4527_v27  ;;  %v8012_v30 = vpack.c.bf16 %v4727_v28, %v4727_v28 }
 0x3f1   : > { %v3475_v31 = vpop.f32.mrb[108].mxu0  ;;  %v4275_v32 = vpop.f32.mrb[108].mxu1 }
 0x3f2   : > { %6528 = vst.msk [vmem:[%s8945_s4 + $0x2d4] sm:$0xf] %vm6346_vm0, %v7812_v29  ;;  %6728 = vst.msk [vmem:[%s8945_s4 + $0x5f4] sm:$0xf] %vm6346_vm0, %v8012_v30  ;;  %v3476_v33 = vadd.f32 %v10248_v25, %v3475_v31  ;;  %v4276_v34 = vadd.f32 %v10248_v25, %v4275_v32  ;;  %v3477_v35 = vpop.f32.mrb[109].mxu0  ;;  %v4277_v36 = vpop.f32.mrb[109].mxu1 }
 0x3f3   : > { %v3478_v37 = vpop.f32.mrb[110].mxu0  ;;  %v4278_v38 = vpop.f32.mrb[110].mxu1 }
 0x3f4   : > { %v4528_v39 = vmax.f32 %v3476_v33, 0.0  ;;  %v4728_v40 = vmax.f32 %v4276_v34, 0.0  ;;  %v3479_v41 = vadd.f32 %v10248_v25, %v3478_v37  ;;  %v4279_v42 = vadd.f32 %v10248_v25, %v4278_v38  ;;  %v3480_v43 = vpop.f32.mrb[111].mxu0  ;;  %v4280_v44 = vpop.f32.mrb[111].mxu1 }
 0x3f6   : > { %v7813_v45 = vpack.c.bf16 %v4528_v39, %v4528_v39  ;;  %v8013_v46 = vpack.c.bf16 %v4728_v40, %v4728_v40  ;;  %v4529_v47 = vmax.f32 %v3479_v41, 0.0  ;;  %v4729_v48 = vmax.f32 %v4279_v42, 0.0 }
 0x3f8   : > { %6529 = vst.msk [vmem:[%s8945_s4 + $0x2d8] sm:$0xf] %vm6346_vm0, %v7813_v45  ;;  %6729 = vst.msk [vmem:[%s8945_s4 + $0x5f8] sm:$0xf] %vm6346_vm0, %v8013_v46  ;;  %v7814_v49 = vpack.c.bf16 %v4529_v47, %v4529_v47  ;;  %v8014_v50 = vpack.c.bf16 %v4729_v48, %v4729_v48 }
 0x3f9   : > { %v3483_v51 = vpop.f32.mrb[112].mxu0  ;;  %v4283_v52 = vpop.f32.mrb[112].mxu1 }
 0x3fa   : > { %6530 = vst.msk [vmem:[%s8945_s4 + $0x2dc] sm:$0xf] %vm6346_vm0, %v7814_v49  ;;  %6730 = vst.msk [vmem:[%s8945_s4 + $0x5fc] sm:$0xf] %vm6346_vm0, %v8014_v50  ;;  %v3484_v53 = vadd.f32 %v10248_v25, %v3483_v51  ;;  %v4284_v54 = vadd.f32 %v10248_v25, %v4283_v52  ;;  %v3485_v55 = vpop.f32.mrb[113].mxu0  ;;  %v4285_v56 = vpop.f32.mrb[113].mxu1 }
 0x3fb   : > { %v3486_v57 = vpop.f32.mrb[114].mxu0  ;;  %v4286_v58 = vpop.f32.mrb[114].mxu1 }
 0x3fc   : > { %v4530_v59 = vmax.f32 %v3484_v53, 0.0  ;;  %v4730_v60 = vmax.f32 %v4284_v54, 0.0  ;;  %v3487_v61 = vadd.f32 %v10248_v25, %v3486_v57  ;;  %v4287_v62 = vadd.f32 %v10248_v25, %v4286_v58  ;;  %v3488_v0 = vpop.f32.mrb[115].mxu0  ;;  %v4288_v1 = vpop.f32.mrb[115].mxu1 }
 0x3fe   : > { %v7815_v2 = vpack.c.bf16 %v4530_v59, %v4530_v59  ;;  %v8015_v3 = vpack.c.bf16 %v4730_v60, %v4730_v60  ;;  %v4531_v63 = vmax.f32 %v3487_v61, 0.0  ;;  %v4731_v4 = vmax.f32 %v4287_v62, 0.0 }
 0x400   : > { %6531 = vst.msk [vmem:[%s8945_s4 + $0x2e0] sm:$0xf] %vm6346_vm0, %v7815_v2  ;;  %6731 = vst.msk [vmem:[%s8945_s4 + $0x600] sm:$0xf] %vm6346_vm0, %v8015_v3  ;;  %v7816_v5 = vpack.c.bf16 %v4531_v63, %v4531_v63  ;;  %v8016_v6 = vpack.c.bf16 %v4731_v4, %v4731_v4 }
 0x401   : > { %v3491_v8 = vpop.f32.mrb[116].mxu0  ;;  %v4291_v9 = vpop.f32.mrb[116].mxu1 }
 0x402   : > { %6532 = vst.msk [vmem:[%s8945_s4 + $0x2e4] sm:$0xf] %vm6346_vm0, %v7816_v5  ;;  %6732 = vst.msk [vmem:[%s8945_s4 + $0x604] sm:$0xf] %vm6346_vm0, %v8016_v6  ;;  %v3492_v7 = vadd.f32 %v10248_v25, %v3491_v8  ;;  %v4292_v10 = vadd.f32 %v10248_v25, %v4291_v9  ;;  %v3493_v11 = vpop.f32.mrb[117].mxu0  ;;  %v4293_v12 = vpop.f32.mrb[117].mxu1 }
 0x403   : > { %v3494_v14 = vpop.f32.mrb[118].mxu0  ;;  %v4294_v15 = vpop.f32.mrb[118].mxu1 }
 0x404   : > { %v4532_v13 = vmax.f32 %v3492_v7, 0.0  ;;  %v4732_v16 = vmax.f32 %v4292_v10, 0.0  ;;  %v3495_v17 = vadd.f32 %v10248_v25, %v3494_v14  ;;  %v4295_v18 = vadd.f32 %v10248_v25, %v4294_v15  ;;  %v3496_v20 = vpop.f32.mrb[119].mxu0  ;;  %v4296_v21 = vpop.f32.mrb[119].mxu1 }
 0x406   : > { %v7817_v19 = vpack.c.bf16 %v4532_v13, %v4532_v13  ;;  %v8017_v22 = vpack.c.bf16 %v4732_v16, %v4732_v16  ;;  %v4533_v23 = vmax.f32 %v3495_v17, 0.0  ;;  %v4733_v24 = vmax.f32 %v4295_v18, 0.0 }
 0x408   : > { %6533 = vst.msk [vmem:[%s8945_s4 + $0x2e8] sm:$0xf] %vm6346_vm0, %v7817_v19  ;;  %6733 = vst.msk [vmem:[%s8945_s4 + $0x608] sm:$0xf] %vm6346_vm0, %v8017_v22  ;;  %v7818_v26 = vpack.c.bf16 %v4533_v23, %v4533_v23  ;;  %v8018_v27 = vpack.c.bf16 %v4733_v24, %v4733_v24 }
 0x409   : > { %v3499_v28 = vpop.f32.mrb[120].mxu0  ;;  %v4299_v29 = vpop.f32.mrb[120].mxu1 }
 0x40a   : > { %6534 = vst.msk [vmem:[%s8945_s4 + $0x2ec] sm:$0xf] %vm6346_vm0, %v7818_v26  ;;  %6734 = vst.msk [vmem:[%s8945_s4 + $0x60c] sm:$0xf] %vm6346_vm0, %v8018_v27  ;;  %v3500_v30 = vadd.f32 %v10248_v25, %v3499_v28  ;;  %v4300_v31 = vadd.f32 %v10248_v25, %v4299_v29  ;;  %v3501_v32 = vpop.f32.mrb[121].mxu0  ;;  %v4301_v33 = vpop.f32.mrb[121].mxu1 }
 0x40b   : > { %v3502_v34 = vpop.f32.mrb[122].mxu0  ;;  %v4302_v35 = vpop.f32.mrb[122].mxu1 }
 0x40c   : > { %v4534_v36 = vmax.f32 %v3500_v30, 0.0  ;;  %v4734_v37 = vmax.f32 %v4300_v31, 0.0  ;;  %v3503_v38 = vadd.f32 %v10248_v25, %v3502_v34  ;;  %v4303_v39 = vadd.f32 %v10248_v25, %v4302_v35  ;;  %v3504_v40 = vpop.f32.mrb[123].mxu0  ;;  %v4304_v41 = vpop.f32.mrb[123].mxu1 }
 0x40e   : > { %v7819_v42 = vpack.c.bf16 %v4534_v36, %v4534_v36  ;;  %v8019_v43 = vpack.c.bf16 %v4734_v37, %v4734_v37  ;;  %v4535_v44 = vmax.f32 %v3503_v38, 0.0  ;;  %v4735_v45 = vmax.f32 %v4303_v39, 0.0 }
 0x410   : > { %6535 = vst.msk [vmem:[%s8945_s4 + $0x2f0] sm:$0xf] %vm6346_vm0, %v7819_v42  ;;  %6735 = vst.msk [vmem:[%s8945_s4 + $0x610] sm:$0xf] %vm6346_vm0, %v8019_v43  ;;  %v7820_v46 = vpack.c.bf16 %v4535_v44, %v4535_v44  ;;  %v8020_v47 = vpack.c.bf16 %v4735_v45, %v4735_v45 }
 0x411   : > { %v3507_v48 = vpop.f32.mrb[124].mxu0  ;;  %v4307_v49 = vpop.f32.mrb[124].mxu1 }
 0x412   : > { %6536 = vst.msk [vmem:[%s8945_s4 + $0x2f4] sm:$0xf] %vm6346_vm0, %v7820_v46  ;;  %6736 = vst.msk [vmem:[%s8945_s4 + $0x614] sm:$0xf] %vm6346_vm0, %v8020_v47  ;;  %v3508_v50 = vadd.f32 %v10248_v25, %v3507_v48  ;;  %v4308_v51 = vadd.f32 %v10248_v25, %v4307_v49  ;;  %v3509_v52 = vpop.f32.mrb[125].mxu0  ;;  %v4309_v53 = vpop.f32.mrb[125].mxu1 }
 0x413   : > { %v3510_v54 = vpop.f32.mrb[126].mxu0  ;;  %v4310_v55 = vpop.f32.mrb[126].mxu1 }
 0x414   : > { %v4536_v56 = vmax.f32 %v3508_v50, 0.0  ;;  %v4736_v57 = vmax.f32 %v4308_v51, 0.0  ;;  %v3511_v58 = vadd.f32 %v10248_v25, %v3510_v54  ;;  %v4311_v59 = vadd.f32 %v10248_v25, %v4310_v55  ;;  %v3512_v60 = vpop.f32.mrb[127].mxu0  ;;  %v4312_v61 = vpop.f32.mrb[127].mxu1 }
 0x416   : > { %v7821_v62 = vpack.c.bf16 %v4536_v56, %v4536_v56  ;;  %v8021_v0 = vpack.c.bf16 %v4736_v57, %v4736_v57  ;;  %v4537_v1 = vmax.f32 %v3511_v58, 0.0  ;;  %v4737_v2 = vmax.f32 %v4311_v59, 0.0 }
 0x418   : > { %6537 = vst.msk [vmem:[%s8945_s4 + $0x2f8] sm:$0xf] %vm6346_vm0, %v7821_v62  ;;  %6737 = vst.msk [vmem:[%s8945_s4 + $0x618] sm:$0xf] %vm6346_vm0, %v8021_v0  ;;  %v7822_v3 = vpack.c.bf16 %v4537_v1, %v4537_v1  ;;  %v8022_v63 = vpack.c.bf16 %v4737_v2, %v4737_v2 }
 0x419   : > { %v3515_v4 = vpop.f32.mrb[128].mxu0  ;;  %v4315_v5 = vpop.f32.mrb[128].mxu1 }
 0x41a   : > { %6538 = vst.msk [vmem:[%s8945_s4 + $0x2fc] sm:$0xf] %vm6346_vm0, %v7822_v3  ;;  %6738 = vst.msk [vmem:[%s8945_s4 + $0x61c] sm:$0xf] %vm6346_vm0, %v8022_v63  ;;  %v3516_v6 = vadd.f32 %v10248_v25, %v3515_v4  ;;  %v4316_v8 = vadd.f32 %v10248_v25, %v4315_v5  ;;  %v3517_v9 = vpop.f32.mrb[129].mxu0  ;;  %v4317_v7 = vpop.f32.mrb[129].mxu1 }
 0x41b   : > { %v3518_v10 = vpop.f32.mrb[130].mxu0  ;;  %v4318_v11 = vpop.f32.mrb[130].mxu1 }
 0x41c   : > { %v4538_v12 = vmax.f32 %v3516_v6, 0.0  ;;  %v4738_v14 = vmax.f32 %v4316_v8, 0.0  ;;  %v3519_v15 = vadd.f32 %v10248_v25, %v3518_v10  ;;  %v4319_v13 = vadd.f32 %v10248_v25, %v4318_v11  ;;  %v3520_v16 = vpop.f32.mrb[131].mxu0  ;;  %v4320_v17 = vpop.f32.mrb[131].mxu1 }
 0x41e   : > { %v7823_v18 = vpack.c.bf16 %v4538_v12, %v4538_v12  ;;  %v8023_v20 = vpack.c.bf16 %v4738_v14, %v4738_v14  ;;  %v4539_v21 = vmax.f32 %v3519_v15, 0.0  ;;  %v4739_v19 = vmax.f32 %v4319_v13, 0.0 }
 0x420   : > { %6539 = vst.msk [vmem:[%s8945_s4 + $0x300] sm:$0xf] %vm6346_vm0, %v7823_v18  ;;  %6739 = vst.msk [vmem:[%s8945_s4 + $0x620] sm:$0xf] %vm6346_vm0, %v8023_v20  ;;  %v7824_v22 = vpack.c.bf16 %v4539_v21, %v4539_v21  ;;  %v8024_v23 = vpack.c.bf16 %v4739_v19, %v4739_v19 }
 0x421   : > { %v3523_v24 = vpop.f32.mrb[132].mxu0  ;;  %v4323_v26 = vpop.f32.mrb[132].mxu1 }
 0x422   : > { %6540 = vst.msk [vmem:[%s8945_s4 + $0x304] sm:$0xf] %vm6346_vm0, %v7824_v22  ;;  %6740 = vst.msk [vmem:[%s8945_s4 + $0x624] sm:$0xf] %vm6346_vm0, %v8024_v23  ;;  %v3524_v27 = vadd.f32 %v10248_v25, %v3523_v24  ;;  %v4324_v28 = vadd.f32 %v10248_v25, %v4323_v26  ;;  %v3525_v29 = vpop.f32.mrb[133].mxu0  ;;  %v4325_v30 = vpop.f32.mrb[133].mxu1 }
 0x423   : > { %v3526_v31 = vpop.f32.mrb[134].mxu0  ;;  %v4326_v32 = vpop.f32.mrb[134].mxu1 }
 0x424   : > { %v4540_v33 = vmax.f32 %v3524_v27, 0.0  ;;  %v4740_v34 = vmax.f32 %v4324_v28, 0.0  ;;  %v3527_v35 = vadd.f32 %v10248_v25, %v3526_v31  ;;  %v4327_v36 = vadd.f32 %v10248_v25, %v4326_v32  ;;  %v3528_v37 = vpop.f32.mrb[135].mxu0  ;;  %v4328_v38 = vpop.f32.mrb[135].mxu1 }
 0x426   : > { %v7825_v39 = vpack.c.bf16 %v4540_v33, %v4540_v33  ;;  %v8025_v40 = vpack.c.bf16 %v4740_v34, %v4740_v34  ;;  %v4541_v41 = vmax.f32 %v3527_v35, 0.0  ;;  %v4741_v42 = vmax.f32 %v4327_v36, 0.0 }
 0x428   : > { %6541 = vst.msk [vmem:[%s8945_s4 + $0x308] sm:$0xf] %vm6346_vm0, %v7825_v39  ;;  %6741 = vst.msk [vmem:[%s8945_s4 + $0x628] sm:$0xf] %vm6346_vm0, %v8025_v40  ;;  %v7826_v43 = vpack.c.bf16 %v4541_v41, %v4541_v41  ;;  %v8026_v44 = vpack.c.bf16 %v4741_v42, %v4741_v42 }
 0x429   : > { %v3531_v45 = vpop.f32.mrb[136].mxu0  ;;  %v4331_v46 = vpop.f32.mrb[136].mxu1 }
 0x42a   : > { %6542 = vst.msk [vmem:[%s8945_s4 + $0x30c] sm:$0xf] %vm6346_vm0, %v7826_v43  ;;  %6742 = vst.msk [vmem:[%s8945_s4 + $0x62c] sm:$0xf] %vm6346_vm0, %v8026_v44  ;;  %v3532_v47 = vadd.f32 %v10248_v25, %v3531_v45  ;;  %v4332_v48 = vadd.f32 %v10248_v25, %v4331_v46  ;;  %v3533_v49 = vpop.f32.mrb[137].mxu0  ;;  %v4333_v50 = vpop.f32.mrb[137].mxu1 }
 0x42b   : > { %v3534_v51 = vpop.f32.mrb[138].mxu0  ;;  %v4334_v52 = vpop.f32.mrb[138].mxu1 }
 0x42c   : > { %v4542_v53 = vmax.f32 %v3532_v47, 0.0  ;;  %v4742_v54 = vmax.f32 %v4332_v48, 0.0  ;;  %v3535_v55 = vadd.f32 %v10248_v25, %v3534_v51  ;;  %v4335_v56 = vadd.f32 %v10248_v25, %v4334_v52  ;;  %v3536_v57 = vpop.f32.mrb[139].mxu0  ;;  %v4336_v58 = vpop.f32.mrb[139].mxu1 }
 0x42e   : > { %v7827_v59 = vpack.c.bf16 %v4542_v53, %v4542_v53  ;;  %v8027_v60 = vpack.c.bf16 %v4742_v54, %v4742_v54  ;;  %v4543_v61 = vmax.f32 %v3535_v55, 0.0  ;;  %v4743_v62 = vmax.f32 %v4335_v56, 0.0 }
 0x430   : > { %6543 = vst.msk [vmem:[%s8945_s4 + $0x310] sm:$0xf] %vm6346_vm0, %v7827_v59  ;;  %6743 = vst.msk [vmem:[%s8945_s4 + $0x630] sm:$0xf] %vm6346_vm0, %v8027_v60  ;;  %v7828_v0 = vpack.c.bf16 %v4543_v61, %v4543_v61  ;;  %v8028_v1 = vpack.c.bf16 %v4743_v62, %v4743_v62 }
 0x431   : > { %v3539_v2 = vpop.f32.mrb[140].mxu0  ;;  %v4339_v3 = vpop.f32.mrb[140].mxu1 }
 0x432   : > { %6544 = vst.msk [vmem:[%s8945_s4 + $0x314] sm:$0xf] %vm6346_vm0, %v7828_v0  ;;  %6744 = vst.msk [vmem:[%s8945_s4 + $0x634] sm:$0xf] %vm6346_vm0, %v8028_v1  ;;  %v3540_v63 = vadd.f32 %v10248_v25, %v3539_v2  ;;  %v4340_v4 = vadd.f32 %v10248_v25, %v4339_v3  ;;  %v3541_v5 = vpop.f32.mrb[141].mxu0  ;;  %v4341_v6 = vpop.f32.mrb[141].mxu1 }
 0x433   : > { %v3542_v8 = vpop.f32.mrb[142].mxu0  ;;  %v4342_v9 = vpop.f32.mrb[142].mxu1 }
 0x434   : > { %v4544_v7 = vmax.f32 %v3540_v63, 0.0  ;;  %v4744_v10 = vmax.f32 %v4340_v4, 0.0  ;;  %v3543_v11 = vadd.f32 %v10248_v25, %v3542_v8  ;;  %v4343_v12 = vadd.f32 %v10248_v25, %v4342_v9  ;;  %v3544_v14 = vpop.f32.mrb[143].mxu0  ;;  %v4344_v15 = vpop.f32.mrb[143].mxu1 }
 0x436   : > { %v7829_v13 = vpack.c.bf16 %v4544_v7, %v4544_v7  ;;  %v8029_v16 = vpack.c.bf16 %v4744_v10, %v4744_v10  ;;  %v4545_v17 = vmax.f32 %v3543_v11, 0.0  ;;  %v4745_v18 = vmax.f32 %v4343_v12, 0.0 }
 0x438   : > { %6545 = vst.msk [vmem:[%s8945_s4 + $0x318] sm:$0xf] %vm6346_vm0, %v7829_v13  ;;  %6745 = vst.msk [vmem:[%s8945_s4 + $0x638] sm:$0xf] %vm6346_vm0, %v8029_v16  ;;  %v7830_v20 = vpack.c.bf16 %v4545_v17, %v4545_v17  ;;  %v8030_v21 = vpack.c.bf16 %v4745_v18, %v4745_v18 }
 0x43a   : > { %6546 = vst.msk [vmem:[%s8945_s4 + $0x31c] sm:$0xf] %vm6346_vm0, %v7830_v20  ;;  %6746 = vst.msk [vmem:[%s8945_s4 + $0x63c] sm:$0xf] %vm6346_vm0, %v8030_v21 }
 0x43b PF: > { %s13_s12 = sadd.s32 1, %s8699_s12  }
 0x43c   : > { %p10_p4 = scmp.ge.s32.totalorder %s13_s12, 4  }
 0x43e   :  { %12 = sbr.rel (!%p10_p4) target bundleno = 1 (0x1), region = 62 }

// kernel: forward.5
= control target key start
LH: loop header
LB: loop body
LE: loop exit
PB: predicated region body
PF: predicated region fallthrough
CT: control target
= control target key end

     0   :  { %s3528_s12 = smov 0   ;;  %s4098_s0 = inlined_call_operand.vmem [shape: bf16[1296,512], index: 0, kind: input, shape index: {}]   ;;  %s4099_s1 = inlined_call_operand.vmem [shape: bf16[512,64], index: 1, kind: input, shape index: {}]   ;;  %s4100_s2 = inlined_call_operand.vmem [shape: f32[1,64], index: 2, kind: input, shape index: {}]   ;;  %s4101_s3 = inlined_call_operand.vmem [shape: bf16[1296,64], index: 3, kind: output, shape index: {}]  }
   0x1 LB: > { %s2681_s13 = sadd.s32 4294967295, %s3505_s12   ;;  %p2685_p0 = scmp.ge.s32.totalorder %s3505_s12, 1  ;;  %s3505_s12 = sphi %s3528_s12, %s13_s12  }
   0x2   : > { %p139_p1 = scmp.lt.s32.totalorder %s3505_s12, 3 }
   0x4   : > { %p140_p2 = pnand %p2685_p0, %p139_p1 }
   0x5   : > { %v3222_v0 = vld [vmem:[%s4099_s1] sm:$0xff] (!%p140_p2)   ;;  %v3507_v1 = vmov (!%p140_p2), 0   ;;  %v3224_v3 = vld [vmem:[%s4099_s1 + $0x8] sm:$0xff] (!%p140_p2)   ;;  %v3226_v5 = vld [vmem:[%s4099_s1 + $0x10] sm:$0xff] (!%p140_p2)   ;;  %s164_s7 = smul.u32 (!%p140_p2), 81, %s2681_s13  ;;  %vm2543_vm0 = vcmask (!%p140_p2), 519168  }
   0x6   : > { %143 = sbr.rel (%p140_p2) target bundleno = 611 (0x263), region = 32  ;;  %1417 = vmatprep.subr.bf16.mxu1 (!%p140_p2), %v3507_v1  ;;  %1777 = vmatprep.subr.bf16.mxu0 (!%p140_p2), %v3507_v1  ;;  %v3223_v2 = vld [vmem:[%s4099_s1 + $0x80] sm:$0xff] (!%p140_p2)   ;;  %v3225_v4 = vld [vmem:[%s4099_s1 + $0x88] sm:$0xff] (!%p140_p2)   ;;  %v3227_v6 = vld [vmem:[%s4099_s1 + $0x90] sm:$0xff] (!%p140_p2)  }
   0x7   : > { %1418 = vmatpush1.bf16.msra.mxu1 (!%p140_p2), %v3222_v0  ;;  %1778 = vmatpush1.bf16.msra.mxu0 (!%p140_p2), %v3223_v2  ;;  %v3228_v7 = vld [vmem:[%s4099_s1 + $0x18] sm:$0xff] (!%p140_p2)   ;;  %v3230_v9 = vld [vmem:[%s4099_s1 + $0x20] sm:$0xff] (!%p140_p2)   ;;  %v3232_v11 = vld [vmem:[%s4099_s1 + $0x28] sm:$0xff] (!%p140_p2)   ;;  %p165_p3 = scmp.lt.s32.totalorder (!%p140_p2), %s164_s7, 161 }
   0x8   : > { %1419 = vmatprep.subr.bf16.mxu1 (!%p140_p2), %v3507_v1  ;;  %1779 = vmatprep.subr.bf16.mxu0 (!%p140_p2), %v3507_v1  ;;  %v3229_v8 = vld [vmem:[%s4099_s1 + $0x98] sm:$0xff] (!%p140_p2)   ;;  %v3231_v10 = vld [vmem:[%s4099_s1 + $0xa0] sm:$0xff] (!%p140_p2)   ;;  %v3233_v12 = vld [vmem:[%s4099_s1 + $0xa8] sm:$0xff] (!%p140_p2)  }
   0x9   : > { %v3234_v13 = vld [vmem:[%s4099_s1 + $0x30] sm:$0xff] (!%p140_p2)   ;;  %v3236_v15 = vld [vmem:[%s4099_s1 + $0x38] sm:$0xff] (!%p140_p2)   ;;  %v3238_v17 = vld [vmem:[%s4099_s1 + $0x40] sm:$0xff] (!%p140_p2)  }
   0xa   : > { %v3235_v14 = vld [vmem:[%s4099_s1 + $0xb0] sm:$0xff] (!%p140_p2)   ;;  %v3237_v16 = vld [vmem:[%s4099_s1 + $0xb8] sm:$0xff] (!%p140_p2)   ;;  %v3239_v18 = vld [vmem:[%s4099_s1 + $0xc0] sm:$0xff] (!%p140_p2)  }
   0xb   : > { %1420 = vmatpush1.bf16.msra.mxu1 (!%p140_p2), %v3224_v3  ;;  %1780 = vmatpush1.bf16.msra.mxu0 (!%p140_p2), %v3225_v4  ;;  %v3240_v20 = vld [vmem:[%s4099_s1 + $0x48] sm:$0xff] (!%p140_p2)   ;;  %v3242_v23 = vld [vmem:[%s4099_s1 + $0x50] sm:$0xff] (!%p140_p2)   ;;  %v3244_v25 = vld [vmem:[%s4099_s1 + $0x58] sm:$0xff] (!%p140_p2)  }
   0xc   : > { %1421 = vmatprep.subr.bf16.mxu1 (!%p140_p2), %v3507_v1  ;;  %1781 = vmatprep.subr.bf16.mxu0 (!%p140_p2), %v3507_v1  ;;  %v3241_v22 = vld [vmem:[%s4099_s1 + $0xc8] sm:$0xff] (!%p140_p2)   ;;  %v3243_v24 = vld [vmem:[%s4099_s1 + $0xd0] sm:$0xff] (!%p140_p2)   ;;  %v3245_v26 = vld [vmem:[%s4099_s1 + $0xd8] sm:$0xff] (!%p140_p2)  }
   0xd   : > { %s4103_s7 = smov (!%p165_p3, %s164_s7), 161  ;;  %v3246_v27 = vld [vmem:[%s4099_s1 + $0x60] sm:$0xff]   ;;  %v3248_v29 = vld [vmem:[%s4099_s1 + $0x68] sm:$0xff]   ;;  %v3250_v31 = vld [vmem:[%s4099_s1 + $0x70] sm:$0xff]  }
   0xe   : > { %s2969_s21 = sshll.u32 %s4103_s7, 4  ;;  %v3247_v28 = vld [vmem:[%s4099_s1 + $0xe0] sm:$0xff]   ;;  %v3249_v30 = vld [vmem:[%s4099_s1 + $0xe8] sm:$0xff]   ;;  %v3251_v32 = vld [vmem:[%s4099_s1 + $0xf0] sm:$0xff]   ;;  %s2688_s9 = sshll.u32 %s4103_s7, 2 }
   0xf   : > { %1422 = vmatpush1.bf16.msra.mxu1 %v3226_v5  ;;  %1782 = vmatpush1.bf16.msra.mxu0 %v3227_v6  ;;  %s3611_s26 = scalar_lea.vmem %s4098_s0, %s2969_s21  ;;  %v3252_v33 = vld [vmem:[%s4099_s1 + $0x78] sm:$0xff]   ;;  %s3799_s14 = scalar_lea.vmem %s4101_s3, %s2688_s9 }
  0x10   : > { %1423 = vmatprep.subr.bf16.mxu1 %v3507_v1  ;;  %1783 = vmatprep.subr.bf16.mxu0 %v3507_v1  ;;  %v3256_v19 = vld [vmem:[%s3611_s26 + $0x4] ss:$16 sps:$4 sm:$0xff]   ;;  %v3259_v21 = vld [vmem:[%s3611_s26 + $0xc] ss:$16 sps:$4 sm:$0xff]   ;;  %v3254_v35 = vld [vmem:[%s3611_s26] ss:$16 sps:$4 sm:$0xff]  }
  0x11   : > { %1449 = vmatprep.mubr.bf16.mxu1 %v3256_v19  ;;  %1809 = vmatprep.mubr.bf16.mxu0 %v3259_v21  ;;  %v3253_v34 = vld [vmem:[%s4099_s1 + $0xf8] sm:$0xff]   ;;  %v3260_v37 = vld [vmem:[%s3611_s26 + $0x24] ss:$16 sps:$4 sm:$0xff]   ;;  %v3264_v39 = vld [vmem:[%s3611_s26 + $0x20] ss:$16 sps:$4 sm:$0xff]  }
  0x12   : > { %v3257_v36 = vld [vmem:[%s3611_s26 + $0x8] ss:$16 sps:$4 sm:$0xff]   ;;  %v3262_v38 = vld [vmem:[%s3611_s26 + $0x2c] ss:$16 sps:$4 sm:$0xff]   ;;  %v3266_v41 = vld [vmem:[%s3611_s26 + $0x44] ss:$16 sps:$4 sm:$0xff]  }
  0x13   : > { %1424 = vmatpush1.bf16.msra.mxu1 %v3228_v7  ;;  %1784 = vmatpush1.bf16.msra.mxu0 %v3229_v8  ;;  %v3265_v40 = vld [vmem:[%s3611_s26 + $0x28] ss:$16 sps:$4 sm:$0xff]   ;;  %v3268_v42 = vld [vmem:[%s3611_s26 + $0x4c] ss:$16 sps:$4 sm:$0xff]   ;;  %v3270_v43 = vld [vmem:[%s3611_s26 + $0x40] ss:$16 sps:$4 sm:$0xff]  }
  0x14   : > { %1425 = vmatprep.subr.bf16.mxu1 %v3507_v1  ;;  %1785 = vmatprep.subr.bf16.mxu0 %v3507_v1  ;;  %v3271_v44 = vld [vmem:[%s3611_s26 + $0x48] ss:$16 sps:$4 sm:$0xff]   ;;  %v3272_v45 = vld [vmem:[%s3611_s26 + $0x64] ss:$16 sps:$4 sm:$0xff]   ;;  %v3274_v46 = vld [vmem:[%s3611_s26 + $0x6c] ss:$16 sps:$4 sm:$0xff]  }
  0x15   : > { %v3276_v47 = vld [vmem:[%s3611_s26 + $0x60] ss:$16 sps:$4 sm:$0xff]   ;;  %v3277_v48 = vld [vmem:[%s3611_s26 + $0x68] ss:$16 sps:$4 sm:$0xff]   ;;  %v3278_v49 = vld [vmem:[%s3611_s26 + $0x84] ss:$16 sps:$4 sm:$0xff]  }
  0x16   : > { %v3280_v50 = vld [vmem:[%s3611_s26 + $0x8c] ss:$16 sps:$4 sm:$0xff]   ;;  %v3282_v51 = vld [vmem:[%s3611_s26 + $0x80] ss:$16 sps:$4 sm:$0xff]   ;;  %v3283_v52 = vld [vmem:[%s3611_s26 + $0x88] ss:$16 sps:$4 sm:$0xff]  }
  0x17   : > { %1426 = vmatpush1.bf16.msra.mxu1 %v3230_v9  ;;  %1786 = vmatpush1.bf16.msra.mxu0 %v3231_v10  ;;  %v3284_v53 = vld [vmem:[%s3611_s26 + $0xa4] ss:$16 sps:$4 sm:$0xff]   ;;  %v3286_v54 = vld [vmem:[%s3611_s26 + $0xac] ss:$16 sps:$4 sm:$0xff]   ;;  %v3288_v55 = vld [vmem:[%s3611_s26 + $0xa0] ss:$16 sps:$4 sm:$0xff]  }
  0x18   : > { %1427 = vmatprep.subr.bf16.mxu1 %v3507_v1  ;;  %1787 = vmatprep.subr.bf16.mxu0 %v3507_v1  ;;  %v3289_v56 = vld [vmem:[%s3611_s26 + $0xa8] ss:$16 sps:$4 sm:$0xff]   ;;  %v3290_v57 = vld [vmem:[%s3611_s26 + $0xc4] ss:$16 sps:$4 sm:$0xff]   ;;  %v3292_v58 = vld [vmem:[%s3611_s26 + $0xcc] ss:$16 sps:$4 sm:$0xff]  }
  0x19   : > { %v3294_v59 = vld [vmem:[%s3611_s26 + $0xc0] ss:$16 sps:$4 sm:$0xff]   ;;  %v3295_v60 = vld [vmem:[%s3611_s26 + $0xc8] ss:$16 sps:$4 sm:$0xff]   ;;  %v3296_v61 = vld [vmem:[%s3611_s26 + $0xe4] ss:$16 sps:$4 sm:$0xff]  }
  0x1a   : > { %v3298_v62 = vld [vmem:[%s3611_s26 + $0xec] ss:$16 sps:$4 sm:$0xff]   ;;  %v3300_v63 = vld [vmem:[%s3611_s26 + $0xe0] ss:$16 sps:$4 sm:$0xff]   ;;  %v3301_v0 = vld [vmem:[%s3611_s26 + $0xe8] ss:$16 sps:$4 sm:$0xff]  }
  0x1b   : > { %1428 = vmatpush1.bf16.msra.mxu1 %v3232_v11  ;;  %1788 = vmatpush1.bf16.msra.mxu0 %v3233_v12  ;;  %v3304_v2 = vld [vmem:[%s3611_s26 + $0x10c] ss:$16 sps:$4 sm:$0xff]   ;;  %v3306_v3 = vld [vmem:[%s3611_s26 + $0x100] ss:$16 sps:$4 sm:$0xff]   ;;  %v3307_v4 = vld [vmem:[%s3611_s26 + $0x108] ss:$16 sps:$4 sm:$0xff]  }
  0x1c   : > { %1429 = vmatprep.subr.bf16.mxu1 %v3507_v1  ;;  %1789 = vmatprep.subr.bf16.mxu0 %v3507_v1  ;;  %v3308_v5 = vld [vmem:[%s3611_s26 + $0x124] ss:$16 sps:$4 sm:$0xff]   ;;  %v3310_v6 = vld [vmem:[%s3611_s26 + $0x12c] ss:$16 sps:$4 sm:$0xff]   ;;  %v3312_v7 = vld [vmem:[%s3611_s26 + $0x120] ss:$16 sps:$4 sm:$0xff]  }
  0x1d   : > { %v3313_v8 = vld [vmem:[%s3611_s26 + $0x128] ss:$16 sps:$4 sm:$0xff]   ;;  %v3314_v9 = vld [vmem:[%s3611_s26 + $0x144] ss:$16 sps:$4 sm:$0xff]   ;;  %v3316_v10 = vld [vmem:[%s3611_s26 + $0x14c] ss:$16 sps:$4 sm:$0xff]  }
  0x1e   : > { %v3318_v11 = vld [vmem:[%s3611_s26 + $0x140] ss:$16 sps:$4 sm:$0xff]   ;;  %v3319_v12 = vld [vmem:[%s3611_s26 + $0x148] ss:$16 sps:$4 sm:$0xff]   ;;  %v3332_v21 = vld [vmem:[%s3611_s26 + $0x1a4] ss:$16 sps:$4 sm:$0xff]  }
  0x1f   : > { %1430 = vmatpush1.bf16.msra.mxu1 %v3234_v13  ;;  %1790 = vmatpush1.bf16.msra.mxu0 %v3235_v14  ;;  %v3320_v13 = vld [vmem:[%s3611_s26 + $0x164] ss:$16 sps:$4 sm:$0xff]   ;;  %v3322_v14 = vld [vmem:[%s3611_s26 + $0x16c] ss:$16 sps:$4 sm:$0xff]   ;;  %v3330_v19 = vld [vmem:[%s3611_s26 + $0x180] ss:$16 sps:$4 sm:$0xff]  }
  0x20   : > { %1431 = vmatprep.subr.bf16.mxu1 %v3507_v1  ;;  %1791 = vmatprep.subr.bf16.mxu0 %v3507_v1 }
  0x23   : > { %1432 = vmatpush1.bf16.msra.mxu1 %v3236_v15  ;;  %1792 = vmatpush1.bf16.msra.mxu0 %v3237_v16  ;;  %v3324_v15 = vld [vmem:[%s3611_s26 + $0x160] ss:$16 sps:$4 sm:$0xff]   ;;  %v3325_v16 = vld [vmem:[%s3611_s26 + $0x168] ss:$16 sps:$4 sm:$0xff]  }
  0x24   : > { %1433 = vmatprep.subr.bf16.mxu1 %v3507_v1  ;;  %1793 = vmatprep.subr.bf16.mxu0 %v3507_v1 }
  0x27   : > { %1434 = vmatpush1.bf16.msra.mxu1 %v3238_v17  ;;  %1794 = vmatpush1.bf16.msra.mxu0 %v3239_v18  ;;  %v3326_v17 = vld [vmem:[%s3611_s26 + $0x184] ss:$16 sps:$4 sm:$0xff]   ;;  %v3328_v18 = vld [vmem:[%s3611_s26 + $0x18c] ss:$16 sps:$4 sm:$0xff]  }
  0x28   : > { %1435 = vmatprep.subr.bf16.mxu1 %v3507_v1  ;;  %1795 = vmatprep.subr.bf16.mxu0 %v3507_v1 }
  0x2b   : > { %1436 = vmatpush1.bf16.msra.mxu1 %v3240_v20  ;;  %1796 = vmatpush1.bf16.msra.mxu0 %v3241_v22  ;;  %v3331_v20 = vld [vmem:[%s3611_s26 + $0x188] ss:$16 sps:$4 sm:$0xff]   ;;  %v3334_v22 = vld [vmem:[%s3611_s26 + $0x1ac] ss:$16 sps:$4 sm:$0xff]  }
  0x2c   : > { %1437 = vmatprep.subr.bf16.mxu1 %v3507_v1  ;;  %1797 = vmatprep.subr.bf16.mxu0 %v3507_v1 }
  0x2f   : > { %1438 = vmatpush1.bf16.msra.mxu1 %v3242_v23  ;;  %1798 = vmatpush1.bf16.msra.mxu0 %v3243_v24  ;;  %v3336_v23 = vld [vmem:[%s3611_s26 + $0x1a0] ss:$16 sps:$4 sm:$0xff]   ;;  %v3337_v24 = vld [vmem:[%s3611_s26 + $0x1a8] ss:$16 sps:$4 sm:$0xff]  }
  0x30   : > { %1439 = vmatprep.subr.bf16.mxu1 %v3507_v1  ;;  %1799 = vmatprep.subr.bf16.mxu0 %v3507_v1 }
  0x33   : > { %1440 = vmatpush1.bf16.msra.mxu1 %v3244_v25  ;;  %1800 = vmatpush1.bf16.msra.mxu0 %v3245_v26  ;;  %v3338_v25 = vld [vmem:[%s3611_s26 + $0x1c4] ss:$16 sps:$4 sm:$0xff]   ;;  %v3340_v26 = vld [vmem:[%s3611_s26 + $0x1cc] ss:$16 sps:$4 sm:$0xff]  }
  0x34   : > { %1441 = vmatprep.subr.bf16.mxu1 %v3507_v1  ;;  %1801 = vmatprep.subr.bf16.mxu0 %v3507_v1 }
  0x37   : > { %1442 = vmatpush1.bf16.msra.mxu1 %v3246_v27  ;;  %1802 = vmatpush1.bf16.msra.mxu0 %v3247_v28  ;;  %v3342_v27 = vld [vmem:[%s3611_s26 + $0x1c0] ss:$16 sps:$4 sm:$0xff]   ;;  %v3343_v28 = vld [vmem:[%s3611_s26 + $0x1c8] ss:$16 sps:$4 sm:$0xff]  }
  0x38   : > { %1443 = vmatprep.subr.bf16.mxu1 %v3507_v1  ;;  %1803 = vmatprep.subr.bf16.mxu0 %v3507_v1 }
  0x3b   : > { %1444 = vmatpush1.bf16.msra.mxu1 %v3248_v29  ;;  %1804 = vmatpush1.bf16.msra.mxu0 %v3249_v30  ;;  %v3344_v29 = vld [vmem:[%s3611_s26 + $0x1e4] ss:$16 sps:$4 sm:$0xff]   ;;  %v3346_v30 = vld [vmem:[%s3611_s26 + $0x1ec] ss:$16 sps:$4 sm:$0xff]  }
  0x3c   : > { %1445 = vmatprep.subr.bf16.mxu1 %v3507_v1  ;;  %1805 = vmatprep.subr.bf16.mxu0 %v3507_v1 }
  0x3f   : > { %1446 = vmatpush1.bf16.msra.mxu1 %v3250_v31  ;;  %1806 = vmatpush1.bf16.msra.mxu0 %v3251_v32  ;;  %v3348_v31 = vld [vmem:[%s3611_s26 + $0x1e0] ss:$16 sps:$4 sm:$0xff]   ;;  %v3349_v32 = vld [vmem:[%s3611_s26 + $0x1e8] ss:$16 sps:$4 sm:$0xff]  }
  0x40   : > { %1447 = vmatprep.subr.bf16.mxu1 %v3507_v1  ;;  %1807 = vmatprep.subr.bf16.mxu0 %v3507_v1  ;;  %v3302_v1 = vld [vmem:[%s3611_s26 + $0x104] ss:$16 sps:$4 sm:$0xff]  }
  0x43   : > { %1448 = vmatpush1.bf16.msra.mxu1 %v3252_v33  ;;  %1808 = vmatpush1.bf16.msra.mxu0 %v3253_v34  ;;  %v3350_v33 = vld [vmem:[%s3611_s26 + $0x204] ss:$16 sps:$4 sm:$0xff]   ;;  %v3352_v34 = vld [vmem:[%s3611_s26 + $0x20c] ss:$16 sps:$4 sm:$0xff]  }
  0x46   : > { %1450 = vmatmul.mubr.bf16.vlgmr.msra.gmra.mrb[0].mxu1 %v3254_v35  ;;  %1810 = vmatmul.mubr.bf16.vlgmr.msra.gmra.mrb[0].mxu0 %v3257_v36  ;;  %v3354_v35 = vld [vmem:[%s3611_s26 + $0x200] ss:$16 sps:$4 sm:$0xff]   ;;  %v3355_v36 = vld [vmem:[%s3611_s26 + $0x208] ss:$16 sps:$4 sm:$0xff]  }
  0x47   : > { %1457 = vmatprep.mubr.bf16.mxu1 %v3260_v37  ;;  %1817 = vmatprep.mubr.bf16.mxu0 %v3262_v38  ;;  %v3356_v37 = vld [vmem:[%s3611_s26 + $0x224] ss:$16 sps:$4 sm:$0xff]   ;;  %v3358_v38 = vld [vmem:[%s3611_s26 + $0x22c] ss:$16 sps:$4 sm:$0xff]  }
  0x4e   : > { %1458 = vmatmul.mubr.bf16.gmra.mrb[4].mxu1 %v3264_v39  ;;  %1818 = vmatmul.mubr.bf16.gmra.mrb[4].mxu0 %v3265_v40  ;;  %v3360_v39 = vld [vmem:[%s3611_s26 + $0x220] ss:$16 sps:$4 sm:$0xff]   ;;  %v3361_v40 = vld [vmem:[%s3611_s26 + $0x228] ss:$16 sps:$4 sm:$0xff]  }
  0x4f   : > { %1465 = vmatprep.mubr.bf16.mxu1 %v3266_v41  ;;  %1825 = vmatprep.mubr.bf16.mxu0 %v3268_v42  ;;  %v3362_v41 = vld [vmem:[%s3611_s26 + $0x244] ss:$16 sps:$4 sm:$0xff]   ;;  %v3364_v42 = vld [vmem:[%s3611_s26 + $0x24c] ss:$16 sps:$4 sm:$0xff]  }
  0x56   : > { %1466 = vmatmul.mubr.bf16.gmra.mrb[8].mxu1 %v3270_v43  ;;  %1826 = vmatmul.mubr.bf16.gmra.mrb[8].mxu0 %v3271_v44  ;;  %v3366_v43 = vld [vmem:[%s3611_s26 + $0x240] ss:$16 sps:$4 sm:$0xff]   ;;  %v3367_v44 = vld [vmem:[%s3611_s26 + $0x248] ss:$16 sps:$4 sm:$0xff]  }
  0x57   : > { %1473 = vmatprep.mubr.bf16.mxu1 %v3272_v45  ;;  %1833 = vmatprep.mubr.bf16.mxu0 %v3274_v46  ;;  %v3368_v45 = vld [vmem:[%s3611_s26 + $0x264] ss:$16 sps:$4 sm:$0xff]   ;;  %v3370_v46 = vld [vmem:[%s3611_s26 + $0x26c] ss:$16 sps:$4 sm:$0xff]  }
  0x5e   : > { %1474 = vmatmul.mubr.bf16.gmra.mrb[12].mxu1 %v3276_v47  ;;  %1834 = vmatmul.mubr.bf16.gmra.mrb[12].mxu0 %v3277_v48  ;;  %v3372_v47 = vld [vmem:[%s3611_s26 + $0x260] ss:$16 sps:$4 sm:$0xff]   ;;  %v3373_v48 = vld [vmem:[%s3611_s26 + $0x268] ss:$16 sps:$4 sm:$0xff]  }
  0x5f   : > { %1481 = vmatprep.mubr.bf16.mxu1 %v3278_v49  ;;  %1841 = vmatprep.mubr.bf16.mxu0 %v3280_v50  ;;  %v3374_v49 = vld [vmem:[%s3611_s26 + $0x284] ss:$16 sps:$4 sm:$0xff]   ;;  %v3376_v50 = vld [vmem:[%s3611_s26 + $0x28c] ss:$16 sps:$4 sm:$0xff]  }
  0x66   : > { %1482 = vmatmul.mubr.bf16.gmra.mrb[16].mxu1 %v3282_v51  ;;  %1842 = vmatmul.mubr.bf16.gmra.mrb[16].mxu0 %v3283_v52  ;;  %v3378_v51 = vld [vmem:[%s3611_s26 + $0x280] ss:$16 sps:$4 sm:$0xff]   ;;  %v3379_v52 = vld [vmem:[%s3611_s26 + $0x288] ss:$16 sps:$4 sm:$0xff]  }
  0x67   : > { %1489 = vmatprep.mubr.bf16.mxu1 %v3284_v53  ;;  %1849 = vmatprep.mubr.bf16.mxu0 %v3286_v54  ;;  %v3380_v53 = vld [vmem:[%s3611_s26 + $0x2a4] ss:$16 sps:$4 sm:$0xff]   ;;  %v3382_v54 = vld [vmem:[%s3611_s26 + $0x2ac] ss:$16 sps:$4 sm:$0xff]  }
  0x6e   : > { %1490 = vmatmul.mubr.bf16.gmra.mrb[20].mxu1 %v3288_v55  ;;  %1850 = vmatmul.mubr.bf16.gmra.mrb[20].mxu0 %v3289_v56  ;;  %v3384_v55 = vld [vmem:[%s3611_s26 + $0x2a0] ss:$16 sps:$4 sm:$0xff]   ;;  %v3385_v56 = vld [vmem:[%s3611_s26 + $0x2a8] ss:$16 sps:$4 sm:$0xff]  }
  0x6f   : > { %1497 = vmatprep.mubr.bf16.mxu1 %v3290_v57  ;;  %1857 = vmatprep.mubr.bf16.mxu0 %v3292_v58  ;;  %v3386_v57 = vld [vmem:[%s3611_s26 + $0x2c4] ss:$16 sps:$4 sm:$0xff]   ;;  %v3388_v58 = vld [vmem:[%s3611_s26 + $0x2cc] ss:$16 sps:$4 sm:$0xff]  }
  0x76   : > { %1498 = vmatmul.mubr.bf16.gmra.mrb[24].mxu1 %v3294_v59  ;;  %1858 = vmatmul.mubr.bf16.gmra.mrb[24].mxu0 %v3295_v60  ;;  %v3390_v59 = vld [vmem:[%s3611_s26 + $0x2c0] ss:$16 sps:$4 sm:$0xff]   ;;  %v3391_v60 = vld [vmem:[%s3611_s26 + $0x2c8] ss:$16 sps:$4 sm:$0xff]  }
  0x77   : > { %1505 = vmatprep.mubr.bf16.mxu1 %v3296_v61  ;;  %1865 = vmatprep.mubr.bf16.mxu0 %v3298_v62  ;;  %v3392_v61 = vld [vmem:[%s3611_s26 + $0x2e4] ss:$16 sps:$4 sm:$0xff]   ;;  %v3394_v62 = vld [vmem:[%s3611_s26 + $0x2ec] ss:$16 sps:$4 sm:$0xff]  }
  0x7e   : > { %1506 = vmatmul.mubr.bf16.gmra.mrb[28].mxu1 %v3300_v63  ;;  %1866 = vmatmul.mubr.bf16.gmra.mrb[28].mxu0 %v3301_v0  ;;  %v3396_v63 = vld [vmem:[%s3611_s26 + $0x2e0] ss:$16 sps:$4 sm:$0xff]   ;;  %v3397_v0 = vld [vmem:[%s3611_s26 + $0x2e8] ss:$16 sps:$4 sm:$0xff]  }
  0x7f   : > { %1513 = vmatprep.mubr.bf16.mxu1 %v3302_v1  ;;  %1873 = vmatprep.mubr.bf16.mxu0 %v3304_v2  ;;  %v3398_v1 = vld [vmem:[%s3611_s26 + $0x304] ss:$16 sps:$4 sm:$0xff]   ;;  %v3400_v2 = vld [vmem:[%s3611_s26 + $0x30c] ss:$16 sps:$4 sm:$0xff]  }
  0x86   : > { %1514 = vmatmul.mubr.bf16.gmra.mrb[32].mxu1 %v3306_v3  ;;  %1874 = vmatmul.mubr.bf16.gmra.mrb[32].mxu0 %v3307_v4  ;;  %v3402_v3 = vld [vmem:[%s3611_s26 + $0x300] ss:$16 sps:$4 sm:$0xff]   ;;  %v3403_v4 = vld [vmem:[%s3611_s26 + $0x308] ss:$16 sps:$4 sm:$0xff]  }
  0x87   : > { %1521 = vmatprep.mubr.bf16.mxu1 %v3308_v5  ;;  %1881 = vmatprep.mubr.bf16.mxu0 %v3310_v6  ;;  %v3404_v5 = vld [vmem:[%s3611_s26 + $0x324] ss:$16 sps:$4 sm:$0xff]   ;;  %v3406_v6 = vld [vmem:[%s3611_s26 + $0x32c] ss:$16 sps:$4 sm:$0xff]  }
  0x8e   : > { %1522 = vmatmul.mubr.bf16.gmra.mrb[36].mxu1 %v3312_v7  ;;  %1882 = vmatmul.mubr.bf16.gmra.mrb[36].mxu0 %v3313_v8  ;;  %v3408_v7 = vld [vmem:[%s3611_s26 + $0x320] ss:$16 sps:$4 sm:$0xff]   ;;  %v3409_v8 = vld [vmem:[%s3611_s26 + $0x328] ss:$16 sps:$4 sm:$0xff]  }
  0x8f   : > { %1529 = vmatprep.mubr.bf16.mxu1 %v3314_v9  ;;  %1889 = vmatprep.mubr.bf16.mxu0 %v3316_v10  ;;  %v3410_v9 = vld [vmem:[%s3611_s26 + $0x344] ss:$16 sps:$4 sm:$0xff]   ;;  %v3412_v10 = vld [vmem:[%s3611_s26 + $0x34c] ss:$16 sps:$4 sm:$0xff]  }
  0x96   : > { %1530 = vmatmul.mubr.bf16.gmra.mrb[40].mxu1 %v3318_v11  ;;  %1890 = vmatmul.mubr.bf16.gmra.mrb[40].mxu0 %v3319_v12  ;;  %v3414_v11 = vld [vmem:[%s3611_s26 + $0x340] ss:$16 sps:$4 sm:$0xff]   ;;  %v3415_v12 = vld [vmem:[%s3611_s26 + $0x348] ss:$16 sps:$4 sm:$0xff]  }
  0x97   : > { %1537 = vmatprep.mubr.bf16.mxu1 %v3320_v13  ;;  %1897 = vmatprep.mubr.bf16.mxu0 %v3322_v14  ;;  %v3416_v13 = vld [vmem:[%s3611_s26 + $0x364] ss:$16 sps:$4 sm:$0xff]   ;;  %v3418_v14 = vld [vmem:[%s3611_s26 + $0x36c] ss:$16 sps:$4 sm:$0xff]  }
  0x9e   : > { %1538 = vmatmul.mubr.bf16.gmra.mrb[44].mxu1 %v3324_v15  ;;  %1898 = vmatmul.mubr.bf16.gmra.mrb[44].mxu0 %v3325_v16  ;;  %v3787_v15 = vld [vmem:[%s4100_s2] ss:$0 sm:$0xff] }
  0x9f   : > { %1545 = vmatprep.mubr.bf16.mxu1 %v3326_v17  ;;  %1905 = vmatprep.mubr.bf16.mxu0 %v3328_v18 }
  0xa6   : > { %1546 = vmatmul.mubr.bf16.gmra.mrb[48].mxu1 %v3330_v19  ;;  %1906 = vmatmul.mubr.bf16.gmra.mrb[48].mxu0 %v3331_v20  ;;  %v3420_v20 = vld [vmem:[%s3611_s26 + $0x360] ss:$16 sps:$4 sm:$0xff]  }
  0xa7   : > { %1553 = vmatprep.mubr.bf16.mxu1 %v3332_v21  ;;  %1913 = vmatprep.mubr.bf16.mxu0 %v3334_v22 }
  0xae   : > { %1554 = vmatmul.mubr.bf16.gmra.mrb[52].mxu1 %v3336_v23  ;;  %1914 = vmatmul.mubr.bf16.gmra.mrb[52].mxu0 %v3337_v24  ;;  %v3421_v23 = vld [vmem:[%s3611_s26 + $0x368] ss:$16 sps:$4 sm:$0xff]   ;;  %v3422_v24 = vld [vmem:[%s3611_s26 + $0x384] ss:$16 sps:$4 sm:$0xff]  }
  0xaf   : > { %1561 = vmatprep.mubr.bf16.mxu1 %v3338_v25  ;;  %1921 = vmatprep.mubr.bf16.mxu0 %v3340_v26 }
  0xb6   : > { %1562 = vmatmul.mubr.bf16.gmra.mrb[56].mxu1 %v3342_v27  ;;  %1922 = vmatmul.mubr.bf16.gmra.mrb[56].mxu0 %v3343_v28 }
  0xb7   : > { %1569 = vmatprep.mubr.bf16.mxu1 %v3344_v29  ;;  %1929 = vmatprep.mubr.bf16.mxu0 %v3346_v30  ;;  %v3424_v29 = vld [vmem:[%s3611_s26 + $0x38c] ss:$16 sps:$4 sm:$0xff]  }
  0xbe   : > { %1570 = vmatmul.mubr.bf16.gmra.mrb[60].mxu1 %v3348_v31  ;;  %1930 = vmatmul.mubr.bf16.gmra.mrb[60].mxu0 %v3349_v32 }
  0xbf   : > { %1577 = vmatprep.mubr.bf16.mxu1 %v3350_v33  ;;  %1937 = vmatprep.mubr.bf16.mxu0 %v3352_v34 }
  0xc6   : > { %1578 = vmatmul.mubr.bf16.gmra.mrb[64].mxu1 %v3354_v35  ;;  %1938 = vmatmul.mubr.bf16.gmra.mrb[64].mxu0 %v3355_v36 }
  0xc7   : > { %1585 = vmatprep.mubr.bf16.mxu1 %v3356_v37  ;;  %1945 = vmatprep.mubr.bf16.mxu0 %v3358_v38 }
  0xce   : > { %1586 = vmatmul.mubr.bf16.gmra.mrb[68].mxu1 %v3360_v39  ;;  %1946 = vmatmul.mubr.bf16.gmra.mrb[68].mxu0 %v3361_v40  ;;  %v3426_v40 = vld [vmem:[%s3611_s26 + $0x380] ss:$16 sps:$4 sm:$0xff]  }
  0xcf   : > { %1593 = vmatprep.mubr.bf16.mxu1 %v3362_v41  ;;  %1953 = vmatprep.mubr.bf16.mxu0 %v3364_v42 }
  0xd6   : > { %1594 = vmatmul.mubr.bf16.gmra.mrb[72].mxu1 %v3366_v43  ;;  %1954 = vmatmul.mubr.bf16.gmra.mrb[72].mxu0 %v3367_v44  ;;  %v3427_v43 = vld [vmem:[%s3611_s26 + $0x388] ss:$16 sps:$4 sm:$0xff]   ;;  %v3428_v44 = vld [vmem:[%s3611_s26 + $0x3a4] ss:$16 sps:$4 sm:$0xff]  }
  0xd7   : > { %1601 = vmatprep.mubr.bf16.mxu1 %v3368_v45  ;;  %1961 = vmatprep.mubr.bf16.mxu0 %v3370_v46 }
  0xde   : > { %1602 = vmatmul.mubr.bf16.gmra.mrb[76].mxu1 %v3372_v47  ;;  %1962 = vmatmul.mubr.bf16.gmra.mrb[76].mxu0 %v3373_v48 }
  0xdf   : > { %1609 = vmatprep.mubr.bf16.mxu1 %v3374_v49  ;;  %1969 = vmatprep.mubr.bf16.mxu0 %v3376_v50  ;;  %v3430_v49 = vld [vmem:[%s3611_s26 + $0x3ac] ss:$16 sps:$4 sm:$0xff]  }
  0xe6   : > { %1610 = vmatmul.mubr.bf16.gmra.mrb[80].mxu1 %v3378_v51  ;;  %1970 = vmatmul.mubr.bf16.gmra.mrb[80].mxu0 %v3379_v52 }
  0xe7   : > { %1617 = vmatprep.mubr.bf16.mxu1 %v3380_v53  ;;  %1977 = vmatprep.mubr.bf16.mxu0 %v3382_v54 }
  0xee   : > { %1618 = vmatmul.mubr.bf16.gmra.mrb[84].mxu1 %v3384_v55  ;;  %1978 = vmatmul.mubr.bf16.gmra.mrb[84].mxu0 %v3385_v56 }
  0xef   : > { %1625 = vmatprep.mubr.bf16.mxu1 %v3386_v57  ;;  %1985 = vmatprep.mubr.bf16.mxu0 %v3388_v58 }
  0xf6   : > { %1626 = vmatmul.mubr.bf16.gmra.mrb[88].mxu1 %v3390_v59  ;;  %1986 = vmatmul.mubr.bf16.gmra.mrb[88].mxu0 %v3391_v60  ;;  %v3432_v60 = vld [vmem:[%s3611_s26 + $0x3a0] ss:$16 sps:$4 sm:$0xff]  }
  0xf7   : > { %1633 = vmatprep.mubr.bf16.mxu1 %v3392_v61  ;;  %1993 = vmatprep.mubr.bf16.mxu0 %v3394_v62 }
  0xfe   : > { %1634 = vmatmul.mubr.bf16.gmra.mrb[92].mxu1 %v3396_v63  ;;  %1994 = vmatmul.mubr.bf16.gmra.mrb[92].mxu0 %v3397_v0  ;;  %v3433_v63 = vld [vmem:[%s3611_s26 + $0x3a8] ss:$16 sps:$4 sm:$0xff]   ;;  %v3434_v0 = vld [vmem:[%s3611_s26 + $0x3c4] ss:$16 sps:$4 sm:$0xff]  }
  0xff   : > { %1641 = vmatprep.mubr.bf16.mxu1 %v3398_v1  ;;  %2001 = vmatprep.mubr.bf16.mxu0 %v3400_v2 }
 0x106   : > { %1642 = vmatmul.mubr.bf16.gmra.mrb[96].mxu1 %v3402_v3  ;;  %2002 = vmatmul.mubr.bf16.gmra.mrb[96].mxu0 %v3403_v4 }
 0x107   : > { %1649 = vmatprep.mubr.bf16.mxu1 %v3404_v5  ;;  %2009 = vmatprep.mubr.bf16.mxu0 %v3406_v6  ;;  %v3436_v5 = vld [vmem:[%s3611_s26 + $0x3cc] ss:$16 sps:$4 sm:$0xff]  }
 0x10e   : > { %1650 = vmatmul.mubr.bf16.gmra.mrb[100].mxu1 %v3408_v7  ;;  %2010 = vmatmul.mubr.bf16.gmra.mrb[100].mxu0 %v3409_v8 }
 0x10f   : > { %1657 = vmatprep.mubr.bf16.mxu1 %v3410_v9  ;;  %2017 = vmatprep.mubr.bf16.mxu0 %v3412_v10 }
 0x116   : > { %1658 = vmatmul.mubr.bf16.gmra.mrb[104].mxu1 %v3414_v11  ;;  %2018 = vmatmul.mubr.bf16.gmra.mrb[104].mxu0 %v3415_v12 }
 0x117   : > { %1665 = vmatprep.mubr.bf16.mxu1 %v3416_v13  ;;  %2025 = vmatprep.mubr.bf16.mxu0 %v3418_v14 }
 0x119   : > { %v1451_v16 = vpop.f32.mrb[0].mxu1  ;;  %v1811_v18 = vpop.f32.mrb[0].mxu0 }
 0x11a   : > { %v1452_v17 = vadd.f32 %v3787_v15, %v1451_v16  ;;  %v1453_v19 = vpop.f32.mrb[1].mxu1  ;;  %v1813_v21 = vpop.f32.mrb[1].mxu0 }
 0x11b   : > { %v1454_v22 = vpop.f32.mrb[2].mxu1  ;;  %v1814_v27 = vpop.f32.mrb[2].mxu0  ;;  %v3440_v21 = vld [vmem:[%s3611_s26 + $0x3e4] ss:$16 sps:$4 sm:$0xff]  }
 0x11c   : > { %v1812_v25 = vadd.f32 %v1811_v18, %v1452_v17  ;;  %v1455_v26 = vadd.f32 %v3787_v15, %v1454_v22  ;;  %v1456_v28 = vpop.f32.mrb[3].mxu1  ;;  %v1816_v30 = vpop.f32.mrb[3].mxu0  ;;  %v3438_v17 = vld [vmem:[%s3611_s26 + $0x3c0] ss:$16 sps:$4 sm:$0xff]  }
 0x11e   : > { %v2137_v31 = vmax.f32 %v1812_v25, 0.0  ;;  %v1815_v32 = vadd.f32 %v1814_v27, %v1455_v26  ;;  %1666 = vmatmul.mubr.bf16.gmra.mrb[108].mxu1 %v3420_v20  ;;  %2026 = vmatmul.mubr.bf16.gmra.mrb[108].mxu0 %v3421_v23  ;;  %v3439_v20 = vld [vmem:[%s3611_s26 + $0x3c8] ss:$16 sps:$4 sm:$0xff]   ;;  %v3442_v26 = vld [vmem:[%s3611_s26 + $0x3ec] ss:$16 sps:$4 sm:$0xff]  }
 0x11f   : > { %1673 = vmatprep.mubr.bf16.mxu1 %v3422_v24  ;;  %2033 = vmatprep.mubr.bf16.mxu0 %v3424_v29 }
 0x120   : > { %v2970_v33 = vpack.c.bf16 %v2137_v31, %v2137_v31  ;;  %v2138_v34 = vmax.f32 %v1815_v32, 0.0 }
 0x121   : > { %v1459_v35 = vpop.f32.mrb[4].mxu1  ;;  %v1819_v38 = vpop.f32.mrb[4].mxu0 }
 0x122   : > { %2544 = vst.msk [vmem:[%s3799_s14] sm:$0xf] %vm2543_vm0, %v2970_v33  ;;  %v2971_v36 = vpack.c.bf16 %v2138_v34, %v2138_v34  ;;  %v1460_v37 = vadd.f32 %v3787_v15, %v1459_v35  ;;  %v1461_v39 = vpop.f32.mrb[5].mxu1  ;;  %v1821_v41 = vpop.f32.mrb[5].mxu0 }
 0x123   : > { %v1462_v42 = vpop.f32.mrb[6].mxu1  ;;  %v1822_v47 = vpop.f32.mrb[6].mxu0  ;;  %v3446_v41 = vld [vmem:[%s3611_s26 + $0x404] ss:$16 sps:$4 sm:$0xff]  }
 0x124   : > { %2545 = vst.msk [vmem:[%s3799_s14 + $0x4] sm:$0xf] %vm2543_vm0, %v2971_v36  ;;  %v1820_v45 = vadd.f32 %v1819_v38, %v1460_v37  ;;  %v1463_v46 = vadd.f32 %v3787_v15, %v1462_v42  ;;  %v1464_v48 = vpop.f32.mrb[7].mxu1  ;;  %v1824_v50 = vpop.f32.mrb[7].mxu0  ;;  %v3444_v37 = vld [vmem:[%s3611_s26 + $0x3e0] ss:$16 sps:$4 sm:$0xff]  }
 0x126   : > { %v2139_v51 = vmax.f32 %v1820_v45, 0.0  ;;  %v1823_v52 = vadd.f32 %v1822_v47, %v1463_v46  ;;  %1674 = vmatmul.mubr.bf16.gmra.mrb[112].mxu1 %v3426_v40  ;;  %2034 = vmatmul.mubr.bf16.gmra.mrb[112].mxu0 %v3427_v43  ;;  %v3445_v40 = vld [vmem:[%s3611_s26 + $0x3e8] ss:$16 sps:$4 sm:$0xff]   ;;  %v3448_v46 = vld [vmem:[%s3611_s26 + $0x40c] ss:$16 sps:$4 sm:$0xff]  }
 0x127   : > { %1681 = vmatprep.mubr.bf16.mxu1 %v3428_v44  ;;  %2041 = vmatprep.mubr.bf16.mxu0 %v3430_v49 }
 0x128   : > { %v2972_v53 = vpack.c.bf16 %v2139_v51, %v2139_v51  ;;  %v2140_v54 = vmax.f32 %v1823_v52, 0.0 }
 0x129   : > { %v1467_v55 = vpop.f32.mrb[8].mxu1  ;;  %v1827_v58 = vpop.f32.mrb[8].mxu0 }
 0x12a   : > { %2546 = vst.msk [vmem:[%s3799_s14 + $0x8] sm:$0xf] %vm2543_vm0, %v2972_v53  ;;  %v2973_v56 = vpack.c.bf16 %v2140_v54, %v2140_v54  ;;  %v1468_v57 = vadd.f32 %v3787_v15, %v1467_v55  ;;  %v1469_v59 = vpop.f32.mrb[9].mxu1  ;;  %v1829_v61 = vpop.f32.mrb[9].mxu0 }
 0x12b   : > { %v1470_v62 = vpop.f32.mrb[10].mxu1  ;;  %v1830_v3 = vpop.f32.mrb[10].mxu0  ;;  %v3452_v61 = vld [vmem:[%s3611_s26 + $0x424] ss:$16 sps:$4 sm:$0xff]  }
 0x12c   : > { %2547 = vst.msk [vmem:[%s3799_s14 + $0xc] sm:$0xf] %vm2543_vm0, %v2973_v56  ;;  %v1828_v1 = vadd.f32 %v1827_v58, %v1468_v57  ;;  %v1471_v2 = vadd.f32 %v3787_v15, %v1470_v62  ;;  %v1472_v4 = vpop.f32.mrb[11].mxu1  ;;  %v1832_v6 = vpop.f32.mrb[11].mxu0  ;;  %v3450_v57 = vld [vmem:[%s3611_s26 + $0x400] ss:$16 sps:$4 sm:$0xff]  }
 0x12e   : > { %v2141_v7 = vmax.f32 %v1828_v1, 0.0  ;;  %v1831_v8 = vadd.f32 %v1830_v3, %v1471_v2  ;;  %1682 = vmatmul.mubr.bf16.gmra.mrb[116].mxu1 %v3432_v60  ;;  %2042 = vmatmul.mubr.bf16.gmra.mrb[116].mxu0 %v3433_v63  ;;  %v3451_v60 = vld [vmem:[%s3611_s26 + $0x408] ss:$16 sps:$4 sm:$0xff]   ;;  %v3454_v2 = vld [vmem:[%s3611_s26 + $0x42c] ss:$16 sps:$4 sm:$0xff]  }
 0x12f   : > { %1689 = vmatprep.mubr.bf16.mxu1 %v3434_v0  ;;  %2049 = vmatprep.mubr.bf16.mxu0 %v3436_v5 }
 0x130   : > { %v2974_v9 = vpack.c.bf16 %v2141_v7, %v2141_v7  ;;  %v2142_v10 = vmax.f32 %v1831_v8, 0.0 }
 0x131   : > { %v1475_v11 = vpop.f32.mrb[12].mxu1  ;;  %v1835_v14 = vpop.f32.mrb[12].mxu0 }
 0x132   : > { %2548 = vst.msk [vmem:[%s3799_s14 + $0x10] sm:$0xf] %vm2543_vm0, %v2974_v9  ;;  %v2975_v12 = vpack.c.bf16 %v2142_v10, %v2142_v10  ;;  %v1476_v13 = vadd.f32 %v3787_v15, %v1475_v11  ;;  %v1477_v16 = vpop.f32.mrb[13].mxu1  ;;  %v1837_v18 = vpop.f32.mrb[13].mxu0 }
 0x133   : > { %v1478_v19 = vpop.f32.mrb[14].mxu1  ;;  %v1838_v24 = vpop.f32.mrb[14].mxu0  ;;  %v3458_v18 = vld [vmem:[%s3611_s26 + $0x444] ss:$16 sps:$4 sm:$0xff]  }
 0x134   : > { %2549 = vst.msk [vmem:[%s3799_s14 + $0x14] sm:$0xf] %vm2543_vm0, %v2975_v12  ;;  %v1836_v22 = vadd.f32 %v1835_v14, %v1476_v13  ;;  %v1479_v23 = vadd.f32 %v3787_v15, %v1478_v19  ;;  %v1480_v25 = vpop.f32.mrb[15].mxu1  ;;  %v1840_v27 = vpop.f32.mrb[15].mxu0  ;;  %v3456_v13 = vld [vmem:[%s3611_s26 + $0x420] ss:$16 sps:$4 sm:$0xff]  }
 0x136   : > { %v2143_v28 = vmax.f32 %v1836_v22, 0.0  ;;  %v1839_v29 = vadd.f32 %v1838_v24, %v1479_v23  ;;  %1690 = vmatmul.mubr.bf16.gmra.mrb[120].mxu1 %v3438_v17  ;;  %2050 = vmatmul.mubr.bf16.gmra.mrb[120].mxu0 %v3439_v20  ;;  %v3457_v17 = vld [vmem:[%s3611_s26 + $0x428] ss:$16 sps:$4 sm:$0xff]   ;;  %v3460_v23 = vld [vmem:[%s3611_s26 + $0x44c] ss:$16 sps:$4 sm:$0xff]  }
 0x137   : > { %1697 = vmatprep.mubr.bf16.mxu1 %v3440_v21  ;;  %2057 = vmatprep.mubr.bf16.mxu0 %v3442_v26 }
 0x138   : > { %v2976_v30 = vpack.c.bf16 %v2143_v28, %v2143_v28  ;;  %v2144_v31 = vmax.f32 %v1839_v29, 0.0 }
 0x139   : > { %v1483_v32 = vpop.f32.mrb[16].mxu1  ;;  %v1843_v35 = vpop.f32.mrb[16].mxu0 }
 0x13a   : > { %2550 = vst.msk [vmem:[%s3799_s14 + $0x18] sm:$0xf] %vm2543_vm0, %v2976_v30  ;;  %v2977_v33 = vpack.c.bf16 %v2144_v31, %v2144_v31  ;;  %v1484_v34 = vadd.f32 %v3787_v15, %v1483_v32  ;;  %v1485_v36 = vpop.f32.mrb[17].mxu1  ;;  %v1845_v38 = vpop.f32.mrb[17].mxu0 }
 0x13b   : > { %v1486_v39 = vpop.f32.mrb[18].mxu1  ;;  %v1846_v44 = vpop.f32.mrb[18].mxu0  ;;  %v3464_v38 = vld [vmem:[%s3611_s26 + $0x464] ss:$16 sps:$4 sm:$0xff]  }
 0x13c   : > { %2551 = vst.msk [vmem:[%s3799_s14 + $0x1c] sm:$0xf] %vm2543_vm0, %v2977_v33  ;;  %v1844_v42 = vadd.f32 %v1843_v35, %v1484_v34  ;;  %v1487_v43 = vadd.f32 %v3787_v15, %v1486_v39  ;;  %v1488_v45 = vpop.f32.mrb[19].mxu1  ;;  %v1848_v47 = vpop.f32.mrb[19].mxu0  ;;  %v3462_v34 = vld [vmem:[%s3611_s26 + $0x440] ss:$16 sps:$4 sm:$0xff]  }
 0x13e   : > { %v2145_v48 = vmax.f32 %v1844_v42, 0.0  ;;  %v1847_v49 = vadd.f32 %v1846_v44, %v1487_v43  ;;  %1698 = vmatmul.mubr.bf16.gmra.mrb[124].mxu1 %v3444_v37  ;;  %2058 = vmatmul.mubr.bf16.gmra.mrb[124].mxu0 %v3445_v40  ;;  %v3463_v37 = vld [vmem:[%s3611_s26 + $0x448] ss:$16 sps:$4 sm:$0xff]   ;;  %v3466_v43 = vld [vmem:[%s3611_s26 + $0x46c] ss:$16 sps:$4 sm:$0xff]  }
 0x13f   : > { %1705 = vmatprep.mubr.bf16.mxu1 %v3446_v41  ;;  %2065 = vmatprep.mubr.bf16.mxu0 %v3448_v46 }
 0x140   : > { %v2978_v50 = vpack.c.bf16 %v2145_v48, %v2145_v48  ;;  %v2146_v51 = vmax.f32 %v1847_v49, 0.0 }
 0x141   : > { %v1491_v52 = vpop.f32.mrb[20].mxu1  ;;  %v1851_v55 = vpop.f32.mrb[20].mxu0 }
 0x142   : > { %2552 = vst.msk [vmem:[%s3799_s14 + $0x20] sm:$0xf] %vm2543_vm0, %v2978_v50  ;;  %v2979_v53 = vpack.c.bf16 %v2146_v51, %v2146_v51  ;;  %v1492_v54 = vadd.f32 %v3787_v15, %v1491_v52  ;;  %v1493_v56 = vpop.f32.mrb[21].mxu1  ;;  %v1853_v58 = vpop.f32.mrb[21].mxu0 }
 0x143   : > { %v1494_v59 = vpop.f32.mrb[22].mxu1  ;;  %v1854_v0 = vpop.f32.mrb[22].mxu0  ;;  %v3470_v58 = vld [vmem:[%s3611_s26 + $0x484] ss:$16 sps:$4 sm:$0xff]  }
 0x144   : > { %2553 = vst.msk [vmem:[%s3799_s14 + $0x24] sm:$0xf] %vm2543_vm0, %v2979_v53  ;;  %v1852_v62 = vadd.f32 %v1851_v55, %v1492_v54  ;;  %v1495_v63 = vadd.f32 %v3787_v15, %v1494_v59  ;;  %v1496_v1 = vpop.f32.mrb[23].mxu1  ;;  %v1856_v3 = vpop.f32.mrb[23].mxu0  ;;  %v3468_v54 = vld [vmem:[%s3611_s26 + $0x460] ss:$16 sps:$4 sm:$0xff]  }
 0x146   : > { %v2147_v4 = vmax.f32 %v1852_v62, 0.0  ;;  %v1855_v5 = vadd.f32 %v1854_v0, %v1495_v63  ;;  %1706 = vmatmul.mubr.bf16.gmra.mrb[128].mxu1 %v3450_v57  ;;  %2066 = vmatmul.mubr.bf16.gmra.mrb[128].mxu0 %v3451_v60  ;;  %v3469_v57 = vld [vmem:[%s3611_s26 + $0x468] ss:$16 sps:$4 sm:$0xff]   ;;  %v3472_v63 = vld [vmem:[%s3611_s26 + $0x48c] ss:$16 sps:$4 sm:$0xff]  }
 0x147   : > { %1713 = vmatprep.mubr.bf16.mxu1 %v3452_v61  ;;  %2073 = vmatprep.mubr.bf16.mxu0 %v3454_v2 }
 0x148   : > { %v2980_v6 = vpack.c.bf16 %v2147_v4, %v2147_v4  ;;  %v2148_v7 = vmax.f32 %v1855_v5, 0.0 }
 0x149   : > { %v1499_v8 = vpop.f32.mrb[24].mxu1  ;;  %v1859_v11 = vpop.f32.mrb[24].mxu0 }
 0x14a   : > { %2554 = vst.msk [vmem:[%s3799_s14 + $0x28] sm:$0xf] %vm2543_vm0, %v2980_v6  ;;  %v2981_v9 = vpack.c.bf16 %v2148_v7, %v2148_v7  ;;  %v1500_v10 = vadd.f32 %v3787_v15, %v1499_v8  ;;  %v1501_v12 = vpop.f32.mrb[25].mxu1  ;;  %v1861_v14 = vpop.f32.mrb[25].mxu0 }
 0x14b   : > { %v1502_v16 = vpop.f32.mrb[26].mxu1  ;;  %v1862_v21 = vpop.f32.mrb[26].mxu0  ;;  %v3476_v14 = vld [vmem:[%s3611_s26 + $0x4a4] ss:$16 sps:$4 sm:$0xff]  }
 0x14c   : > { %2555 = vst.msk [vmem:[%s3799_s14 + $0x2c] sm:$0xf] %vm2543_vm0, %v2981_v9  ;;  %v1860_v19 = vadd.f32 %v1859_v11, %v1500_v10  ;;  %v1503_v20 = vadd.f32 %v3787_v15, %v1502_v16  ;;  %v1504_v22 = vpop.f32.mrb[27].mxu1  ;;  %v1864_v24 = vpop.f32.mrb[27].mxu0  ;;  %v3474_v10 = vld [vmem:[%s3611_s26 + $0x480] ss:$16 sps:$4 sm:$0xff]  }
 0x14e   : > { %v2149_v25 = vmax.f32 %v1860_v19, 0.0  ;;  %v1863_v26 = vadd.f32 %v1862_v21, %v1503_v20  ;;  %1714 = vmatmul.mubr.bf16.gmra.mrb[132].mxu1 %v3456_v13  ;;  %2074 = vmatmul.mubr.bf16.gmra.mrb[132].mxu0 %v3457_v17  ;;  %v3475_v13 = vld [vmem:[%s3611_s26 + $0x488] ss:$16 sps:$4 sm:$0xff]   ;;  %v3478_v20 = vld [vmem:[%s3611_s26 + $0x4ac] ss:$16 sps:$4 sm:$0xff]  }
 0x14f   : > { %1721 = vmatprep.mubr.bf16.mxu1 %v3458_v18  ;;  %2081 = vmatprep.mubr.bf16.mxu0 %v3460_v23 }
 0x150   : > { %v2982_v27 = vpack.c.bf16 %v2149_v25, %v2149_v25  ;;  %v2150_v28 = vmax.f32 %v1863_v26, 0.0 }
 0x151   : > { %v1507_v29 = vpop.f32.mrb[28].mxu1  ;;  %v1867_v32 = vpop.f32.mrb[28].mxu0 }
 0x152   : > { %2556 = vst.msk [vmem:[%s3799_s14 + $0x30] sm:$0xf] %vm2543_vm0, %v2982_v27  ;;  %v2983_v30 = vpack.c.bf16 %v2150_v28, %v2150_v28  ;;  %v1508_v31 = vadd.f32 %v3787_v15, %v1507_v29  ;;  %v1509_v33 = vpop.f32.mrb[29].mxu1  ;;  %v1869_v35 = vpop.f32.mrb[29].mxu0 }
 0x153   : > { %v1510_v36 = vpop.f32.mrb[30].mxu1  ;;  %v1870_v41 = vpop.f32.mrb[30].mxu0  ;;  %v3482_v35 = vld [vmem:[%s3611_s26 + $0x4c4] ss:$16 sps:$4 sm:$0xff]  }
 0x154   : > { %2557 = vst.msk [vmem:[%s3799_s14 + $0x34] sm:$0xf] %vm2543_vm0, %v2983_v30  ;;  %v1868_v39 = vadd.f32 %v1867_v32, %v1508_v31  ;;  %v1511_v40 = vadd.f32 %v3787_v15, %v1510_v36  ;;  %v1512_v42 = vpop.f32.mrb[31].mxu1  ;;  %v1872_v44 = vpop.f32.mrb[31].mxu0  ;;  %v3480_v31 = vld [vmem:[%s3611_s26 + $0x4a0] ss:$16 sps:$4 sm:$0xff]  }
 0x156   : > { %v2151_v45 = vmax.f32 %v1868_v39, 0.0  ;;  %v1871_v46 = vadd.f32 %v1870_v41, %v1511_v40  ;;  %1722 = vmatmul.mubr.bf16.gmra.mrb[136].mxu1 %v3462_v34  ;;  %2082 = vmatmul.mubr.bf16.gmra.mrb[136].mxu0 %v3463_v37  ;;  %v3481_v34 = vld [vmem:[%s3611_s26 + $0x4a8] ss:$16 sps:$4 sm:$0xff]   ;;  %v3484_v40 = vld [vmem:[%s3611_s26 + $0x4cc] ss:$16 sps:$4 sm:$0xff]  }
 0x157   : > { %1729 = vmatprep.mubr.bf16.mxu1 %v3464_v38  ;;  %2089 = vmatprep.mubr.bf16.mxu0 %v3466_v43 }
 0x158   : > { %v2984_v47 = vpack.c.bf16 %v2151_v45, %v2151_v45  ;;  %v2152_v48 = vmax.f32 %v1871_v46, 0.0 }
 0x159   : > { %v1515_v49 = vpop.f32.mrb[32].mxu1  ;;  %v1875_v52 = vpop.f32.mrb[32].mxu0 }
 0x15a   : > { %2558 = vst.msk [vmem:[%s3799_s14 + $0x38] sm:$0xf] %vm2543_vm0, %v2984_v47  ;;  %v2985_v50 = vpack.c.bf16 %v2152_v48, %v2152_v48  ;;  %v1516_v51 = vadd.f32 %v3787_v15, %v1515_v49  ;;  %v1517_v53 = vpop.f32.mrb[33].mxu1  ;;  %v1877_v55 = vpop.f32.mrb[33].mxu0 }
 0x15b   : > { %v1518_v56 = vpop.f32.mrb[34].mxu1  ;;  %v1878_v61 = vpop.f32.mrb[34].mxu0  ;;  %v3488_v55 = vld [vmem:[%s3611_s26 + $0x4e4] ss:$16 sps:$4 sm:$0xff]  }
 0x15c   : > { %2559 = vst.msk [vmem:[%s3799_s14 + $0x3c] sm:$0xf] %vm2543_vm0, %v2985_v50  ;;  %v1876_v59 = vadd.f32 %v1875_v52, %v1516_v51  ;;  %v1519_v60 = vadd.f32 %v3787_v15, %v1518_v56  ;;  %v1520_v62 = vpop.f32.mrb[35].mxu1  ;;  %v1880_v0 = vpop.f32.mrb[35].mxu0  ;;  %v3486_v51 = vld [vmem:[%s3611_s26 + $0x4c0] ss:$16 sps:$4 sm:$0xff]  }
 0x15e   : > { %v2153_v1 = vmax.f32 %v1876_v59, 0.0  ;;  %v1879_v2 = vadd.f32 %v1878_v61, %v1519_v60  ;;  %1730 = vmatmul.mubr.bf16.gmra.mrb[140].mxu1 %v3468_v54  ;;  %2090 = vmatmul.mubr.bf16.gmra.mrb[140].mxu0 %v3469_v57  ;;  %v3487_v54 = vld [vmem:[%s3611_s26 + $0x4c8] ss:$16 sps:$4 sm:$0xff]   ;;  %v3490_v60 = vld [vmem:[%s3611_s26 + $0x4ec] ss:$16 sps:$4 sm:$0xff]  }
 0x15f   : > { %1737 = vmatprep.mubr.bf16.mxu1 %v3470_v58  ;;  %2097 = vmatprep.mubr.bf16.mxu0 %v3472_v63 }
 0x160   : > { %v2986_v3 = vpack.c.bf16 %v2153_v1, %v2153_v1  ;;  %v2154_v4 = vmax.f32 %v1879_v2, 0.0  ;;  %v338_v2 = vld [vmem:[%s3611_s26 + $0x500] sm:$0xff] }
 0x161   : > { %v1523_v5 = vpop.f32.mrb[36].mxu1  ;;  %v1883_v8 = vpop.f32.mrb[36].mxu0 }
 0x162   : > { %2560 = vst.msk [vmem:[%s3799_s14 + $0x40] sm:$0xf] %vm2543_vm0, %v2986_v3  ;;  %v2987_v6 = vpack.c.bf16 %v2154_v4, %v2154_v4  ;;  %v1524_v7 = vadd.f32 %v3787_v15, %v1523_v5  ;;  %v1525_v9 = vpop.f32.mrb[37].mxu1  ;;  %v1885_v11 = vpop.f32.mrb[37].mxu0  ;;  %v339_v4 = vld [vmem:[%s3611_s26 + $0x508] sm:$0xff] }
 0x163   : > { %v1526_v12 = vpop.f32.mrb[38].mxu1  ;;  %v1886_v18 = vpop.f32.mrb[38].mxu0  ;;  %v3492_v9 = vld [vmem:[%s3611_s26 + $0x4e0] ss:$16 sps:$4 sm:$0xff]  }
 0x164   : > { %2561 = vst.msk [vmem:[%s3799_s14 + $0x44] sm:$0xf] %vm2543_vm0, %v2987_v6  ;;  %v1884_v16 = vadd.f32 %v1883_v8, %v1524_v7  ;;  %v1527_v17 = vadd.f32 %v3787_v15, %v1526_v12  ;;  %v1528_v19 = vpop.f32.mrb[39].mxu1  ;;  %v1888_v21 = vpop.f32.mrb[39].mxu0  ;;  %v3493_v12 = vld [vmem:[%s3611_s26 + $0x4e8] ss:$16 sps:$4 sm:$0xff]  }
 0x165   : > { %v2853_v19 = vcombine.high %v339_v4, %v339_v4 }
 0x166   : > { %v2155_v22 = vmax.f32 %v1884_v16, 0.0  ;;  %v1887_v23 = vadd.f32 %v1886_v18, %v1527_v17  ;;  %1738 = vmatmul.mubr.bf16.gmra.mrb[144].mxu1 %v3474_v10  ;;  %2098 = vmatmul.mubr.bf16.gmra.mrb[144].mxu0 %v3475_v13  ;;  %v2851_v13 = vcombine.high %v338_v2, %v338_v2 }
 0x167   : > { %1745 = vmatprep.mubr.bf16.mxu1 %v3476_v14  ;;  %2105 = vmatprep.mubr.bf16.mxu0 %v3478_v20 }
 0x168   : > { %v2988_v24 = vpack.c.bf16 %v2155_v22, %v2155_v22  ;;  %v2156_v25 = vmax.f32 %v1887_v23, 0.0 }
 0x169   : > { %v1531_v26 = vpop.f32.mrb[40].mxu1  ;;  %v1891_v29 = vpop.f32.mrb[40].mxu0 }
 0x16a   : > { %2562 = vst.msk [vmem:[%s3799_s14 + $0x48] sm:$0xf] %vm2543_vm0, %v2988_v24  ;;  %v2989_v27 = vpack.c.bf16 %v2156_v25, %v2156_v25  ;;  %v1532_v28 = vadd.f32 %v3787_v15, %v1531_v26  ;;  %v1533_v30 = vpop.f32.mrb[41].mxu1  ;;  %v1893_v32 = vpop.f32.mrb[41].mxu0 }
 0x16b   : > { %v1534_v33 = vpop.f32.mrb[42].mxu1  ;;  %v1894_v38 = vpop.f32.mrb[42].mxu0  ;;  %v2850_v30 = vcombine.low %v338_v2, %v338_v2 }
 0x16c   : > { %2563 = vst.msk [vmem:[%s3799_s14 + $0x4c] sm:$0xf] %vm2543_vm0, %v2989_v27  ;;  %v1892_v36 = vadd.f32 %v1891_v29, %v1532_v28  ;;  %v1535_v37 = vadd.f32 %v3787_v15, %v1534_v33  ;;  %v1536_v39 = vpop.f32.mrb[43].mxu1  ;;  %v1896_v41 = vpop.f32.mrb[43].mxu0  ;;  %v2852_v33 = vcombine.low %v339_v4, %v339_v4 }
 0x16e   : > { %v2157_v42 = vmax.f32 %v1892_v36, 0.0  ;;  %v1895_v43 = vadd.f32 %v1894_v38, %v1535_v37  ;;  %1746 = vmatmul.mubr.bf16.gmra.mrb[148].mxu1 %v3480_v31  ;;  %2106 = vmatmul.mubr.bf16.gmra.mrb[148].mxu0 %v3481_v34 }
 0x16f   : > { %1753 = vmatprep.mubr.bf16.mxu1 %v3482_v35  ;;  %2113 = vmatprep.mubr.bf16.mxu0 %v3484_v40 }
 0x170   : > { %v2990_v44 = vpack.c.bf16 %v2157_v42, %v2157_v42  ;;  %v2158_v45 = vmax.f32 %v1895_v43, 0.0 }
 0x171   : > { %v1539_v46 = vpop.f32.mrb[44].mxu1  ;;  %v1899_v49 = vpop.f32.mrb[44].mxu0 }
 0x172   : > { %2564 = vst.msk [vmem:[%s3799_s14 + $0x50] sm:$0xf] %vm2543_vm0, %v2990_v44  ;;  %v2991_v47 = vpack.c.bf16 %v2158_v45, %v2158_v45  ;;  %v1540_v48 = vadd.f32 %v3787_v15, %v1539_v46  ;;  %v1541_v50 = vpop.f32.mrb[45].mxu1  ;;  %v1901_v52 = vpop.f32.mrb[45].mxu0 }
 0x173   : > { %v1542_v53 = vpop.f32.mrb[46].mxu1  ;;  %v1902_v58 = vpop.f32.mrb[46].mxu0 }
 0x174   : > { %2565 = vst.msk [vmem:[%s3799_s14 + $0x54] sm:$0xf] %vm2543_vm0, %v2991_v47  ;;  %v1900_v56 = vadd.f32 %v1899_v49, %v1540_v48  ;;  %v1543_v57 = vadd.f32 %v3787_v15, %v1542_v53  ;;  %v1544_v59 = vpop.f32.mrb[47].mxu1  ;;  %v1904_v61 = vpop.f32.mrb[47].mxu0 }
 0x176   : > { %v2159_v62 = vmax.f32 %v1900_v56, 0.0  ;;  %v1903_v63 = vadd.f32 %v1902_v58, %v1543_v57  ;;  %1754 = vmatmul.mubr.bf16.gmra.mrb[152].mxu1 %v3486_v51  ;;  %2114 = vmatmul.mubr.bf16.gmra.mrb[152].mxu0 %v3487_v54 }
 0x177   : > { %1761 = vmatprep.mubr.bf16.mxu1 %v3488_v55  ;;  %2121 = vmatprep.mubr.bf16.mxu0 %v3490_v60 }
 0x178   : > { %v2992_v0 = vpack.c.bf16 %v2159_v62, %v2159_v62  ;;  %v2160_v1 = vmax.f32 %v1903_v63, 0.0 }
 0x179   : > { %v1547_v3 = vpop.f32.mrb[48].mxu1  ;;  %v1907_v7 = vpop.f32.mrb[48].mxu0 }
 0x17a   : > { %2566 = vst.msk [vmem:[%s3799_s14 + $0x58] sm:$0xf] %vm2543_vm0, %v2992_v0  ;;  %v2993_v5 = vpack.c.bf16 %v2160_v1, %v2160_v1  ;;  %v1548_v6 = vadd.f32 %v3787_v15, %v1547_v3  ;;  %v1549_v8 = vpop.f32.mrb[49].mxu1  ;;  %v1909_v10 = vpop.f32.mrb[49].mxu0 }
 0x17b   : > { %v1550_v11 = vpop.f32.mrb[50].mxu1  ;;  %v1910_v17 = vpop.f32.mrb[50].mxu0 }
 0x17c   : > { %2567 = vst.msk [vmem:[%s3799_s14 + $0x5c] sm:$0xf] %vm2543_vm0, %v2993_v5  ;;  %v1908_v14 = vadd.f32 %v1907_v7, %v1548_v6  ;;  %v1551_v16 = vadd.f32 %v3787_v15, %v1550_v11  ;;  %v1552_v18 = vpop.f32.mrb[51].mxu1  ;;  %v1912_v20 = vpop.f32.mrb[51].mxu0 }
 0x17e   : > { %v2161_v21 = vmax.f32 %v1908_v14, 0.0  ;;  %v1911_v22 = vadd.f32 %v1910_v17, %v1551_v16  ;;  %1762 = vmatmul.mubr.bf16.gmra.mrb[156].mxu1 %v3492_v9  ;;  %2122 = vmatmul.mubr.bf16.gmra.mrb[156].mxu0 %v3493_v12 }
 0x17f   : > { %1769 = vmatprep.mubr.bf16.mxu1 %v2851_v13  ;;  %2129 = vmatprep.mubr.bf16.mxu0 %v2853_v19 }
 0x180   : > { %v2994_v23 = vpack.c.bf16 %v2161_v21, %v2161_v21  ;;  %v2162_v24 = vmax.f32 %v1911_v22, 0.0 }
 0x181   : > { %v1555_v25 = vpop.f32.mrb[52].mxu1  ;;  %v1915_v28 = vpop.f32.mrb[52].mxu0 }
 0x182   : > { %2568 = vst.msk [vmem:[%s3799_s14 + $0x60] sm:$0xf] %vm2543_vm0, %v2994_v23  ;;  %v2995_v26 = vpack.c.bf16 %v2162_v24, %v2162_v24  ;;  %v1556_v27 = vadd.f32 %v3787_v15, %v1555_v25  ;;  %v1557_v29 = vpop.f32.mrb[53].mxu1  ;;  %v1917_v31 = vpop.f32.mrb[53].mxu0 }
 0x183   : > { %v1558_v32 = vpop.f32.mrb[54].mxu1  ;;  %v1918_v36 = vpop.f32.mrb[54].mxu0 }
 0x184   : > { %2569 = vst.msk [vmem:[%s3799_s14 + $0x64] sm:$0xf] %vm2543_vm0, %v2995_v26  ;;  %v1916_v34 = vadd.f32 %v1915_v28, %v1556_v27  ;;  %v1559_v35 = vadd.f32 %v3787_v15, %v1558_v32  ;;  %v1560_v37 = vpop.f32.mrb[55].mxu1  ;;  %v1920_v38 = vpop.f32.mrb[55].mxu0 }
 0x186   : > { %v2163_v39 = vmax.f32 %v1916_v34, 0.0  ;;  %v1919_v40 = vadd.f32 %v1918_v36, %v1559_v35  ;;  %1770 = vmatmul.mubr.bf16.gmra.mrb[160].mxu1 %v2850_v30  ;;  %2130 = vmatmul.mubr.bf16.gmra.mrb[160].mxu0 %v2852_v33 }
 0x188   : > { %v2996_v41 = vpack.c.bf16 %v2163_v39, %v2163_v39  ;;  %v2164_v42 = vmax.f32 %v1919_v40, 0.0 }
 0x189   : > { %v1563_v43 = vpop.f32.mrb[56].mxu1  ;;  %v1923_v46 = vpop.f32.mrb[56].mxu0 }
 0x18a   : > { %2570 = vst.msk [vmem:[%s3799_s14 + $0x68] sm:$0xf] %vm2543_vm0, %v2996_v41  ;;  %v2997_v44 = vpack.c.bf16 %v2164_v42, %v2164_v42  ;;  %v1564_v45 = vadd.f32 %v3787_v15, %v1563_v43  ;;  %v1565_v47 = vpop.f32.mrb[57].mxu1  ;;  %v1925_v48 = vpop.f32.mrb[57].mxu0 }
 0x18b   : > { %v1566_v49 = vpop.f32.mrb[58].mxu1  ;;  %v1926_v52 = vpop.f32.mrb[58].mxu0 }
 0x18c   : > { %2571 = vst.msk [vmem:[%s3799_s14 + $0x6c] sm:$0xf] %vm2543_vm0, %v2997_v44  ;;  %v1924_v50 = vadd.f32 %v1923_v46, %v1564_v45  ;;  %v1567_v51 = vadd.f32 %v3787_v15, %v1566_v49  ;;  %v1568_v53 = vpop.f32.mrb[59].mxu1  ;;  %v1928_v54 = vpop.f32.mrb[59].mxu0 }
 0x18e   : > { %v2165_v55 = vmax.f32 %v1924_v50, 0.0  ;;  %v1927_v56 = vadd.f32 %v1926_v52, %v1567_v51 }
 0x190   : > { %v2998_v57 = vpack.c.bf16 %v2165_v55, %v2165_v55  ;;  %v2166_v58 = vmax.f32 %v1927_v56, 0.0 }
 0x191   : > { %v1571_v59 = vpop.f32.mrb[60].mxu1  ;;  %v1931_v62 = vpop.f32.mrb[60].mxu0 }
 0x192   : > { %2572 = vst.msk [vmem:[%s3799_s14 + $0x70] sm:$0xf] %vm2543_vm0, %v2998_v57  ;;  %v2999_v60 = vpack.c.bf16 %v2166_v58, %v2166_v58  ;;  %v1572_v61 = vadd.f32 %v3787_v15, %v1571_v59  ;;  %v1573_v63 = vpop.f32.mrb[61].mxu1  ;;  %v1933_v0 = vpop.f32.mrb[61].mxu0 }
 0x193   : > { %v1574_v1 = vpop.f32.mrb[62].mxu1  ;;  %v1934_v4 = vpop.f32.mrb[62].mxu0 }
 0x194   : > { %2573 = vst.msk [vmem:[%s3799_s14 + $0x74] sm:$0xf] %vm2543_vm0, %v2999_v60  ;;  %v1932_v2 = vadd.f32 %v1931_v62, %v1572_v61  ;;  %v1575_v3 = vadd.f32 %v3787_v15, %v1574_v1  ;;  %v1576_v5 = vpop.f32.mrb[63].mxu1  ;;  %v1936_v6 = vpop.f32.mrb[63].mxu0 }
 0x196   : > { %v2167_v7 = vmax.f32 %v1932_v2, 0.0  ;;  %v1935_v8 = vadd.f32 %v1934_v4, %v1575_v3 }
 0x198   : > { %v3000_v9 = vpack.c.bf16 %v2167_v7, %v2167_v7  ;;  %v2168_v10 = vmax.f32 %v1935_v8, 0.0 }
 0x199   : > { %v1579_v11 = vpop.f32.mrb[64].mxu1  ;;  %v1939_v14 = vpop.f32.mrb[64].mxu0 }
 0x19a   : > { %2574 = vst.msk [vmem:[%s3799_s14 + $0x78] sm:$0xf] %vm2543_vm0, %v3000_v9  ;;  %v3001_v12 = vpack.c.bf16 %v2168_v10, %v2168_v10  ;;  %v1580_v13 = vadd.f32 %v3787_v15, %v1579_v11  ;;  %v1581_v16 = vpop.f32.mrb[65].mxu1  ;;  %v1941_v17 = vpop.f32.mrb[65].mxu0 }
 0x19b   : > { %v1582_v18 = vpop.f32.mrb[66].mxu1  ;;  %v1942_v21 = vpop.f32.mrb[66].mxu0 }
 0x19c   : > { %2575 = vst.msk [vmem:[%s3799_s14 + $0x7c] sm:$0xf] %vm2543_vm0, %v3001_v12  ;;  %v1940_v19 = vadd.f32 %v1939_v14, %v1580_v13  ;;  %v1583_v20 = vadd.f32 %v3787_v15, %v1582_v18  ;;  %v1584_v22 = vpop.f32.mrb[67].mxu1  ;;  %v1944_v23 = vpop.f32.mrb[67].mxu0 }
 0x19e   : > { %v2169_v24 = vmax.f32 %v1940_v19, 0.0  ;;  %v1943_v25 = vadd.f32 %v1942_v21, %v1583_v20 }
 0x1a0   : > { %v3002_v26 = vpack.c.bf16 %v2169_v24, %v2169_v24  ;;  %v2170_v27 = vmax.f32 %v1943_v25, 0.0 }
 0x1a1   : > { %v1587_v28 = vpop.f32.mrb[68].mxu1  ;;  %v1947_v31 = vpop.f32.mrb[68].mxu0 }
 0x1a2   : > { %2576 = vst.msk [vmem:[%s3799_s14 + $0x80] sm:$0xf] %vm2543_vm0, %v3002_v26  ;;  %v3003_v29 = vpack.c.bf16 %v2170_v27, %v2170_v27  ;;  %v1588_v30 = vadd.f32 %v3787_v15, %v1587_v28  ;;  %v1589_v32 = vpop.f32.mrb[69].mxu1  ;;  %v1949_v33 = vpop.f32.mrb[69].mxu0 }
 0x1a3   : > { %v1590_v34 = vpop.f32.mrb[70].mxu1  ;;  %v1950_v37 = vpop.f32.mrb[70].mxu0 }
 0x1a4   : > { %2577 = vst.msk [vmem:[%s3799_s14 + $0x84] sm:$0xf] %vm2543_vm0, %v3003_v29  ;;  %v1948_v35 = vadd.f32 %v1947_v31, %v1588_v30  ;;  %v1591_v36 = vadd.f32 %v3787_v15, %v1590_v34  ;;  %v1592_v38 = vpop.f32.mrb[71].mxu1  ;;  %v1952_v39 = vpop.f32.mrb[71].mxu0 }
 0x1a6   : > { %v2171_v40 = vmax.f32 %v1948_v35, 0.0  ;;  %v1951_v41 = vadd.f32 %v1950_v37, %v1591_v36 }
 0x1a8   : > { %v3004_v42 = vpack.c.bf16 %v2171_v40, %v2171_v40  ;;  %v2172_v43 = vmax.f32 %v1951_v41, 0.0 }
 0x1a9   : > { %v1595_v44 = vpop.f32.mrb[72].mxu1  ;;  %v1955_v47 = vpop.f32.mrb[72].mxu0 }
 0x1aa   : > { %2578 = vst.msk [vmem:[%s3799_s14 + $0x88] sm:$0xf] %vm2543_vm0, %v3004_v42  ;;  %v3005_v45 = vpack.c.bf16 %v2172_v43, %v2172_v43  ;;  %v1596_v46 = vadd.f32 %v3787_v15, %v1595_v44  ;;  %v1597_v48 = vpop.f32.mrb[73].mxu1  ;;  %v1957_v49 = vpop.f32.mrb[73].mxu0 }
 0x1ab   : > { %v1598_v50 = vpop.f32.mrb[74].mxu1  ;;  %v1958_v53 = vpop.f32.mrb[74].mxu0 }
 0x1ac   : > { %2579 = vst.msk [vmem:[%s3799_s14 + $0x8c] sm:$0xf] %vm2543_vm0, %v3005_v45  ;;  %v1956_v51 = vadd.f32 %v1955_v47, %v1596_v46  ;;  %v1599_v52 = vadd.f32 %v3787_v15, %v1598_v50  ;;  %v1600_v54 = vpop.f32.mrb[75].mxu1  ;;  %v1960_v55 = vpop.f32.mrb[75].mxu0  ;;  %v3980_v47 = vld [vmem:[%s4100_s2] ss:$0 sm:$0xff] }
 0x1ae   : > { %v2173_v56 = vmax.f32 %v1956_v51, 0.0  ;;  %v1959_v57 = vadd.f32 %v1958_v53, %v1599_v52 }
 0x1b0   : > { %v3006_v58 = vpack.c.bf16 %v2173_v56, %v2173_v56  ;;  %v2174_v59 = vmax.f32 %v1959_v57, 0.0 }
 0x1b1   : > { %v1603_v60 = vpop.f32.mrb[76].mxu1  ;;  %v1963_v63 = vpop.f32.mrb[76].mxu0 }
 0x1b2   : > { %2580 = vst.msk [vmem:[%s3799_s14 + $0x90] sm:$0xf] %vm2543_vm0, %v3006_v58  ;;  %v3007_v61 = vpack.c.bf16 %v2174_v59, %v2174_v59  ;;  %v1604_v62 = vadd.f32 %v3787_v15, %v1603_v60  ;;  %v1605_v0 = vpop.f32.mrb[77].mxu1  ;;  %v1965_v1 = vpop.f32.mrb[77].mxu0 }
 0x1b3   : > { %v1606_v2 = vpop.f32.mrb[78].mxu1  ;;  %v1966_v5 = vpop.f32.mrb[78].mxu0 }
 0x1b4   : > { %2581 = vst.msk [vmem:[%s3799_s14 + $0x94] sm:$0xf] %vm2543_vm0, %v3007_v61  ;;  %v1964_v3 = vadd.f32 %v1963_v63, %v1604_v62  ;;  %v1607_v4 = vadd.f32 %v3787_v15, %v1606_v2  ;;  %v1608_v6 = vpop.f32.mrb[79].mxu1  ;;  %v1968_v7 = vpop.f32.mrb[79].mxu0 }
 0x1b6   : > { %v2175_v8 = vmax.f32 %v1964_v3, 0.0  ;;  %v1967_v9 = vadd.f32 %v1966_v5, %v1607_v4 }
 0x1b8   : > { %v3008_v10 = vpack.c.bf16 %v2175_v8, %v2175_v8  ;;  %v2176_v11 = vmax.f32 %v1967_v9, 0.0 }
 0x1b9   : > { %v1611_v12 = vpop.f32.mrb[80].mxu1  ;;  %v1971_v16 = vpop.f32.mrb[80].mxu0 }
 0x1ba   : > { %2582 = vst.msk [vmem:[%s3799_s14 + $0x98] sm:$0xf] %vm2543_vm0, %v3008_v10  ;;  %v3009_v13 = vpack.c.bf16 %v2176_v11, %v2176_v11  ;;  %v1612_v14 = vadd.f32 %v3787_v15, %v1611_v12  ;;  %v1613_v17 = vpop.f32.mrb[81].mxu1  ;;  %v1973_v18 = vpop.f32.mrb[81].mxu0 }
 0x1bb   : > { %v1614_v19 = vpop.f32.mrb[82].mxu1  ;;  %v1974_v22 = vpop.f32.mrb[82].mxu0 }
 0x1bc   : > { %2583 = vst.msk [vmem:[%s3799_s14 + $0x9c] sm:$0xf] %vm2543_vm0, %v3009_v13  ;;  %v1972_v20 = vadd.f32 %v1971_v16, %v1612_v14  ;;  %v1615_v21 = vadd.f32 %v3787_v15, %v1614_v19  ;;  %v1616_v23 = vpop.f32.mrb[83].mxu1  ;;  %v1976_v24 = vpop.f32.mrb[83].mxu0 }
 0x1be   : > { %v2177_v25 = vmax.f32 %v1972_v20, 0.0  ;;  %v1975_v26 = vadd.f32 %v1974_v22, %v1615_v21 }
 0x1c0   : > { %v3010_v27 = vpack.c.bf16 %v2177_v25, %v2177_v25  ;;  %v2178_v28 = vmax.f32 %v1975_v26, 0.0 }
 0x1c1   : > { %v1619_v29 = vpop.f32.mrb[84].mxu1  ;;  %v1979_v32 = vpop.f32.mrb[84].mxu0 }
 0x1c2   : > { %2584 = vst.msk [vmem:[%s3799_s14 + $0xa0] sm:$0xf] %vm2543_vm0, %v3010_v27  ;;  %v3011_v30 = vpack.c.bf16 %v2178_v28, %v2178_v28  ;;  %v1620_v31 = vadd.f32 %v3787_v15, %v1619_v29  ;;  %v1621_v33 = vpop.f32.mrb[85].mxu1  ;;  %v1981_v34 = vpop.f32.mrb[85].mxu0 }
 0x1c3   : > { %v1622_v35 = vpop.f32.mrb[86].mxu1  ;;  %v1982_v38 = vpop.f32.mrb[86].mxu0 }
 0x1c4   : > { %2585 = vst.msk [vmem:[%s3799_s14 + $0xa4] sm:$0xf] %vm2543_vm0, %v3011_v30  ;;  %v1980_v36 = vadd.f32 %v1979_v32, %v1620_v31  ;;  %v1623_v37 = vadd.f32 %v3787_v15, %v1622_v35  ;;  %v1624_v39 = vpop.f32.mrb[87].mxu1  ;;  %v1984_v40 = vpop.f32.mrb[87].mxu0 }
 0x1c6   : > { %v2179_v41 = vmax.f32 %v1980_v36, 0.0  ;;  %v1983_v42 = vadd.f32 %v1982_v38, %v1623_v37 }
 0x1c8   : > { %v3012_v43 = vpack.c.bf16 %v2179_v41, %v2179_v41  ;;  %v2180_v44 = vmax.f32 %v1983_v42, 0.0 }
 0x1c9   : > { %v1627_v45 = vpop.f32.mrb[88].mxu1  ;;  %v1987_v15 = vpop.f32.mrb[88].mxu0 }
 0x1ca   : > { %2586 = vst.msk [vmem:[%s3799_s14 + $0xa8] sm:$0xf] %vm2543_vm0, %v3012_v43  ;;  %v3013_v46 = vpack.c.bf16 %v2180_v44, %v2180_v44  ;;  %v1628_v48 = vadd.f32 %v3980_v47, %v1627_v45  ;;  %v1629_v49 = vpop.f32.mrb[89].mxu1  ;;  %v1989_v50 = vpop.f32.mrb[89].mxu0 }
 0x1cb   : > { %v1630_v51 = vpop.f32.mrb[90].mxu1  ;;  %v1990_v54 = vpop.f32.mrb[90].mxu0 }
 0x1cc   : > { %2587 = vst.msk [vmem:[%s3799_s14 + $0xac] sm:$0xf] %vm2543_vm0, %v3013_v46  ;;  %v1988_v52 = vadd.f32 %v1987_v15, %v1628_v48  ;;  %v1631_v53 = vadd.f32 %v3980_v47, %v1630_v51  ;;  %v1632_v55 = vpop.f32.mrb[91].mxu1  ;;  %v1992_v56 = vpop.f32.mrb[91].mxu0 }
 0x1ce   : > { %v2181_v57 = vmax.f32 %v1988_v52, 0.0  ;;  %v1991_v58 = vadd.f32 %v1990_v54, %v1631_v53 }
 0x1d0   : > { %v3014_v59 = vpack.c.bf16 %v2181_v57, %v2181_v57  ;;  %v2182_v60 = vmax.f32 %v1991_v58, 0.0 }
 0x1d1   : > { %v1635_v61 = vpop.f32.mrb[92].mxu1  ;;  %v1995_v0 = vpop.f32.mrb[92].mxu0 }
 0x1d2   : > { %2588 = vst.msk [vmem:[%s3799_s14 + $0xb0] sm:$0xf] %vm2543_vm0, %v3014_v59  ;;  %v3015_v62 = vpack.c.bf16 %v2182_v60, %v2182_v60  ;;  %v1636_v63 = vadd.f32 %v3980_v47, %v1635_v61  ;;  %v1637_v1 = vpop.f32.mrb[93].mxu1  ;;  %v1997_v2 = vpop.f32.mrb[93].mxu0 }
 0x1d3   : > { %v1638_v3 = vpop.f32.mrb[94].mxu1  ;;  %v1998_v6 = vpop.f32.mrb[94].mxu0 }
 0x1d4   : > { %2589 = vst.msk [vmem:[%s3799_s14 + $0xb4] sm:$0xf] %vm2543_vm0, %v3015_v62  ;;  %v1996_v4 = vadd.f32 %v1995_v0, %v1636_v63  ;;  %v1639_v5 = vadd.f32 %v3980_v47, %v1638_v3  ;;  %v1640_v7 = vpop.f32.mrb[95].mxu1  ;;  %v2000_v8 = vpop.f32.mrb[95].mxu0 }
 0x1d6   : > { %v2183_v9 = vmax.f32 %v1996_v4, 0.0  ;;  %v1999_v10 = vadd.f32 %v1998_v6, %v1639_v5 }
 0x1d8   : > { %v3016_v11 = vpack.c.bf16 %v2183_v9, %v2183_v9  ;;  %v2184_v12 = vmax.f32 %v1999_v10, 0.0 }
 0x1d9   : > { %v1643_v13 = vpop.f32.mrb[96].mxu1  ;;  %v2003_v17 = vpop.f32.mrb[96].mxu0 }
 0x1da   : > { %2590 = vst.msk [vmem:[%s3799_s14 + $0xb8] sm:$0xf] %vm2543_vm0, %v3016_v11  ;;  %v3017_v14 = vpack.c.bf16 %v2184_v12, %v2184_v12  ;;  %v1644_v16 = vadd.f32 %v3980_v47, %v1643_v13  ;;  %v1645_v18 = vpop.f32.mrb[97].mxu1  ;;  %v2005_v19 = vpop.f32.mrb[97].mxu0 }
 0x1db   : > { %v1646_v20 = vpop.f32.mrb[98].mxu1  ;;  %v2006_v23 = vpop.f32.mrb[98].mxu0 }
 0x1dc   : > { %2591 = vst.msk [vmem:[%s3799_s14 + $0xbc] sm:$0xf] %vm2543_vm0, %v3017_v14  ;;  %v2004_v21 = vadd.f32 %v2003_v17, %v1644_v16  ;;  %v1647_v22 = vadd.f32 %v3980_v47, %v1646_v20  ;;  %v1648_v24 = vpop.f32.mrb[99].mxu1  ;;  %v2008_v25 = vpop.f32.mrb[99].mxu0 }
 0x1de   : > { %v2185_v26 = vmax.f32 %v2004_v21, 0.0  ;;  %v2007_v27 = vadd.f32 %v2006_v23, %v1647_v22 }
 0x1e0   : > { %v3018_v28 = vpack.c.bf16 %v2185_v26, %v2185_v26  ;;  %v2186_v29 = vmax.f32 %v2007_v27, 0.0 }
 0x1e1   : > { %v1651_v30 = vpop.f32.mrb[100].mxu1  ;;  %v2011_v33 = vpop.f32.mrb[100].mxu0 }
 0x1e2   : > { %2592 = vst.msk [vmem:[%s3799_s14 + $0xc0] sm:$0xf] %vm2543_vm0, %v3018_v28  ;;  %v3019_v31 = vpack.c.bf16 %v2186_v29, %v2186_v29  ;;  %v1652_v32 = vadd.f32 %v3980_v47, %v1651_v30  ;;  %v1653_v34 = vpop.f32.mrb[101].mxu1  ;;  %v2013_v35 = vpop.f32.mrb[101].mxu0 }
 0x1e3   : > { %v1654_v36 = vpop.f32.mrb[102].mxu1  ;;  %v2014_v39 = vpop.f32.mrb[102].mxu0 }
 0x1e4   : > { %2593 = vst.msk [vmem:[%s3799_s14 + $0xc4] sm:$0xf] %vm2543_vm0, %v3019_v31  ;;  %v2012_v37 = vadd.f32 %v2011_v33, %v1652_v32  ;;  %v1655_v38 = vadd.f32 %v3980_v47, %v1654_v36  ;;  %v1656_v40 = vpop.f32.mrb[103].mxu1  ;;  %v2016_v41 = vpop.f32.mrb[103].mxu0 }
 0x1e6   : > { %v2187_v42 = vmax.f32 %v2012_v37, 0.0  ;;  %v2015_v43 = vadd.f32 %v2014_v39, %v1655_v38 }
 0x1e8   : > { %v3020_v44 = vpack.c.bf16 %v2187_v42, %v2187_v42  ;;  %v2188_v45 = vmax.f32 %v2015_v43, 0.0 }
 0x1e9   : > { %v1659_v46 = vpop.f32.mrb[104].mxu1  ;;  %v2019_v49 = vpop.f32.mrb[104].mxu0 }
 0x1ea   : > { %2594 = vst.msk [vmem:[%s3799_s14 + $0xc8] sm:$0xf] %vm2543_vm0, %v3020_v44  ;;  %v3021_v48 = vpack.c.bf16 %v2188_v45, %v2188_v45  ;;  %v1660_v15 = vadd.f32 %v3980_v47, %v1659_v46  ;;  %v1661_v50 = vpop.f32.mrb[105].mxu1  ;;  %v2021_v51 = vpop.f32.mrb[105].mxu0 }
 0x1eb   : > { %v1662_v52 = vpop.f32.mrb[106].mxu1  ;;  %v2022_v55 = vpop.f32.mrb[106].mxu0 }
 0x1ec   : > { %2595 = vst.msk [vmem:[%s3799_s14 + $0xcc] sm:$0xf] %vm2543_vm0, %v3021_v48  ;;  %v2020_v53 = vadd.f32 %v2019_v49, %v1660_v15  ;;  %v1663_v54 = vadd.f32 %v3980_v47, %v1662_v52  ;;  %v1664_v56 = vpop.f32.mrb[107].mxu1  ;;  %v2024_v57 = vpop.f32.mrb[107].mxu0 }
 0x1ee   : > { %v2189_v58 = vmax.f32 %v2020_v53, 0.0  ;;  %v2023_v59 = vadd.f32 %v2022_v55, %v1663_v54 }
 0x1f0   : > { %v3022_v60 = vpack.c.bf16 %v2189_v58, %v2189_v58  ;;  %v2190_v61 = vmax.f32 %v2023_v59, 0.0 }
 0x1f1   : > { %v1667_v62 = vpop.f32.mrb[108].mxu1  ;;  %v2027_v1 = vpop.f32.mrb[108].mxu0 }
 0x1f2   : > { %2596 = vst.msk [vmem:[%s3799_s14 + $0xd0] sm:$0xf] %vm2543_vm0, %v3022_v60  ;;  %v3023_v63 = vpack.c.bf16 %v2190_v61, %v2190_v61  ;;  %v1668_v0 = vadd.f32 %v3980_v47, %v1667_v62  ;;  %v1669_v2 = vpop.f32.mrb[109].mxu1  ;;  %v2029_v3 = vpop.f32.mrb[109].mxu0 }
 0x1f3   : > { %v1670_v4 = vpop.f32.mrb[110].mxu1  ;;  %v2030_v7 = vpop.f32.mrb[110].mxu0 }
 0x1f4   : > { %2597 = vst.msk [vmem:[%s3799_s14 + $0xd4] sm:$0xf] %vm2543_vm0, %v3023_v63  ;;  %v2028_v5 = vadd.f32 %v2027_v1, %v1668_v0  ;;  %v1671_v6 = vadd.f32 %v3980_v47, %v1670_v4  ;;  %v1672_v8 = vpop.f32.mrb[111].mxu1  ;;  %v2032_v9 = vpop.f32.mrb[111].mxu0 }
 0x1f6   : > { %v2191_v10 = vmax.f32 %v2028_v5, 0.0  ;;  %v2031_v11 = vadd.f32 %v2030_v7, %v1671_v6 }
 0x1f8   : > { %v3024_v12 = vpack.c.bf16 %v2191_v10, %v2191_v10  ;;  %v2192_v13 = vmax.f32 %v2031_v11, 0.0 }
 0x1f9   : > { %v1675_v14 = vpop.f32.mrb[112].mxu1  ;;  %v2035_v18 = vpop.f32.mrb[112].mxu0 }
 0x1fa   : > { %2598 = vst.msk [vmem:[%s3799_s14 + $0xd8] sm:$0xf] %vm2543_vm0, %v3024_v12  ;;  %v3025_v16 = vpack.c.bf16 %v2192_v13, %v2192_v13  ;;  %v1676_v17 = vadd.f32 %v3980_v47, %v1675_v14  ;;  %v1677_v19 = vpop.f32.mrb[113].mxu1  ;;  %v2037_v20 = vpop.f32.mrb[113].mxu0 }
 0x1fb   : > { %v1678_v21 = vpop.f32.mrb[114].mxu1  ;;  %v2038_v24 = vpop.f32.mrb[114].mxu0 }
 0x1fc   : > { %2599 = vst.msk [vmem:[%s3799_s14 + $0xdc] sm:$0xf] %vm2543_vm0, %v3025_v16  ;;  %v2036_v22 = vadd.f32 %v2035_v18, %v1676_v17  ;;  %v1679_v23 = vadd.f32 %v3980_v47, %v1678_v21  ;;  %v1680_v25 = vpop.f32.mrb[115].mxu1  ;;  %v2040_v26 = vpop.f32.mrb[115].mxu0 }
 0x1fe   : > { %v2193_v27 = vmax.f32 %v2036_v22, 0.0  ;;  %v2039_v28 = vadd.f32 %v2038_v24, %v1679_v23 }
 0x200   : > { %v3026_v29 = vpack.c.bf16 %v2193_v27, %v2193_v27  ;;  %v2194_v30 = vmax.f32 %v2039_v28, 0.0 }
 0x201   : > { %v1683_v31 = vpop.f32.mrb[116].mxu1  ;;  %v2043_v34 = vpop.f32.mrb[116].mxu0 }
 0x202   : > { %2600 = vst.msk [vmem:[%s3799_s14 + $0xe0] sm:$0xf] %vm2543_vm0, %v3026_v29  ;;  %v3027_v32 = vpack.c.bf16 %v2194_v30, %v2194_v30  ;;  %v1684_v33 = vadd.f32 %v3980_v47, %v1683_v31  ;;  %v1685_v35 = vpop.f32.mrb[117].mxu1  ;;  %v2045_v36 = vpop.f32.mrb[117].mxu0 }
 0x203   : > { %v1686_v37 = vpop.f32.mrb[118].mxu1  ;;  %v2046_v40 = vpop.f32.mrb[118].mxu0 }
 0x204   : > { %2601 = vst.msk [vmem:[%s3799_s14 + $0xe4] sm:$0xf] %vm2543_vm0, %v3027_v32  ;;  %v2044_v38 = vadd.f32 %v2043_v34, %v1684_v33  ;;  %v1687_v39 = vadd.f32 %v3980_v47, %v1686_v37  ;;  %v1688_v41 = vpop.f32.mrb[119].mxu1  ;;  %v2048_v42 = vpop.f32.mrb[119].mxu0 }
 0x206   : > { %v2195_v43 = vmax.f32 %v2044_v38, 0.0  ;;  %v2047_v44 = vadd.f32 %v2046_v40, %v1687_v39 }
 0x208   : > { %v3028_v45 = vpack.c.bf16 %v2195_v43, %v2195_v43  ;;  %v2196_v46 = vmax.f32 %v2047_v44, 0.0 }
 0x209   : > { %v1691_v48 = vpop.f32.mrb[120].mxu1  ;;  %v2051_v50 = vpop.f32.mrb[120].mxu0 }
 0x20a   : > { %2602 = vst.msk [vmem:[%s3799_s14 + $0xe8] sm:$0xf] %vm2543_vm0, %v3028_v45  ;;  %v3029_v15 = vpack.c.bf16 %v2196_v46, %v2196_v46  ;;  %v1692_v49 = vadd.f32 %v3980_v47, %v1691_v48  ;;  %v1693_v51 = vpop.f32.mrb[121].mxu1  ;;  %v2053_v52 = vpop.f32.mrb[121].mxu0 }
 0x20b   : > { %v1694_v53 = vpop.f32.mrb[122].mxu1  ;;  %v2054_v56 = vpop.f32.mrb[122].mxu0 }
 0x20c   : > { %2603 = vst.msk [vmem:[%s3799_s14 + $0xec] sm:$0xf] %vm2543_vm0, %v3029_v15  ;;  %v2052_v54 = vadd.f32 %v2051_v50, %v1692_v49  ;;  %v1695_v55 = vadd.f32 %v3980_v47, %v1694_v53  ;;  %v1696_v57 = vpop.f32.mrb[123].mxu1  ;;  %v2056_v58 = vpop.f32.mrb[123].mxu0 }
 0x20e   : > { %v2197_v59 = vmax.f32 %v2052_v54, 0.0  ;;  %v2055_v60 = vadd.f32 %v2054_v56, %v1695_v55 }
 0x210   : > { %v3030_v61 = vpack.c.bf16 %v2197_v59, %v2197_v59  ;;  %v2198_v62 = vmax.f32 %v2055_v60, 0.0 }
 0x211   : > { %v1699_v63 = vpop.f32.mrb[124].mxu1  ;;  %v2059_v2 = vpop.f32.mrb[124].mxu0 }
 0x212   : > { %2604 = vst.msk [vmem:[%s3799_s14 + $0xf0] sm:$0xf] %vm2543_vm0, %v3030_v61  ;;  %v3031_v0 = vpack.c.bf16 %v2198_v62, %v2198_v62  ;;  %v1700_v1 = vadd.f32 %v3980_v47, %v1699_v63  ;;  %v1701_v3 = vpop.f32.mrb[125].mxu1  ;;  %v2061_v4 = vpop.f32.mrb[125].mxu0 }
 0x213   : > { %v1702_v5 = vpop.f32.mrb[126].mxu1  ;;  %v2062_v8 = vpop.f32.mrb[126].mxu0 }
 0x214   : > { %2605 = vst.msk [vmem:[%s3799_s14 + $0xf4] sm:$0xf] %vm2543_vm0, %v3031_v0  ;;  %v2060_v6 = vadd.f32 %v2059_v2, %v1700_v1  ;;  %v1703_v7 = vadd.f32 %v3980_v47, %v1702_v5  ;;  %v1704_v9 = vpop.f32.mrb[127].mxu1  ;;  %v2064_v10 = vpop.f32.mrb[127].mxu0 }
 0x216   : > { %v2199_v11 = vmax.f32 %v2060_v6, 0.0  ;;  %v2063_v12 = vadd.f32 %v2062_v8, %v1703_v7 }
 0x218   : > { %v3032_v13 = vpack.c.bf16 %v2199_v11, %v2199_v11  ;;  %v2200_v14 = vmax.f32 %v2063_v12, 0.0 }
 0x219   : > { %v1707_v16 = vpop.f32.mrb[128].mxu1  ;;  %v2067_v19 = vpop.f32.mrb[128].mxu0 }
 0x21a   : > { %2606 = vst.msk [vmem:[%s3799_s14 + $0xf8] sm:$0xf] %vm2543_vm0, %v3032_v13  ;;  %v3033_v17 = vpack.c.bf16 %v2200_v14, %v2200_v14  ;;  %v1708_v18 = vadd.f32 %v3980_v47, %v1707_v16  ;;  %v1709_v20 = vpop.f32.mrb[129].mxu1  ;;  %v2069_v21 = vpop.f32.mrb[129].mxu0 }
 0x21b   : > { %v1710_v22 = vpop.f32.mrb[130].mxu1  ;;  %v2070_v25 = vpop.f32.mrb[130].mxu0 }
 0x21c   : > { %2607 = vst.msk [vmem:[%s3799_s14 + $0xfc] sm:$0xf] %vm2543_vm0, %v3033_v17  ;;  %v2068_v23 = vadd.f32 %v2067_v19, %v1708_v18  ;;  %v1711_v24 = vadd.f32 %v3980_v47, %v1710_v22  ;;  %v1712_v26 = vpop.f32.mrb[131].mxu1  ;;  %v2072_v27 = vpop.f32.mrb[131].mxu0 }
 0x21e   : > { %v2201_v28 = vmax.f32 %v2068_v23, 0.0  ;;  %v2071_v29 = vadd.f32 %v2070_v25, %v1711_v24 }
 0x220   : > { %v3034_v30 = vpack.c.bf16 %v2201_v28, %v2201_v28  ;;  %v2202_v31 = vmax.f32 %v2071_v29, 0.0 }
 0x221   : > { %v1715_v32 = vpop.f32.mrb[132].mxu1  ;;  %v2075_v35 = vpop.f32.mrb[132].mxu0 }
 0x222   : > { %2608 = vst.msk [vmem:[%s3799_s14 + $0x100] sm:$0xf] %vm2543_vm0, %v3034_v30  ;;  %v3035_v33 = vpack.c.bf16 %v2202_v31, %v2202_v31  ;;  %v1716_v34 = vadd.f32 %v3980_v47, %v1715_v32  ;;  %v1717_v36 = vpop.f32.mrb[133].mxu1  ;;  %v2077_v37 = vpop.f32.mrb[133].mxu0 }
 0x223   : > { %v1718_v38 = vpop.f32.mrb[134].mxu1  ;;  %v2078_v41 = vpop.f32.mrb[134].mxu0 }
 0x224   : > { %2609 = vst.msk [vmem:[%s3799_s14 + $0x104] sm:$0xf] %vm2543_vm0, %v3035_v33  ;;  %v2076_v39 = vadd.f32 %v2075_v35, %v1716_v34  ;;  %v1719_v40 = vadd.f32 %v3980_v47, %v1718_v38  ;;  %v1720_v42 = vpop.f32.mrb[135].mxu1  ;;  %v2080_v43 = vpop.f32.mrb[135].mxu0 }
 0x226   : > { %v2203_v44 = vmax.f32 %v2076_v39, 0.0  ;;  %v2079_v45 = vadd.f32 %v2078_v41, %v1719_v40 }
 0x228   : > { %v3036_v46 = vpack.c.bf16 %v2203_v44, %v2203_v44  ;;  %v2204_v48 = vmax.f32 %v2079_v45, 0.0 }
 0x229   : > { %v1723_v15 = vpop.f32.mrb[136].mxu1  ;;  %v2083_v51 = vpop.f32.mrb[136].mxu0 }
 0x22a   : > { %2610 = vst.msk [vmem:[%s3799_s14 + $0x108] sm:$0xf] %vm2543_vm0, %v3036_v46  ;;  %v3037_v49 = vpack.c.bf16 %v2204_v48, %v2204_v48  ;;  %v1724_v50 = vadd.f32 %v3980_v47, %v1723_v15  ;;  %v1725_v52 = vpop.f32.mrb[137].mxu1  ;;  %v2085_v53 = vpop.f32.mrb[137].mxu0 }
 0x22b   : > { %v1726_v54 = vpop.f32.mrb[138].mxu1  ;;  %v2086_v57 = vpop.f32.mrb[138].mxu0 }
 0x22c   : > { %2611 = vst.msk [vmem:[%s3799_s14 + $0x10c] sm:$0xf] %vm2543_vm0, %v3037_v49  ;;  %v2084_v55 = vadd.f32 %v2083_v51, %v1724_v50  ;;  %v1727_v56 = vadd.f32 %v3980_v47, %v1726_v54  ;;  %v1728_v58 = vpop.f32.mrb[139].mxu1  ;;  %v2088_v59 = vpop.f32.mrb[139].mxu0 }
 0x22e   : > { %v2205_v60 = vmax.f32 %v2084_v55, 0.0  ;;  %v2087_v61 = vadd.f32 %v2086_v57, %v1727_v56 }
 0x230   : > { %v3038_v62 = vpack.c.bf16 %v2205_v60, %v2205_v60  ;;  %v2206_v63 = vmax.f32 %v2087_v61, 0.0 }
 0x231   : > { %v1731_v0 = vpop.f32.mrb[140].mxu1  ;;  %v2091_v3 = vpop.f32.mrb[140].mxu0 }
 0x232   : > { %2612 = vst.msk [vmem:[%s3799_s14 + $0x110] sm:$0xf] %vm2543_vm0, %v3038_v62  ;;  %v3039_v1 = vpack.c.bf16 %v2206_v63, %v2206_v63  ;;  %v1732_v2 = vadd.f32 %v3980_v47, %v1731_v0  ;;  %v1733_v4 = vpop.f32.mrb[141].mxu1  ;;  %v2093_v5 = vpop.f32.mrb[141].mxu0 }
 0x233   : > { %v1734_v6 = vpop.f32.mrb[142].mxu1  ;;  %v2094_v9 = vpop.f32.mrb[142].mxu0 }
 0x234   : > { %2613 = vst.msk [vmem:[%s3799_s14 + $0x114] sm:$0xf] %vm2543_vm0, %v3039_v1  ;;  %v2092_v7 = vadd.f32 %v2091_v3, %v1732_v2  ;;  %v1735_v8 = vadd.f32 %v3980_v47, %v1734_v6  ;;  %v1736_v10 = vpop.f32.mrb[143].mxu1  ;;  %v2096_v11 = vpop.f32.mrb[143].mxu0 }
 0x236   : > { %v2207_v12 = vmax.f32 %v2092_v7, 0.0  ;;  %v2095_v13 = vadd.f32 %v2094_v9, %v1735_v8 }
 0x238   : > { %v3040_v14 = vpack.c.bf16 %v2207_v12, %v2207_v12  ;;  %v2208_v16 = vmax.f32 %v2095_v13, 0.0 }
 0x239   : > { %v1739_v17 = vpop.f32.mrb[144].mxu1  ;;  %v2099_v20 = vpop.f32.mrb[144].mxu0 }
 0x23a   : > { %2614 = vst.msk [vmem:[%s3799_s14 + $0x118] sm:$0xf] %vm2543_vm0, %v3040_v14  ;;  %v3041_v18 = vpack.c.bf16 %v2208_v16, %v2208_v16  ;;  %v1740_v19 = vadd.f32 %v3980_v47, %v1739_v17  ;;  %v1741_v21 = vpop.f32.mrb[145].mxu1  ;;  %v2101_v22 = vpop.f32.mrb[145].mxu0 }
 0x23b   : > { %v1742_v23 = vpop.f32.mrb[146].mxu1  ;;  %v2102_v26 = vpop.f32.mrb[146].mxu0 }
 0x23c   : > { %2615 = vst.msk [vmem:[%s3799_s14 + $0x11c] sm:$0xf] %vm2543_vm0, %v3041_v18  ;;  %v2100_v24 = vadd.f32 %v2099_v20, %v1740_v19  ;;  %v1743_v25 = vadd.f32 %v3980_v47, %v1742_v23  ;;  %v1744_v27 = vpop.f32.mrb[147].mxu1  ;;  %v2104_v28 = vpop.f32.mrb[147].mxu0 }
 0x23e   : > { %v2209_v29 = vmax.f32 %v2100_v24, 0.0  ;;  %v2103_v30 = vadd.f32 %v2102_v26, %v1743_v25 }
 0x240   : > { %v3042_v31 = vpack.c.bf16 %v2209_v29, %v2209_v29  ;;  %v2210_v32 = vmax.f32 %v2103_v30, 0.0 }
 0x241   : > { %v1747_v33 = vpop.f32.mrb[148].mxu1  ;;  %v2107_v36 = vpop.f32.mrb[148].mxu0 }
 0x242   : > { %2616 = vst.msk [vmem:[%s3799_s14 + $0x120] sm:$0xf] %vm2543_vm0, %v3042_v31  ;;  %v3043_v34 = vpack.c.bf16 %v2210_v32, %v2210_v32  ;;  %v1748_v35 = vadd.f32 %v3980_v47, %v1747_v33  ;;  %v1749_v37 = vpop.f32.mrb[149].mxu1  ;;  %v2109_v38 = vpop.f32.mrb[149].mxu0 }
 0x243   : > { %v1750_v39 = vpop.f32.mrb[150].mxu1  ;;  %v2110_v42 = vpop.f32.mrb[150].mxu0 }
 0x244   : > { %2617 = vst.msk [vmem:[%s3799_s14 + $0x124] sm:$0xf] %vm2543_vm0, %v3043_v34  ;;  %v2108_v40 = vadd.f32 %v2107_v36, %v1748_v35  ;;  %v1751_v41 = vadd.f32 %v3980_v47, %v1750_v39  ;;  %v1752_v43 = vpop.f32.mrb[151].mxu1  ;;  %v2112_v44 = vpop.f32.mrb[151].mxu0 }
 0x246   : > { %v2211_v45 = vmax.f32 %v2108_v40, 0.0  ;;  %v2111_v46 = vadd.f32 %v2110_v42, %v1751_v41 }
 0x248   : > { %v3044_v48 = vpack.c.bf16 %v2211_v45, %v2211_v45  ;;  %v2212_v15 = vmax.f32 %v2111_v46, 0.0 }
 0x249   : > { %v1755_v49 = vpop.f32.mrb[152].mxu1  ;;  %v2115_v52 = vpop.f32.mrb[152].mxu0 }
 0x24a   : > { %2618 = vst.msk [vmem:[%s3799_s14 + $0x128] sm:$0xf] %vm2543_vm0, %v3044_v48  ;;  %v3045_v50 = vpack.c.bf16 %v2212_v15, %v2212_v15  ;;  %v1756_v51 = vadd.f32 %v3980_v47, %v1755_v49  ;;  %v1757_v53 = vpop.f32.mrb[153].mxu1  ;;  %v2117_v54 = vpop.f32.mrb[153].mxu0 }
 0x24b   : > { %v1758_v55 = vpop.f32.mrb[154].mxu1  ;;  %v2118_v58 = vpop.f32.mrb[154].mxu0 }
 0x24c   : > { %2619 = vst.msk [vmem:[%s3799_s14 + $0x12c] sm:$0xf] %vm2543_vm0, %v3045_v50  ;;  %v2116_v56 = vadd.f32 %v2115_v52, %v1756_v51  ;;  %v1759_v57 = vadd.f32 %v3980_v47, %v1758_v55  ;;  %v1760_v59 = vpop.f32.mrb[155].mxu1  ;;  %v2120_v60 = vpop.f32.mrb[155].mxu0 }
 0x24e   : > { %v2213_v61 = vmax.f32 %v2116_v56, 0.0  ;;  %v2119_v62 = vadd.f32 %v2118_v58, %v1759_v57 }
 0x250   : > { %v3046_v63 = vpack.c.bf16 %v2213_v61, %v2213_v61  ;;  %v2214_v0 = vmax.f32 %v2119_v62, 0.0 }
 0x251   : > { %v1763_v1 = vpop.f32.mrb[156].mxu1  ;;  %v2123_v4 = vpop.f32.mrb[156].mxu0 }
 0x252   : > { %2620 = vst.msk [vmem:[%s3799_s14 + $0x130] sm:$0xf] %vm2543_vm0, %v3046_v63  ;;  %v3047_v2 = vpack.c.bf16 %v2214_v0, %v2214_v0  ;;  %v1764_v3 = vadd.f32 %v3980_v47, %v1763_v1  ;;  %v1765_v5 = vpop.f32.mrb[157].mxu1  ;;  %v2125_v6 = vpop.f32.mrb[157].mxu0 }
 0x253   : > { %v1766_v7 = vpop.f32.mrb[158].mxu1  ;;  %v2126_v10 = vpop.f32.mrb[158].mxu0 }
 0x254   : > { %2621 = vst.msk [vmem:[%s3799_s14 + $0x134] sm:$0xf] %vm2543_vm0, %v3047_v2  ;;  %v2124_v8 = vadd.f32 %v2123_v4, %v1764_v3  ;;  %v1767_v9 = vadd.f32 %v3980_v47, %v1766_v7  ;;  %v1768_v11 = vpop.f32.mrb[159].mxu1  ;;  %v2128_v12 = vpop.f32.mrb[159].mxu0 }
 0x256   : > { %v2215_v13 = vmax.f32 %v2124_v8, 0.0  ;;  %v2127_v14 = vadd.f32 %v2126_v10, %v1767_v9 }
 0x258   : > { %v3048_v16 = vpack.c.bf16 %v2215_v13, %v2215_v13  ;;  %v2216_v17 = vmax.f32 %v2127_v14, 0.0 }
 0x259   : > { %v1771_v18 = vpop.f32.mrb[160].mxu1  ;;  %v2131_v21 = vpop.f32.mrb[160].mxu0 }
 0x25a   : > { %2622 = vst.msk [vmem:[%s3799_s14 + $0x138] sm:$0xf] %vm2543_vm0, %v3048_v16  ;;  %v3049_v19 = vpack.c.bf16 %v2216_v17, %v2216_v17  ;;  %v1772_v20 = vadd.f32 %v3980_v47, %v1771_v18  ;;  %v1773_v22 = vpop.f32.mrb[161].mxu1  ;;  %v2133_v23 = vpop.f32.mrb[161].mxu0 }
 0x25b   : > { %v1774_v24 = vpop.f32.mrb[162].mxu1  ;;  %v2134_v26 = vpop.f32.mrb[162].mxu0 }
 0x25c   : > { %2623 = vst.msk [vmem:[%s3799_s14 + $0x13c] sm:$0xf] %vm2543_vm0, %v3049_v19  ;;  %v2132_v25 = vadd.f32 %v2131_v21, %v1772_v20  ;;  %v1775_v27 = vpop.f32.mrb[163].mxu1  ;;  %v2135_v28 = vpop.f32.mrb[163].mxu0 }
 0x25e   : > { %v2217_v29 = vmax.f32 %v2132_v25, 0.0 }
 0x260   : > { %v3050_v30 = vpack.c.bf16 %v2217_v29, %v2217_v29 }
 0x262   : > { %2624 = vst.msk [vmem:[%s3799_s14 + $0x140] sm:$0xf] %vm2543_vm0, %v3050_v30 }
 0x263 PF: > { %s13_s12 = sadd.s32 1, %s3505_s12  }
 0x264   : > { %p10_p4 = scmp.ge.s32.totalorder %s13_s12, 4  }
 0x266   :  { %12 = sbr.rel (!%p10_p4) target bundleno = 1 (0x1), region = 62 }

// kernel: forward.6
= control target key start
LH: loop header
LB: loop body
LE: loop exit
PB: predicated region body
PF: predicated region fallthrough
CT: control target
= control target key end

     0   :  { %s3274_s12 = smov 0   ;;  %s3953_s0 = inlined_call_operand.vmem [shape: bf16[784,576], index: 0, kind: input, shape index: {}]   ;;  %s3954_s1 = inlined_call_operand.vmem [shape: bf16[576,64], index: 1, kind: input, shape index: {}]   ;;  %s3955_s2 = inlined_call_operand.vmem [shape: f32[1,64], index: 2, kind: input, shape index: {}]   ;;  %s3956_s3 = inlined_call_operand.vmem [shape: bf16[784,64], index: 3, kind: output, shape index: {}]  }
   0x1 LB: > { %s2361_s13 = sadd.s32 4294967295, %s3249_s12   ;;  %p2365_p0 = scmp.ge.s32.totalorder %s3249_s12, 1  ;;  %s3249_s12 = sphi %s3274_s12, %s13_s12  }
   0x2   : > { %p139_p1 = scmp.lt.s32.totalorder %s3249_s12, 3 }
   0x4   : > { %p140_p2 = pnand %p2365_p0, %p139_p1 }
   0x5   : > { %v3034_v0 = vld [vmem:[%s3954_s1] sm:$0xff] (!%p140_p2)   ;;  %v3251_v1 = vmov (!%p140_p2), 0   ;;  %v3036_v3 = vld [vmem:[%s3954_s1 + $0x8] sm:$0xff] (!%p140_p2)   ;;  %v3038_v5 = vld [vmem:[%s3954_s1 + $0x10] sm:$0xff] (!%p140_p2)   ;;  %s164_s5 = smul.u32 (!%p140_p2), 49, %s2361_s13  ;;  %v3252_v39 = vmov (!%p140_p2), 0.0  }
   0x6   : > { %143 = sbr.rel (%p140_p2) target bundleno = 585 (0x249), region = 32  ;;  %1313 = vmatprep.subr.bf16.mxu1 (!%p140_p2), %v3251_v1  ;;  %1545 = vmatprep.subr.bf16.mxu0 (!%p140_p2), %v3251_v1  ;;  %v3290_v2 = vld [vmem:[%s3954_s1 + $0x80] sm:$0xff] (!%p140_p2)   ;;  %v3300_v4 = vld [vmem:[%s3954_s1 + $0x88] sm:$0xff] (!%p140_p2)   ;;  %v3311_v6 = vld [vmem:[%s3954_s1 + $0x90] sm:$0xff] (!%p140_p2)   ;;  %vm3253_vm0 = vmmov (!%p140_p2), 0   ;;  %vm1237_vm1 = vcmask (!%p140_p2), 523264  }
   0x7   : > { %1314 = vmatpush1.bf16.msra.mxu1 (!%p140_p2), %v3034_v0  ;;  %1546 = vmatpush1.bf16.msra.mxu0 (!%p140_p2), %v3290_v2  ;;  %v3040_v7 = vld [vmem:[%s3954_s1 + $0x18] sm:$0xff] (!%p140_p2)   ;;  %v3042_v9 = vld [vmem:[%s3954_s1 + $0x20] sm:$0xff] (!%p140_p2)   ;;  %v3044_v11 = vld [vmem:[%s3954_s1 + $0x28] sm:$0xff] (!%p140_p2)   ;;  %p165_p3 = scmp.lt.s32.totalorder (!%p140_p2), %s164_s5, 97  ;;  %vm2255_vm2 = vcmask (!%p140_p2), 519168  }
   0x8   : > { %1315 = vmatprep.subr.bf16.mxu1 (!%p140_p2), %v3251_v1  ;;  %1547 = vmatprep.subr.bf16.mxu0 (!%p140_p2), %v3251_v1  ;;  %v3322_v8 = vld [vmem:[%s3954_s1 + $0x98] sm:$0xff] (!%p140_p2)   ;;  %v3335_v10 = vld [vmem:[%s3954_s1 + $0xa0] sm:$0xff] (!%p140_p2)   ;;  %v3346_v12 = vld [vmem:[%s3954_s1 + $0xa8] sm:$0xff] (!%p140_p2)  }
   0x9   : > { %v3046_v13 = vld [vmem:[%s3954_s1 + $0x30] sm:$0xff] (!%p140_p2)   ;;  %v3048_v15 = vld [vmem:[%s3954_s1 + $0x38] sm:$0xff] (!%p140_p2)   ;;  %v3050_v17 = vld [vmem:[%s3954_s1 + $0x40] sm:$0xff] (!%p140_p2)  }
   0xa   : > { %v3359_v14 = vld [vmem:[%s3954_s1 + $0xb0] sm:$0xff] (!%p140_p2)   ;;  %v3371_v16 = vld [vmem:[%s3954_s1 + $0xb8] sm:$0xff] (!%p140_p2)   ;;  %v3387_v18 = vld [vmem:[%s3954_s1 + $0xc0] sm:$0xff] (!%p140_p2)  }
   0xb   : > { %1316 = vmatpush1.bf16.msra.mxu1 (!%p140_p2), %v3036_v3  ;;  %1548 = vmatpush1.bf16.msra.mxu0 (!%p140_p2), %v3300_v4  ;;  %v3052_v20 = vld [vmem:[%s3954_s1 + $0x48] sm:$0xff] (!%p140_p2)   ;;  %v3054_v23 = vld [vmem:[%s3954_s1 + $0x50] sm:$0xff] (!%p140_p2)   ;;  %v3056_v25 = vld [vmem:[%s3954_s1 + $0x58] sm:$0xff] (!%p140_p2)  }
   0xc   : > { %1317 = vmatprep.subr.bf16.mxu1 (!%p140_p2), %v3251_v1  ;;  %1549 = vmatprep.subr.bf16.mxu0 (!%p140_p2), %v3251_v1  ;;  %v3400_v22 = vld [vmem:[%s3954_s1 + $0xc8] sm:$0xff] (!%p140_p2)   ;;  %v3411_v24 = vld [vmem:[%s3954_s1 + $0xd0] sm:$0xff] (!%p140_p2)   ;;  %v3422_v26 = vld [vmem:[%s3954_s1 + $0xd8] sm:$0xff] (!%p140_p2)  }
   0xd   : > { %s3958_s5 = smov (!%p165_p3, %s164_s5), 97  ;;  %v3058_v27 = vld [vmem:[%s3954_s1 + $0x60] sm:$0xff]   ;;  %v3060_v29 = vld [vmem:[%s3954_s1 + $0x68] sm:$0xff]   ;;  %v3062_v31 = vld [vmem:[%s3954_s1 + $0x70] sm:$0xff]  }
   0xe   : > { %s3022_s19 = smul.u32 20, %s3958_s5  ;;  %v3433_v28 = vld [vmem:[%s3954_s1 + $0xe0] sm:$0xff]   ;;  %v3444_v30 = vld [vmem:[%s3954_s1 + $0xe8] sm:$0xff]   ;;  %v3455_v32 = vld [vmem:[%s3954_s1 + $0xf0] sm:$0xff]   ;;  %s2367_s17 = sshll.u32 %s3958_s5, 2 }
   0xf   : > { %1318 = vmatpush1.bf16.msra.mxu1 %v3038_v5  ;;  %1550 = vmatpush1.bf16.msra.mxu0 %v3311_v6  ;;  %v3064_v33 = vld [vmem:[%s3954_s1 + $0x78] sm:$0xff]   ;;  %v3072_v38 = vld [vmem:[%s3954_s1 + $0x100] sm:$0xff]   ;;  %v3091_v41 = vld [vmem:[%s3954_s1 + $0x108] sm:$0xff]   ;;  %s3779_s20 = scalar_lea.vmem %s3956_s3, %s2367_s17 }
  0x10   : > { %1319 = vmatprep.subr.bf16.mxu1 %v3251_v1  ;;  %1551 = vmatprep.subr.bf16.mxu0 %v3251_v1  ;;  %s3380_s26 = scalar_lea.vmem %s3953_s0, %s3022_s19  ;;  %v3466_v34 = vld [vmem:[%s3954_s1 + $0xf8] sm:$0xff]   ;;  %v3110_v46 = vld [vmem:[%s3954_s1 + $0x110] sm:$0xff]  }
  0x11   : > { %v3068_v19 = vld [vmem:[%s3380_s26 + $0x4] ss:$20 sps:$4 sm:$0xff]   ;;  %v3071_v21 = vld [vmem:[%s3380_s26 + $0xc] ss:$20 sps:$4 sm:$0xff]   ;;  %v3069_v36 = vld [vmem:[%s3380_s26 + $0x8] ss:$20 sps:$4 sm:$0xff]  }
  0x12   : > { %1345 = vmatprep.mubr.bf16.mxu1 %v3068_v19  ;;  %1577 = vmatprep.mubr.bf16.mxu0 %v3071_v21  ;;  %v3066_v35 = vld [vmem:[%s3380_s26] ss:$20 sps:$4 sm:$0xff]   ;;  %v3077_v42 = vld [vmem:[%s3380_s26 + $0x28] ss:$20 sps:$4 sm:$0xff]   ;;  %v3078_v43 = vld [vmem:[%s3380_s26 + $0x30] ss:$20 sps:$4 sm:$0xff]  }
  0x13   : > { %1320 = vmatpush1.bf16.msra.mxu1 %v3040_v7  ;;  %1552 = vmatpush1.bf16.msra.mxu0 %v3322_v8  ;;  %v3073_v37 = vld [vmem:[%s3380_s26 + $0x2c] ss:$20 sps:$4 sm:$0xff]   ;;  %v3075_v40 = vld [vmem:[%s3380_s26 + $0x34] ss:$20 sps:$4 sm:$0xff]   ;;  %v3081_v45 = vld [vmem:[%s3380_s26 + $0x5c] ss:$20 sps:$4 sm:$0xff]  }
  0x14   : > { %1321 = vmatprep.subr.bf16.mxu1 %v3251_v1  ;;  %1553 = vmatprep.subr.bf16.mxu0 %v3251_v1  ;;  %v3079_v44 = vld [vmem:[%s3380_s26 + $0x54] ss:$20 sps:$4 sm:$0xff]   ;;  %v3133_v47 = vld [vmem:[%s3954_s1 + $0x118] sm:$0xff]   ;;  %v3083_v48 = vld [vmem:[%s3380_s26 + $0x50] ss:$20 sps:$4 sm:$0xff]  }
  0x15   : > { %v3084_v49 = vld [vmem:[%s3380_s26 + $0x58] ss:$20 sps:$4 sm:$0xff]   ;;  %v3085_v50 = vld [vmem:[%s3380_s26 + $0x7c] ss:$20 sps:$4 sm:$0xff]   ;;  %v3090_v53 = vld [vmem:[%s3380_s26 + $0x80] ss:$20 sps:$4 sm:$0xff]  }
  0x16   : > { %v3087_v51 = vld [vmem:[%s3380_s26 + $0x84] ss:$20 sps:$4 sm:$0xff]   ;;  %v3094_v55 = vld [vmem:[%s3380_s26 + $0xac] ss:$20 sps:$4 sm:$0xff]   ;;  %v3097_v57 = vld [vmem:[%s3380_s26 + $0xa8] ss:$20 sps:$4 sm:$0xff]  }
  0x17   : > { %1322 = vmatpush1.bf16.msra.mxu1 %v3042_v9  ;;  %1554 = vmatpush1.bf16.msra.mxu0 %v3335_v10  ;;  %v3089_v52 = vld [vmem:[%s3380_s26 + $0x78] ss:$20 sps:$4 sm:$0xff]   ;;  %v3096_v56 = vld [vmem:[%s3380_s26 + $0xa0] ss:$20 sps:$4 sm:$0xff]   ;;  %v3102_v60 = vld [vmem:[%s3380_s26 + $0xc8] ss:$20 sps:$4 sm:$0xff]  }
  0x18   : > { %1323 = vmatprep.subr.bf16.mxu1 %v3251_v1  ;;  %1555 = vmatprep.subr.bf16.mxu0 %v3251_v1  ;;  %v3092_v54 = vld [vmem:[%s3380_s26 + $0xa4] ss:$20 sps:$4 sm:$0xff]   ;;  %v3098_v58 = vld [vmem:[%s3380_s26 + $0xcc] ss:$20 sps:$4 sm:$0xff]   ;;  %v3100_v59 = vld [vmem:[%s3380_s26 + $0xd4] ss:$20 sps:$4 sm:$0xff]  }
  0x19   : > { %v3103_v61 = vld [vmem:[%s3380_s26 + $0xd0] ss:$20 sps:$4 sm:$0xff]   ;;  %v3104_v62 = vld [vmem:[%s3380_s26 + $0xf4] ss:$20 sps:$4 sm:$0xff]   ;;  %v3115_v5 = vld [vmem:[%s3380_s26 + $0x118] ss:$20 sps:$4 sm:$0xff]  }
  0x1a   : > { %v3106_v63 = vld [vmem:[%s3380_s26 + $0xfc] ss:$20 sps:$4 sm:$0xff]   ;;  %v3117_v7 = vld [vmem:[%s3380_s26 + $0x144] ss:$20 sps:$4 sm:$0xff]   ;;  %v3121_v9 = vld [vmem:[%s3380_s26 + $0x140] ss:$20 sps:$4 sm:$0xff]  }
  0x1b   : > { %1324 = vmatpush1.bf16.msra.mxu1 %v3044_v11  ;;  %1556 = vmatpush1.bf16.msra.mxu0 %v3346_v12  ;;  %v3108_v0 = vld [vmem:[%s3380_s26 + $0xf0] ss:$20 sps:$4 sm:$0xff]   ;;  %v3123_v11 = vld [vmem:[%s3380_s26 + $0x16c] ss:$20 sps:$4 sm:$0xff]  }
  0x1c   : > { %1325 = vmatprep.subr.bf16.mxu1 %v3251_v1  ;;  %1557 = vmatprep.subr.bf16.mxu0 %v3251_v1  ;;  %v3111_v3 = vld [vmem:[%s3380_s26 + $0x11c] ss:$20 sps:$4 sm:$0xff]   ;;  %v3138_v19 = vld [vmem:[%s3380_s26 + $0x1c4] ss:$20 sps:$4 sm:$0xff]   ;;  %v3141_v21 = vld [vmem:[%s3380_s26 + $0x1c0] ss:$20 sps:$4 sm:$0xff]  }
  0x1f   : > { %1326 = vmatpush1.bf16.msra.mxu1 %v3046_v13  ;;  %1558 = vmatpush1.bf16.msra.mxu0 %v3359_v14  ;;  %v3127_v13 = vld [vmem:[%s3380_s26 + $0x168] ss:$20 sps:$4 sm:$0xff]  }
  0x20   : > { %1327 = vmatprep.subr.bf16.mxu1 %v3251_v1  ;;  %1559 = vmatprep.subr.bf16.mxu0 %v3251_v1 }
  0x23   : > { %1328 = vmatpush1.bf16.msra.mxu1 %v3048_v15  ;;  %1560 = vmatpush1.bf16.msra.mxu0 %v3371_v16  ;;  %v3129_v15 = vld [vmem:[%s3380_s26 + $0x194] ss:$20 sps:$4 sm:$0xff]  }
  0x24   : > { %1329 = vmatprep.subr.bf16.mxu1 %v3251_v1  ;;  %1561 = vmatprep.subr.bf16.mxu0 %v3251_v1 }
  0x27   : > { %1330 = vmatpush1.bf16.msra.mxu1 %v3050_v17  ;;  %1562 = vmatpush1.bf16.msra.mxu0 %v3387_v18  ;;  %v3135_v17 = vld [vmem:[%s3380_s26 + $0x198] ss:$20 sps:$4 sm:$0xff]  }
  0x28   : > { %1331 = vmatprep.subr.bf16.mxu1 %v3251_v1  ;;  %1563 = vmatprep.subr.bf16.mxu0 %v3251_v1 }
  0x2b   : > { %1332 = vmatpush1.bf16.msra.mxu1 %v3052_v20  ;;  %1564 = vmatpush1.bf16.msra.mxu0 %v3400_v22  ;;  %v3140_v20 = vld [vmem:[%s3380_s26 + $0x1b8] ss:$20 sps:$4 sm:$0xff]  }
  0x2c   : > { %1333 = vmatprep.subr.bf16.mxu1 %v3251_v1  ;;  %1565 = vmatprep.subr.bf16.mxu0 %v3251_v1 }
  0x2f   : > { %1334 = vmatpush1.bf16.msra.mxu1 %v3054_v23  ;;  %1566 = vmatpush1.bf16.msra.mxu0 %v3411_v24  ;;  %v3144_v23 = vld [vmem:[%s3380_s26 + $0x1ec] ss:$20 sps:$4 sm:$0xff]  }
  0x30   : > { %1335 = vmatprep.subr.bf16.mxu1 %v3251_v1  ;;  %1567 = vmatprep.subr.bf16.mxu0 %v3251_v1 }
  0x33   : > { %1336 = vmatpush1.bf16.msra.mxu1 %v3056_v25  ;;  %1568 = vmatpush1.bf16.msra.mxu0 %v3422_v26  ;;  %v3147_v25 = vld [vmem:[%s3380_s26 + $0x1e8] ss:$20 sps:$4 sm:$0xff]  }
  0x34   : > { %1337 = vmatprep.subr.bf16.mxu1 %v3251_v1  ;;  %1569 = vmatprep.subr.bf16.mxu0 %v3251_v1 }
  0x37   : > { %1338 = vmatpush1.bf16.msra.mxu1 %v3058_v27  ;;  %1570 = vmatpush1.bf16.msra.mxu0 %v3433_v28  ;;  %v3150_v27 = vld [vmem:[%s3380_s26 + $0x208] ss:$20 sps:$4 sm:$0xff]  }
  0x38   : > { %1339 = vmatprep.subr.bf16.mxu1 %v3251_v1  ;;  %1571 = vmatprep.subr.bf16.mxu0 %v3251_v1 }
  0x3b   : > { %1340 = vmatpush1.bf16.msra.mxu1 %v3060_v29  ;;  %1572 = vmatpush1.bf16.msra.mxu0 %v3444_v30  ;;  %v3152_v29 = vld [vmem:[%s3380_s26 + $0x234] ss:$20 sps:$4 sm:$0xff]  }
  0x3c   : > { %1341 = vmatprep.subr.bf16.mxu1 %v3251_v1  ;;  %1573 = vmatprep.subr.bf16.mxu0 %v3251_v1 }
  0x3f   : > { %1342 = vmatpush1.bf16.msra.mxu1 %v3062_v31  ;;  %1574 = vmatpush1.bf16.msra.mxu0 %v3455_v32  ;;  %v3155_v31 = vld [vmem:[%s3380_s26 + $0x38] ss:$20 sps:$4 sm:$0xff]  }
  0x40   : > { %1343 = vmatprep.subr.bf16.mxu1 %v3251_v1  ;;  %1575 = vmatprep.subr.bf16.mxu0 %v3251_v1 }
  0x43   : > { %1344 = vmatpush1.bf16.msra.mxu1 %v3064_v33  ;;  %1576 = vmatpush1.bf16.msra.mxu0 %v3466_v34  ;;  %v3158_v33 = vld [vmem:[%s3380_s26 + $0x258] ss:$20 sps:$4 sm:$0xff]  }
  0x44   : > { %2792 = vmatprep.subr.bf16.mxu1 %v3251_v1  ;;  %2684 = vmatprep.subr.bf16.mxu0 %v3252_v39 }
  0x46   : > { %1346 = vmatmul.mubr.bf16.vlgmr.msra.gmra.mrb[0].mxu1 %v3066_v35  ;;  %1578 = vmatmul.mubr.bf16.vlgmr.msra.gmra.mrb[0].mxu0 %v3069_v36  ;;  %v3160_v35 = vld [vmem:[%s3380_s26 + $0x284] ss:$20 sps:$4 sm:$0xff]   ;;  %v3162_v36 = vld [vmem:[%s3380_s26 + $0x280] ss:$20 sps:$4 sm:$0xff]  }
  0x47   : > { %1353 = vmatprep.mubr.bf16.mxu1 %v3073_v37  ;;  %2685 = vmatpush3.bf16.msra.mxu0 %v3072_v38  ;;  %v3163_v37 = vld [vmem:[%s3380_s26 + $0x88] ss:$20 sps:$4 sm:$0xff]   ;;  %v3164_v38 = vld [vmem:[%s3380_s26 + $0x2ac] ss:$20 sps:$4 sm:$0xff]  }
  0x48   : > { %2808 = vmatpush1.bf16.msra.mxu1 %v3290_v2  ;;  %1585 = vmatprep.mubr.bf16.mxu0 %v3075_v40  ;;  %v3109_v2 = vld [vmem:[%s3380_s26 + $0xf8] ss:$20 sps:$4 sm:$0xff]   ;;  %v3166_v40 = vld [vmem:[%s3380_s26 + $0x2a8] ss:$20 sps:$4 sm:$0xff]  }
  0x49   : > { %2793 = vmatprep.subr.bf16.mxu1 %v3251_v1  ;;  %2686 = vmatprep.subr.bf16.mxu0 %v3252_v39 }
  0x4b   : > { %2687 = vmatpush3.bf16.msra.mxu0 %v3091_v41  ;;  %v3167_v41 = vld [vmem:[%s3380_s26 + $0xb0] ss:$20 sps:$4 sm:$0xff]  }
  0x4c   : > { %2809 = vmatpush1.bf16.msra.mxu1 %v3300_v4  ;;  %2688 = vmatprep.subr.bf16.mxu0 %v3252_v39  ;;  %v3113_v4 = vld [vmem:[%s3380_s26 + $0x124] ss:$20 sps:$4 sm:$0xff]  }
  0x4d   : > { %2794 = vmatprep.subr.bf16.mxu1 %v3251_v1 }
  0x4e   : > { %1354 = vmatmul.mubr.bf16.gmra.mrb[4].mxu1 %v3077_v42  ;;  %1586 = vmatmul.mubr.bf16.gmra.mrb[4].mxu0 %v3078_v43  ;;  %v3168_v42 = vld [vmem:[%s3380_s26 + $0x2d4] ss:$20 sps:$4 sm:$0xff]   ;;  %v3170_v43 = vld [vmem:[%s3380_s26 + $0x2d0] ss:$20 sps:$4 sm:$0xff]  }
  0x4f   : > { %1361 = vmatprep.mubr.bf16.mxu1 %v3079_v44  ;;  %1593 = vmatprep.mubr.bf16.mxu0 %v3081_v45  ;;  %v3171_v44 = vld [vmem:[%s3380_s26 + $0xd8] ss:$20 sps:$4 sm:$0xff]   ;;  %v3172_v45 = vld [vmem:[%s3380_s26 + $0x2fc] ss:$20 sps:$4 sm:$0xff]  }
  0x50   : > { %2810 = vmatpush1.bf16.msra.mxu1 %v3311_v6  ;;  %2689 = vmatpush3.bf16.msra.mxu0 %v3110_v46  ;;  %v3116_v6 = vld [vmem:[%s3380_s26 + $0x120] ss:$20 sps:$4 sm:$0xff]   ;;  %v3174_v46 = vld [vmem:[%s3380_s26 + $0x2f8] ss:$20 sps:$4 sm:$0xff]  }
  0x51   : > { %2795 = vmatprep.subr.bf16.mxu1 %v3251_v1  ;;  %2690 = vmatprep.subr.bf16.mxu0 %v3252_v39 }
  0x54   : > { %2811 = vmatpush1.bf16.msra.mxu1 %v3322_v8  ;;  %2691 = vmatpush3.bf16.msra.mxu0 %v3133_v47  ;;  %v3119_v8 = vld [vmem:[%s3380_s26 + $0x14c] ss:$20 sps:$4 sm:$0xff]  }
  0x55   : > { %2796 = vmatprep.subr.bf16.mxu1 %v3251_v1  ;;  %v3175_v47 = vld [vmem:[%s3380_s26 + $0x100] ss:$20 sps:$4 sm:$0xff]  }
  0x56   : > { %1362 = vmatmul.mubr.bf16.gmra.mrb[8].mxu1 %v3083_v48  ;;  %1594 = vmatmul.mubr.bf16.gmra.mrb[8].mxu0 %v3084_v49  ;;  %v3176_v48 = vld [vmem:[%s3380_s26 + $0x324] ss:$20 sps:$4 sm:$0xff]   ;;  %v3178_v49 = vld [vmem:[%s3380_s26 + $0x320] ss:$20 sps:$4 sm:$0xff]  }
  0x57   : > { %1369 = vmatprep.mubr.bf16.mxu1 %v3085_v50  ;;  %1601 = vmatprep.mubr.bf16.mxu0 %v3087_v51  ;;  %v3179_v50 = vld [vmem:[%s3380_s26 + $0x128] ss:$20 sps:$4 sm:$0xff]   ;;  %v3180_v51 = vld [vmem:[%s3380_s26 + $0x34c] ss:$20 sps:$4 sm:$0xff]  }
  0x58   : > { %2812 = vmatpush1.bf16.msra.mxu1 %v3335_v10  ;;  %v3122_v10 = vld [vmem:[%s3380_s26 + $0x148] ss:$20 sps:$4 sm:$0xff]  }
  0x59   : > { %2797 = vmatprep.subr.bf16.mxu1 %v3251_v1 }
  0x5c   : > { %2813 = vmatpush1.bf16.msra.mxu1 %v3346_v12  ;;  %v3125_v12 = vld [vmem:[%s3380_s26 + $0x174] ss:$20 sps:$4 sm:$0xff]  }
  0x5d   : > { %2798 = vmatprep.subr.bf16.mxu1 %v3251_v1 }
  0x5e   : > { %1370 = vmatmul.mubr.bf16.gmra.mrb[12].mxu1 %v3089_v52  ;;  %1602 = vmatmul.mubr.bf16.gmra.mrb[12].mxu0 %v3090_v53  ;;  %v3182_v52 = vld [vmem:[%s3380_s26 + $0x348] ss:$20 sps:$4 sm:$0xff]   ;;  %v3183_v53 = vld [vmem:[%s3380_s26 + $0x150] ss:$20 sps:$4 sm:$0xff]  }
  0x5f   : > { %1377 = vmatprep.mubr.bf16.mxu1 %v3092_v54  ;;  %1609 = vmatprep.mubr.bf16.mxu0 %v3094_v55  ;;  %v3184_v54 = vld [vmem:[%s3380_s26 + $0x374] ss:$20 sps:$4 sm:$0xff]   ;;  %v3186_v55 = vld [vmem:[%s3380_s26 + $0x370] ss:$20 sps:$4 sm:$0xff]  }
  0x60   : > { %2814 = vmatpush1.bf16.msra.mxu1 %v3359_v14  ;;  %v3128_v14 = vld [vmem:[%s3380_s26 + $0x170] ss:$20 sps:$4 sm:$0xff]  }
  0x61   : > { %2799 = vmatprep.subr.bf16.mxu1 %v3251_v1 }
  0x64   : > { %2815 = vmatpush1.bf16.msra.mxu1 %v3371_v16  ;;  %v3134_v16 = vld [vmem:[%s3380_s26 + $0x190] ss:$20 sps:$4 sm:$0xff]  }
  0x65   : > { %2800 = vmatprep.subr.bf16.mxu1 %v3251_v1 }
  0x66   : > { %1378 = vmatmul.mubr.bf16.gmra.mrb[16].mxu1 %v3096_v56  ;;  %1610 = vmatmul.mubr.bf16.gmra.mrb[16].mxu0 %v3097_v57  ;;  %v3187_v56 = vld [vmem:[%s3380_s26 + $0x178] ss:$20 sps:$4 sm:$0xff]   ;;  %v3188_v57 = vld [vmem:[%s3380_s26 + $0x39c] ss:$20 sps:$4 sm:$0xff]  }
  0x67   : > { %1385 = vmatprep.mubr.bf16.mxu1 %v3098_v58  ;;  %1617 = vmatprep.mubr.bf16.mxu0 %v3100_v59  ;;  %v322_v58 = vld [vmem:[%s3380_s26 + $0x3c0] sm:$0xff]  ;;  %v3190_v59 = vld [vmem:[%s3380_s26 + $0x398] ss:$20 sps:$4 sm:$0xff]  }
  0x68   : > { %2816 = vmatpush1.bf16.msra.mxu1 %v3387_v18  ;;  %v3136_v18 = vld [vmem:[%s3380_s26 + $0x1bc] ss:$20 sps:$4 sm:$0xff]  }
  0x69   : > { %2801 = vmatprep.subr.bf16.mxu1 %v3251_v1 }
  0x6c   : > { %2817 = vmatpush1.bf16.msra.mxu1 %v3400_v22  ;;  %v3142_v22 = vld [vmem:[%s3380_s26 + $0x1e4] ss:$20 sps:$4 sm:$0xff]  }
  0x6d   : > { %2802 = vmatprep.subr.bf16.mxu1 %v3251_v1 }
  0x6e   : > { %1386 = vmatmul.mubr.bf16.gmra.mrb[20].mxu1 %v3102_v60  ;;  %1618 = vmatmul.mubr.bf16.gmra.mrb[20].mxu0 %v3103_v61  ;;  %v3191_v60 = vld [vmem:[%s3380_s26 + $0x1a0] ss:$20 sps:$4 sm:$0xff]   ;;  %v2490_v61 = vcombine.high %v322_v58, %v322_v58 }
  0x6f   : > { %1393 = vmatprep.mubr.bf16.mxu1 %v3104_v62  ;;  %1625 = vmatprep.mubr.bf16.mxu0 %v3106_v63  ;;  %v2489_v62 = vcombine.low %v322_v58, %v322_v58  ;;  %v3194_v63 = vld [vmem:[%s3380_s26 + $0x1c8] ss:$20 sps:$4 sm:$0xff]  }
  0x70   : > { %2818 = vmatpush1.bf16.msra.mxu1 %v3411_v24  ;;  %v3146_v24 = vld [vmem:[%s3380_s26 + $0x1e0] ss:$20 sps:$4 sm:$0xff]  }
  0x71   : > { %2803 = vmatprep.subr.bf16.mxu1 %v3251_v1 }
  0x74   : > { %2819 = vmatpush1.bf16.msra.mxu1 %v3422_v26  ;;  %v3148_v26 = vld [vmem:[%s3380_s26 + $0x20c] ss:$20 sps:$4 sm:$0xff]  }
  0x75   : > { %2804 = vmatprep.subr.bf16.mxu1 %v3251_v1 }
  0x76   : > { %1394 = vmatmul.mubr.bf16.gmra.mrb[24].mxu1 %v3108_v0  ;;  %1626 = vmatmul.mubr.bf16.gmra.mrb[24].mxu0 %v3109_v2  ;;  %v3197_v0 = vld [vmem:[%s3380_s26 + $0x214] ss:$20 sps:$4 sm:$0xff]   ;;  %v3195_v2 = vld [vmem:[%s3380_s26 + $0x210] ss:$20 sps:$4 sm:$0xff]  }
  0x77   : > { %1401 = vmatprep.mubr.bf16.mxu1 %v3111_v3  ;;  %1633 = vmatprep.mubr.bf16.mxu0 %v3113_v4  ;;  %v3198_v3 = vld [vmem:[%s3380_s26 + $0x1f0] ss:$20 sps:$4 sm:$0xff]  }
  0x78   : > { %2820 = vmatpush1.bf16.msra.mxu1 %v3433_v28  ;;  %v3151_v28 = vld [vmem:[%s3380_s26 + $0x10] ss:$20 sps:$4 sm:$0xff]  }
  0x79   : > { %2805 = vmatprep.subr.bf16.mxu1 %v3251_v1  ;;  %v3199_v4 = vld [vmem:[%s3380_s26 + $0x23c] ss:$20 sps:$4 sm:$0xff]  }
  0x7c   : > { %2821 = vmatpush1.bf16.msra.mxu1 %v3444_v30  ;;  %v3154_v30 = vld [vmem:[%s3380_s26 + $0x230] ss:$20 sps:$4 sm:$0xff]  }
  0x7d   : > { %2806 = vmatprep.subr.bf16.mxu1 %v3251_v1 }
  0x7e   : > { %1402 = vmatmul.mubr.bf16.gmra.mrb[28].mxu1 %v3115_v5  ;;  %1634 = vmatmul.mubr.bf16.gmra.mrb[28].mxu0 %v3116_v6  ;;  %v3201_v5 = vld [vmem:[%s3380_s26 + $0x238] ss:$20 sps:$4 sm:$0xff]  }
  0x7f   : > { %1409 = vmatprep.mubr.bf16.mxu1 %v3117_v7  ;;  %1641 = vmatprep.mubr.bf16.mxu0 %v3119_v8  ;;  %v3202_v6 = vld [vmem:[%s3380_s26 + $0x218] ss:$20 sps:$4 sm:$0xff]  }
  0x80   : > { %2822 = vmatpush1.bf16.msra.mxu1 %v3455_v32  ;;  %v3156_v32 = vld [vmem:[%s3380_s26 + $0x25c] ss:$20 sps:$4 sm:$0xff]   ;;  %v3203_v7 = vld [vmem:[%s3380_s26 + $0x264] ss:$20 sps:$4 sm:$0xff]  }
  0x81   : > { %2807 = vmatprep.subr.bf16.mxu1 %v3251_v1  ;;  %v3131_v1 = vld [vmem:[%s3380_s26 + $0x19c] ss:$20 sps:$4 sm:$0xff]  }
  0x84   : > { %2823 = vmatpush1.bf16.msra.mxu1 %v3466_v34  ;;  %v3159_v34 = vld [vmem:[%s3380_s26 + $0x60] ss:$20 sps:$4 sm:$0xff]  }
  0x86   : > { %1410 = vmatmul.mubr.bf16.gmra.mrb[32].mxu1 %v3121_v9  ;;  %1642 = vmatmul.mubr.bf16.gmra.mrb[32].mxu0 %v3122_v10  ;;  %v3205_v10 = vld [vmem:[%s3380_s26 + $0x260] ss:$20 sps:$4 sm:$0xff]  }
  0x87   : > { %1417 = vmatprep.mubr.bf16.mxu1 %v3123_v11  ;;  %1649 = vmatprep.mubr.bf16.mxu0 %v3125_v12  ;;  %v3206_v11 = vld [vmem:[%s3380_s26 + $0x240] ss:$20 sps:$4 sm:$0xff]  }
  0x8e   : > { %1418 = vmatmul.mubr.bf16.gmra.mrb[36].mxu1 %v3127_v13  ;;  %1650 = vmatmul.mubr.bf16.gmra.mrb[36].mxu0 %v3128_v14  ;;  %v3207_v13 = vld [vmem:[%s3380_s26 + $0x28c] ss:$20 sps:$4 sm:$0xff]  }
  0x8f   : > { %1425 = vmatprep.mubr.bf16.mxu1 %v3129_v15  ;;  %1657 = vmatprep.mubr.bf16.mxu0 %v3131_v1 }
  0x96   : > { %1426 = vmatmul.mubr.bf16.gmra.mrb[40].mxu1 %v3134_v16  ;;  %1658 = vmatmul.mubr.bf16.gmra.mrb[40].mxu0 %v3135_v17  ;;  %v3209_v16 = vld [vmem:[%s3380_s26 + $0x288] ss:$20 sps:$4 sm:$0xff]  }
  0x97   : > { %1433 = vmatprep.mubr.bf16.mxu1 %v3136_v18  ;;  %1665 = vmatprep.mubr.bf16.mxu0 %v3138_v19  ;;  %v3210_v17 = vld [vmem:[%s3380_s26 + $0x268] ss:$20 sps:$4 sm:$0xff]  }
  0x98   : > { %v3211_v19 = vld [vmem:[%s3380_s26 + $0x2b4] ss:$20 sps:$4 sm:$0xff]  }
  0x9e   : > { %1434 = vmatmul.mubr.bf16.gmra.mrb[44].mxu1 %v3140_v20  ;;  %1666 = vmatmul.mubr.bf16.gmra.mrb[44].mxu0 %v3141_v21 }
  0x9f   : > { %1441 = vmatprep.mubr.bf16.mxu1 %v3142_v22  ;;  %1673 = vmatprep.mubr.bf16.mxu0 %v3144_v23  ;;  %v3213_v23 = vld [vmem:[%s3380_s26 + $0x2b0] ss:$20 sps:$4 sm:$0xff]  }
  0xa6   : > { %1442 = vmatmul.mubr.bf16.gmra.mrb[48].mxu1 %v3146_v24  ;;  %1674 = vmatmul.mubr.bf16.gmra.mrb[48].mxu0 %v3147_v25  ;;  %v3214_v24 = vld [vmem:[%s3380_s26 + $0x290] ss:$20 sps:$4 sm:$0xff]  }
  0xa7   : > { %1449 = vmatprep.mubr.bf16.mxu1 %v3148_v26  ;;  %2692 = vmatprep.mubr.msk.bf16.mxu0 %vm3253_vm0, %v3252_v39  ;;  %v3215_v26 = vld [vmem:[%s3380_s26 + $0x2dc] ss:$20 sps:$4 sm:$0xff]  }
  0xae   : > { %1450 = vmatmul.mubr.bf16.gmra.mrb[52].mxu1 %v3150_v27  ;;  %2693 = vmatmul.mubr.msk.bf16.vlgmr.msra.gmra.mrb[0].mxu0 %vm1237_vm1, %v3151_v28 }
  0xaf   : > { %1457 = vmatprep.mubr.bf16.mxu1 %v3152_v29  ;;  %2696 = vmatprep.mubr.msk.bf16.mxu0 %vm3253_vm0, %v3252_v39 }
  0xb6   : > { %1458 = vmatmul.mubr.bf16.gmra.mrb[56].mxu1 %v3154_v30  ;;  %2697 = vmatmul.mubr.msk.bf16.gmra.mrb[4].mxu0 %vm1237_vm1, %v3155_v31  ;;  %v3217_v30 = vld [vmem:[%s3380_s26 + $0x2d8] ss:$20 sps:$4 sm:$0xff]  }
  0xb7   : > { %1465 = vmatprep.mubr.bf16.mxu1 %v3156_v32  ;;  %2700 = vmatprep.mubr.msk.bf16.mxu0 %vm3253_vm0, %v3252_v39  ;;  %v3218_v31 = vld [vmem:[%s3380_s26 + $0x2b8] ss:$20 sps:$4 sm:$0xff]  }
  0xbe   : > { %1466 = vmatmul.mubr.bf16.gmra.mrb[60].mxu1 %v3158_v33  ;;  %2701 = vmatmul.mubr.msk.bf16.gmra.mrb[8].mxu0 %vm1237_vm1, %v3159_v34  ;;  %v3219_v33 = vld [vmem:[%s3380_s26 + $0x304] ss:$20 sps:$4 sm:$0xff]  }
  0xbf   : > { %1473 = vmatprep.mubr.bf16.mxu1 %v3160_v35  ;;  %2704 = vmatprep.mubr.msk.bf16.mxu0 %vm3253_vm0, %v3252_v39 }
  0xc6   : > { %1474 = vmatmul.mubr.bf16.gmra.mrb[64].mxu1 %v3162_v36  ;;  %2705 = vmatmul.mubr.msk.bf16.gmra.mrb[12].mxu0 %vm1237_vm1, %v3163_v37  ;;  %v3221_v37 = vld [vmem:[%s3380_s26 + $0x300] ss:$20 sps:$4 sm:$0xff]  }
  0xc7   : > { %1481 = vmatprep.mubr.bf16.mxu1 %v3164_v38  ;;  %2708 = vmatprep.mubr.msk.bf16.mxu0 %vm3253_vm0, %v3252_v39  ;;  %v3222_v38 = vld [vmem:[%s3380_s26 + $0x2e0] ss:$20 sps:$4 sm:$0xff]  }
  0xce   : > { %1482 = vmatmul.mubr.bf16.gmra.mrb[68].mxu1 %v3166_v40  ;;  %2709 = vmatmul.mubr.msk.bf16.gmra.mrb[16].mxu0 %vm1237_vm1, %v3167_v41  ;;  %v3223_v41 = vld [vmem:[%s3380_s26 + $0x32c] ss:$20 sps:$4 sm:$0xff]  }
  0xcf   : > { %1489 = vmatprep.mubr.bf16.mxu1 %v3168_v42  ;;  %2712 = vmatprep.mubr.msk.bf16.mxu0 %vm3253_vm0, %v3252_v39 }
  0xd6   : > { %1490 = vmatmul.mubr.bf16.gmra.mrb[72].mxu1 %v3170_v43  ;;  %2713 = vmatmul.mubr.msk.bf16.gmra.mrb[20].mxu0 %vm1237_vm1, %v3171_v44 }
  0xd7   : > { %1497 = vmatprep.mubr.bf16.mxu1 %v3172_v45  ;;  %2716 = vmatprep.mubr.msk.bf16.mxu0 %vm3253_vm0, %v3252_v39  ;;  %v3225_v45 = vld [vmem:[%s3380_s26 + $0x328] ss:$20 sps:$4 sm:$0xff]  }
  0xde   : > { %1498 = vmatmul.mubr.bf16.gmra.mrb[76].mxu1 %v3174_v46  ;;  %2717 = vmatmul.mubr.msk.bf16.gmra.mrb[24].mxu0 %vm1237_vm1, %v3175_v47  ;;  %v3226_v46 = vld [vmem:[%s3380_s26 + $0x308] ss:$20 sps:$4 sm:$0xff]  }
  0xdf   : > { %1505 = vmatprep.mubr.bf16.mxu1 %v3176_v48  ;;  %2720 = vmatprep.mubr.msk.bf16.mxu0 %vm3253_vm0, %v3252_v39  ;;  %v3227_v48 = vld [vmem:[%s3380_s26 + $0x354] ss:$20 sps:$4 sm:$0xff]  }
  0xe6   : > { %1506 = vmatmul.mubr.bf16.gmra.mrb[80].mxu1 %v3178_v49  ;;  %2721 = vmatmul.mubr.msk.bf16.gmra.mrb[28].mxu0 %vm1237_vm1, %v3179_v50 }
  0xe7   : > { %1513 = vmatprep.mubr.bf16.mxu1 %v3180_v51  ;;  %2724 = vmatprep.mubr.msk.bf16.mxu0 %vm3253_vm0, %v3252_v39 }
  0xee   : > { %1514 = vmatmul.mubr.bf16.gmra.mrb[84].mxu1 %v3182_v52  ;;  %2725 = vmatmul.mubr.msk.bf16.gmra.mrb[32].mxu0 %vm1237_vm1, %v3183_v53  ;;  %v3229_v52 = vld [vmem:[%s3380_s26 + $0x350] ss:$20 sps:$4 sm:$0xff]  }
  0xef   : > { %1521 = vmatprep.mubr.bf16.mxu1 %v3184_v54  ;;  %2728 = vmatprep.mubr.msk.bf16.mxu0 %vm3253_vm0, %v3252_v39  ;;  %v3230_v53 = vld [vmem:[%s3380_s26 + $0x330] ss:$20 sps:$4 sm:$0xff]  }
  0xf6   : > { %1522 = vmatmul.mubr.bf16.gmra.mrb[88].mxu1 %v3186_v55  ;;  %2729 = vmatmul.mubr.msk.bf16.gmra.mrb[36].mxu0 %vm1237_vm1, %v3187_v56  ;;  %v3231_v55 = vld [vmem:[%s3380_s26 + $0x37c] ss:$20 sps:$4 sm:$0xff]  }
  0xf7   : > { %1529 = vmatprep.mubr.bf16.mxu1 %v3188_v57  ;;  %2732 = vmatprep.mubr.msk.bf16.mxu0 %vm3253_vm0, %v3252_v39 }
  0xfe   : > { %1530 = vmatmul.mubr.bf16.gmra.mrb[92].mxu1 %v3190_v59  ;;  %2733 = vmatmul.mubr.msk.bf16.gmra.mrb[40].mxu0 %vm1237_vm1, %v3191_v60  ;;  %v3233_v59 = vld [vmem:[%s3380_s26 + $0x378] ss:$20 sps:$4 sm:$0xff]  }
  0xff   : > { %1537 = vmatprep.mubr.bf16.mxu1 %v2490_v61  ;;  %2736 = vmatprep.mubr.msk.bf16.mxu0 %vm3253_vm0, %v3252_v39  ;;  %v3234_v60 = vld [vmem:[%s3380_s26 + $0x358] ss:$20 sps:$4 sm:$0xff]  }
 0x106   : > { %1538 = vmatmul.mubr.bf16.gmra.mrb[96].mxu1 %v2489_v62  ;;  %2737 = vmatmul.mubr.msk.bf16.gmra.mrb[44].mxu0 %vm1237_vm1, %v3194_v63  ;;  %v3235_v62 = vld [vmem:[%s3380_s26 + $0x3a4] ss:$20 sps:$4 sm:$0xff]  }
 0x107   : > { %1681 = vmatprep.mubr.bf16.mxu1 %v3197_v0  ;;  %2740 = vmatprep.mubr.msk.bf16.mxu0 %vm3253_vm0, %v3252_v39  ;;  %v323_v0 = vld [vmem:[%s3380_s26 + $0x3c8] sm:$0xff] }
 0x10e   : > { %1682 = vmatmul.mubr.bf16.vlgmr.msra.gmra.mrb[52].mxu1 %v3195_v2  ;;  %2741 = vmatmul.mubr.msk.bf16.gmra.mrb[48].mxu0 %vm1237_vm1, %v3198_v3 }
 0x10f   : > { %1689 = vmatprep.mubr.bf16.mxu1 %v3199_v4  ;;  %2744 = vmatprep.mubr.msk.bf16.mxu0 %vm3253_vm0, %v3252_v39  ;;  %v3237_v4 = vld [vmem:[%s3380_s26 + $0x3a0] ss:$20 sps:$4 sm:$0xff]  }
 0x116   : > { %1690 = vmatmul.mubr.bf16.gmra.mrb[56].mxu1 %v3201_v5  ;;  %2745 = vmatmul.mubr.msk.bf16.gmra.mrb[52].mxu0 %vm1237_vm1, %v3202_v6  ;;  %v3238_v5 = vld [vmem:[%s3380_s26 + $0x380] ss:$20 sps:$4 sm:$0xff]  }
 0x117   : > { %1697 = vmatprep.mubr.bf16.mxu1 %v3203_v7  ;;  %2748 = vmatprep.mubr.msk.bf16.mxu0 %vm3253_vm0, %v3252_v39  ;;  %v2492_v7 = vcombine.high %v323_v0, %v323_v0 }
 0x119   : > { %v3654_v8 = vpop.f32.mrb[0].mxu1 }
 0x11a   : > { %v1349_v9 = vpop.f32.mrb[1].mxu1 }
 0x11b   : > { %v3658_v12 = vpop.f32.mrb[2].mxu1 }
 0x11c   : > { %v1352_v14 = vpop.f32.mrb[3].mxu1 }
 0x11d   : > { %v3241_v14 = vld [vmem:[%s3380_s26 + $0x3a8] ss:$20 sps:$4 sm:$0xff]  }
 0x11e   : > { %1698 = vmatmul.mubr.bf16.gmra.mrb[60].mxu1 %v3205_v10  ;;  %2749 = vmatmul.mubr.msk.bf16.gmra.mrb[56].mxu0 %vm1237_vm1, %v3206_v11 }
 0x11f   : > { %1705 = vmatprep.mubr.bf16.mxu1 %v3207_v13  ;;  %2752 = vmatprep.mubr.msk.bf16.mxu0 %vm3253_vm0, %v3252_v39  ;;  %v2491_v13 = vcombine.low %v323_v0, %v323_v0 }
 0x121   : > { %v3664_v15 = vpop.f32.mrb[4].mxu1 }
 0x122   : > { %v1357_v1 = vpop.f32.mrb[5].mxu1 }
 0x123   : > { %v3668_v18 = vpop.f32.mrb[6].mxu1 }
 0x124   : > { %v1360_v20 = vpop.f32.mrb[7].mxu1 }
 0x125   : > { %v3242_v20 = vld [vmem:[%s3380_s26 + $0x3d0] ss:$0 sps:$4 sm:$0xff]  }
 0x126   : > { %1706 = vmatmul.mubr.bf16.gmra.mrb[64].mxu1 %v3209_v16  ;;  %2753 = vmatmul.mubr.msk.bf16.gmra.mrb[60].mxu0 %vm1237_vm1, %v3210_v17 }
 0x127   : > { %1713 = vmatprep.mubr.bf16.mxu1 %v3211_v19  ;;  %2756 = vmatprep.mubr.msk.bf16.mxu0 %vm3253_vm0, %v3252_v39 }
 0x129   : > { %v3674_v21 = vpop.f32.mrb[8].mxu1 }
 0x12a   : > { %v1365_v22 = vpop.f32.mrb[9].mxu1 }
 0x12b   : > { %v3678_v25 = vpop.f32.mrb[10].mxu1 }
 0x12c   : > { %v1368_v27 = vpop.f32.mrb[11].mxu1 }
 0x12e   : > { %1714 = vmatmul.mubr.bf16.gmra.mrb[68].mxu1 %v3213_v23  ;;  %2757 = vmatmul.mubr.msk.bf16.gmra.mrb[64].mxu0 %vm1237_vm1, %v3214_v24 }
 0x12f   : > { %1721 = vmatprep.mubr.bf16.mxu1 %v3215_v26  ;;  %2760 = vmatprep.mubr.msk.bf16.mxu0 %vm3253_vm0, %v3252_v39 }
 0x131   : > { %v3684_v28 = vpop.f32.mrb[12].mxu1 }
 0x132   : > { %v1373_v29 = vpop.f32.mrb[13].mxu1 }
 0x133   : > { %v3688_v32 = vpop.f32.mrb[14].mxu1 }
 0x134   : > { %v1376_v34 = vpop.f32.mrb[15].mxu1 }
 0x135   : > { %v3769_v34 = vld [vmem:[%s3955_s2] ss:$0 sm:$0xff] }
 0x136   : > { %1722 = vmatmul.mubr.bf16.gmra.mrb[72].mxu1 %v3217_v30  ;;  %2761 = vmatmul.mubr.msk.bf16.gmra.mrb[68].mxu0 %vm1237_vm1, %v3218_v31 }
 0x137   : > { %1729 = vmatprep.mubr.bf16.mxu1 %v3219_v33  ;;  %2764 = vmatprep.mubr.msk.bf16.mxu0 %vm3253_vm0, %v3252_v39 }
 0x139   : > { %v3694_v35 = vpop.f32.mrb[16].mxu1 }
 0x13a   : > { %v1381_v36 = vpop.f32.mrb[17].mxu1 }
 0x13b   : > { %v3698_v40 = vpop.f32.mrb[18].mxu1  ;;  %v1348_v36 = vadd.f32 %v3769_v34, %v3654_v8 }
 0x13c   : > { %v1384_v42 = vpop.f32.mrb[19].mxu1 }
 0x13e   : > { %1730 = vmatmul.mubr.bf16.gmra.mrb[76].mxu1 %v3221_v37  ;;  %2765 = vmatmul.mubr.msk.bf16.gmra.mrb[72].mxu0 %vm1237_vm1, %v3222_v38  ;;  %v1351_v38 = vadd.f32 %v3769_v34, %v3658_v12  ;;  %v1356_v12 = vadd.f32 %v3769_v34, %v3664_v15  ;;  %v1364_v15 = vadd.f32 %v3769_v34, %v3674_v21 }
 0x13f   : > { %1737 = vmatprep.mubr.bf16.mxu1 %v3223_v41  ;;  %2768 = vmatprep.mubr.msk.bf16.mxu0 %vm3253_vm0, %v3252_v39  ;;  %v1372_v21 = vadd.f32 %v3769_v34, %v3684_v28  ;;  %v1380_v28 = vadd.f32 %v3769_v34, %v3694_v35 }
 0x141   : > { %v3704_v43 = vpop.f32.mrb[20].mxu1 }
 0x142   : > { %v1389_v44 = vpop.f32.mrb[21].mxu1  ;;  %v1388_v35 = vadd.f32 %v3769_v34, %v3704_v43 }
 0x143   : > { %v3708_v47 = vpop.f32.mrb[22].mxu1 }
 0x144   : > { %v1392_v49 = vpop.f32.mrb[23].mxu1 }
 0x146   : > { %1738 = vmatmul.mubr.bf16.gmra.mrb[80].mxu1 %v3225_v45  ;;  %2769 = vmatmul.mubr.msk.bf16.gmra.mrb[76].mxu0 %vm1237_vm1, %v3226_v46 }
 0x147   : > { %1745 = vmatprep.mubr.bf16.mxu1 %v3227_v48  ;;  %2772 = vmatprep.mubr.msk.bf16.mxu0 %vm3253_vm0, %v3252_v39 }
 0x149   : > { %v3714_v50 = vpop.f32.mrb[24].mxu1 }
 0x14a   : > { %v1397_v51 = vpop.f32.mrb[25].mxu1  ;;  %v1396_v43 = vadd.f32 %v3769_v34, %v3714_v50 }
 0x14b   : > { %v3718_v54 = vpop.f32.mrb[26].mxu1 }
 0x14c   : > { %v1400_v56 = vpop.f32.mrb[27].mxu1 }
 0x14e   : > { %1746 = vmatmul.mubr.bf16.gmra.mrb[84].mxu1 %v3229_v52  ;;  %2773 = vmatmul.mubr.msk.bf16.gmra.mrb[80].mxu0 %vm1237_vm1, %v3230_v53  ;;  %v1359_v53 = vadd.f32 %v3769_v34, %v3668_v18  ;;  %v1367_v18 = vadd.f32 %v3769_v34, %v3678_v25  ;;  %v1375_v25 = vadd.f32 %v3769_v34, %v3688_v32 }
 0x14f   : > { %1753 = vmatprep.mubr.bf16.mxu1 %v3231_v55  ;;  %2776 = vmatprep.mubr.msk.bf16.mxu0 %vm3253_vm0, %v3252_v39  ;;  %v1383_v32 = vadd.f32 %v3769_v34, %v3698_v40  ;;  %v1391_v40 = vadd.f32 %v3769_v34, %v3708_v47  ;;  %v1399_v47 = vadd.f32 %v3769_v34, %v3718_v54 }
 0x151   : > { %v3724_v57 = vpop.f32.mrb[28].mxu1 }
 0x152   : > { %v1405_v58 = vpop.f32.mrb[29].mxu1  ;;  %v1404_v50 = vadd.f32 %v3769_v34, %v3724_v57 }
 0x153   : > { %v3728_v61 = vpop.f32.mrb[30].mxu1 }
 0x154   : > { %v1408_v63 = vpop.f32.mrb[31].mxu1  ;;  %v1407_v54 = vadd.f32 %v3769_v34, %v3728_v61 }
 0x156   : > { %1754 = vmatmul.mubr.bf16.gmra.mrb[88].mxu1 %v3233_v59  ;;  %2777 = vmatmul.mubr.msk.bf16.gmra.mrb[84].mxu0 %vm1237_vm1, %v3234_v60 }
 0x157   : > { %1761 = vmatprep.mubr.bf16.mxu1 %v3235_v62  ;;  %2780 = vmatprep.mubr.msk.bf16.mxu0 %vm3253_vm0, %v3252_v39 }
 0x159   : > { %v3735_v2 = vpop.f32.mrb[32].mxu1 }
 0x15a   : > { %v1413_v3 = vpop.f32.mrb[33].mxu1  ;;  %v1412_v57 = vadd.f32 %v3769_v34, %v3735_v2 }
 0x15b   : > { %v3739_v6 = vpop.f32.mrb[34].mxu1 }
 0x15c   : > { %v1416_v9 = vpop.f32.mrb[35].mxu1  ;;  %v1415_v61 = vadd.f32 %v3769_v34, %v3739_v6 }
 0x15e   : > { %1762 = vmatmul.mubr.bf16.gmra.mrb[92].mxu1 %v3237_v4  ;;  %2781 = vmatmul.mubr.msk.bf16.gmra.mrb[88].mxu0 %vm1237_vm1, %v3238_v5 }
 0x15f   : > { %1769 = vmatprep.mubr.bf16.mxu1 %v2492_v7  ;;  %2784 = vmatprep.mubr.msk.bf16.mxu0 %vm3253_vm0, %v3252_v39 }
 0x161   : > { %v3744_v10 = vpop.f32.mrb[36].mxu1 }
 0x162   : > { %v1421_v11 = vpop.f32.mrb[37].mxu1  ;;  %v1420_v2 = vadd.f32 %v3769_v34, %v3744_v10 }
 0x163   : > { %v3747_v1 = vpop.f32.mrb[38].mxu1 }
 0x164   : > { %v1424_v16 = vpop.f32.mrb[39].mxu1  ;;  %v1423_v6 = vadd.f32 %v3769_v34, %v3747_v1 }
 0x166   : > { %1770 = vmatmul.mubr.bf16.gmra.mrb[96].mxu1 %v2491_v13  ;;  %2785 = vmatmul.mubr.msk.bf16.gmra.mrb[92].mxu0 %vm1237_vm1, %v3241_v14 }
 0x167   : > { %2788 = vmatprep.mubr.msk.bf16.mxu0 %vm3253_vm0, %v3252_v39 }
 0x169   : > { %v3752_v17 = vpop.f32.mrb[40].mxu1 }
 0x16a   : > { %v1429_v19 = vpop.f32.mrb[41].mxu1  ;;  %v1428_v10 = vadd.f32 %v3769_v34, %v3752_v17 }
 0x16b   : > { %v3755_v22 = vpop.f32.mrb[42].mxu1 }
 0x16c   : > { %v1432_v23 = vpop.f32.mrb[43].mxu1  ;;  %v1431_v1 = vadd.f32 %v3769_v34, %v3755_v22 }
 0x16e   : > { %2789 = vmatmul.mubr.msk.bf16.gmra.mrb[96].mxu0 %vm1237_vm1, %v3242_v20 }
 0x171   : > { %v3758_v24 = vpop.f32.mrb[44].mxu1 }
 0x172   : > { %v1437_v26 = vpop.f32.mrb[45].mxu1  ;;  %v1436_v17 = vadd.f32 %v3769_v34, %v3758_v24 }
 0x173   : > { %v3760_v27 = vpop.f32.mrb[46].mxu1 }
 0x174   : > { %v1440_v29 = vpop.f32.mrb[47].mxu1  ;;  %v1439_v22 = vadd.f32 %v3769_v34, %v3760_v27 }
 0x179   : > { %v3762_v30 = vpop.f32.mrb[48].mxu1 }
 0x17a   : > { %v1445_v31 = vpop.f32.mrb[49].mxu1  ;;  %v1444_v24 = vadd.f32 %v3769_v34, %v3762_v30 }
 0x17b   : > { %v3764_v39 = vpop.f32.mrb[50].mxu1 }
 0x17c   : > { %v1448_v33 = vpop.f32.mrb[51].mxu1 }
 0x181   : > { %v1811_v37 = vpop.f32.mrb[0].mxu0 }
 0x182   : > { %v2825_v41 = vadd.f32 %v1811_v37, %v1348_v36  ;;  %v2694_v42 = vpop.f32.mrb[1].mxu0 }
 0x183   : > { %v1814_v44 = vpop.f32.mrb[2].mxu0 }
 0x184   : > { %v2009_v45 = vmax.f32 %v2825_v41, 0.0  ;;  %v2827_v46 = vadd.f32 %v1814_v44, %v1351_v38  ;;  %v2695_v48 = vpop.f32.mrb[3].mxu0 }
 0x186   : > { %v2606_v8 = vpack.c.bf16 %v2009_v45, %v2009_v45  ;;  %v2010_v49 = vmax.f32 %v2827_v46, 0.0 }
 0x188   : > { %2256 = vst.msk [vmem:[%s3779_s20] sm:$0xf] %vm2255_vm2, %v2606_v8  ;;  %v2607_v51 = vpack.c.bf16 %v2010_v49, %v2010_v49 }
 0x189   : > { %v1819_v52 = vpop.f32.mrb[4].mxu0 }
 0x18a   : > { %2257 = vst.msk [vmem:[%s3779_s20 + $0x4] sm:$0xf] %vm2255_vm2, %v2607_v51  ;;  %v2829_v55 = vadd.f32 %v1819_v52, %v1356_v12  ;;  %v2698_v56 = vpop.f32.mrb[5].mxu0 }
 0x18b   : > { %v1822_v58 = vpop.f32.mrb[6].mxu0 }
 0x18c   : > { %v2011_v59 = vmax.f32 %v2829_v55, 0.0  ;;  %v2831_v60 = vadd.f32 %v1822_v58, %v1359_v53  ;;  %v2699_v62 = vpop.f32.mrb[7].mxu0 }
 0x18e   : > { %v2608_v63 = vpack.c.bf16 %v2011_v59, %v2011_v59  ;;  %v2012_v0 = vmax.f32 %v2831_v60, 0.0 }
 0x190   : > { %2258 = vst.msk [vmem:[%s3779_s20 + $0x8] sm:$0xf] %vm2255_vm2, %v2608_v63  ;;  %v2609_v3 = vpack.c.bf16 %v2012_v0, %v2012_v0 }
 0x191   : > { %v1827_v4 = vpop.f32.mrb[8].mxu0 }
 0x192   : > { %2259 = vst.msk [vmem:[%s3779_s20 + $0xc] sm:$0xf] %vm2255_vm2, %v2609_v3  ;;  %v2833_v5 = vadd.f32 %v1827_v4, %v1364_v15  ;;  %v2702_v7 = vpop.f32.mrb[9].mxu0 }
 0x193   : > { %v1830_v9 = vpop.f32.mrb[10].mxu0 }
 0x194   : > { %v2013_v11 = vmax.f32 %v2833_v5, 0.0  ;;  %v2835_v13 = vadd.f32 %v1830_v9, %v1367_v18  ;;  %v2703_v14 = vpop.f32.mrb[11].mxu0 }
 0x196   : > { %v2610_v16 = vpack.c.bf16 %v2013_v11, %v2013_v11  ;;  %v2014_v19 = vmax.f32 %v2835_v13, 0.0 }
 0x198   : > { %2260 = vst.msk [vmem:[%s3779_s20 + $0x10] sm:$0xf] %vm2255_vm2, %v2610_v16  ;;  %v2611_v20 = vpack.c.bf16 %v2014_v19, %v2014_v19 }
 0x199   : > { %v1835_v23 = vpop.f32.mrb[12].mxu0 }
 0x19a   : > { %2261 = vst.msk [vmem:[%s3779_s20 + $0x14] sm:$0xf] %vm2255_vm2, %v2611_v20  ;;  %v2837_v26 = vadd.f32 %v1835_v23, %v1372_v21  ;;  %v2706_v29 = vpop.f32.mrb[13].mxu0 }
 0x19b   : > { %v1838_v31 = vpop.f32.mrb[14].mxu0 }
 0x19c   : > { %v2015_v33 = vmax.f32 %v2837_v26, 0.0  ;;  %v2839_v36 = vadd.f32 %v1838_v31, %v1375_v25  ;;  %v2707_v37 = vpop.f32.mrb[15].mxu0 }
 0x19e   : > { %v2612_v38 = vpack.c.bf16 %v2015_v33, %v2015_v33  ;;  %v2016_v41 = vmax.f32 %v2839_v36, 0.0 }
 0x1a0   : > { %2262 = vst.msk [vmem:[%s3779_s20 + $0x18] sm:$0xf] %vm2255_vm2, %v2612_v38  ;;  %v2613_v42 = vpack.c.bf16 %v2016_v41, %v2016_v41 }
 0x1a1   : > { %v1843_v44 = vpop.f32.mrb[16].mxu0 }
 0x1a2   : > { %2263 = vst.msk [vmem:[%s3779_s20 + $0x1c] sm:$0xf] %vm2255_vm2, %v2613_v42  ;;  %v2841_v45 = vadd.f32 %v1843_v44, %v1380_v28  ;;  %v2710_v46 = vpop.f32.mrb[17].mxu0 }
 0x1a3   : > { %v1846_v48 = vpop.f32.mrb[18].mxu0 }
 0x1a4   : > { %v2017_v8 = vmax.f32 %v2841_v45, 0.0  ;;  %v2843_v49 = vadd.f32 %v1846_v48, %v1383_v32  ;;  %v2711_v12 = vpop.f32.mrb[19].mxu0 }
 0x1a6   : > { %v2614_v51 = vpack.c.bf16 %v2017_v8, %v2017_v8  ;;  %v2018_v52 = vmax.f32 %v2843_v49, 0.0 }
 0x1a8   : > { %2264 = vst.msk [vmem:[%s3779_s20 + $0x20] sm:$0xf] %vm2255_vm2, %v2614_v51  ;;  %v2615_v53 = vpack.c.bf16 %v2018_v52, %v2018_v52 }
 0x1a9   : > { %v1851_v55 = vpop.f32.mrb[20].mxu0 }
 0x1aa   : > { %2265 = vst.msk [vmem:[%s3779_s20 + $0x24] sm:$0xf] %vm2255_vm2, %v2615_v53  ;;  %v2845_v56 = vadd.f32 %v1851_v55, %v1388_v35  ;;  %v2714_v58 = vpop.f32.mrb[21].mxu0 }
 0x1ab   : > { %v1854_v59 = vpop.f32.mrb[22].mxu0 }
 0x1ac   : > { %v2019_v60 = vmax.f32 %v2845_v56, 0.0  ;;  %v2847_v62 = vadd.f32 %v1854_v59, %v1391_v40  ;;  %v2715_v63 = vpop.f32.mrb[23].mxu0 }
 0x1ae   : > { %v2616_v0 = vpack.c.bf16 %v2019_v60, %v2019_v60  ;;  %v2020_v15 = vmax.f32 %v2847_v62, 0.0 }
 0x1b0   : > { %2266 = vst.msk [vmem:[%s3779_s20 + $0x28] sm:$0xf] %vm2255_vm2, %v2616_v0  ;;  %v2617_v3 = vpack.c.bf16 %v2020_v15, %v2020_v15 }
 0x1b1   : > { %v1859_v4 = vpop.f32.mrb[24].mxu0 }
 0x1b2   : > { %2267 = vst.msk [vmem:[%s3779_s20 + $0x2c] sm:$0xf] %vm2255_vm2, %v2617_v3  ;;  %v2849_v18 = vadd.f32 %v1859_v4, %v1396_v43  ;;  %v2718_v5 = vpop.f32.mrb[25].mxu0 }
 0x1b3   : > { %v1862_v7 = vpop.f32.mrb[26].mxu0 }
 0x1b4   : > { %v2021_v9 = vmax.f32 %v2849_v18, 0.0  ;;  %v2851_v11 = vadd.f32 %v1862_v7, %v1399_v47  ;;  %v2719_v13 = vpop.f32.mrb[27].mxu0 }
 0x1b6   : > { %v2618_v14 = vpack.c.bf16 %v2021_v9, %v2021_v9  ;;  %v2022_v16 = vmax.f32 %v2851_v11, 0.0 }
 0x1b8   : > { %2268 = vst.msk [vmem:[%s3779_s20 + $0x30] sm:$0xf] %vm2255_vm2, %v2618_v14  ;;  %v2619_v19 = vpack.c.bf16 %v2022_v16, %v2022_v16 }
 0x1b9   : > { %v1867_v21 = vpop.f32.mrb[28].mxu0 }
 0x1ba   : > { %2269 = vst.msk [vmem:[%s3779_s20 + $0x34] sm:$0xf] %vm2255_vm2, %v2619_v19  ;;  %v2853_v20 = vadd.f32 %v1867_v21, %v1404_v50  ;;  %v2722_v23 = vpop.f32.mrb[29].mxu0 }
 0x1bb   : > { %v1870_v25 = vpop.f32.mrb[30].mxu0 }
 0x1bc   : > { %v2023_v26 = vmax.f32 %v2853_v20, 0.0  ;;  %v2855_v29 = vadd.f32 %v1870_v25, %v1407_v54  ;;  %v2723_v31 = vpop.f32.mrb[31].mxu0  ;;  %v1447_v20 = vadd.f32 %v3769_v34, %v3764_v39 }
 0x1be   : > { %v2620_v33 = vpack.c.bf16 %v2023_v26, %v2023_v26  ;;  %v2024_v36 = vmax.f32 %v2855_v29, 0.0 }
 0x1c0   : > { %2270 = vst.msk [vmem:[%s3779_s20 + $0x38] sm:$0xf] %vm2255_vm2, %v2620_v33  ;;  %v2621_v37 = vpack.c.bf16 %v2024_v36, %v2024_v36 }
 0x1c1   : > { %v1875_v38 = vpop.f32.mrb[32].mxu0 }
 0x1c2   : > { %2271 = vst.msk [vmem:[%s3779_s20 + $0x3c] sm:$0xf] %vm2255_vm2, %v2621_v37  ;;  %v2857_v41 = vadd.f32 %v1875_v38, %v1412_v57  ;;  %v2726_v28 = vpop.f32.mrb[33].mxu0 }
 0x1c3   : > { %v1878_v42 = vpop.f32.mrb[34].mxu0 }
 0x1c4   : > { %v2025_v44 = vmax.f32 %v2857_v41, 0.0  ;;  %v2859_v32 = vadd.f32 %v1878_v42, %v1415_v61  ;;  %v2727_v45 = vpop.f32.mrb[35].mxu0 }
 0x1c6   : > { %v2622_v46 = vpack.c.bf16 %v2025_v44, %v2025_v44  ;;  %v2026_v48 = vmax.f32 %v2859_v32, 0.0 }
 0x1c8   : > { %2272 = vst.msk [vmem:[%s3779_s20 + $0x40] sm:$0xf] %vm2255_vm2, %v2622_v46  ;;  %v2623_v8 = vpack.c.bf16 %v2026_v48, %v2026_v48 }
 0x1c9   : > { %v1883_v49 = vpop.f32.mrb[36].mxu0 }
 0x1ca   : > { %2273 = vst.msk [vmem:[%s3779_s20 + $0x44] sm:$0xf] %vm2255_vm2, %v2623_v8  ;;  %v2861_v12 = vadd.f32 %v1883_v49, %v1420_v2  ;;  %v2730_v51 = vpop.f32.mrb[37].mxu0 }
 0x1cb   : > { %v1886_v52 = vpop.f32.mrb[38].mxu0 }
 0x1cc   : > { %v2027_v35 = vmax.f32 %v2861_v12, 0.0  ;;  %v2863_v53 = vadd.f32 %v1886_v52, %v1423_v6  ;;  %v2731_v55 = vpop.f32.mrb[39].mxu0 }
 0x1ce   : > { %v2624_v40 = vpack.c.bf16 %v2027_v35, %v2027_v35  ;;  %v2028_v56 = vmax.f32 %v2863_v53, 0.0 }
 0x1d0   : > { %2274 = vst.msk [vmem:[%s3779_s20 + $0x48] sm:$0xf] %vm2255_vm2, %v2624_v40  ;;  %v2625_v58 = vpack.c.bf16 %v2028_v56, %v2028_v56 }
 0x1d1   : > { %v1891_v59 = vpop.f32.mrb[40].mxu0 }
 0x1d2   : > { %2275 = vst.msk [vmem:[%s3779_s20 + $0x4c] sm:$0xf] %vm2255_vm2, %v2625_v58  ;;  %v2865_v60 = vadd.f32 %v1891_v59, %v1428_v10  ;;  %v2734_v62 = vpop.f32.mrb[41].mxu0 }
 0x1d3   : > { %v1894_v63 = vpop.f32.mrb[42].mxu0 }
 0x1d4   : > { %v2029_v0 = vmax.f32 %v2865_v60, 0.0  ;;  %v2867_v15 = vadd.f32 %v1894_v63, %v1431_v1  ;;  %v2735_v43 = vpop.f32.mrb[43].mxu0 }
 0x1d6   : > { %v2626_v3 = vpack.c.bf16 %v2029_v0, %v2029_v0  ;;  %v2030_v4 = vmax.f32 %v2867_v15, 0.0 }
 0x1d8   : > { %2276 = vst.msk [vmem:[%s3779_s20 + $0x50] sm:$0xf] %vm2255_vm2, %v2626_v3  ;;  %v2627_v47 = vpack.c.bf16 %v2030_v4, %v2030_v4 }
 0x1d9   : > { %v1899_v18 = vpop.f32.mrb[44].mxu0 }
 0x1da   : > { %2277 = vst.msk [vmem:[%s3779_s20 + $0x54] sm:$0xf] %vm2255_vm2, %v2627_v47  ;;  %v2869_v5 = vadd.f32 %v1899_v18, %v1436_v17  ;;  %v2738_v7 = vpop.f32.mrb[45].mxu0 }
 0x1db   : > { %v1902_v9 = vpop.f32.mrb[46].mxu0 }
 0x1dc   : > { %v2031_v11 = vmax.f32 %v2869_v5, 0.0  ;;  %v2871_v13 = vadd.f32 %v1902_v9, %v1439_v22  ;;  %v2739_v14 = vpop.f32.mrb[47].mxu0 }
 0x1de   : > { %v2628_v16 = vpack.c.bf16 %v2031_v11, %v2031_v11  ;;  %v2032_v50 = vmax.f32 %v2871_v13, 0.0 }
 0x1e0   : > { %2278 = vst.msk [vmem:[%s3779_s20 + $0x58] sm:$0xf] %vm2255_vm2, %v2628_v16  ;;  %v2629_v19 = vpack.c.bf16 %v2032_v50, %v2032_v50 }
 0x1e1   : > { %v1683_v21 = vpop.f32.mrb[52].mxu1  ;;  %v1907_v27 = vpop.f32.mrb[48].mxu0 }
 0x1e2   : > { %v1685_v54 = vpop.f32.mrb[53].mxu1  ;;  %2279 = vst.msk [vmem:[%s3779_s20 + $0x5c] sm:$0xf] %vm2255_vm2, %v2629_v19  ;;  %v2873_v23 = vadd.f32 %v1907_v27, %v1444_v24  ;;  %v2742_v25 = vpop.f32.mrb[49].mxu0  ;;  %v2876_v38 = vadd.f32 %v3769_v34, %v1683_v21 }
 0x1e3   : > { %v1686_v26 = vpop.f32.mrb[54].mxu1  ;;  %v1910_v29 = vpop.f32.mrb[50].mxu0 }
 0x1e4   : > { %v1688_v31 = vpop.f32.mrb[55].mxu1  ;;  %v2033_v33 = vmax.f32 %v2873_v23, 0.0  ;;  %v2875_v30 = vadd.f32 %v1910_v29, %v1447_v20  ;;  %v2743_v36 = vpop.f32.mrb[51].mxu0  ;;  %v2878_v42 = vadd.f32 %v3769_v34, %v1686_v26 }
 0x1e6   : > { %v2630_v57 = vpack.c.bf16 %v2033_v33, %v2033_v33  ;;  %v2034_v37 = vmax.f32 %v2875_v30, 0.0 }
 0x1e8   : > { %2280 = vst.msk [vmem:[%s3779_s20 + $0x60] sm:$0xf] %vm2255_vm2, %v2630_v57  ;;  %v2631_v61 = vpack.c.bf16 %v2034_v37, %v2034_v37 }
 0x1e9   : > { %v1691_v41 = vpop.f32.mrb[56].mxu1  ;;  %v1915_v39 = vpop.f32.mrb[52].mxu0 }
 0x1ea   : > { %v1693_v28 = vpop.f32.mrb[57].mxu1  ;;  %2281 = vst.msk [vmem:[%s3779_s20 + $0x64] sm:$0xf] %vm2255_vm2, %v2631_v61  ;;  %v2877_v44 = vadd.f32 %v2876_v38, %v1915_v39  ;;  %v2746_v32 = vpop.f32.mrb[53].mxu0  ;;  %v2880_v51 = vadd.f32 %v3769_v34, %v1691_v41 }
 0x1eb   : > { %v1694_v45 = vpop.f32.mrb[58].mxu1  ;;  %v1918_v46 = vpop.f32.mrb[54].mxu0 }
 0x1ec   : > { %v1696_v48 = vpop.f32.mrb[59].mxu1  ;;  %v2035_v2 = vmax.f32 %v2877_v44, 0.0  ;;  %v2879_v8 = vadd.f32 %v2878_v42, %v1918_v46  ;;  %v2747_v49 = vpop.f32.mrb[55].mxu0  ;;  %v2882_v40 = vadd.f32 %v3769_v34, %v1694_v45 }
 0x1ee   : > { %v2632_v6 = vpack.c.bf16 %v2035_v2, %v2035_v2  ;;  %v2036_v12 = vmax.f32 %v2879_v8, 0.0 }
 0x1f0   : > { %2282 = vst.msk [vmem:[%s3779_s20 + $0x68] sm:$0xf] %vm2255_vm2, %v2632_v6  ;;  %v2633_v52 = vpack.c.bf16 %v2036_v12, %v2036_v12 }
 0x1f1   : > { %v1699_v35 = vpop.f32.mrb[60].mxu1  ;;  %v1923_v53 = vpop.f32.mrb[56].mxu0 }
 0x1f2   : > { %v1701_v55 = vpop.f32.mrb[61].mxu1  ;;  %2283 = vst.msk [vmem:[%s3779_s20 + $0x6c] sm:$0xf] %vm2255_vm2, %v2633_v52  ;;  %v2881_v56 = vadd.f32 %v2880_v51, %v1923_v53  ;;  %v2750_v10 = vpop.f32.mrb[57].mxu0  ;;  %v2884_v43 = vadd.f32 %v3769_v34, %v1699_v35 }
 0x1f3   : > { %v1702_v58 = vpop.f32.mrb[62].mxu1  ;;  %v1926_v59 = vpop.f32.mrb[58].mxu0 }
 0x1f4   : > { %v1704_v1 = vpop.f32.mrb[63].mxu1  ;;  %v2037_v60 = vmax.f32 %v2881_v56, 0.0  ;;  %v2883_v62 = vadd.f32 %v2882_v40, %v1926_v59  ;;  %v2751_v63 = vpop.f32.mrb[59].mxu0  ;;  %v2886_v18 = vadd.f32 %v3769_v34, %v1702_v58 }
 0x1f6   : > { %v2634_v0 = vpack.c.bf16 %v2037_v60, %v2037_v60  ;;  %v2038_v15 = vmax.f32 %v2883_v62, 0.0 }
 0x1f8   : > { %2284 = vst.msk [vmem:[%s3779_s20 + $0x70] sm:$0xf] %vm2255_vm2, %v2634_v0  ;;  %v2635_v3 = vpack.c.bf16 %v2038_v15, %v2038_v15 }
 0x1f9   : > { %v1707_v4 = vpop.f32.mrb[64].mxu1  ;;  %v1931_v17 = vpop.f32.mrb[60].mxu0 }
 0x1fa   : > { %v1709_v47 = vpop.f32.mrb[65].mxu1  ;;  %2285 = vst.msk [vmem:[%s3779_s20 + $0x74] sm:$0xf] %vm2255_vm2, %v2635_v3  ;;  %v2885_v22 = vadd.f32 %v2884_v43, %v1931_v17  ;;  %v2754_v5 = vpop.f32.mrb[61].mxu0  ;;  %v2888_v19 = vadd.f32 %v3769_v34, %v1707_v4 }
 0x1fb   : > { %v1710_v7 = vpop.f32.mrb[66].mxu1  ;;  %v1934_v9 = vpop.f32.mrb[62].mxu0 }
 0x1fc   : > { %v1712_v11 = vpop.f32.mrb[67].mxu1  ;;  %v2039_v13 = vmax.f32 %v2885_v22, 0.0  ;;  %v2887_v14 = vadd.f32 %v2886_v18, %v1934_v9  ;;  %v2755_v16 = vpop.f32.mrb[63].mxu0  ;;  %v2890_v23 = vadd.f32 %v3769_v34, %v1710_v7 }
 0x1fe   : > { %v2636_v50 = vpack.c.bf16 %v2039_v13, %v2039_v13  ;;  %v2040_v24 = vmax.f32 %v2887_v14, 0.0 }
 0x200   : > { %2286 = vst.msk [vmem:[%s3779_s20 + $0x78] sm:$0xf] %vm2255_vm2, %v2636_v50  ;;  %v2637_v21 = vpack.c.bf16 %v2040_v24, %v2040_v24 }
 0x201   : > { %v1715_v27 = vpop.f32.mrb[68].mxu1  ;;  %v1939_v54 = vpop.f32.mrb[64].mxu0 }
 0x202   : > { %v1717_v20 = vpop.f32.mrb[69].mxu1  ;;  %2287 = vst.msk [vmem:[%s3779_s20 + $0x7c] sm:$0xf] %vm2255_vm2, %v2637_v21  ;;  %v2889_v25 = vadd.f32 %v2888_v19, %v1939_v54  ;;  %v2758_v26 = vpop.f32.mrb[65].mxu0  ;;  %v2892_v61 = vadd.f32 %v3769_v34, %v1715_v27 }
 0x203   : > { %v1718_v29 = vpop.f32.mrb[70].mxu1  ;;  %v1942_v31 = vpop.f32.mrb[66].mxu0 }
 0x204   : > { %v1720_v33 = vpop.f32.mrb[71].mxu1  ;;  %v2041_v30 = vmax.f32 %v2889_v25, 0.0  ;;  %v2891_v36 = vadd.f32 %v2890_v23, %v1942_v31  ;;  %v2759_v57 = vpop.f32.mrb[67].mxu0  ;;  %v2894_v44 = vadd.f32 %v3769_v34, %v1718_v29 }
 0x206   : > { %v2638_v37 = vpack.c.bf16 %v2041_v30, %v2041_v30  ;;  %v2042_v38 = vmax.f32 %v2891_v36, 0.0 }
 0x208   : > { %2288 = vst.msk [vmem:[%s3779_s20 + $0x80] sm:$0xf] %vm2255_vm2, %v2638_v37  ;;  %v2639_v41 = vpack.c.bf16 %v2042_v38, %v2042_v38 }
 0x209   : > { %v1723_v39 = vpop.f32.mrb[72].mxu1  ;;  %v1947_v28 = vpop.f32.mrb[68].mxu0 }
 0x20a   : > { %v1725_v42 = vpop.f32.mrb[73].mxu1  ;;  %2289 = vst.msk [vmem:[%s3779_s20 + $0x84] sm:$0xf] %vm2255_vm2, %v2639_v41  ;;  %v2893_v32 = vadd.f32 %v2892_v61, %v1947_v28  ;;  %v2762_v45 = vpop.f32.mrb[69].mxu0  ;;  %v2896_v52 = vadd.f32 %v3769_v34, %v1723_v39 }
 0x20b   : > { %v1726_v46 = vpop.f32.mrb[74].mxu1  ;;  %v1950_v48 = vpop.f32.mrb[70].mxu0 }
 0x20c   : > { %v1728_v2 = vpop.f32.mrb[75].mxu1  ;;  %v2043_v8 = vmax.f32 %v2893_v32, 0.0  ;;  %v2895_v49 = vadd.f32 %v2894_v44, %v1950_v48  ;;  %v2763_v6 = vpop.f32.mrb[71].mxu0  ;;  %v2898_v56 = vadd.f32 %v3769_v34, %v1726_v46 }
 0x20e   : > { %v2640_v12 = vpack.c.bf16 %v2043_v8, %v2043_v8  ;;  %v2044_v51 = vmax.f32 %v2895_v49, 0.0 }
 0x210   : > { %2290 = vst.msk [vmem:[%s3779_s20 + $0x88] sm:$0xf] %vm2255_vm2, %v2640_v12  ;;  %v2641_v35 = vpack.c.bf16 %v2044_v51, %v2044_v51 }
 0x211   : > { %v1731_v53 = vpop.f32.mrb[76].mxu1  ;;  %v1955_v55 = vpop.f32.mrb[72].mxu0 }
 0x212   : > { %v1733_v40 = vpop.f32.mrb[77].mxu1  ;;  %2291 = vst.msk [vmem:[%s3779_s20 + $0x8c] sm:$0xf] %vm2255_vm2, %v2641_v35  ;;  %v2897_v10 = vadd.f32 %v2896_v52, %v1955_v55  ;;  %v2766_v58 = vpop.f32.mrb[73].mxu0  ;;  %v2900_v3 = vadd.f32 %v3769_v34, %v1731_v53 }
 0x213   : > { %v1734_v59 = vpop.f32.mrb[78].mxu1  ;;  %v1958_v1 = vpop.f32.mrb[74].mxu0 }
 0x214   : > { %v1736_v60 = vpop.f32.mrb[79].mxu1  ;;  %v2045_v62 = vmax.f32 %v2897_v10, 0.0  ;;  %v2899_v63 = vadd.f32 %v2898_v56, %v1958_v1  ;;  %v2767_v0 = vpop.f32.mrb[75].mxu0  ;;  %v2902_v22 = vadd.f32 %v3769_v34, %v1734_v59 }
 0x216   : > { %v2642_v15 = vpack.c.bf16 %v2045_v62, %v2045_v62  ;;  %v2046_v43 = vmax.f32 %v2899_v63, 0.0 }
 0x218   : > { %2292 = vst.msk [vmem:[%s3779_s20 + $0x90] sm:$0xf] %vm2255_vm2, %v2642_v15  ;;  %v2643_v4 = vpack.c.bf16 %v2046_v43, %v2046_v43 }
 0x219   : > { %v1739_v17 = vpop.f32.mrb[80].mxu1  ;;  %v1963_v47 = vpop.f32.mrb[76].mxu0 }
 0x21a   : > { %v1741_v18 = vpop.f32.mrb[81].mxu1  ;;  %2293 = vst.msk [vmem:[%s3779_s20 + $0x94] sm:$0xf] %vm2255_vm2, %v2643_v4  ;;  %v2901_v5 = vadd.f32 %v2900_v3, %v1963_v47  ;;  %v2770_v7 = vpop.f32.mrb[77].mxu0  ;;  %v2904_v21 = vadd.f32 %v3769_v34, %v1739_v17 }
 0x21b   : > { %v1742_v9 = vpop.f32.mrb[82].mxu1  ;;  %v1966_v11 = vpop.f32.mrb[78].mxu0 }
 0x21c   : > { %v1744_v13 = vpop.f32.mrb[83].mxu1  ;;  %v2047_v14 = vmax.f32 %v2901_v5, 0.0  ;;  %v2903_v16 = vadd.f32 %v2902_v22, %v1966_v11  ;;  %v2771_v50 = vpop.f32.mrb[79].mxu0  ;;  %v2906_v25 = vadd.f32 %v3769_v34, %v1742_v9 }
 0x21e   : > { %v2644_v24 = vpack.c.bf16 %v2047_v14, %v2047_v14  ;;  %v2048_v19 = vmax.f32 %v2903_v16, 0.0 }
 0x220   : > { %2294 = vst.msk [vmem:[%s3779_s20 + $0x98] sm:$0xf] %vm2255_vm2, %v2644_v24  ;;  %v2645_v27 = vpack.c.bf16 %v2048_v19, %v2048_v19 }
 0x221   : > { %v1747_v54 = vpop.f32.mrb[84].mxu1  ;;  %v1971_v20 = vpop.f32.mrb[80].mxu0 }
 0x222   : > { %v1749_v23 = vpop.f32.mrb[85].mxu1  ;;  %2295 = vst.msk [vmem:[%s3779_s20 + $0x9c] sm:$0xf] %vm2255_vm2, %v2645_v27  ;;  %v2905_v26 = vadd.f32 %v2904_v21, %v1971_v20  ;;  %v2774_v29 = vpop.f32.mrb[81].mxu0  ;;  %v2908_v41 = vadd.f32 %v3769_v34, %v1747_v54 }
 0x223   : > { %v1750_v31 = vpop.f32.mrb[86].mxu1  ;;  %v1974_v33 = vpop.f32.mrb[82].mxu0 }
 0x224   : > { %v1752_v30 = vpop.f32.mrb[87].mxu1  ;;  %v2049_v36 = vmax.f32 %v2905_v26, 0.0  ;;  %v2907_v57 = vadd.f32 %v2906_v25, %v1974_v33  ;;  %v2775_v37 = vpop.f32.mrb[83].mxu0  ;;  %v2910_v32 = vadd.f32 %v3769_v34, %v1750_v31 }
 0x226   : > { %v2646_v38 = vpack.c.bf16 %v2049_v36, %v2049_v36  ;;  %v2050_v61 = vmax.f32 %v2907_v57, 0.0 }
 0x228   : > { %2296 = vst.msk [vmem:[%s3779_s20 + $0xa0] sm:$0xf] %vm2255_vm2, %v2646_v38  ;;  %v2647_v39 = vpack.c.bf16 %v2050_v61, %v2050_v61 }
 0x229   : > { %v1755_v28 = vpop.f32.mrb[88].mxu1  ;;  %v1979_v42 = vpop.f32.mrb[84].mxu0 }
 0x22a   : > { %v1757_v44 = vpop.f32.mrb[89].mxu1  ;;  %2297 = vst.msk [vmem:[%s3779_s20 + $0xa4] sm:$0xf] %vm2255_vm2, %v2647_v39  ;;  %v2909_v45 = vadd.f32 %v2908_v41, %v1979_v42  ;;  %v2778_v46 = vpop.f32.mrb[85].mxu0  ;;  %v2912_v35 = vadd.f32 %v3769_v34, %v1755_v28 }
 0x22b   : > { %v1758_v48 = vpop.f32.mrb[90].mxu1  ;;  %v1982_v2 = vpop.f32.mrb[86].mxu0 }
 0x22c   : > { %v1760_v8 = vpop.f32.mrb[91].mxu1  ;;  %v2051_v49 = vmax.f32 %v2909_v45, 0.0  ;;  %v2911_v6 = vadd.f32 %v2910_v32, %v1982_v2  ;;  %v2779_v12 = vpop.f32.mrb[87].mxu0  ;;  %v2914_v10 = vadd.f32 %v3769_v34, %v1758_v48 }
 0x22e   : > { %v2648_v51 = vpack.c.bf16 %v2051_v49, %v2051_v49  ;;  %v2052_v52 = vmax.f32 %v2911_v6, 0.0 }
 0x230   : > { %2298 = vst.msk [vmem:[%s3779_s20 + $0xa8] sm:$0xf] %vm2255_vm2, %v2648_v51  ;;  %v2649_v53 = vpack.c.bf16 %v2052_v52, %v2052_v52 }
 0x231   : > { %v1763_v55 = vpop.f32.mrb[92].mxu1  ;;  %v1987_v40 = vpop.f32.mrb[88].mxu0 }
 0x232   : > { %v1765_v56 = vpop.f32.mrb[93].mxu1  ;;  %2299 = vst.msk [vmem:[%s3779_s20 + $0xac] sm:$0xf] %vm2255_vm2, %v2649_v53  ;;  %v2913_v58 = vadd.f32 %v2912_v35, %v1987_v40  ;;  %v2782_v59 = vpop.f32.mrb[89].mxu0  ;;  %v2916_v4 = vadd.f32 %v3769_v34, %v1763_v55 }
 0x233   : > { %v1766_v1 = vpop.f32.mrb[94].mxu1  ;;  %v1990_v60 = vpop.f32.mrb[90].mxu0 }
 0x234   : > { %v1768_v62 = vpop.f32.mrb[95].mxu1  ;;  %v2053_v63 = vmax.f32 %v2913_v58, 0.0  ;;  %v2915_v0 = vadd.f32 %v2914_v10, %v1990_v60  ;;  %v2783_v15 = vpop.f32.mrb[91].mxu0  ;;  %v2918_v5 = vadd.f32 %v3769_v34, %v1766_v1 }
 0x236   : > { %v2650_v43 = vpack.c.bf16 %v2053_v63, %v2053_v63  ;;  %v2054_v3 = vmax.f32 %v2915_v0, 0.0 }
 0x238   : > { %2300 = vst.msk [vmem:[%s3779_s20 + $0xb0] sm:$0xf] %vm2255_vm2, %v2650_v43  ;;  %v2651_v17 = vpack.c.bf16 %v2054_v3, %v2054_v3 }
 0x239   : > { %v1771_v47 = vpop.f32.mrb[96].mxu1  ;;  %v1995_v18 = vpop.f32.mrb[92].mxu0 }
 0x23a   : > { %v1773_v22 = vpop.f32.mrb[97].mxu1  ;;  %2301 = vst.msk [vmem:[%s3779_s20 + $0xb4] sm:$0xf] %vm2255_vm2, %v2651_v17  ;;  %v2917_v7 = vadd.f32 %v2916_v4, %v1995_v18  ;;  %v2786_v9 = vpop.f32.mrb[93].mxu0  ;;  %v2920_v27 = vadd.f32 %v3769_v34, %v1771_v47 }
 0x23b   : > { %v1774_v11 = vpop.f32.mrb[98].mxu1  ;;  %v1998_v13 = vpop.f32.mrb[94].mxu0 }
 0x23c   : > { %v1775_v14 = vpop.f32.mrb[99].mxu1  ;;  %v2055_v16 = vmax.f32 %v2917_v7, 0.0  ;;  %v2919_v50 = vadd.f32 %v2918_v5, %v1998_v13  ;;  %v2787_v24 = vpop.f32.mrb[95].mxu0 }
 0x23e   : > { %v2652_v19 = vpack.c.bf16 %v2055_v16, %v2055_v16  ;;  %v2056_v21 = vmax.f32 %v2919_v50, 0.0 }
 0x240   : > { %2302 = vst.msk [vmem:[%s3779_s20 + $0xb8] sm:$0xf] %vm2255_vm2, %v2652_v19  ;;  %v2653_v54 = vpack.c.bf16 %v2056_v21, %v2056_v21 }
 0x241   : > { %v2003_v20 = vpop.f32.mrb[96].mxu0 }
 0x242   : > { %2303 = vst.msk [vmem:[%s3779_s20 + $0xbc] sm:$0xf] %vm2255_vm2, %v2653_v54  ;;  %v2921_v23 = vadd.f32 %v2920_v27, %v2003_v20  ;;  %v2790_v25 = vpop.f32.mrb[97].mxu0 }
 0x243   : > { %v2006_v26 = vpop.f32.mrb[98].mxu0 }
 0x244   : > { %v2057_v29 = vmax.f32 %v2921_v23, 0.0  ;;  %v2791_v31 = vpop.f32.mrb[99].mxu0 }
 0x246   : > { %v2654_v33 = vpack.c.bf16 %v2057_v29, %v2057_v29 }
 0x248   : > { %2304 = vst.msk [vmem:[%s3779_s20 + $0xc0] sm:$0xf] %vm2255_vm2, %v2654_v33 }
 0x249 PF: > { %s13_s12 = sadd.s32 1, %s3249_s12  }
 0x24a   : > { %p10_p4 = scmp.ge.s32.totalorder %s13_s12, 4  }
 0x24c   :  { %12 = sbr.rel (!%p10_p4) target bundleno = 1 (0x1), region = 62 }

// kernel: forward.7
= control target key start
LH: loop header
LB: loop body
LE: loop exit
PB: predicated region body
PF: predicated region fallthrough
CT: control target
= control target key end

     0   :  { %v3790_v1 = vmov 0   ;;  %vm2326_vm1 = vcmask 64512   ;;  %vm3792_vm2 = vmmov 0   ;;  %vm1770_vm4 = vcmask 523264   ;;  %s4684_s3 = inlined_call_operand.vmem [shape: bf16[3136,32], index: 3, kind: input, shape index: {}]   ;;  %s4685_s0 = inlined_call_operand.vmem [shape: bf16[16,3136], index: 0, kind: input, shape index: {}]   ;;  %s4686_s1 = inlined_call_operand.vmem [shape: s32[16,1], index: 1, kind: input, shape index: {}]   ;;  %s4687_s2 = inlined_call_operand.vmem [shape: f32[8,32], index: 2, kind: input, shape index: {}]   ;;  %s4688_s4 = inlined_call_operand.vmem [shape: f32[1,32], index: 4, kind: input, shape index: {}]   ;;  %s4689_s6 = inlined_call_operand.vmem [shape: bf16[32,128], index: 6, kind: input, shape index: {}]   ;;  %s4690_s5 = inlined_call_operand.vmem [shape: bf16[32,128], index: 5, kind: input, shape index: {}]   ;;  %s4691_s8 = inlined_call_operand.vmem [shape: bf16[128,512], index: 8, kind: input, shape index: {}]   ;;  %s4692_s7 = inlined_call_operand.vmem [shape: f32[1,128], index: 7, kind: input, shape index: {}]   ;;  %s4693_s11 = inlined_call_operand.<no memory space> [shape: f32[1,1], index: 11, kind: input, shape index: {}]   ;;  %s4694_s9 = inlined_call_operand.vmem [shape: f32[1,512], index: 9, kind: input, shape index: {}]   ;;  %s4695_s10 = inlined_call_operand.vmem [shape: f32[1,512], index: 10, kind: input, shape index: {}]   ;;  %s4696_s12 = inlined_call_operand.vmem [shape: f32[16,1], index: 12, kind: output, shape index: {}]  }
   0x1   :  { %v3493_v0 = vld [vmem:[%s4684_s3 + $0x40] sm:$0xff]   ;;  %3492 = vset.pattern.permute.xlu0 %v3790_v1  ;;  %v3497_v5 = vld [vmem:[%s4684_s3 + $0x48] sm:$0xff]   ;;  %v3501_v9 = vld [vmem:[%s4684_s3 + $0x50] sm:$0xff]   ;;  %vm2432_vm5 = vcmask 261120   ;;  %vm2904_vm6 = vcmask 7168  }
   0x2   :  { %v3494_v2 = vld [vmem:[%s4684_s3] sm:$0xff]   ;;  %3178 = vmatprep.subr.bf16.mxu0 %v3493_v0  ;;  %v3498_v6 = vld [vmem:[%s4684_s3 + $0x8] sm:$0xff]   ;;  %v3502_v10 = vld [vmem:[%s4684_s3 + $0x10] sm:$0xff]  }
   0x3   :  { %v3495_v3 = vld [vmem:[%s4684_s3 + $0xc0] sm:$0xff]   ;;  %3179 = vmatpush3.bf16.msra.mxu0 %v3494_v2  ;;  %v3499_v7 = vld [vmem:[%s4684_s3 + $0xc8] sm:$0xff]   ;;  %v3503_v11 = vld [vmem:[%s4684_s3 + $0xd0] sm:$0xff]  }
   0x4   :  { %v3496_v4 = vld [vmem:[%s4684_s3 + $0x80] sm:$0xff]   ;;  %3200 = vmatprep.subr.bf16.mxu1 %v3495_v3  ;;  %3180 = vmatprep.subr.bf16.mxu0 %v3497_v5  ;;  %v3500_v8 = vld [vmem:[%s4684_s3 + $0x88] sm:$0xff]   ;;  %v3504_v12 = vld [vmem:[%s4684_s3 + $0x90] sm:$0xff]  }
   0x5   :  { %3201 = vmatpush3.bf16.msra.mxu1 %v3496_v4  ;;  %v3505_v13 = vld [vmem:[%s4684_s3 + $0x58] sm:$0xff]   ;;  %v3509_v17 = vld [vmem:[%s4684_s3 + $0x60] sm:$0xff]   ;;  %v3513_v21 = vld [vmem:[%s4684_s3 + $0x68] sm:$0xff]  }
   0x6   :  { %3202 = vmatprep.subr.bf16.mxu1 %v3499_v7  ;;  %v3506_v14 = vld [vmem:[%s4684_s3 + $0x18] sm:$0xff]   ;;  %v3510_v18 = vld [vmem:[%s4684_s3 + $0x20] sm:$0xff]   ;;  %v3514_v22 = vld [vmem:[%s4684_s3 + $0x28] sm:$0xff]  }
   0x7   :  { %3181 = vmatpush3.bf16.msra.mxu0 %v3498_v6  ;;  %v3507_v15 = vld [vmem:[%s4684_s3 + $0xd8] sm:$0xff]   ;;  %v3511_v19 = vld [vmem:[%s4684_s3 + $0xe0] sm:$0xff]   ;;  %v3515_v23 = vld [vmem:[%s4684_s3 + $0xe8] sm:$0xff]  }
   0x8   :  { %3182 = vmatprep.subr.bf16.mxu0 %v3501_v9  ;;  %v3508_v16 = vld [vmem:[%s4684_s3 + $0x98] sm:$0xff]   ;;  %v3512_v20 = vld [vmem:[%s4684_s3 + $0xa0] sm:$0xff]   ;;  %v3516_v24 = vld [vmem:[%s4684_s3 + $0xa8] sm:$0xff]  }
   0x9   :  { %3203 = vmatpush3.bf16.msra.mxu1 %v3500_v8  ;;  %v3517_v25 = vld [vmem:[%s4684_s3 + $0x70] sm:$0xff]   ;;  %v3521_v29 = vld [vmem:[%s4684_s3 + $0x78] sm:$0xff]   ;;  %v3524_v32 = vld [vmem:[%s4685_s0] ss:$100 sps:$4 sm:$0xff]  }
   0xa   :  { %3204 = vmatprep.subr.bf16.mxu1 %v3503_v11  ;;  %v3518_v26 = vld [vmem:[%s4684_s3 + $0x30] sm:$0xff]   ;;  %v3522_v30 = vld [vmem:[%s4684_s3 + $0x38] sm:$0xff]   ;;  %v3526_v33 = vld [vmem:[%s4685_s0 + $0x4] ss:$100 sps:$4 sm:$0xff]  }
   0xb   :  { %3183 = vmatpush3.bf16.msra.mxu0 %v3502_v10  ;;  %v3519_v27 = vld [vmem:[%s4684_s3 + $0xf0] sm:$0xff]   ;;  %v3523_v31 = vld [vmem:[%s4684_s3 + $0xf8] sm:$0xff]   ;;  %1806 = vmatprep.mubr.bf16.mxu0 %v3526_v33  ;;  %v3528_v35 = vld [vmem:[%s4684_s3 + $0x140] sm:$0xff]  }
   0xc   :  { %3184 = vmatprep.subr.bf16.mxu0 %v3505_v13  ;;  %v3520_v28 = vld [vmem:[%s4684_s3 + $0xb0] sm:$0xff]   ;;  %v3527_v34 = vld [vmem:[%s4684_s3 + $0xb8] sm:$0xff]   ;;  %v3529_v36 = vld [vmem:[%s4685_s0 + $0x8] ss:$100 sps:$4 sm:$0xff]  }
   0xd   :  { %3205 = vmatpush3.bf16.msra.mxu1 %v3504_v12  ;;  %v3531_v37 = vld [vmem:[%s4685_s0 + $0xc] ss:$100 sps:$4 sm:$0xff]   ;;  %v3532_v38 = vld [vmem:[%s4684_s3 + $0x100] sm:$0xff]   ;;  %v3543_v49 = vld [vmem:[%s4684_s3 + $0x158] sm:$0xff]  }
   0xe   :  { %3206 = vmatprep.subr.bf16.mxu1 %v3507_v15  ;;  %1847 = vmatprep.mubr.bf16.mxu1 %v3531_v37  ;;  %v3533_v39 = vld [vmem:[%s4684_s3 + $0x1c0] sm:$0xff]   ;;  %v3535_v41 = vld [vmem:[%s4684_s3 + $0x148] sm:$0xff]   ;;  %v3539_v45 = vld [vmem:[%s4684_s3 + $0x150] sm:$0xff]  }
   0xf   :  { %3185 = vmatpush3.bf16.msra.mxu0 %v3506_v14  ;;  %v3534_v40 = vld [vmem:[%s4684_s3 + $0x180] sm:$0xff]   ;;  %v3536_v42 = vld [vmem:[%s4684_s3 + $0x108] sm:$0xff]   ;;  %v3540_v46 = vld [vmem:[%s4684_s3 + $0x110] sm:$0xff]  }
  0x10   :  { %3186 = vmatprep.subr.bf16.mxu0 %v3509_v17  ;;  %v3537_v43 = vld [vmem:[%s4684_s3 + $0x1c8] sm:$0xff]   ;;  %v3541_v47 = vld [vmem:[%s4684_s3 + $0x1d0] sm:$0xff]   ;;  %v3544_v50 = vld [vmem:[%s4684_s3 + $0x118] sm:$0xff]  }
  0x11   :  { %3207 = vmatpush3.bf16.msra.mxu1 %v3508_v16  ;;  %v3538_v44 = vld [vmem:[%s4684_s3 + $0x188] sm:$0xff]   ;;  %v3542_v48 = vld [vmem:[%s4684_s3 + $0x190] sm:$0xff]   ;;  %v3545_v51 = vld [vmem:[%s4684_s3 + $0x1d8] sm:$0xff]  }
  0x12   :  { %3208 = vmatprep.subr.bf16.mxu1 %v3511_v19  ;;  %v3546_v52 = vld [vmem:[%s4684_s3 + $0x198] sm:$0xff]   ;;  %v3547_v53 = vld [vmem:[%s4684_s3 + $0x160] sm:$0xff]   ;;  %v3551_v57 = vld [vmem:[%s4684_s3 + $0x168] sm:$0xff]  }
  0x13   :  { %3187 = vmatpush3.bf16.msra.mxu0 %v3510_v18  ;;  %v3548_v54 = vld [vmem:[%s4684_s3 + $0x120] sm:$0xff]   ;;  %v3552_v58 = vld [vmem:[%s4684_s3 + $0x128] sm:$0xff]   ;;  %v3555_v61 = vld [vmem:[%s4684_s3 + $0x170] sm:$0xff]  }
  0x14   :  { %3188 = vmatprep.subr.bf16.mxu0 %v3513_v21  ;;  %v3549_v55 = vld [vmem:[%s4684_s3 + $0x1e0] sm:$0xff]   ;;  %v3553_v59 = vld [vmem:[%s4684_s3 + $0x1e8] sm:$0xff]   ;;  %v3556_v62 = vld [vmem:[%s4684_s3 + $0x130] sm:$0xff]  }
  0x15   :  { %3209 = vmatpush3.bf16.msra.mxu1 %v3512_v20  ;;  %v3550_v56 = vld [vmem:[%s4684_s3 + $0x1a0] sm:$0xff]   ;;  %v3554_v60 = vld [vmem:[%s4684_s3 + $0x1a8] sm:$0xff]   ;;  %v3557_v63 = vld [vmem:[%s4684_s3 + $0x1f0] sm:$0xff]  }
  0x16   :  { %3210 = vmatprep.subr.bf16.mxu1 %v3515_v23  ;;  %v3558_v0 = vld [vmem:[%s4684_s3 + $0x1b0] sm:$0xff]   ;;  %v3559_v2 = vld [vmem:[%s4684_s3 + $0x178] sm:$0xff]   ;;  %v3566_v8 = vld [vmem:[%s4684_s3 + $0x240] sm:$0xff]  }
  0x17   :  { %3189 = vmatpush3.bf16.msra.mxu0 %v3514_v22  ;;  %v3560_v3 = vld [vmem:[%s4684_s3 + $0x138] sm:$0xff]   ;;  %v3562_v5 = vld [vmem:[%s4685_s0 + $0x10] ss:$100 sps:$4 sm:$0xff]   ;;  %v3570_v11 = vld [vmem:[%s4684_s3 + $0x200] sm:$0xff]  }
  0x18   :  { %3190 = vmatprep.subr.bf16.mxu0 %v3517_v25  ;;  %v3561_v4 = vld [vmem:[%s4684_s3 + $0x1f8] sm:$0xff]   ;;  %v3571_v12 = vld [vmem:[%s4684_s3 + $0x2c0] sm:$0xff]   ;;  %v3573_v14 = vld [vmem:[%s4684_s3 + $0x248] sm:$0xff]  }
  0x19   :  { %3211 = vmatpush3.bf16.msra.mxu1 %v3516_v24  ;;  %v3564_v6 = vld [vmem:[%s4685_s0 + $0x14] ss:$100 sps:$4 sm:$0xff]   ;;  %v3569_v10 = vld [vmem:[%s4685_s0 + $0x1c] ss:$100 sps:$4 sm:$0xff]   ;;  %v3574_v16 = vld [vmem:[%s4684_s3 + $0x208] sm:$0xff]  }
  0x1a   :  { %3212 = vmatprep.subr.bf16.mxu1 %v3519_v27  ;;  %v3565_v7 = vld [vmem:[%s4684_s3 + $0x1b8] sm:$0xff]   ;;  %v3572_v13 = vld [vmem:[%s4684_s3 + $0x280] sm:$0xff]   ;;  %v3575_v17 = vld [vmem:[%s4684_s3 + $0x2c8] sm:$0xff]  }
  0x1b   :  { %3191 = vmatpush3.bf16.msra.mxu0 %v3518_v26  ;;  %v3567_v9 = vld [vmem:[%s4685_s0 + $0x18] ss:$100 sps:$4 sm:$0xff]   ;;  %v2309_v15 = vld [vmem:[%s4686_s1] sm:$0xff]  ;;  %v3576_v18 = vld [vmem:[%s4684_s3 + $0x288] sm:$0xff]  }
  0x1c   :  { %3192 = vmatprep.subr.bf16.mxu0 %v3521_v29  ;;  %2314 = vperm.xlu0 %3492, %v2309_v15   ;;  %v3577_v19 = vld [vmem:[%s4684_s3 + $0x250] sm:$0xff]   ;;  %v2310_v20 = vld [vmem:[%s4686_s1 + $0x8] sm:$0xff]  ;;  %v3581_v24 = vld [vmem:[%s4684_s3 + $0x258] sm:$0xff]  }
  0x1d   :  { %3213 = vmatpush3.bf16.msra.mxu1 %v3520_v28  ;;  %v3578_v21 = vld [vmem:[%s4684_s3 + $0x210] sm:$0xff]   ;;  %v3582_v25 = vld [vmem:[%s4684_s3 + $0x218] sm:$0xff]   ;;  %v3585_v28 = vld [vmem:[%s4684_s3 + $0x260] sm:$0xff]  }
  0x1e   :  { %3214 = vmatprep.subr.bf16.mxu1 %v3523_v31  ;;  %v3579_v22 = vld [vmem:[%s4684_s3 + $0x2d0] sm:$0xff]   ;;  %v3583_v26 = vld [vmem:[%s4684_s3 + $0x2d8] sm:$0xff]   ;;  %v3586_v29 = vld [vmem:[%s4684_s3 + $0x220] sm:$0xff]  }
  0x1f   :  { %3193 = vmatpush3.bf16.msra.mxu0 %v3522_v30  ;;  %v3580_v23 = vld [vmem:[%s4684_s3 + $0x290] sm:$0xff]   ;;  %v3584_v27 = vld [vmem:[%s4684_s3 + $0x298] sm:$0xff]   ;;  %v3587_v30 = vld [vmem:[%s4684_s3 + $0x2e0] sm:$0xff]  }
  0x20   :  { %3222 = vmatprep.subr.bf16.mxu0 %v3528_v35  ;;  %2317 = vperm.xlu0 %3492, %v2310_v20   ;;  %v3588_v31 = vld [vmem:[%s4684_s3 + $0x2a0] sm:$0xff]   ;;  %v3590_v33 = vld [vmem:[%s4684_s3 + $0x228] sm:$0xff]   ;;  %v3594_v37 = vld [vmem:[%s4684_s3 + $0x230] sm:$0xff]  }
  0x21   :  { %3215 = vmatpush3.bf16.msra.mxu1 %v3527_v34  ;;  %v3591_v34 = vld [vmem:[%s4684_s3 + $0x2e8] sm:$0xff]   ;;  %v3637_v15 = vld [vmem:[%s4684_s3 + $0x3f8] sm:$0xff]  }
  0x22   :  { %1807 = vmatmul.mubr.bf16.vlgmr.msra.gmra.mrb[0].mxu0 %v3524_v32  ;;  %3244 = vmatprep.subr.bf16.mxu1 %v3533_v39  ;;  %v3589_v32 = vld [vmem:[%s4684_s3 + $0x268] sm:$0xff]   ;;  %v3596_v39 = vld [vmem:[%s4684_s3 + $0x2b0] sm:$0xff]   ;;  %v3643_v20 = vld [vmem:[%s4685_s0 + $0x38] ss:$100 sps:$4 sm:$0xff]  }
  0x23   :  { %3223 = vmatpush3.bf16.msra.mxu0 %v3532_v38  ;;  %1888 = vmatprep.mubr.bf16.mxu0 %v3564_v6  ;;  %v3592_v35 = vld [vmem:[%s4684_s3 + $0x2a8] sm:$0xff]   ;;  %v3595_v38 = vld [vmem:[%s4684_s3 + $0x2f0] sm:$0xff]  }
  0x24   :  { %1848 = vmatmul.mubr.bf16.vlgmr.msra.gmra.mrb[0].mxu1 %v3529_v36  ;;  %3224 = vmatprep.subr.bf16.mxu0 %v3535_v41  ;;  %v3593_v36 = vld [vmem:[%s4684_s3 + $0x270] sm:$0xff]   ;;  %v3598_v41 = vld [vmem:[%s4684_s3 + $0x238] sm:$0xff]   ;;  %v3628_v6 = vld [vmem:[%s4684_s3 + $0x328] sm:$0xff]  }
  0x25   :  { %3245 = vmatpush3.bf16.msra.mxu1 %v3534_v40  ;;  %1929 = vmatprep.mubr.bf16.mxu1 %v3569_v10  ;;  %v3597_v40 = vld [vmem:[%s4684_s3 + $0x278] sm:$0xff]   ;;  %v3632_v10 = vld [vmem:[%s4684_s3 + $0x330] sm:$0xff]  }
  0x26   :  { %3246 = vmatprep.subr.bf16.mxu1 %v3537_v43  ;;  %v3600_v43 = vld [vmem:[%s4685_s0 + $0x20] ss:$100 sps:$4 sm:$0xff]  }
  0x27   :  { %3225 = vmatpush3.bf16.msra.mxu0 %v3536_v42  ;;  %v3599_v42 = vld [vmem:[%s4684_s3 + $0x2f8] sm:$0xff]  }
  0x28   :  { %3226 = vmatprep.subr.bf16.mxu0 %v3539_v45  ;;  %v3603_v45 = vld [vmem:[%s4684_s3 + $0x2b8] sm:$0xff]  }
  0x29   :  { %3247 = vmatpush3.bf16.msra.mxu1 %v3538_v44  ;;  %v3602_v44 = vld [vmem:[%s4685_s0 + $0x24] ss:$100 sps:$4 sm:$0xff]  }
  0x2a   :  { %3248 = vmatprep.subr.bf16.mxu1 %v3541_v47  ;;  %v3605_v47 = vld [vmem:[%s4685_s0 + $0x28] ss:$100 sps:$4 sm:$0xff]  }
  0x2b   :  { %3227 = vmatpush3.bf16.msra.mxu0 %v3540_v46  ;;  %v3604_v46 = vld [vmem:[%s4684_s3 + $0x340] sm:$0xff]  }
  0x2c   :  { %3228 = vmatprep.subr.bf16.mxu0 %v3543_v49  ;;  %v3608_v49 = vld [vmem:[%s4684_s3 + $0x300] sm:$0xff]  }
  0x2d   :  { %3249 = vmatpush3.bf16.msra.mxu1 %v3542_v48  ;;  %v3607_v48 = vld [vmem:[%s4685_s0 + $0x2c] ss:$100 sps:$4 sm:$0xff]  }
  0x2e   :  { %3250 = vmatprep.subr.bf16.mxu1 %v3545_v51  ;;  %v3610_v51 = vld [vmem:[%s4684_s3 + $0x380] sm:$0xff]  }
  0x2f   :  { %3229 = vmatpush3.bf16.msra.mxu0 %v3544_v50  ;;  %v3609_v50 = vld [vmem:[%s4684_s3 + $0x3c0] sm:$0xff]  }
  0x30   :  { %3230 = vmatprep.subr.bf16.mxu0 %v3547_v53  ;;  %v3612_v53 = vld [vmem:[%s4684_s3 + $0x308] sm:$0xff]  }
  0x31   :  { %3251 = vmatpush3.bf16.msra.mxu1 %v3546_v52  ;;  %v3611_v52 = vld [vmem:[%s4684_s3 + $0x348] sm:$0xff]  }
  0x32   :  { %3252 = vmatprep.subr.bf16.mxu1 %v3549_v55  ;;  %v3614_v55 = vld [vmem:[%s4684_s3 + $0x388] sm:$0xff]  }
  0x33   :  { %3231 = vmatpush3.bf16.msra.mxu0 %v3548_v54  ;;  %v3613_v54 = vld [vmem:[%s4684_s3 + $0x3c8] sm:$0xff]  }
  0x34   :  { %3232 = vmatprep.subr.bf16.mxu0 %v3551_v57  ;;  %v3616_v57 = vld [vmem:[%s4684_s3 + $0x310] sm:$0xff]  }
  0x35   :  { %3253 = vmatpush3.bf16.msra.mxu1 %v3550_v56  ;;  %v3615_v56 = vld [vmem:[%s4684_s3 + $0x350] sm:$0xff]  }
  0x36   :  { %3254 = vmatprep.subr.bf16.mxu1 %v3553_v59  ;;  %v3618_v59 = vld [vmem:[%s4684_s3 + $0x390] sm:$0xff]  }
  0x37   :  { %3233 = vmatpush3.bf16.msra.mxu0 %v3552_v58  ;;  %v3617_v58 = vld [vmem:[%s4684_s3 + $0x3d0] sm:$0xff]  }
  0x38   :  { %3234 = vmatprep.subr.bf16.mxu0 %v3555_v61  ;;  %v3620_v61 = vld [vmem:[%s4684_s3 + $0x318] sm:$0xff]  }
  0x39   :  { %3255 = vmatpush3.bf16.msra.mxu1 %v3554_v60  ;;  %v3619_v60 = vld [vmem:[%s4684_s3 + $0x358] sm:$0xff]  }
  0x3a   :  { %3256 = vmatprep.subr.bf16.mxu1 %v3557_v63  ;;  %v3622_v63 = vld [vmem:[%s4684_s3 + $0x398] sm:$0xff]  }
  0x3b   :  { %3235 = vmatpush3.bf16.msra.mxu0 %v3556_v62  ;;  %v3621_v62 = vld [vmem:[%s4684_s3 + $0x3d8] sm:$0xff]  }
  0x3c   :  { %3236 = vmatprep.subr.bf16.mxu0 %v3559_v2  ;;  %v3624_v2 = vld [vmem:[%s4684_s3 + $0x320] sm:$0xff]  }
  0x3d   :  { %3257 = vmatpush3.bf16.msra.mxu1 %v3558_v0  ;;  %v3623_v0 = vld [vmem:[%s4684_s3 + $0x360] sm:$0xff]  }
  0x3e   :  { %3258 = vmatprep.subr.bf16.mxu1 %v3561_v4  ;;  %v3626_v4 = vld [vmem:[%s4684_s3 + $0x3a0] sm:$0xff]  }
  0x3f   :  { %3237 = vmatpush3.bf16.msra.mxu0 %v3560_v3  ;;  %v3625_v3 = vld [vmem:[%s4684_s3 + $0x3e0] sm:$0xff]  }
  0x40   :  { %3266 = vmatprep.subr.bf16.mxu0 %v3566_v8  ;;  %v3630_v8 = vld [vmem:[%s4684_s3 + $0x3a8] sm:$0xff]  }
  0x41   :  { %3259 = vmatpush3.bf16.msra.mxu1 %v3565_v7  ;;  %v3629_v7 = vld [vmem:[%s4684_s3 + $0x3e8] sm:$0xff]  }
  0x42   :  { %1889 = vmatmul.mubr.bf16.vlgmr.msra.gmra.mrb[4].mxu0 %v3562_v5  ;;  %3288 = vmatprep.subr.bf16.mxu1 %v3571_v12  ;;  %v3627_v5 = vld [vmem:[%s4684_s3 + $0x368] sm:$0xff]   ;;  %v3634_v12 = vld [vmem:[%s4684_s3 + $0x3b0] sm:$0xff]  }
  0x43   :  { %3267 = vmatpush3.bf16.msra.mxu0 %v3570_v11  ;;  %1970 = vmatprep.mubr.bf16.mxu0 %v3602_v44  ;;  %v3633_v11 = vld [vmem:[%s4684_s3 + $0x3f0] sm:$0xff]   ;;  %v3668_v44 = vld [vmem:[%s4684_s3 + $0x4a8] sm:$0xff]  }
  0x44   :  { %1930 = vmatmul.mubr.bf16.vlgmr.msra.gmra.mrb[4].mxu1 %v3567_v9  ;;  %3268 = vmatprep.subr.bf16.mxu0 %v3573_v14  ;;  %v3631_v9 = vld [vmem:[%s4684_s3 + $0x370] sm:$0xff]   ;;  %v3636_v14 = vld [vmem:[%s4684_s3 + $0x338] sm:$0xff]  }
  0x45   :  { %3289 = vmatpush3.bf16.msra.mxu1 %v3572_v13  ;;  %2011 = vmatprep.mubr.bf16.mxu1 %v3607_v48  ;;  %v3635_v13 = vld [vmem:[%s4684_s3 + $0x378] sm:$0xff]   ;;  %v3672_v48 = vld [vmem:[%s4684_s3 + $0x4b0] sm:$0xff]  }
  0x46   :  { %3290 = vmatprep.subr.bf16.mxu1 %v3575_v17  ;;  %v3640_v17 = vld [vmem:[%s4685_s0 + $0x34] ss:$100 sps:$4 sm:$0xff]  }
  0x47   :  { %3269 = vmatpush3.bf16.msra.mxu0 %v3574_v16  ;;  %v3638_v16 = vld [vmem:[%s4685_s0 + $0x30] ss:$100 sps:$4 sm:$0xff]  }
  0x48   :  { %3270 = vmatprep.subr.bf16.mxu0 %v3577_v19  ;;  %v3642_v19 = vld [vmem:[%s4684_s3 + $0x440] sm:$0xff]  }
  0x49   :  { %3291 = vmatpush3.bf16.msra.mxu1 %v3576_v18  ;;  %v3641_v18 = vld [vmem:[%s4684_s3 + $0x3b8] sm:$0xff]  }
  0x4a   :  { %3292 = vmatprep.subr.bf16.mxu1 %v3579_v22  ;;  %v3646_v22 = vld [vmem:[%s4684_s3 + $0x400] sm:$0xff]  }
  0x4b   :  { %3271 = vmatpush3.bf16.msra.mxu0 %v3578_v21  ;;  %v3645_v21 = vld [vmem:[%s4685_s0 + $0x3c] ss:$100 sps:$4 sm:$0xff]  }
  0x4c   :  { %3272 = vmatprep.subr.bf16.mxu0 %v3581_v24  ;;  %v3648_v24 = vld [vmem:[%s4684_s3 + $0x480] sm:$0xff]  }
  0x4d   :  { %3293 = vmatpush3.bf16.msra.mxu1 %v3580_v23  ;;  %v3647_v23 = vld [vmem:[%s4684_s3 + $0x4c0] sm:$0xff]  }
  0x4e   :  { %3294 = vmatprep.subr.bf16.mxu1 %v3583_v26  ;;  %v3650_v26 = vld [vmem:[%s4684_s3 + $0x408] sm:$0xff]  }
  0x4f   :  { %3273 = vmatpush3.bf16.msra.mxu0 %v3582_v25  ;;  %v3649_v25 = vld [vmem:[%s4684_s3 + $0x448] sm:$0xff]  }
  0x50   :  { %3274 = vmatprep.subr.bf16.mxu0 %v3585_v28  ;;  %v3652_v28 = vld [vmem:[%s4684_s3 + $0x488] sm:$0xff]  }
  0x51   :  { %3295 = vmatpush3.bf16.msra.mxu1 %v3584_v27  ;;  %v3651_v27 = vld [vmem:[%s4684_s3 + $0x4c8] sm:$0xff]  }
  0x52   :  { %3296 = vmatprep.subr.bf16.mxu1 %v3587_v30  ;;  %v3654_v30 = vld [vmem:[%s4684_s3 + $0x410] sm:$0xff]  }
  0x53   :  { %3275 = vmatpush3.bf16.msra.mxu0 %v3586_v29  ;;  %v3653_v29 = vld [vmem:[%s4684_s3 + $0x450] sm:$0xff]  }
  0x54   :  { %3276 = vmatprep.subr.bf16.mxu0 %v3589_v32  ;;  %v3656_v32 = vld [vmem:[%s4684_s3 + $0x490] sm:$0xff]  }
  0x55   :  { %3297 = vmatpush3.bf16.msra.mxu1 %v3588_v31  ;;  %v3655_v31 = vld [vmem:[%s4684_s3 + $0x4d0] sm:$0xff]  }
  0x56   :  { %3298 = vmatprep.subr.bf16.mxu1 %v3591_v34  ;;  %v3658_v34 = vld [vmem:[%s4684_s3 + $0x418] sm:$0xff]  }
  0x57   :  { %3277 = vmatpush3.bf16.msra.mxu0 %v3590_v33  ;;  %v3657_v33 = vld [vmem:[%s4684_s3 + $0x458] sm:$0xff]  }
  0x58   :  { %3278 = vmatprep.subr.bf16.mxu0 %v3593_v36  ;;  %v3660_v36 = vld [vmem:[%s4684_s3 + $0x498] sm:$0xff]  }
  0x59   :  { %3299 = vmatpush3.bf16.msra.mxu1 %v3592_v35  ;;  %v3659_v35 = vld [vmem:[%s4684_s3 + $0x4d8] sm:$0xff]  }
  0x5a   :  { %3300 = vmatprep.subr.bf16.mxu1 %v3595_v38  ;;  %v3662_v38 = vld [vmem:[%s4684_s3 + $0x420] sm:$0xff]  }
  0x5b   :  { %3279 = vmatpush3.bf16.msra.mxu0 %v3594_v37  ;;  %v3661_v37 = vld [vmem:[%s4684_s3 + $0x460] sm:$0xff]  }
  0x5c   :  { %3280 = vmatprep.subr.bf16.mxu0 %v3597_v40  ;;  %v3664_v40 = vld [vmem:[%s4684_s3 + $0x4a0] sm:$0xff]  }
  0x5d   :  { %3301 = vmatpush3.bf16.msra.mxu1 %v3596_v39  ;;  %v3663_v39 = vld [vmem:[%s4684_s3 + $0x4e0] sm:$0xff]  }
  0x5e   :  { %3302 = vmatprep.subr.bf16.mxu1 %v3599_v42  ;;  %v3666_v42 = vld [vmem:[%s4684_s3 + $0x428] sm:$0xff]  }
  0x5f   :  { %3281 = vmatpush3.bf16.msra.mxu0 %v3598_v41  ;;  %v3665_v41 = vld [vmem:[%s4684_s3 + $0x468] sm:$0xff]  }
  0x60   :  { %3310 = vmatprep.subr.bf16.mxu0 %v3604_v46  ;;  %v3670_v46 = vld [vmem:[%s4684_s3 + $0x430] sm:$0xff]  }
  0x61   :  { %3303 = vmatpush3.bf16.msra.mxu1 %v3603_v45  ;;  %v3669_v45 = vld [vmem:[%s4684_s3 + $0x470] sm:$0xff]  }
  0x62   :  { %1971 = vmatmul.mubr.bf16.vlgmr.msra.gmra.mrb[8].mxu0 %v3600_v43  ;;  %3332 = vmatprep.subr.bf16.mxu1 %v3609_v50  ;;  %v3667_v43 = vld [vmem:[%s4684_s3 + $0x4e8] sm:$0xff]   ;;  %v3674_v50 = vld [vmem:[%s4684_s3 + $0x438] sm:$0xff]  }
  0x63   :  { %3311 = vmatpush3.bf16.msra.mxu0 %v3608_v49  ;;  %2052 = vmatprep.mubr.bf16.mxu0 %v3640_v17  ;;  %v3673_v49 = vld [vmem:[%s4684_s3 + $0x478] sm:$0xff]   ;;  %v3706_v17 = vld [vmem:[%s4684_s3 + $0x5a8] sm:$0xff]  }
  0x64   :  { %2012 = vmatmul.mubr.bf16.vlgmr.msra.gmra.mrb[8].mxu1 %v3605_v47  ;;  %3312 = vmatprep.subr.bf16.mxu0 %v3611_v52  ;;  %v3671_v47 = vld [vmem:[%s4684_s3 + $0x4f0] sm:$0xff]   ;;  %v3676_v52 = vld [vmem:[%s4685_s0 + $0x40] ss:$100 sps:$4 sm:$0xff]  }
  0x65   :  { %3333 = vmatpush3.bf16.msra.mxu1 %v3610_v51  ;;  %2093 = vmatprep.mubr.bf16.mxu1 %v3645_v21  ;;  %v3675_v51 = vld [vmem:[%s4684_s3 + $0x4f8] sm:$0xff]   ;;  %v3709_v21 = vld [vmem:[%s4684_s3 + $0x5f0] sm:$0xff]  }
  0x66   :  { %3334 = vmatprep.subr.bf16.mxu1 %v3613_v54  ;;  %v3679_v54 = vld [vmem:[%s4684_s3 + $0x4b8] sm:$0xff]  }
  0x67   :  { %3313 = vmatpush3.bf16.msra.mxu0 %v3612_v53  ;;  %v3678_v53 = vld [vmem:[%s4685_s0 + $0x44] ss:$100 sps:$4 sm:$0xff]  }
  0x68   :  { %3314 = vmatprep.subr.bf16.mxu0 %v3615_v56  ;;  %v3681_v56 = vld [vmem:[%s4685_s0 + $0x48] ss:$100 sps:$4 sm:$0xff]  }
  0x69   :  { %3335 = vmatpush3.bf16.msra.mxu1 %v3614_v55  ;;  %v3680_v55 = vld [vmem:[%s4684_s3 + $0x540] sm:$0xff]  }
  0x6a   :  { %3336 = vmatprep.subr.bf16.mxu1 %v3617_v58  ;;  %v3684_v58 = vld [vmem:[%s4684_s3 + $0x500] sm:$0xff]  }
  0x6b   :  { %3315 = vmatpush3.bf16.msra.mxu0 %v3616_v57  ;;  %v3683_v57 = vld [vmem:[%s4685_s0 + $0x4c] ss:$100 sps:$4 sm:$0xff]  }
  0x6c   :  { %3316 = vmatprep.subr.bf16.mxu0 %v3619_v60  ;;  %v3686_v60 = vld [vmem:[%s4684_s3 + $0x580] sm:$0xff]  }
  0x6d   :  { %3337 = vmatpush3.bf16.msra.mxu1 %v3618_v59  ;;  %v3685_v59 = vld [vmem:[%s4684_s3 + $0x5c0] sm:$0xff]  }
  0x6e   :  { %3338 = vmatprep.subr.bf16.mxu1 %v3621_v62  ;;  %v3688_v62 = vld [vmem:[%s4684_s3 + $0x508] sm:$0xff]  }
  0x6f   :  { %3317 = vmatpush3.bf16.msra.mxu0 %v3620_v61  ;;  %v3687_v61 = vld [vmem:[%s4684_s3 + $0x548] sm:$0xff]  }
  0x70   :  { %3318 = vmatprep.subr.bf16.mxu0 %v3623_v0  ;;  %v3690_v0 = vld [vmem:[%s4684_s3 + $0x588] sm:$0xff]  }
  0x71   :  { %3339 = vmatpush3.bf16.msra.mxu1 %v3622_v63  ;;  %v3689_v63 = vld [vmem:[%s4684_s3 + $0x5c8] sm:$0xff]  }
  0x72   :  { %3340 = vmatprep.subr.bf16.mxu1 %v3625_v3  ;;  %v3692_v3 = vld [vmem:[%s4684_s3 + $0x510] sm:$0xff]  }
  0x73   :  { %3319 = vmatpush3.bf16.msra.mxu0 %v3624_v2  ;;  %v3691_v2 = vld [vmem:[%s4684_s3 + $0x550] sm:$0xff]  }
  0x74   :  { %3320 = vmatprep.subr.bf16.mxu0 %v3627_v5  ;;  %v3694_v5 = vld [vmem:[%s4684_s3 + $0x590] sm:$0xff]  }
  0x75   :  { %3341 = vmatpush3.bf16.msra.mxu1 %v3626_v4  ;;  %v3693_v4 = vld [vmem:[%s4684_s3 + $0x5d0] sm:$0xff]  }
  0x76   :  { %3342 = vmatprep.subr.bf16.mxu1 %v3629_v7  ;;  %v3696_v7 = vld [vmem:[%s4684_s3 + $0x518] sm:$0xff]  }
  0x77   :  { %3321 = vmatpush3.bf16.msra.mxu0 %v3628_v6  ;;  %v3695_v6 = vld [vmem:[%s4684_s3 + $0x558] sm:$0xff]  }
  0x78   :  { %3322 = vmatprep.subr.bf16.mxu0 %v3631_v9  ;;  %v3698_v9 = vld [vmem:[%s4684_s3 + $0x598] sm:$0xff]  }
  0x79   :  { %3343 = vmatpush3.bf16.msra.mxu1 %v3630_v8  ;;  %v3697_v8 = vld [vmem:[%s4684_s3 + $0x5d8] sm:$0xff]  }
  0x7a   :  { %3344 = vmatprep.subr.bf16.mxu1 %v3633_v11  ;;  %v3700_v11 = vld [vmem:[%s4684_s3 + $0x520] sm:$0xff]  }
  0x7b   :  { %3323 = vmatpush3.bf16.msra.mxu0 %v3632_v10  ;;  %v3699_v10 = vld [vmem:[%s4684_s3 + $0x560] sm:$0xff]  }
  0x7c   :  { %3324 = vmatprep.subr.bf16.mxu0 %v3635_v13  ;;  %v3702_v13 = vld [vmem:[%s4684_s3 + $0x5a0] sm:$0xff]  }
  0x7d   :  { %3345 = vmatpush3.bf16.msra.mxu1 %v3634_v12  ;;  %v3701_v12 = vld [vmem:[%s4684_s3 + $0x5e0] sm:$0xff]  }
  0x7e   :  { %3346 = vmatprep.subr.bf16.mxu1 %v3637_v15  ;;  %v3704_v15 = vld [vmem:[%s4684_s3 + $0x528] sm:$0xff]  }
  0x7f   :  { %3325 = vmatpush3.bf16.msra.mxu0 %v3636_v14  ;;  %v3703_v14 = vld [vmem:[%s4684_s3 + $0x568] sm:$0xff]  }
  0x80   :  { %3354 = vmatprep.subr.bf16.mxu0 %v3642_v19  ;;  %v3708_v19 = vld [vmem:[%s4684_s3 + $0x530] sm:$0xff]  }
  0x81   :  { %3347 = vmatpush3.bf16.msra.mxu1 %v3641_v18  ;;  %v3707_v18 = vld [vmem:[%s4684_s3 + $0x570] sm:$0xff]  }
  0x82   :  { %2053 = vmatmul.mubr.bf16.vlgmr.msra.gmra.mrb[12].mxu0 %v3638_v16  ;;  %3376 = vmatprep.subr.bf16.mxu1 %v3647_v23  ;;  %v3705_v16 = vld [vmem:[%s4684_s3 + $0x5e8] sm:$0xff]   ;;  %v3711_v23 = vld [vmem:[%s4684_s3 + $0x578] sm:$0xff]  }
  0x83   :  { %3355 = vmatpush3.bf16.msra.mxu0 %v3646_v22  ;;  %2134 = vmatprep.mubr.bf16.mxu0 %v3678_v53  ;;  %v3710_v22 = vld [vmem:[%s4684_s3 + $0x5b0] sm:$0xff]  }
  0x84   :  { %2094 = vmatmul.mubr.bf16.vlgmr.msra.gmra.mrb[12].mxu1 %v3643_v20  ;;  %3356 = vmatprep.subr.bf16.mxu0 %v3649_v25  ;;  %v2311_v20 = vlaneseq }
  0x85   :  { %3377 = vmatpush3.bf16.msra.mxu1 %v3648_v24  ;;  %2175 = vmatprep.mubr.bf16.mxu1 %v3683_v57  ;;  %v3712_v24 = vld [vmem:[%s4684_s3 + $0x538] sm:$0xff]  }
  0x86   :  { %3378 = vmatprep.subr.bf16.mxu1 %v3651_v27  ;;  %v2312_v25 = vand.u32 127, %v2311_v20  ;;  %v3714_v27 = vld [vmem:[%s4685_s0 + $0x50] ss:$100 sps:$4 sm:$0xff]  }
  0x87   :  { %3357 = vmatpush3.bf16.msra.mxu0 %v3650_v26  ;;  %v3713_v26 = vld [vmem:[%s4684_s3 + $0x5f8] sm:$0xff]  }
  0x88   :  { %3358 = vmatprep.subr.bf16.mxu0 %v3653_v29  ;;  %v3716_v29 = vld [vmem:[%s4685_s0 + $0x54] ss:$100 sps:$4 sm:$0xff]  }
  0x89   :  { %3379 = vmatpush3.bf16.msra.mxu1 %v3652_v28 }
  0x8a   :  { %3380 = vmatprep.subr.bf16.mxu1 %v3655_v31  ;;  %v3717_v31 = vld [vmem:[%s4684_s3 + $0x5b8] sm:$0xff]  }
  0x8b   :  { %3359 = vmatpush3.bf16.msra.mxu0 %v3654_v30  ;;  %v3791_v30 = vmov 0.0  }
  0x8c   :  { %3360 = vmatprep.subr.bf16.mxu0 %v3657_v33  ;;  %v3720_v33 = vld [vmem:[%s4685_s0 + $0x5c] ss:$100 sps:$4 sm:$0xff]  }
  0x8d   :  { %3381 = vmatpush3.bf16.msra.mxu1 %v3656_v32  ;;  %v3718_v32 = vld [vmem:[%s4685_s0 + $0x58] ss:$100 sps:$4 sm:$0xff]  }
  0x8e   :  { %3382 = vmatprep.subr.bf16.mxu1 %v3659_v35 }
  0x8f   :  { %3361 = vmatpush3.bf16.msra.mxu0 %v3658_v34  ;;  %v3721_v34 = vld [vmem:[%s4684_s3 + $0x600] sm:$0xff]  }
  0x90   :  { %3362 = vmatprep.subr.bf16.mxu0 %v3661_v37 }
  0x91   :  { %3383 = vmatpush3.bf16.msra.mxu1 %v3660_v36  ;;  %v3722_v36 = vld [vmem:[%s4684_s3 + $0x608] sm:$0xff]  }
  0x92   :  { %3384 = vmatprep.subr.bf16.mxu1 %v3663_v39  ;;  %v3723_v39 = vld [vmem:[%s4684_s3 + $0x610] sm:$0xff]  }
  0x93   :  { %3363 = vmatpush3.bf16.msra.mxu0 %v3662_v38  ;;  %v2325_v38 = vld [vmem:[%s4687_s2] sm:$0xff] }
  0x94   :  { %3364 = vmatprep.subr.bf16.mxu0 %v3665_v41  ;;  %v3724_v41 = vld [vmem:[%s4684_s3 + $0x618] sm:$0xff]  }
  0x95   :  { %3385 = vmatpush3.bf16.msra.mxu1 %v3664_v40 }
  0x96   :  { %3386 = vmatprep.subr.bf16.mxu1 %v3667_v43 }
  0x97   :  { %3365 = vmatpush3.bf16.msra.mxu0 %v3666_v42  ;;  %v3725_v42 = vld [vmem:[%s4685_s0 + $0x60] ss:$100 sps:$4 sm:$0xff]  }
  0x98   :  { %3366 = vmatprep.subr.bf16.mxu0 %v3669_v45 }
  0x99   :  { %3387 = vmatpush3.bf16.msra.mxu1 %v3668_v44  ;;  %v2911_v44 = vld [vmem:[%s4688_s4] ss:$0 sm:$0xff] }
  0x9a   :  { %3388 = vmatprep.subr.bf16.mxu1 %v3671_v47 }
  0x9b   :  { %3367 = vmatpush3.bf16.msra.mxu0 %v3670_v46  ;;  %v2315_v28 = vpop.permute.xlu0 %2314 }
  0x9c   :  { %3368 = vmatprep.subr.bf16.mxu0 %v3673_v49  ;;  %vm2319_vm0 = vcmp.eq.s32.totalorder %v2315_v28, %v2312_v25 }
  0x9d   :  { %3389 = vmatpush3.bf16.msra.mxu1 %v3672_v48  ;;  %v3134_v35 = vsel %vm2319_vm0, 1.0, %v3791_v30 }
  0x9e   :  { %3390 = vmatprep.subr.bf16.mxu1 %v3675_v51 }
  0x9f   :  { %3369 = vmatpush3.bf16.msra.mxu0 %v3674_v50  ;;  %v2318_v37 = vpop.permute.xlu0 %2317 }
  0xa0   :  { %3398 = vmatprep.subr.bf16.mxu0 %v3680_v55  ;;  %vm2320_vm3 = vcmp.eq.s32.totalorder %v2318_v37, %v2312_v25 }
  0xa1   :  { %3391 = vmatpush3.bf16.msra.mxu1 %v3679_v54  ;;  %v3135_v40 = vsel %vm2320_vm3, 1.0, %v3791_v30 }
  0xa2   :  { %2135 = vmatmul.mubr.bf16.vlgmr.msra.gmra.mrb[16].mxu0 %v3676_v52  ;;  %3420 = vmatprep.subr.bf16.mxu1 %v3685_v59 }
  0xa3   :  { %3399 = vmatpush3.bf16.msra.mxu0 %v3684_v58  ;;  %2216 = vmatprep.mubr.bf16.mxu0 %v3716_v29 }
  0xa4   :  { %2176 = vmatmul.mubr.bf16.vlgmr.msra.gmra.mrb[16].mxu1 %v3681_v56  ;;  %3400 = vmatprep.subr.bf16.mxu0 %v3687_v61 }
  0xa5   :  { %3421 = vmatpush3.bf16.msra.mxu1 %v3686_v60  ;;  %2257 = vmatprep.mubr.bf16.mxu1 %v3720_v33 }
  0xa6   :  { %3422 = vmatprep.subr.bf16.mxu1 %v3689_v63 }
  0xa7   :  { %3401 = vmatpush3.bf16.msra.mxu0 %v3688_v62 }
  0xa8   :  { %3402 = vmatprep.subr.bf16.mxu0 %v3691_v2 }
  0xa9   :  { %3423 = vmatpush3.bf16.msra.mxu1 %v3690_v0 }
  0xaa   :  { %3424 = vmatprep.subr.bf16.mxu1 %v3693_v4 }
  0xab   :  { %3403 = vmatpush3.bf16.msra.mxu0 %v3692_v3 }
  0xac   :  { %3404 = vmatprep.subr.bf16.mxu0 %v3695_v6 }
  0xad   :  { %3425 = vmatpush3.bf16.msra.mxu1 %v3694_v5 }
  0xae   :  { %3426 = vmatprep.subr.bf16.mxu1 %v3697_v8 }
  0xaf   :  { %3405 = vmatpush3.bf16.msra.mxu0 %v3696_v7 }
  0xb0   :  { %3406 = vmatprep.subr.bf16.mxu0 %v3699_v10 }
  0xb1   :  { %3427 = vmatpush3.bf16.msra.mxu1 %v3698_v9 }
  0xb2   :  { %3428 = vmatprep.subr.bf16.mxu1 %v3701_v12 }
  0xb3   :  { %3407 = vmatpush3.bf16.msra.mxu0 %v3700_v11 }
  0xb4   :  { %3408 = vmatprep.subr.bf16.mxu0 %v3703_v14  ;;  %v3727_v14 = vld [vmem:[%s4689_s6 + $0x8] sm:$0xff]  }
  0xb5   :  { %3429 = vmatpush3.bf16.msra.mxu1 %v3702_v13  ;;  %v3726_v13 = vld [vmem:[%s4689_s6] sm:$0xff]  }
  0xb6   :  { %3430 = vmatprep.subr.bf16.mxu1 %v3705_v16 }
  0xb7   :  { %3409 = vmatpush3.bf16.msra.mxu0 %v3704_v15 }
  0xb8   :  { %3410 = vmatprep.subr.bf16.mxu0 %v3707_v18 }
  0xb9   :  { %3431 = vmatpush3.bf16.msra.mxu1 %v3706_v17 }
  0xba   :  { %3432 = vmatprep.subr.bf16.mxu1 %v3709_v21 }
  0xbb   :  { %3411 = vmatpush3.bf16.msra.mxu0 %v3708_v19  ;;  %v3728_v19 = vld [vmem:[%s4690_s5] sm:$0xff]  }
  0xbc   :  { %3412 = vmatprep.subr.bf16.mxu0 %v3711_v23 }
  0xbd   :  { %3433 = vmatpush3.bf16.msra.mxu1 %v3710_v22 }
  0xbe   :  { %3434 = vmatprep.subr.bf16.mxu1 %v3713_v26  ;;  %v3729_v26 = vld [vmem:[%s4690_s5 + $0x8] sm:$0xff]  }
  0xbf   :  { %3413 = vmatpush3.bf16.msra.mxu0 %v3712_v24 }
  0xc0   :  { %3456 = vmatprep.subr.bf16.mxu0 %v3791_v30 }
  0xc1   :  { %3435 = vmatpush3.bf16.msra.mxu1 %v3717_v31 }
  0xc2   :  { %2217 = vmatmul.mubr.bf16.vlgmr.msra.gmra.mrb[20].mxu0 %v3714_v27  ;;  %3468 = vmatprep.subr.mxu1 %v2325_v38 }
  0xc3   :  { %3464 = vmatprep.mubr.msk.bf16.mxu0 %vm3792_vm2, %v3791_v30  ;;  %3457 = vmatpush3.bf16.msra.mxu0 %v3721_v34 }
  0xc4   :  { %2258 = vmatmul.mubr.bf16.vlgmr.msra.gmra.mrb[20].mxu1 %v3718_v32  ;;  %3458 = vmatprep.subr.bf16.mxu0 %v3791_v30 }
  0xc5   :  { %3470 = vmatprep.mubr.msk.f32.mxu1 %vm2326_vm1, %v3134_v35  ;;  %3469 = vmatpush3.msra.mxu1 %v2325_v38  ;;  %v3732_v35 = vld [vmem:[%s4691_s8 + $0x4] ss:$16 sps:$4 sm:$0xff]  }
  0xc6   :  { %3473 = vmatprep.subr.bf16.mxu1 %v3791_v30 }
  0xc7   :  { %3459 = vmatpush3.bf16.msra.mxu0 %v3722_v36  ;;  %v3735_v36 = vld [vmem:[%s4691_s8 + $0xc] ss:$16 sps:$4 sm:$0xff]  }
  0xc8   :  { %3460 = vmatprep.subr.bf16.mxu0 %v3791_v30 }
  0xcb   :  { %3461 = vmatpush3.bf16.msra.mxu0 %v3723_v39 }
  0xcc   :  { %3471 = vmatmul.mubr.msk.f32.vlgmr.msra.gmra.mrb[24].mxu1 %vm2326_vm1, %v3135_v40  ;;  %3462 = vmatprep.subr.bf16.mxu0 %v3791_v30 }
  0xcd   :  { %3477 = vmatprep.mubr.msk.bf16.mxu1 %vm3792_vm2, %v3791_v30  ;;  %3474 = vmatpush3.bf16.msra.mxu1 %v3726_v13 }
  0xce   :  { %3475 = vmatprep.subr.bf16.mxu1 %v3791_v30 }
  0xcf   :  { %3463 = vmatpush3.bf16.msra.mxu0 %v3724_v41 }
  0xd0   :  { %3481 = vmatprep.subr.bf16.mxu0 %v3791_v30 }
  0xd1   :  { %3476 = vmatpush3.bf16.msra.mxu1 %v3727_v14 }
  0xd2   :  { %3465 = vmatmul.mubr.msk.bf16.vlgmr.msra.gmra.mrb[24].mxu0 %vm1770_vm4, %v3725_v42  ;;  %2759 = vmatprep.subr.bf16.mxu1 %v3732_v35  ;;  %v3738_v35 = vld [vmem:[%s4691_s8 + $0x24] ss:$16 sps:$4 sm:$0xff]  }
  0xd3   :  { %3485 = vmatprep.mubr.msk.bf16.mxu0 %vm3792_vm2, %v3791_v30  ;;  %3482 = vmatpush3.bf16.msra.mxu0 %v3728_v19 }
  0xd4   :  { %3483 = vmatprep.subr.bf16.mxu0 %v3791_v30 }
  0xd7   :  { %3484 = vmatpush3.bf16.msra.mxu0 %v3729_v26 }
  0xd8   :  { %2802 = vmatprep.subr.bf16.mxu0 %v3735_v36  ;;  %v3736_v36 = vld [vmem:[%s4691_s8 + $0x20] ss:$16 sps:$4 sm:$0xff]  }
  0xf5   :  { %v3194_v43 = vpop.f32.mrb[0].mxu0 }
  0xf6   :  { %v3195_v45 = vpop.f32.mrb[1].mxu0 }
  0xf7   :  { %v3196_v46 = vadd.f32 %v3195_v45, %v3194_v43  ;;  %v3197_v47 = vpop.f32.mrb[2].mxu0  ;;  %v3216_v48 = vpop.f32.mrb[0].mxu1 }
  0xf8   :  { %v3198_v49 = vpop.f32.mrb[3].mxu0  ;;  %v3217_v52 = vpop.f32.mrb[1].mxu1 }
  0xf9   :  { %v1809_v50 = vadd.f32 %v3196_v46, %v2911_v44  ;;  %v3199_v51 = vadd.f32 %v3198_v49, %v3197_v47  ;;  %v3218_v53 = vadd.f32 %v3217_v52, %v3216_v48  ;;  %v3219_v54 = vpop.f32.mrb[2].mxu1 }
  0xfa   :  { %v3220_v56 = vpop.f32.mrb[3].mxu1 }
  0xfb   :  { %v1812_v55 = vadd.f32 %v3199_v51, %v2911_v44  ;;  %v1850_v57 = vadd.f32 %v3218_v53, %v1809_v50  ;;  %v3221_v58 = vadd.f32 %v3220_v56, %v3219_v54 }
  0xfd   :  { %v1853_v59 = vadd.f32 %v3221_v58, %v1812_v55 }
 0x115   :  { %v3238_v60 = vpop.f32.mrb[4].mxu0 }
 0x116   :  { %v3239_v61 = vpop.f32.mrb[5].mxu0 }
 0x117   :  { %v3240_v62 = vadd.f32 %v3239_v61, %v3238_v60  ;;  %v3241_v63 = vpop.f32.mrb[6].mxu0  ;;  %v3260_v3 = vpop.f32.mrb[4].mxu1 }
 0x118   :  { %v3242_v0 = vpop.f32.mrb[7].mxu0  ;;  %v3261_v5 = vpop.f32.mrb[5].mxu1 }
 0x119   :  { %v1891_v2 = vadd.f32 %v3240_v62, %v1850_v57  ;;  %v3243_v4 = vadd.f32 %v3242_v0, %v3241_v63  ;;  %v3262_v7 = vadd.f32 %v3261_v5, %v3260_v3  ;;  %v3263_v8 = vpop.f32.mrb[6].mxu1 }
 0x11a   :  { %v3264_v9 = vpop.f32.mrb[7].mxu1 }
 0x11b   :  { %v1894_v6 = vadd.f32 %v3243_v4, %v1853_v59  ;;  %v1932_v10 = vadd.f32 %v3262_v7, %v1891_v2  ;;  %v3265_v11 = vadd.f32 %v3264_v9, %v3263_v8 }
 0x11d   :  { %v1935_v12 = vadd.f32 %v3265_v11, %v1894_v6 }
 0x135   :  { %v3282_v15 = vpop.f32.mrb[8].mxu0 }
 0x136   :  { %v3283_v16 = vpop.f32.mrb[9].mxu0 }
 0x137   :  { %v3284_v17 = vadd.f32 %v3283_v16, %v3282_v15  ;;  %v3285_v18 = vpop.f32.mrb[10].mxu0  ;;  %v3304_v21 = vpop.f32.mrb[8].mxu1 }
 0x138   :  { %v3286_v22 = vpop.f32.mrb[11].mxu0  ;;  %v3305_v25 = vpop.f32.mrb[9].mxu1 }
 0x139   :  { %v1973_v23 = vadd.f32 %v3284_v17, %v1932_v10  ;;  %v3287_v24 = vadd.f32 %v3286_v22, %v3285_v18  ;;  %v3306_v27 = vadd.f32 %v3305_v25, %v3304_v21  ;;  %v3307_v28 = vpop.f32.mrb[10].mxu1 }
 0x13a   :  { %v3308_v31 = vpop.f32.mrb[11].mxu1 }
 0x13b   :  { %v1976_v29 = vadd.f32 %v3287_v24, %v1935_v12  ;;  %v2014_v32 = vadd.f32 %v3306_v27, %v1973_v23  ;;  %v3309_v33 = vadd.f32 %v3308_v31, %v3307_v28 }
 0x13d   :  { %v2017_v34 = vadd.f32 %v3309_v33, %v1976_v29  ;;  %v3730_v33 = vld [vmem:[%s4691_s8] ss:$16 sps:$4 sm:$0xff]  }
 0x155   :  { %v3326_v37 = vpop.f32.mrb[12].mxu0 }
 0x156   :  { %v3327_v38 = vpop.f32.mrb[13].mxu0 }
 0x157   :  { %v3328_v39 = vadd.f32 %v3327_v38, %v3326_v37  ;;  %v3329_v30 = vpop.f32.mrb[14].mxu0  ;;  %v3348_v42 = vpop.f32.mrb[12].mxu1  ;;  %v3744_v37 = vld [vmem:[%s4691_s8 + $0x44] ss:$16 sps:$4 sm:$0xff]  }
 0x158   :  { %v3330_v40 = vpop.f32.mrb[15].mxu0  ;;  %v3349_v44 = vpop.f32.mrb[13].mxu1 }
 0x159   :  { %v2055_v41 = vadd.f32 %v3328_v39, %v2014_v32  ;;  %v3331_v43 = vadd.f32 %v3330_v40, %v3329_v30  ;;  %v3350_v46 = vadd.f32 %v3349_v44, %v3348_v42  ;;  %v3351_v47 = vpop.f32.mrb[14].mxu1  ;;  %v3742_v39 = vld [vmem:[%s4691_s8 + $0x40] ss:$16 sps:$4 sm:$0xff]   ;;  %v3733_v40 = vld [vmem:[%s4691_s8 + $0x8] ss:$16 sps:$4 sm:$0xff]  }
 0x15a   :  { %v3352_v48 = vpop.f32.mrb[15].mxu1  ;;  %v3748_v44 = vld [vmem:[%s4691_s8 + $0x60] ss:$16 sps:$4 sm:$0xff]  }
 0x15b   :  { %v2058_v45 = vadd.f32 %v3331_v43, %v2017_v34  ;;  %v2096_v49 = vadd.f32 %v3350_v46, %v2055_v41  ;;  %v3353_v50 = vadd.f32 %v3352_v48, %v3351_v47  ;;  %v3750_v41 = vld [vmem:[%s4691_s8 + $0x64] ss:$16 sps:$4 sm:$0xff]   ;;  %v3741_v43 = vld [vmem:[%s4691_s8 + $0x2c] ss:$16 sps:$4 sm:$0xff]   ;;  %v3745_v47 = vld [vmem:[%s4691_s8 + $0x48] ss:$16 sps:$4 sm:$0xff]  }
 0x15c   :  { %v3747_v46 = vld [vmem:[%s4691_s8 + $0x4c] ss:$16 sps:$4 sm:$0xff]  }
 0x15d   :  { %v2099_v51 = vadd.f32 %v3353_v50, %v2058_v45  ;;  %v3739_v45 = vld [vmem:[%s4691_s8 + $0x28] ss:$16 sps:$4 sm:$0xff]   ;;  %v3753_v48 = vld [vmem:[%s4691_s8 + $0x6c] ss:$16 sps:$4 sm:$0xff]  }
 0x15e   :  { %v3759_v50 = vld [vmem:[%s4691_s8 + $0x8c] ss:$16 sps:$4 sm:$0xff]  }
 0x175   :  { %v3370_v52 = vpop.f32.mrb[16].mxu0 }
 0x176   :  { %v3371_v53 = vpop.f32.mrb[17].mxu0 }
 0x177   :  { %v3372_v54 = vadd.f32 %v3371_v53, %v3370_v52  ;;  %v3373_v55 = vpop.f32.mrb[18].mxu0  ;;  %v3392_v56 = vpop.f32.mrb[16].mxu1  ;;  %v3757_v52 = vld [vmem:[%s4691_s8 + $0x88] ss:$16 sps:$4 sm:$0xff]   ;;  %v3762_v53 = vld [vmem:[%s4691_s8 + $0xa4] ss:$16 sps:$4 sm:$0xff]  }
 0x178   :  { %v3374_v57 = vpop.f32.mrb[19].mxu0  ;;  %v3393_v60 = vpop.f32.mrb[17].mxu1 }
 0x179   :  { %v2137_v58 = vadd.f32 %v3372_v54, %v2096_v49  ;;  %v3375_v59 = vadd.f32 %v3374_v57, %v3373_v55  ;;  %v3394_v61 = vadd.f32 %v3393_v60, %v3392_v56  ;;  %v3395_v62 = vpop.f32.mrb[18].mxu1  ;;  %v3751_v49 = vld [vmem:[%s4691_s8 + $0x68] ss:$16 sps:$4 sm:$0xff]   ;;  %v3765_v54 = vld [vmem:[%s4691_s8 + $0xac] ss:$16 sps:$4 sm:$0xff]  }
 0x17a   :  { %v3396_v0 = vpop.f32.mrb[19].mxu1  ;;  %v3760_v55 = vld [vmem:[%s4691_s8 + $0xa0] ss:$16 sps:$4 sm:$0xff]   ;;  %v3763_v56 = vld [vmem:[%s4691_s8 + $0xa8] ss:$16 sps:$4 sm:$0xff]  }
 0x17b   :  { %v2140_v63 = vadd.f32 %v3375_v59, %v2099_v51  ;;  %v2178_v2 = vadd.f32 %v3394_v61, %v2137_v58  ;;  %v3397_v3 = vadd.f32 %v3396_v0, %v3395_v62  ;;  %v3754_v51 = vld [vmem:[%s4691_s8 + $0x80] ss:$16 sps:$4 sm:$0xff]   ;;  %v3768_v57 = vld [vmem:[%s4691_s8 + $0xc4] ss:$16 sps:$4 sm:$0xff]   ;;  %v3771_v58 = vld [vmem:[%s4691_s8 + $0xcc] ss:$16 sps:$4 sm:$0xff]  }
 0x17c   :  { %v3766_v59 = vld [vmem:[%s4691_s8 + $0xc0] ss:$16 sps:$4 sm:$0xff]   ;;  %v3769_v60 = vld [vmem:[%s4691_s8 + $0xc8] ss:$16 sps:$4 sm:$0xff]   ;;  %v3774_v61 = vld [vmem:[%s4691_s8 + $0xe4] ss:$16 sps:$4 sm:$0xff]  }
 0x17d   :  { %v2181_v4 = vadd.f32 %v3397_v3, %v2140_v63  ;;  %v3777_v62 = vld [vmem:[%s4691_s8 + $0xec] ss:$16 sps:$4 sm:$0xff]   ;;  %v3772_v63 = vld [vmem:[%s4691_s8 + $0xe0] ss:$16 sps:$4 sm:$0xff]   ;;  %v3775_v0 = vld [vmem:[%s4691_s8 + $0xe8] ss:$16 sps:$4 sm:$0xff]  }
 0x195   :  { %v3414_v5 = vpop.f32.mrb[20].mxu0 }
 0x196   :  { %v3415_v6 = vpop.f32.mrb[21].mxu0 }
 0x197   :  { %v3416_v7 = vadd.f32 %v3415_v6, %v3414_v5  ;;  %v3417_v8 = vpop.f32.mrb[22].mxu0  ;;  %v3436_v9 = vpop.f32.mrb[20].mxu1 }
 0x198   :  { %v3418_v10 = vpop.f32.mrb[23].mxu0  ;;  %v3437_v13 = vpop.f32.mrb[21].mxu1 }
 0x199   :  { %v2219_v11 = vadd.f32 %v3416_v7, %v2178_v2  ;;  %v3419_v12 = vadd.f32 %v3418_v10, %v3417_v8  ;;  %v3438_v14 = vadd.f32 %v3437_v13, %v3436_v9  ;;  %v3439_v15 = vpop.f32.mrb[22].mxu1  ;;  %v3144_v7 = vld [vmem:[%s4692_s7] ss:$0 sm:$0xff] }
 0x19a   :  { %v3440_v17 = vpop.f32.mrb[23].mxu1 }
 0x19b   :  { %v2222_v16 = vadd.f32 %v3419_v12, %v2181_v4  ;;  %v3441_v18 = vadd.f32 %v3440_v17, %v3439_v15  ;;  %v2260_v19 = vadd.f32 %v3438_v14, %v2219_v11 }
 0x19d   :  { %v2263_v21 = vadd.f32 %v3441_v18, %v2222_v16  ;;  %v17_v18 = vstv %s4693_s11 }
 0x19e   :  { %18 = vst [vmem:[#allocation2] sm:$0x1] %v17_v18 }
 0x19f   :  { %v3472_v22 = vpop.f32.mrb[24].mxu1 }
 0x1a0   :  { %3778 = vtanh.f32 %v3472_v22  ;;  %v2399_v23 = vpop.f32.mrb[25].mxu1 }
 0x1a1   :  { %3780 = vtanh.f32 %v2399_v23  ;;  %v2577_v23 = vld [vmem:[%s4694_s9] sm:$0xf] }
 0x1a5   :  { %v2300_v24 = vpop.f32.mrb[24].mxu0 }
 0x1a6   :  { %v2301_v25 = vadd.f32 %v2300_v24, %v2260_v19  ;;  %v3466_v26 = vpop.f32.mrb[25].mxu0  ;;  %v2580_v19 = vshrl.u32 %v2311_v20, 7 }
 0x1a7   :  { %v2303_v27 = vpop.f32.mrb[26].mxu0 }
 0x1a8   :  { %v2304_v28 = vadd.f32 %v2303_v27, %v2263_v21  ;;  %v3467_v29 = vpop.f32.mrb[27].mxu0  ;;  %3782 = vtanh.f32 %v2301_v25  ;;  %v2581_v21 = vsub.s32 0, %v2580_v19  ;;  %v2589_v22 = vsub.s32 2, %v2580_v19 }
 0x1a9   :  { %v2585_v24 = vsub.s32 1, %v2580_v19  ;;  %v2593_v25 = vsub.s32 3, %v2580_v19 }
 0x1aa   :  { %v3779_v31 = vpop.eup %3778  ;;  %3784 = vtanh.f32 %v2304_v28  ;;  %v2582_v26 = vrot.slane %v2577_v23, %v2581_v21  ;;  %v2590_v27 = vrot.slane %v2577_v23, %v2589_v22  ;;  %v2853_v28 = vld [vmem:[%s4695_s10] sm:$0xf] }
 0x1ab   :  { %v3781_v32 = vpop.eup %3780  ;;  %v2586_v29 = vrot.slane %v2577_v23, %v2585_v24  ;;  %v2858_v20 = vrot.slane %v2853_v28, %v2581_v21 }
 0x1ac   :  { %v2415_v34 = vpack.c.bf16 %v3779_v31, %v3781_v32  ;;  %v2594_v31 = vrot.slane %v2577_v23, %v2593_v25 }
 0x1ae   :  { %3478 = vmatmul.mubr.msk.bf16.vlgmr.msra.gmra.mrb[28].mxu1 %vm2432_vm5, %v2415_v34 }
 0x1af   :  { %2760 = vmatpush1.bf16.msra.mxu1 %v3730_v33  ;;  %2791 = vmatprep.mubr.bf16.mxu1 %v3790_v1 }
 0x1b0   :  { %2761 = vmatprep.subr.bf16.mxu1 %v3738_v35 }
 0x1b2   :  { %v3783_v38 = vpop.eup %3782 }
 0x1b3   :  { %2762 = vmatpush1.bf16.msra.mxu1 %v3736_v36  ;;  %v2866_v36 = vrot.slane %v2853_v28, %v2589_v22 }
 0x1b4   :  { %v3785_v30 = vpop.eup %3784  ;;  %2763 = vmatprep.subr.bf16.mxu1 %v3744_v37 }
 0x1b5   :  { %v2410_v42 = vpack.c.bf16 %v3785_v30, %v3783_v38  ;;  %v2862_v30 = vrot.slane %v2853_v28, %v2585_v24 }
 0x1b7   :  { %3486 = vmatmul.mubr.msk.bf16.vlgmr.msra.gmra.mrb[28].mxu0 %vm2432_vm5, %v2410_v42  ;;  %2764 = vmatpush1.bf16.msra.mxu1 %v3742_v39 }
 0x1b8   :  { %2803 = vmatpush1.bf16.msra.mxu0 %v3733_v40  ;;  %2765 = vmatprep.subr.bf16.mxu1 %v3750_v41 }
 0x1b9   :  { %2804 = vmatprep.subr.bf16.mxu0 %v3741_v43  ;;  %2834 = vmatprep.mubr.bf16.mxu0 %v3790_v1  ;;  %v3756_v1 = vld [vmem:[%s4691_s8 + $0x84] ss:$16 sps:$4 sm:$0xff]   ;;  %v2870_v43 = vrot.slane %v2853_v28, %v2593_v25 }
 0x1bb   :  { %2766 = vmatpush1.bf16.msra.mxu1 %v3748_v44 }
 0x1bc   :  { %2805 = vmatpush1.bf16.msra.mxu0 %v3739_v45  ;;  %2767 = vmatprep.subr.bf16.mxu1 %v3756_v1 }
 0x1bd   :  { %2806 = vmatprep.subr.bf16.mxu0 %v3747_v46 }
 0x1bf   :  { %2768 = vmatpush1.bf16.msra.mxu1 %v3754_v51 }
 0x1c0   :  { %2807 = vmatpush1.bf16.msra.mxu0 %v3745_v47  ;;  %2769 = vmatprep.subr.bf16.mxu1 %v3762_v53 }
 0x1c1   :  { %2808 = vmatprep.subr.bf16.mxu0 %v3753_v48 }
 0x1c3   :  { %2770 = vmatpush1.bf16.msra.mxu1 %v3760_v55 }
 0x1c4   :  { %2809 = vmatpush1.bf16.msra.mxu0 %v3751_v49  ;;  %2771 = vmatprep.subr.bf16.mxu1 %v3768_v57 }
 0x1c5   :  { %2810 = vmatprep.subr.bf16.mxu0 %v3759_v50 }
 0x1c7   :  { %2772 = vmatpush1.bf16.msra.mxu1 %v3766_v59 }
 0x1c8   :  { %2811 = vmatpush1.bf16.msra.mxu0 %v3757_v52  ;;  %2773 = vmatprep.subr.bf16.mxu1 %v3774_v61 }
 0x1c9   :  { %2812 = vmatprep.subr.bf16.mxu0 %v3765_v54 }
 0x1cb   :  { %2774 = vmatpush1.bf16.msra.mxu1 %v3772_v63 }
 0x1cc   :  { %2813 = vmatpush1.bf16.msra.mxu0 %v3763_v56 }
 0x1cd   :  { %2814 = vmatprep.subr.bf16.mxu0 %v3771_v58 }
 0x1d0   :  { %2815 = vmatpush1.bf16.msra.mxu0 %v3769_v60 }
 0x1d1   :  { %2816 = vmatprep.subr.bf16.mxu0 %v3777_v62 }
 0x1d4   :  { %2817 = vmatpush1.bf16.msra.mxu0 %v3775_v0 }
 0x281   :  { %v2470_v2 = vpop.f32.mrb[28].mxu1 }
 0x282   :  { %v3479_v3 = vpop.f32.mrb[29].mxu1 }
 0x283   :  { %v2473_v4 = vpop.f32.mrb[30].mxu1 }
 0x284   :  { %v3480_v5 = vpop.f32.mrb[31].mxu1 }
 0x28a   :  { %v2526_v6 = vpop.f32.mrb[28].mxu0 }
 0x28b   :  { %v2527_v8 = vadd.f32 %v2526_v6, %v2470_v2  ;;  %v3487_v9 = vpop.f32.mrb[29].mxu0 }
 0x28c   :  { %v2529_v10 = vpop.f32.mrb[30].mxu0 }
 0x28d   :  { %v2540_v11 = vadd.f32 %v3144_v7, %v2527_v8  ;;  %v2530_v12 = vadd.f32 %v2529_v10, %v2473_v4  ;;  %v3488_v13 = vpop.f32.mrb[31].mxu0  ;;  %v3177_v8 = vld [vmem:[#allocation2] ss:$0 sm:$0xff] }
 0x28f   :  { %v2541_v14 = vadd.f32 %v3144_v7, %v2530_v12  ;;  %v2542_v15 = vmax.f32 %v2540_v11, 0.0 }
 0x291   :  { %v2543_v16 = vmax.f32 %v2541_v14, 0.0 }
 0x293   :  { %v2544_v17 = vpack.c.bf16 %v2543_v16, %v2542_v15 }
 0x295   :  { %2792 = vmatmul.mubr.bf16.vlgmr.msra.gmra.mrb[32].mxu1 %v2544_v17  ;;  %2835 = vmatmul.mubr.bf16.vlgmr.msra.gmra.mrb[32].mxu0 %v2544_v17 }
 0x368   :  { %v2793_v32 = vpop.f32.mrb[32].mxu1  ;;  %v2836_v33 = vpop.f32.mrb[32].mxu0 }
 0x369   :  { %v2794_v34 = vadd.f32 %v2793_v32, %v2582_v26  ;;  %v2837_v35 = vadd.f32 %v2836_v33, %v2590_v27  ;;  %v2795_v37 = vpop.f32.mrb[33].mxu1  ;;  %v2838_v38 = vpop.f32.mrb[33].mxu0 }
 0x36a   :  { %v2796_v39 = vadd.f32 %v2795_v37, %v2586_v29  ;;  %v2839_v40 = vadd.f32 %v2838_v38, %v2594_v31  ;;  %v2797_v41 = vpop.f32.mrb[34].mxu1  ;;  %v2840_v42 = vpop.f32.mrb[34].mxu0 }
 0x36b   :  { %v2845_v44 = vmax.f32 %v2794_v34, 0.0  ;;  %v2847_v45 = vmax.f32 %v2837_v35, 0.0  ;;  %v2798_v46 = vadd.f32 %v2797_v41, %v2582_v26  ;;  %v2841_v47 = vadd.f32 %v2840_v42, %v2590_v27  ;;  %v2799_v48 = vpop.f32.mrb[35].mxu1  ;;  %v2842_v49 = vpop.f32.mrb[35].mxu0 }
 0x36c   :  { %v2846_v1 = vmax.f32 %v2796_v39, 0.0  ;;  %v2848_v50 = vmax.f32 %v2839_v40, 0.0  ;;  %v2800_v51 = vadd.f32 %v2799_v48, %v2586_v29  ;;  %v2843_v52 = vadd.f32 %v2842_v49, %v2594_v31 }
 0x36d   :  { %v2875_v53 = vmul.f32 %v2858_v20, %v2845_v44  ;;  %v2877_v54 = vmul.f32 %v2866_v36, %v2847_v45  ;;  %v2849_v55 = vmax.f32 %v2798_v46, 0.0  ;;  %v2851_v56 = vmax.f32 %v2841_v47, 0.0 }
 0x36e   :  { %v2876_v57 = vmul.f32 %v2862_v30, %v2846_v1  ;;  %v2850_v58 = vmax.f32 %v2800_v51, 0.0  ;;  %v2852_v59 = vmax.f32 %v2843_v52, 0.0  ;;  %v2878_v60 = vmul.f32 %v2870_v43, %v2848_v50 }
 0x36f   :  { %v2879_v61 = vmul.f32 %v2858_v20, %v2849_v55  ;;  %v2881_v62 = vmul.f32 %v2866_v36, %v2851_v56 }
 0x370   :  { %v2880_v63 = vmul.f32 %v2862_v30, %v2850_v58  ;;  %v2882_v0 = vmul.f32 %v2870_v43, %v2852_v59  ;;  %v2883_v2 = vadd.f32 %v2876_v57, %v2875_v53 }
 0x372   :  { %v2888_v3 = vadd.f32 %v2880_v63, %v2879_v61  ;;  %v2884_v4 = vadd.f32 %v2883_v2, %v2877_v54 }
 0x374   :  { %v2885_v5 = vadd.f32 %v2884_v4, %v2878_v60  ;;  %v2889_v6 = vadd.f32 %v2888_v3, %v2881_v62 }
 0x376   :  { %2886 = vadd.xlane.f32.xlu1 %v2885_v5  ;;  %v2890_v7 = vadd.f32 %v2889_v6, %v2882_v0 }
 0x37a   :  { %2891 = vadd.xlane.f32.xlu1 %v2890_v7 }
 0x403   :  { %v2887_v9 = vpop.xlane.xlu1 %2886 }
 0x404   :  { %v2900_v10 = vadd.f32 %v3177_v8, %v2887_v9 }
 0x406   :  { %3786 = vtanh.f32 %v2900_v10 }
 0x407   :  { %v2892_v11 = vpop.xlane.xlu1 %2891 }
 0x408   :  { %v2901_v12 = vadd.f32 %v3177_v8, %v2892_v11 }
 0x40a   :  { %3788 = vtanh.f32 %v2901_v12 }
 0x410   :  { %v3787_v13 = vpop.eup %3786 }
 0x411   :  { %2905 = vst.msk [vmem:[%s4696_s12] sm:$0xff] %vm2904_vm6, %v3787_v13 }
 0x414   :  { %v3789_v14 = vpop.eup %3788 }
 0x415   :  { %2906 = vst.msk [vmem:[%s4696_s12 + $0x8] sm:$0xff] %vm2904_vm6, %v3789_v14 }

</bundles_post_ra>
